<compile_context>
chip_gen: v7x
topology: tpu7x:2x2x1
jax: 0.10.0
libtpu: 0.0.40
codegen_flags: <defaults>
</compile_context>

<pallas_src>
import functools

import jax
import jax.numpy as jnp
from jax.experimental import pallas as pl
from jax.experimental.pallas import tpu as pltpu


def _pick_tile(n, target, align=1):
    """Largest divisor of n that is <= target and (a multiple of `align` or == n)."""
    best = None
    for d in range(1, n + 1):
        if n % d == 0 and d <= target and (d % align == 0 or d == n):
            best = d
    return best if best is not None else n


# ----------------------------- kernels ---------------------------------------

def groupnorm_kernel(x_ref, g_ref, b_ref, o_ref):
    # x_ref: (1, R, Lr), one batch element with channels folded into R sublane rows.
    # GroupNorm(num_groups=1): normalize over everything, per-channel affine via g/b rows.
    x = x_ref[0].astype(jnp.float32)                       # (R, Lr)
    inv_n = 1.0 / float(x.shape[0] * x.shape[1])
    s = jnp.sum(x)
    ss = jnp.sum(x * x)                                    # single pass: E[x^2] - mu^2
    mu = s * inv_n
    var = ss * inv_n - mu * mu
    xn = (x - mu) * jax.lax.rsqrt(var + 1e-5)
    o_ref[0] = (xn * g_ref[...] + b_ref[...]).astype(o_ref.dtype)


def conv3x3_kernel(x_ref, w_ref, b_ref, o_ref, *, relu):
    # Banded 3x3 conv (padding=1) over a flattened channels-last layout.
    #   x_ref: (nb, H, W*Cin)        activations (lane-dense)
    #   w_ref: (3, W*Cin, W*Cout)    banded weights (kw/ci -> w/co structure + W zero-padding
    #                                folded in), bfloat16
    #   b_ref: (1, W*Cout)           bias tiled over W
    #   o_ref: (nb, H, W*Cout)
    nb, H, wcin = x_ref.shape
    wcout = o_ref.shape[-1]
    x = x_ref[...].astype(jnp.bfloat16)
    # 1-row zero halo for the H direction, built in VMEM (no HBM pad round trip).
    zrow = jnp.zeros((nb, 1, wcin), jnp.bfloat16)
    xp = jnp.concatenate([zrow, x, zrow], axis=1)          # (nb, H+2, W*Cin)
    acc = jnp.zeros((nb * H, wcout), jnp.float32)
    for dh in range(3):                                    # 3 accumulated lane-dense matmuls
        slab = xp[:, dh:dh + H, :].reshape(nb * H, wcin)
        acc = acc + jnp.dot(slab, w_ref[dh], preferred_element_type=jnp.float32)
    acc = acc + b_ref[0][None, :]
    if relu:
        acc = jnp.maximum(acc, 0.0)
    o_ref[...] = acc.reshape(nb, H, wcout).astype(o_ref.dtype)


def matmul_bias_kernel(x_ref, w_ref, b_ref, o_ref, *, relu):
    # Row-tiled (tm, K) @ (K, N) + bias (+ReLU); bf16 operands, f32 accumulate.
    acc = jnp.dot(x_ref[...].astype(jnp.bfloat16), w_ref[...],
                  preferred_element_type=jnp.float32)
    acc = acc + b_ref[0][None, :]
    if relu:
        acc = jnp.maximum(acc, 0.0)
    o_ref[...] = acc.astype(o_ref.dtype)


def temporal_attn_kernel(x_ref, lnw_ref, lnb_ref, wqkv_ref, wproj_ref, bproj_ref,
                         mask_ref, o_ref, *, num_heads):
    # Fused: LayerNorm(C) -> fused qkv matmul -> local-window softmax attention over T
    #        -> output projection (head-slab accumulation == concat(heads) @ Wproj)
    #        -> + residual (pre-norm x).
    x = x_ref[...].astype(jnp.float32)                     # (Sb, T, C)
    Sb, T, C = x.shape
    hd = C // num_heads
    scale = float(hd) ** -0.5

    x2 = x.reshape(Sb * T, C)
    mu = jnp.mean(x2, axis=-1, keepdims=True)
    var = jnp.mean(jnp.square(x2 - mu), axis=-1, keepdims=True)
    xn = (x2 - mu) * jax.lax.rsqrt(var + 1e-5)
    xn = xn * lnw_ref[0][None, :] + lnb_ref[0][None, :]

    # One fused qkv matmul (N = 3C), bf16 on the MXU.
    qkv = jnp.dot(xn.astype(jnp.bfloat16), wqkv_ref[...],
                  preferred_element_type=jnp.float32)      # (Sb*T, 3C)
    wproj = wproj_ref[...]                                 # (C, C) bf16
    mask = mask_ref[...][None, :, :]                       # (1, T, T)

    acc = jnp.zeros((Sb * T, C), jnp.float32)
    for h in range(num_heads):                             # static unroll; heads are tiny
        q = qkv[:, h * hd:(h + 1) * hd].reshape(Sb, T, hd)
        k = qkv[:, C + h * hd:C + (h + 1) * hd].reshape(Sb, T, hd)
        v = qkv[:, 2 * C + h * hd:2 * C + (h + 1) * hd].reshape(Sb, T, hd)
        s = jnp.einsum('bqd,bkd->bqk', q.astype(jnp.bfloat16), k.astype(jnp.bfloat16),
                       preferred_element_type=jnp.float32) * scale
        s = s + mask
        s = s - jnp.max(s, axis=-1, keepdims=True)
        p = jnp.exp(s)
        p = p * pl.reciprocal(jnp.sum(p, axis=-1, keepdims=True), approx=True)
        oh = jnp.einsum('bqk,bkd->bqd', p.astype(jnp.bfloat16), v.astype(jnp.bfloat16),
                        preferred_element_type=jnp.float32)          # (Sb, T, hd)
        # concat_h(oh) @ Wproj == sum_h oh_h @ Wproj[h*hd:(h+1)*hd, :]
        acc = acc + jnp.dot(oh.reshape(Sb * T, hd).astype(jnp.bfloat16),
                            wproj[h * hd:(h + 1) * hd, :],
                            preferred_element_type=jnp.float32)
    out = acc + bproj_ref[0][None, :]
    o_ref[...] = (out + x2).astype(o_ref.dtype)


# ----------------------------- wrappers ---------------------------------------

def group_norm(x_bcl, gamma, beta):
    # x_bcl: (B, C, L).  Fold channels into 8 sublane rows when possible (C=4 -> rows of 8).
    B, C, L = x_bcl.shape
    r = 1
    if C < 8 and 8 % C == 0:
        r = 8 // C
        while r > 1 and L % r:
            r //= 2
    R, Lr = C * r, L // r
    xr = x_bcl.reshape(B, R, Lr)
    g = jnp.repeat(gamma, r).reshape(R, 1).astype(jnp.float32)
    b = jnp.repeat(beta, r).reshape(R, 1).astype(jnp.float32)
    out = pl.pallas_call(
        groupnorm_kernel,
        out_shape=jax.ShapeDtypeStruct((B, R, Lr), x_bcl.dtype),
        grid=(B,),
        in_specs=[pl.BlockSpec((1, R, Lr), lambda i: (i, 0, 0)),
                  pl.BlockSpec((R, 1), lambda i: (0, 0)),
                  pl.BlockSpec((R, 1), lambda i: (0, 0))],
        out_specs=pl.BlockSpec((1, R, Lr), lambda i: (i, 0, 0)),
        compiler_params=pltpu.CompilerParams(dimension_semantics=("parallel",)),
    )(xr, g, b)
    return out.reshape(B, C, L)


def conv3x3(x_flat, w_oihw, b, relu):
    # x_flat: (N, H, W*Cin) channels-last flattened; returns (N, H, W*Cout).
    N, H, WCin = x_flat.shape
    Cout, Cin = w_oihw.shape[0], w_oihw.shape[1]
    W = WCin // Cin
    wt = jnp.transpose(w_oihw, (2, 3, 1, 0))               # (kh, kw, Cin, Cout)
    # Banded weights: band[dh][win*Cin+ci, w*Cout+co] = wt[dh, dw, ci, co] with win = w + dw - 1
    # (out-of-range taps dropped == zero padding along W).
    band = jnp.stack([
        sum(jnp.kron(jnp.eye(W, W, k=1 - dw, dtype=wt.dtype), wt[dh, dw]) for dw in range(3))
        for dh in range(3)
    ]).astype(jnp.bfloat16)                                # (3, W*Cin, W*Cout)
    b_t = jnp.tile(b, W).reshape(1, W * Cout).astype(jnp.float32)

    nb = _pick_tile(N, min(max(1, 128 // H), max(1, N // 2)) if N > 1 else 1)
    return pl.pallas_call(
        functools.partial(conv3x3_kernel, relu=relu),
        out_shape=jax.ShapeDtypeStruct((N, H, W * Cout), x_flat.dtype),
        grid=(N // nb,),
        in_specs=[pl.BlockSpec((nb, H, WCin), lambda i: (i, 0, 0)),
                  pl.BlockSpec((3, W * Cin, W * Cout), lambda i: (0, 0, 0)),
                  pl.BlockSpec((1, W * Cout), lambda i: (0, 0))],
        out_specs=pl.BlockSpec((nb, H, W * Cout), lambda i: (i, 0, 0)),
        compiler_params=pltpu.CompilerParams(dimension_semantics=("parallel",)),
    )(x_flat, band, b_t)


def matmul_bias(x, w, b, relu):
    M, K = x.shape
    N = w.shape[1]
    tm = _pick_tile(M, max(1, min(512, M // 2 if M > 1 else 1)), align=8)
    return pl.pallas_call(
        functools.partial(matmul_bias_kernel, relu=relu),
        out_shape=jax.ShapeDtypeStruct((M, N), x.dtype),
        grid=(M // tm,),
        in_specs=[pl.BlockSpec((tm, K), lambda i: (i, 0)),
                  pl.BlockSpec((K, N), lambda i: (0, 0)),
                  pl.BlockSpec((1, N), lambda i: (0, 0))],
        out_specs=pl.BlockSpec((tm, N), lambda i: (i, 0)),
        compiler_params=pltpu.CompilerParams(dimension_semantics=("parallel",)),
    )(x, w.astype(jnp.bfloat16), b.reshape(1, N).astype(jnp.float32))


def temporal_attention(x_res, ln_w, ln_b, wqkv, wproj, bproj, mask, num_heads):
    S, T, C = x_res.shape
    Sb = _pick_tile(S, max(1, min(128, S // 2 if S > 1 else 1)))
    out = pl.pallas_call(
        functools.partial(temporal_attn_kernel, num_heads=num_heads),
        out_shape=jax.ShapeDtypeStruct((S * T, C), x_res.dtype),
        grid=(S // Sb,),
        in_specs=[pl.BlockSpec((Sb, T, C), lambda i: (i, 0, 0)),
                  pl.BlockSpec((1, C), lambda i: (0, 0)),
                  pl.BlockSpec((1, C), lambda i: (0, 0)),
                  pl.BlockSpec((C, 3 * C), lambda i: (0, 0)),
                  pl.BlockSpec((C, C), lambda i: (0, 0)),
                  pl.BlockSpec((1, C), lambda i: (0, 0)),
                  pl.BlockSpec((T, T), lambda i: (0, 0))],
        out_specs=pl.BlockSpec((Sb * T, C), lambda i: (i, 0)),
        compiler_params=pltpu.CompilerParams(dimension_semantics=("parallel",)),
    )(x_res, ln_w.reshape(1, C).astype(jnp.float32), ln_b.reshape(1, C).astype(jnp.float32),
      wqkv.astype(jnp.bfloat16), wproj.astype(jnp.bfloat16),
      bproj.reshape(1, C).astype(jnp.float32), mask)
    return out.reshape(S, T, C)


# ----------------------------- full forward -----------------------------------

def temporal_adapter_forward(x, params, *, num_heads=4, window_size=13):
    """x: (B, C, T, H, W) -- matches the PyTorch module's input layout."""
    B, Ci, T, H, W = x.shape
    Cm = params['conv1_w'].shape[0]
    Ho, Wo = H // 4, W // 4

    # GroupNorm(1, Ci) over (C, T, H, W) per batch element
    xg = group_norm(x.reshape(B, Ci, T * H * W), params['gn_w'], params['gn_b'])
    xg = xg.reshape(B, Ci, T, H, W)

    # 'b c t h w -> (b t) h (w c)'   channels-last, lane-dense flattened layout
    x1 = jnp.transpose(xg, (0, 2, 3, 4, 1)).reshape(B * T, H, W * Ci)

    # conv1 (3x3, pad 1) + ReLU
    x1 = conv3x3(x1, params['conv1_w'], params['conv1_b'], relu=True)       # (BT, H, W*Cm)

    # conv_pool (4x4, stride 4) + ReLU: space-to-depth glue + tiled bf16 matmul
    x2 = x1.reshape(B * T, Ho, 4, Wo, 4 * Cm).transpose(0, 1, 3, 2, 4)
    x2 = x2.reshape(B * T * Ho * Wo, 16 * Cm)
    wp = jnp.transpose(params['pool_w'], (2, 3, 1, 0)).reshape(16 * Cm, Cm)  # (kh,kw,ci) x co
    x2 = matmul_bias(x2, wp, params['pool_b'], relu=True)                    # (BT*Ho*Wo, Cm)

    # '(b t) c h w -> (b h w) t c'
    x3 = x2.reshape(B, T, Ho, Wo, Cm).transpose(0, 2, 3, 1, 4).reshape(B * Ho * Wo, T, Cm)

    # LayerNorm + local temporal attention (window_size) + proj + residual (fused kernel)
    half = window_size // 2
    idx = jnp.arange(T)
    d = idx[None, :] - idx[:, None]                       # j - i
    mask = jnp.where((d >= -half) & (d <= half), 0.0, -1e30).astype(jnp.float32)
    x4 = temporal_attention(x3, params['ln_w'], params['ln_b'],
                            params['qkv_w'].T, params['proj_w'].T, params['proj_b'],
                            mask, num_heads)                                  # (S, T, Cm)

    # '(b h w) t c -> ((b t) h w) c'
    x5 = x4.reshape(B, Ho, Wo, T, Cm).transpose(0, 3, 1, 2, 4).reshape(B * T * Ho * Wo, Cm)

    # conv_upsample (ConvTranspose2d k=4, s=4, non-overlapping) + ReLU: matmul + depth-to-space
    wu = jnp.transpose(params['up_w'], (0, 2, 3, 1)).reshape(Cm, 16 * Cm)    # ci x (kh,kw,co)
    bu = jnp.tile(params['up_b'], 16)
    x6 = matmul_bias(x5, wu, bu, relu=True)                                  # (BT*Ho*Wo, 16Cm)
    x6 = x6.reshape(B * T, Ho, Wo, 4, 4 * Cm).transpose(0, 1, 3, 2, 4).reshape(B * T, H, W * Cm)

    # conv2 (3x3, pad 1, zero-initialized weights/bias as in the PyTorch module)
    x7 = conv3x3(x6, params['conv2_w'], params['conv2_b'], relu=False)       # (BT, H, W*Ci)

    # '(b t) h (w c) -> b c t h w'
    return x7.reshape(B, T, H, W, Ci).transpose(0, 4, 1, 2, 3)


# ----------------------------- deterministic params ---------------------------

def init_params(key, input_channels, intermed_channels):
    Ci, Cm = input_channels, intermed_channels
    ks = jax.random.split(key, 12)

    def nrm(k, shape, scale=0.1):
        return (scale * jax.random.normal(k, shape)).astype(jnp.float32)

    return dict(
        gn_w=(nrm(ks[0], (Ci,)) + 1.0),                  # GroupNorm affine (per channel)
        gn_b=nrm(ks[1], (Ci,)),
        conv1_w=nrm(ks[2], (Cm, Ci, 3, 3)),              # PyTorch OIHW
        conv1_b=nrm(ks[3], (Cm,)),
        pool_w=nrm(ks[4], (Cm, Cm, 4, 4)),               # PyTorch OIHW
        pool_b=nrm(ks[5], (Cm,)),
        ln_w=(nrm(ks[6], (Cm,)) + 1.0),                  # LayerNorm affine
        ln_b=nrm(ks[7], (Cm,)),
        qkv_w=nrm(ks[8], (3 * Cm, Cm)),                  # PyTorch Linear (out,in), qkv_bias=False
        proj_w=nrm(ks[9], (Cm, Cm)),                     # PyTorch Linear (out,in)
        proj_b=nrm(ks[10], (Cm,)),
        up_w=nrm(ks[11], (Cm, Cm, 4, 4)),                # PyTorch ConvTranspose2d (in,out,kh,kw)
        up_b=nrm(jax.random.fold_in(ks[11], 1), (Cm,)),
        conv2_w=jnp.zeros((Ci, Cm, 3, 3), jnp.float32),  # zero-init per module __init__
        conv2_b=jnp.zeros((Ci,), jnp.float32),
    )


# ----------------------------- main --------------------------------------------

if __name__ == "__main__":
    key = jax.random.PRNGKey(0)
    B, Ci, T, H, W = 2, 4, 8, 16, 16          # input x: (B, C, T, H, W)
    Cm, num_heads, window_size = 8, 4, 13     # intermed_channels, heads, attention window

    kx, kp = jax.random.split(key)
    x = jax.random.normal(kx, (B, Ci, T, H, W), jnp.float32)
    params = init_params(kp, Ci, Cm)

    fwd = jax.jit(functools.partial(temporal_adapter_forward,
                                    num_heads=num_heads, window_size=window_size))
    out = fwd(x, params)
    out = jax.block_until_ready(out)

    assert out.shape == (B, Ci, T, H, W), out.shape
    assert bool(jnp.all(jnp.isfinite(out)))
    # conv2 is zero-initialized in the PyTorch module, so the adapter output must be all zeros
    # exactly (any NaN/Inf upstream would propagate and fail this check).
    assert bool(jnp.allclose(out, 0.0))
    print("KERNEL_OK")
</pallas_src>

<mosaic_0001>
module attributes {stable_mosaic.version = 11 : i64} {
  func.func @groupnorm_kernel(%arg0: i32, %arg1: memref<1x8x1024xf32, #tpu.memory_space<vmem>>, %arg2: memref<8x1xf32, #tpu.memory_space<vmem>>, %arg3: memref<8x1xf32, #tpu.memory_space<vmem>>, %arg4: memref<1x8x1024xf32, #tpu.memory_space<vmem>>) attributes {dimension_semantics = [#tpu.dimension_semantics<parallel>], iteration_bounds = array<i64: 2>, scalar_prefetch = 0 : i64, scratch_operands = 0 : i64, tpu.core_type = #tpu.core_type<tc>, window_params = [{transform_indices = @transform_0, window_bounds = array<i64: 1, 8, 1024>}, {pipeline_mode = #tpu.pipeline_mode<synchronous>, transform_indices = @transform_1, window_bounds = array<i64: 8, 1>}, {pipeline_mode = #tpu.pipeline_mode<synchronous>, transform_indices = @transform_2, window_bounds = array<i64: 8, 1>}, {transform_indices = @transform_3, window_bounds = array<i64: 1, 8, 1024>}]} {
    %c0 = arith.constant 0 : index
    %c0_0 = arith.constant 0 : index
    %c0_1 = arith.constant 0 : index
    %0 = vector.load %arg1[%c0, %c0_0, %c0_1] : memref<1x8x1024xf32, #tpu.memory_space<vmem>>, vector<1x8x1024xf32>
    %1 = vector.shape_cast %0 : vector<1x8x1024xf32> to vector<8x1024xf32>
    %2 = vector.shape_cast %1 : vector<8x1024xf32> to vector<1x8x1024xf32>
    %cst = arith.constant dense<0.000000e+00> : vector<1xf32>
    %3 = vector.multi_reduction <add>, %2, %cst [1, 2] : vector<1x8x1024xf32> to vector<1xf32>
    %4 = vector.shape_cast %3 : vector<1xf32> to vector<1x1x1xf32>
    %5 = vector.extract %4[0, 0, 0] : f32 from vector<1x1x1xf32>
    %6 = arith.mulf %1, %1 : vector<8x1024xf32>
    %7 = vector.shape_cast %6 : vector<8x1024xf32> to vector<1x8x1024xf32>
    %cst_2 = arith.constant dense<0.000000e+00> : vector<1xf32>
    %8 = vector.multi_reduction <add>, %7, %cst_2 [1, 2] : vector<1x8x1024xf32> to vector<1xf32>
    %9 = vector.shape_cast %8 : vector<1xf32> to vector<1x1x1xf32>
    %10 = vector.extract %9[0, 0, 0] : f32 from vector<1x1x1xf32>
    %cst_3 = arith.constant 1.22070313E-4 : f32
    %11 = arith.mulf %5, %cst_3 : f32
    %cst_4 = arith.constant 1.22070313E-4 : f32
    %12 = arith.mulf %10, %cst_4 : f32
    %13 = arith.mulf %11, %11 : f32
    %14 = arith.subf %12, %13 : f32
    %15 = vector.broadcast %11 : f32 to vector<8x1024xf32>
    %16 = arith.subf %1, %15 : vector<8x1024xf32>
    %cst_5 = arith.constant 9.99999974E-6 : f32
    %17 = arith.addf %14, %cst_5 : f32
    %18 = math.rsqrt %17 : f32
    %19 = vector.broadcast %18 : f32 to vector<8x1024xf32>
    %20 = arith.mulf %16, %19 : vector<8x1024xf32>
    %c0_6 = arith.constant 0 : index
    %c0_7 = arith.constant 0 : index
    %21 = vector.load %arg2[%c0_6, %c0_7] : memref<8x1xf32, #tpu.memory_space<vmem>>, vector<8x1xf32>
    %22 = vector.broadcast %21 : vector<8x1xf32> to vector<8x1024xf32>
    %23 = arith.mulf %20, %22 : vector<8x1024xf32>
    %c0_8 = arith.constant 0 : index
    %c0_9 = arith.constant 0 : index
    %24 = vector.load %arg3[%c0_8, %c0_9] : memref<8x1xf32, #tpu.memory_space<vmem>>, vector<8x1xf32>
    %25 = vector.broadcast %24 : vector<8x1xf32> to vector<8x1024xf32>
    %26 = arith.addf %23, %25 : vector<8x1024xf32>
    %c0_10 = arith.constant 0 : index
    %c0_11 = arith.constant 0 : index
    %c0_12 = arith.constant 0 : index
    %27 = vector.load %arg4[%c0_10, %c0_11, %c0_12] : memref<1x8x1024xf32, #tpu.memory_space<vmem>>, vector<1x8x1024xf32>
    %28 = vector.shape_cast %27 : vector<1x8x1024xf32> to vector<8x1024xf32>
    %29 = vector.shape_cast %26 : vector<8x1024xf32> to vector<1x8x1024xf32>
    tpu.vector_store %arg4[%c0_10, %c0_11, %c0_12], %29 {strides = array<i32>} : memref<1x8x1024xf32, #tpu.memory_space<vmem>>, vector<1x8x1024xf32>,
    return
  }
  func.func @transform_0(%arg0: i32) -> (i32, i32, i32) {
    %c0_i32 = arith.constant 0 : i32
    %c0_i32_0 = arith.constant 0 : i32
    %c0_i32_1 = arith.constant 0 : i32
    return %arg0, %c0_i32, %c0_i32_0 : i32, i32, i32
  }
  func.func @transform_1(%arg0: i32) -> (i32, i32) {
    %c0_i32 = arith.constant 0 : i32
    %c0_i32_0 = arith.constant 0 : i32
    %c0_i32_1 = arith.constant 0 : i32
    return %c0_i32, %c0_i32_0 : i32, i32
  }
  func.func @transform_2(%arg0: i32) -> (i32, i32) {
    %c0_i32 = arith.constant 0 : i32
    %c0_i32_0 = arith.constant 0 : i32
    %c0_i32_1 = arith.constant 0 : i32
    return %c0_i32, %c0_i32_0 : i32, i32
  }
  func.func @transform_3(%arg0: i32) -> (i32, i32, i32) {
    %c0_i32 = arith.constant 0 : i32
    %c0_i32_0 = arith.constant 0 : i32
    %c0_i32_1 = arith.constant 0 : i32
    return %arg0, %c0_i32, %c0_i32_0 : i32, i32, i32
  }
}

module attributes {stable_mosaic.version = 11 : i64} {
  func.func @conv3x3_kernel(%arg0: i32, %arg1: memref<8x16x64xf32, #tpu.memory_space<vmem>>, %arg2: memref<3x64x128xbf16, #tpu.memory_space<vmem>>, %arg3: memref<1x128xf32, #tpu.memory_space<vmem>>, %arg4: memref<8x16x128xf32, #tpu.memory_space<vmem>>) attributes {dimension_semantics = [#tpu.dimension_semantics<parallel>], iteration_bounds = array<i64: 2>, scalar_prefetch = 0 : i64, scratch_operands = 0 : i64, tpu.core_type = #tpu.core_type<tc>, window_params = [{transform_indices = @transform_0, window_bounds = array<i64: 8, 16, 64>}, {pipeline_mode = #tpu.pipeline_mode<synchronous>, transform_indices = @transform_1, window_bounds = array<i64: 3, 64, 128>}, {pipeline_mode = #tpu.pipeline_mode<synchronous>, transform_indices = @transform_2, window_bounds = array<i64: 1, 128>}, {transform_indices = @transform_3, window_bounds = array<i64: 8, 16, 128>}]} {
    %c0 = arith.constant 0 : index
    %c0_0 = arith.constant 0 : index
    %c0_1 = arith.constant 0 : index
    %0 = vector.load %arg1[%c0, %c0_0, %c0_1] : memref<8x16x64xf32, #tpu.memory_space<vmem>>, vector<8x16x64xf32>
    %1 = arith.truncf %0 : vector<8x16x64xf32> to vector<8x16x64xbf16>
    %cst = arith.constant 0.000000e+00 : bf16
    %2 = vector.broadcast %cst : bf16 to vector<8x1x64xbf16>
    %3 = tpu.concatenate %2, %1, %2 in 1 : vector<8x1x64xbf16>, vector<8x16x64xbf16>, vector<8x1x64xbf16> -> vector<8x18x64xbf16>
    %cst_2 = arith.constant 0.000000e+00 : f32
    %4 = vector.broadcast %cst_2 : f32 to vector<128x128xf32>
    %5 = vector.extract_strided_slice %3 {offsets = [0, 0, 0], sizes = [8, 16, 64], strides = [1, 1, 1]} : vector<8x18x64xbf16> to vector<8x16x64xbf16>
    %6 = vector.shape_cast %5 : vector<8x16x64xbf16> to vector<128x64xbf16>
    %c0_3 = arith.constant 0 : index
    %c0_4 = arith.constant 0 : index
    %c0_5 = arith.constant 0 : index
    %7 = vector.load %arg2[%c0_3, %c0_4, %c0_5] : memref<3x64x128xbf16, #tpu.memory_space<vmem>>, vector<1x64x128xbf16>
    %8 = vector.shape_cast %7 : vector<1x64x128xbf16> to vector<64x128xbf16>
    %cst_6 = arith.constant dense<0.000000e+00> : vector<128x128xf32>
    %9 = tpu.matmul %6, %8, %cst_6 {dimension_numbers = #tpu.dot_dimension_numbers<[1], [0], [0], [1], [0, 0, 1, 1], [], []>} : vector<128x64xbf16>, vector<64x128xbf16>, vector<128x128xf32> -> vector<128x128xf32>
    %10 = arith.addf %4, %9 : vector<128x128xf32>
    %11 = vector.extract_strided_slice %3 {offsets = [0, 1, 0], sizes = [8, 16, 64], strides = [1, 1, 1]} : vector<8x18x64xbf16> to vector<8x16x64xbf16>
    %12 = vector.shape_cast %11 : vector<8x16x64xbf16> to vector<128x64xbf16>
    %c1 = arith.constant 1 : index
    %c0_7 = arith.constant 0 : index
    %c0_8 = arith.constant 0 : index
    %13 = vector.load %arg2[%c1, %c0_7, %c0_8] : memref<3x64x128xbf16, #tpu.memory_space<vmem>>, vector<1x64x128xbf16>
    %14 = vector.shape_cast %13 : vector<1x64x128xbf16> to vector<64x128xbf16>
    %cst_9 = arith.constant dense<0.000000e+00> : vector<128x128xf32>
    %15 = tpu.matmul %12, %14, %cst_9 {dimension_numbers = #tpu.dot_dimension_numbers<[1], [0], [0], [1], [0, 0, 1, 1], [], []>} : vector<128x64xbf16>, vector<64x128xbf16>, vector<128x128xf32> -> vector<128x128xf32>
    %16 = arith.addf %10, %15 : vector<128x128xf32>
    %17 = vector.extract_strided_slice %3 {offsets = [0, 2, 0], sizes = [8, 16, 64], strides = [1, 1, 1]} : vector<8x18x64xbf16> to vector<8x16x64xbf16>
    %18 = vector.shape_cast %17 : vector<8x16x64xbf16> to vector<128x64xbf16>
    %c2 = arith.constant 2 : index
    %c0_10 = arith.constant 0 : index
    %c0_11 = arith.constant 0 : index
    %19 = vector.load %arg2[%c2, %c0_10, %c0_11] : memref<3x64x128xbf16, #tpu.memory_space<vmem>>, vector<1x64x128xbf16>
    %20 = vector.shape_cast %19 : vector<1x64x128xbf16> to vector<64x128xbf16>
    %cst_12 = arith.constant dense<0.000000e+00> : vector<128x128xf32>
    %21 = tpu.matmul %18, %20, %cst_12 {dimension_numbers = #tpu.dot_dimension_numbers<[1], [0], [0], [1], [0, 0, 1, 1], [], []>} : vector<128x64xbf16>, vector<64x128xbf16>, vector<128x128xf32> -> vector<128x128xf32>
    %22 = arith.addf %16, %21 : vector<128x128xf32>
    %c0_13 = arith.constant 0 : index
    %c0_14 = arith.constant 0 : index
    %23 = vector.load %arg3[%c0_13, %c0_14] : memref<1x128xf32, #tpu.memory_space<vmem>>, vector<1x128xf32>
    %24 = vector.shape_cast %23 : vector<1x128xf32> to vector<128xf32>
    %25 = vector.shape_cast %24 : vector<128xf32> to vector<1x128xf32>
    %26 = vector.broadcast %25 : vector<1x128xf32> to vector<128x128xf32>
    %27 = arith.addf %22, %26 : vector<128x128xf32>
    %cst_15 = arith.constant 0.000000e+00 : f32
    %28 = vector.broadcast %cst_15 : f32 to vector<128x128xf32>
    %29 = arith.maximumf %27, %28 : vector<128x128xf32>
    %30 = vector.shape_cast %29 : vector<128x128xf32> to vector<8x16x128xf32>
    %c0_16 = arith.constant 0 : index
    %c0_17 = arith.constant 0 : index
    %c0_18 = arith.constant 0 : index
    %31 = vector.load %arg4[%c0_16, %c0_17, %c0_18] : memref<8x16x128xf32, #tpu.memory_space<vmem>>, vector<8x16x128xf32>
    tpu.vector_store %arg4[%c0_16, %c0_17, %c0_18], %30 {strides = array<i32>} : memref<8x16x128xf32, #tpu.memory_space<vmem>>, vector<8x16x128xf32>,
    return
  }
  func.func @transform_0(%arg0: i32) -> (i32, i32, i32) {
    %c0_i32 = arith.constant 0 : i32
    %c0_i32_0 = arith.constant 0 : i32
    %c0_i32_1 = arith.constant 0 : i32
    return %arg0, %c0_i32, %c0_i32_0 : i32, i32, i32
  }
  func.func @transform_1(%arg0: i32) -> (i32, i32, i32) {
    %c0_i32 = arith.constant 0 : i32
    %c0_i32_0 = arith.constant 0 : i32
    %c0_i32_1 = arith.constant 0 : i32
    %c0_i32_2 = arith.constant 0 : i32
    return %c0_i32, %c0_i32_0, %c0_i32_1 : i32, i32, i32
  }
  func.func @transform_2(%arg0: i32) -> (i32, i32) {
    %c0_i32 = arith.constant 0 : i32
    %c0_i32_0 = arith.constant 0 : i32
    %c0_i32_1 = arith.constant 0 : i32
    return %c0_i32, %c0_i32_0 : i32, i32
  }
  func.func @transform_3(%arg0: i32) -> (i32, i32, i32) {
    %c0_i32 = arith.constant 0 : i32
    %c0_i32_0 = arith.constant 0 : i32
    %c0_i32_1 = arith.constant 0 : i32
    return %arg0, %c0_i32, %c0_i32_0 : i32, i32, i32
  }
}

module attributes {stable_mosaic.version = 11 : i64} {
  func.func @matmul_bias_kernel(%arg0: i32, %arg1: memref<128x128xf32, #tpu.memory_space<vmem>>, %arg2: memref<128x8xbf16, #tpu.memory_space<vmem>>, %arg3: memref<1x8xf32, #tpu.memory_space<vmem>>, %arg4: memref<128x8xf32, #tpu.memory_space<vmem>>) attributes {dimension_semantics = [#tpu.dimension_semantics<parallel>], iteration_bounds = array<i64: 2>, scalar_prefetch = 0 : i64, scratch_operands = 0 : i64, tpu.core_type = #tpu.core_type<tc>, window_params = [{transform_indices = @transform_0, window_bounds = array<i64: 128, 128>}, {pipeline_mode = #tpu.pipeline_mode<synchronous>, transform_indices = @transform_1, window_bounds = array<i64: 128, 8>}, {pipeline_mode = #tpu.pipeline_mode<synchronous>, transform_indices = @transform_2, window_bounds = array<i64: 1, 8>}, {transform_indices = @transform_3, window_bounds = array<i64: 128, 8>}]} {
    %c0 = arith.constant 0 : index
    %c0_0 = arith.constant 0 : index
    %0 = vector.load %arg1[%c0, %c0_0] : memref<128x128xf32, #tpu.memory_space<vmem>>, vector<128x128xf32>
    %1 = arith.truncf %0 : vector<128x128xf32> to vector<128x128xbf16>
    %c0_1 = arith.constant 0 : index
    %c0_2 = arith.constant 0 : index
    %2 = vector.load %arg2[%c0_1, %c0_2] : memref<128x8xbf16, #tpu.memory_space<vmem>>, vector<128x8xbf16>
    %cst = arith.constant dense<0.000000e+00> : vector<128x8xf32>
    %3 = tpu.matmul %1, %2, %cst {dimension_numbers = #tpu.dot_dimension_numbers<[1], [0], [0], [1], [0, 0, 1, 1], [], []>} : vector<128x128xbf16>, vector<128x8xbf16>, vector<128x8xf32> -> vector<128x8xf32>
    %c0_3 = arith.constant 0 : index
    %c0_4 = arith.constant 0 : index
    %4 = vector.load %arg3[%c0_3, %c0_4] : memref<1x8xf32, #tpu.memory_space<vmem>>, vector<1x8xf32>
    %5 = vector.shape_cast %4 : vector<1x8xf32> to vector<8xf32>
    %6 = vector.shape_cast %5 : vector<8xf32> to vector<1x8xf32>
    %7 = vector.broadcast %6 : vector<1x8xf32> to vector<128x8xf32>
    %8 = arith.addf %3, %7 : vector<128x8xf32>
    %cst_5 = arith.constant 0.000000e+00 : f32
    %9 = vector.broadcast %cst_5 : f32 to vector<128x8xf32>
    %10 = arith.maximumf %8, %9 : vector<128x8xf32>
    %c0_6 = arith.constant 0 : index
    %c0_7 = arith.constant 0 : index
    %11 = vector.load %arg4[%c0_6, %c0_7] : memref<128x8xf32, #tpu.memory_space<vmem>>, vector<128x8xf32>
    tpu.vector_store %arg4[%c0_6, %c0_7], %10 {strides = array<i32>} : memref<128x8xf32, #tpu.memory_space<vmem>>, vector<128x8xf32>,
    return
  }
  func.func @transform_0(%arg0: i32) -> (i32, i32) {
    %c0_i32 = arith.constant 0 : i32
    %c0_i32_0 = arith.constant 0 : i32
    return %arg0, %c0_i32 : i32, i32
  }
  func.func @transform_1(%arg0: i32) -> (i32, i32) {
    %c0_i32 = arith.constant 0 : i32
    %c0_i32_0 = arith.constant 0 : i32
    %c0_i32_1 = arith.constant 0 : i32
    return %c0_i32, %c0_i32_0 : i32, i32
  }
  func.func @transform_2(%arg0: i32) -> (i32, i32) {
    %c0_i32 = arith.constant 0 : i32
    %c0_i32_0 = arith.constant 0 : i32
    %c0_i32_1 = arith.constant 0 : i32
    return %c0_i32, %c0_i32_0 : i32, i32
  }
  func.func @transform_3(%arg0: i32) -> (i32, i32) {
    %c0_i32 = arith.constant 0 : i32
    %c0_i32_0 = arith.constant 0 : i32
    return %arg0, %c0_i32 : i32, i32
  }
}

module attributes {stable_mosaic.version = 11 : i64} {
  func.func @temporal_attn_kernel(%arg0: i32, %arg1: memref<16x8x8xf32, #tpu.memory_space<vmem>>, %arg2: memref<1x8xf32, #tpu.memory_space<vmem>>, %arg3: memref<1x8xf32, #tpu.memory_space<vmem>>, %arg4: memref<8x24xbf16, #tpu.memory_space<vmem>>, %arg5: memref<8x8xbf16, #tpu.memory_space<vmem>>, %arg6: memref<1x8xf32, #tpu.memory_space<vmem>>, %arg7: memref<8x8xf32, #tpu.memory_space<vmem>>, %arg8: memref<128x8xf32, #tpu.memory_space<vmem>>) attributes {dimension_semantics = [#tpu.dimension_semantics<parallel>], iteration_bounds = array<i64: 2>, scalar_prefetch = 0 : i64, scratch_operands = 0 : i64, tpu.core_type = #tpu.core_type<tc>, window_params = [{transform_indices = @transform_0, window_bounds = array<i64: 16, 8, 8>}, {pipeline_mode = #tpu.pipeline_mode<synchronous>, transform_indices = @transform_1, window_bounds = array<i64: 1, 8>}, {pipeline_mode = #tpu.pipeline_mode<synchronous>, transform_indices = @transform_2, window_bounds = array<i64: 1, 8>}, {pipeline_mode = #tpu.pipeline_mode<synchronous>, transform_indices = @transform_3, window_bounds = array<i64: 8, 24>}, {pipeline_mode = #tpu.pipeline_mode<synchronous>, transform_indices = @transform_4, window_bounds = array<i64: 8, 8>}, {pipeline_mode = #tpu.pipeline_mode<synchronous>, transform_indices = @transform_5, window_bounds = array<i64: 1, 8>}, {pipeline_mode = #tpu.pipeline_mode<synchronous>, transform_indices = @transform_6, window_bounds = array<i64: 8, 8>}, {transform_indices = @transform_7, window_bounds = array<i64: 128, 8>}]} {
    %c0 = arith.constant 0 : index
    %c0_0 = arith.constant 0 : index
    %c0_1 = arith.constant 0 : index
    %0 = vector.load %arg1[%c0, %c0_0, %c0_1] : memref<16x8x8xf32, #tpu.memory_space<vmem>>, vector<16x8x8xf32>
    %1 = vector.shape_cast %0 : vector<16x8x8xf32> to vector<128x8xf32>
    %cst = arith.constant dense<0.000000e+00> : vector<128xf32>
    %2 = vector.multi_reduction <add>, %1, %cst [1] : vector<128x8xf32> to vector<128xf32>
    %3 = vector.shape_cast %2 : vector<128xf32> to vector<128x1xf32>
    %cst_2 = arith.constant 8.000000e+00 : f32
    %4 = vector.broadcast %cst_2 : f32 to vector<128x1xf32>
    %5 = arith.divf %3, %4 : vector<128x1xf32>
    %6 = vector.broadcast %5 : vector<128x1xf32> to vector<128x8xf32>
    %7 = arith.subf %1, %6 : vector<128x8xf32>
    %8 = arith.mulf %7, %7 : vector<128x8xf32>
    %cst_3 = arith.constant dense<0.000000e+00> : vector<128xf32>
    %9 = vector.multi_reduction <add>, %8, %cst_3 [1] : vector<128x8xf32> to vector<128xf32>
    %10 = vector.shape_cast %9 : vector<128xf32> to vector<128x1xf32>
    %cst_4 = arith.constant 8.000000e+00 : f32
    %11 = vector.broadcast %cst_4 : f32 to vector<128x1xf32>
    %12 = arith.divf %10, %11 : vector<128x1xf32>
    %13 = vector.broadcast %5 : vector<128x1xf32> to vector<128x8xf32>
    %14 = arith.subf %1, %13 : vector<128x8xf32>
    %cst_5 = arith.constant 9.99999974E-6 : f32
    %15 = vector.broadcast %cst_5 : f32 to vector<128x1xf32>
    %16 = arith.addf %12, %15 : vector<128x1xf32>
    %17 = math.rsqrt %16 : vector<128x1xf32>
    %18 = vector.broadcast %17 : vector<128x1xf32> to vector<128x8xf32>
    %19 = arith.mulf %14, %18 : vector<128x8xf32>
    %c0_6 = arith.constant 0 : index
    %c0_7 = arith.constant 0 : index
    %20 = vector.load %arg2[%c0_6, %c0_7] : memref<1x8xf32, #tpu.memory_space<vmem>>, vector<1x8xf32>
    %21 = vector.shape_cast %20 : vector<1x8xf32> to vector<8xf32>
    %22 = vector.shape_cast %21 : vector<8xf32> to vector<1x8xf32>
    %23 = vector.broadcast %22 : vector<1x8xf32> to vector<128x8xf32>
    %24 = arith.mulf %19, %23 : vector<128x8xf32>
    %c0_8 = arith.constant 0 : index
    %c0_9 = arith.constant 0 : index
    %25 = vector.load %arg3[%c0_8, %c0_9] : memref<1x8xf32, #tpu.memory_space<vmem>>, vector<1x8xf32>
    %26 = vector.shape_cast %25 : vector<1x8xf32> to vector<8xf32>
    %27 = vector.shape_cast %26 : vector<8xf32> to vector<1x8xf32>
    %28 = vector.broadcast %27 : vector<1x8xf32> to vector<128x8xf32>
    %29 = arith.addf %24, %28 : vector<128x8xf32>
    %30 = arith.truncf %29 : vector<128x8xf32> to vector<128x8xbf16>
    %c0_10 = arith.constant 0 : index
    %c0_11 = arith.constant 0 : index
    %31 = vector.load %arg4[%c0_10, %c0_11] : memref<8x24xbf16, #tpu.memory_space<vmem>>, vector<8x24xbf16>
    %cst_12 = arith.constant dense<0.000000e+00> : vector<128x24xf32>
    %32 = tpu.matmul %30, %31, %cst_12 {dimension_numbers = #tpu.dot_dimension_numbers<[1], [0], [0], [1], [0, 0, 1, 1], [], []>} : vector<128x8xbf16>, vector<8x24xbf16>, vector<128x24xf32> -> vector<128x24xf32>
    %c0_13 = arith.constant 0 : index
    %c0_14 = arith.constant 0 : index
    %33 = vector.load %arg5[%c0_13, %c0_14] : memref<8x8xbf16, #tpu.memory_space<vmem>>, vector<8x8xbf16>
    %c0_15 = arith.constant 0 : index
    %c0_16 = arith.constant 0 : index
    %34 = vector.load %arg7[%c0_15, %c0_16] : memref<8x8xf32, #tpu.memory_space<vmem>>, vector<8x8xf32>
    %35 = vector.shape_cast %34 : vector<8x8xf32> to vector<1x8x8xf32>
    %cst_17 = arith.constant 0.000000e+00 : f32
    %36 = vector.broadcast %cst_17 : f32 to vector<128x8xf32>
    %37 = vector.extract_strided_slice %32 {offsets = [0, 0], sizes = [128, 2], strides = [1, 1]} : vector<128x24xf32> to vector<128x2xf32>
    %38 = vector.shape_cast %37 : vector<128x2xf32> to vector<16x8x2xf32>
    %39 = vector.extract_strided_slice %32 {offsets = [0, 8], sizes = [128, 2], strides = [1, 1]} : vector<128x24xf32> to vector<128x2xf32>
    %40 = vector.shape_cast %39 : vector<128x2xf32> to vector<16x8x2xf32>
    %41 = vector.extract_strided_slice %32 {offsets = [0, 16], sizes = [128, 2], strides = [1, 1]} : vector<128x24xf32> to vector<128x2xf32>
    %42 = vector.shape_cast %41 : vector<128x2xf32> to vector<16x8x2xf32>
    %43 = arith.truncf %38 : vector<16x8x2xf32> to vector<16x8x2xbf16>
    %44 = arith.truncf %40 : vector<16x8x2xf32> to vector<16x8x2xbf16>
    "tpu.trace_start"() <{level = 10 : i32, message = "bqd,bkd->bqk"}> : () -> ()
    %cst_18 = arith.constant dense<0.000000e+00> : vector<16x8x8xf32>
    %45 = tpu.matmul %43, %44, %cst_18 {dimension_numbers = #tpu.dot_dimension_numbers<[2], [2], [1], [1], [0, 0, 0, 1, 1, 1], [0], [0]>} : vector<16x8x2xbf16>, vector<16x8x2xbf16>, vector<16x8x8xf32> -> vector<16x8x8xf32>
    "tpu.trace_stop"() : () -> ()
    %cst_19 = arith.constant 0.707106769 : f32
    %46 = vector.broadcast %cst_19 : f32 to vector<16x8x8xf32>
    %47 = arith.mulf %45, %46 : vector<16x8x8xf32>
    %48 = vector.broadcast %35 : vector<1x8x8xf32> to vector<16x8x8xf32>
    %49 = arith.addf %47, %48 : vector<16x8x8xf32>
    %cst_20 = arith.constant dense<0xFF800000> : vector<16x8xf32>
    %50 = vector.multi_reduction <maximumf>, %49, %cst_20 [2] : vector<16x8x8xf32> to vector<16x8xf32>
    %51 = vector.shape_cast %50 : vector<16x8xf32> to vector<16x8x1xf32>
    %52 = vector.broadcast %51 : vector<16x8x1xf32> to vector<16x8x8xf32>
    %53 = arith.subf %49, %52 : vector<16x8x8xf32>
    %54 = math.exp %53 : vector<16x8x8xf32>
    %cst_21 = arith.constant dense<0.000000e+00> : vector<16x8xf32>
    %55 = vector.multi_reduction <add>, %54, %cst_21 [2] : vector<16x8x8xf32> to vector<16x8xf32>
    %56 = vector.shape_cast %55 : vector<16x8xf32> to vector<16x8x1xf32>
    %57 = tpu.reciprocal %56 {approx = true} : vector<16x8x1xf32> -> vector<16x8x1xf32>
    %58 = vector.broadcast %57 : vector<16x8x1xf32> to vector<16x8x8xf32>
    %59 = arith.mulf %54, %58 : vector<16x8x8xf32>
    %60 = arith.truncf %59 : vector<16x8x8xf32> to vector<16x8x8xbf16>
    %61 = arith.truncf %42 : vector<16x8x2xf32> to vector<16x8x2xbf16>
    "tpu.trace_start"() <{level = 10 : i32, message = "bqk,bkd->bqd"}> : () -> ()
    %cst_22 = arith.constant dense<0.000000e+00> : vector<16x8x2xf32>
    %62 = tpu.matmul %60, %61, %cst_22 {dimension_numbers = #tpu.dot_dimension_numbers<[2], [1], [1], [2], [0, 0, 0, 1, 1, 2], [0], [0]>} : vector<16x8x8xbf16>, vector<16x8x2xbf16>, vector<16x8x2xf32> -> vector<16x8x2xf32>
    "tpu.trace_stop"() : () -> ()
    %63 = vector.shape_cast %62 : vector<16x8x2xf32> to vector<128x2xf32>
    %64 = arith.truncf %63 : vector<128x2xf32> to vector<128x2xbf16>
    %65 = vector.extract_strided_slice %33 {offsets = [0, 0], sizes = [2, 8], strides = [1, 1]} : vector<8x8xbf16> to vector<2x8xbf16>
    %cst_23 = arith.constant dense<0.000000e+00> : vector<128x8xf32>
    %66 = tpu.matmul %64, %65, %cst_23 {dimension_numbers = #tpu.dot_dimension_numbers<[1], [0], [0], [1], [0, 0, 1, 1], [], []>} : vector<128x2xbf16>, vector<2x8xbf16>, vector<128x8xf32> -> vector<128x8xf32>
    %67 = arith.addf %36, %66 : vector<128x8xf32>
    %68 = vector.extract_strided_slice %32 {offsets = [0, 2], sizes = [128, 2], strides = [1, 1]} : vector<128x24xf32> to vector<128x2xf32>
    %69 = vector.shape_cast %68 : vector<128x2xf32> to vector<16x8x2xf32>
    %70 = vector.extract_strided_slice %32 {offsets = [0, 10], sizes = [128, 2], strides = [1, 1]} : vector<128x24xf32> to vector<128x2xf32>
    %71 = vector.shape_cast %70 : vector<128x2xf32> to vector<16x8x2xf32>
    %72 = vector.extract_strided_slice %32 {offsets = [0, 18], sizes = [128, 2], strides = [1, 1]} : vector<128x24xf32> to vector<128x2xf32>
    %73 = vector.shape_cast %72 : vector<128x2xf32> to vector<16x8x2xf32>
    %74 = arith.truncf %69 : vector<16x8x2xf32> to vector<16x8x2xbf16>
    %75 = arith.truncf %71 : vector<16x8x2xf32> to vector<16x8x2xbf16>
    "tpu.trace_start"() <{level = 10 : i32, message = "bqd,bkd->bqk"}> : () -> ()
    %cst_24 = arith.constant dense<0.000000e+00> : vector<16x8x8xf32>
    %76 = tpu.matmul %74, %75, %cst_24 {dimension_numbers = #tpu.dot_dimension_numbers<[2], [2], [1], [1], [0, 0, 0, 1, 1, 1], [0], [0]>} : vector<16x8x2xbf16>, vector<16x8x2xbf16>, vector<16x8x8xf32> -> vector<16x8x8xf32>
    "tpu.trace_stop"() : () -> ()
    %cst_25 = arith.constant 0.707106769 : f32
    %77 = vector.broadcast %cst_25 : f32 to vector<16x8x8xf32>
    %78 = arith.mulf %76, %77 : vector<16x8x8xf32>
    %79 = vector.broadcast %35 : vector<1x8x8xf32> to vector<16x8x8xf32>
    %80 = arith.addf %78, %79 : vector<16x8x8xf32>
    %cst_26 = arith.constant dense<0xFF800000> : vector<16x8xf32>
    %81 = vector.multi_reduction <maximumf>, %80, %cst_26 [2] : vector<16x8x8xf32> to vector<16x8xf32>
    %82 = vector.shape_cast %81 : vector<16x8xf32> to vector<16x8x1xf32>
    %83 = vector.broadcast %82 : vector<16x8x1xf32> to vector<16x8x8xf32>
    %84 = arith.subf %80, %83 : vector<16x8x8xf32>
    %85 = math.exp %84 : vector<16x8x8xf32>
    %cst_27 = arith.constant dense<0.000000e+00> : vector<16x8xf32>
    %86 = vector.multi_reduction <add>, %85, %cst_27 [2] : vector<16x8x8xf32> to vector<16x8xf32>
    %87 = vector.shape_cast %86 : vector<16x8xf32> to vector<16x8x1xf32>
    %88 = tpu.reciprocal %87 {approx = true} : vector<16x8x1xf32> -> vector<16x8x1xf32>
    %89 = vector.broadcast %88 : vector<16x8x1xf32> to vector<16x8x8xf32>
    %90 = arith.mulf %85, %89 : vector<16x8x8xf32>
    %91 = arith.truncf %90 : vector<16x8x8xf32> to vector<16x8x8xbf16>
    %92 = arith.truncf %73 : vector<16x8x2xf32> to vector<16x8x2xbf16>
    "tpu.trace_start"() <{level = 10 : i32, message = "bqk,bkd->bqd"}> : () -> ()
    %cst_28 = arith.constant dense<0.000000e+00> : vector<16x8x2xf32>
    %93 = tpu.matmul %91, %92, %cst_28 {dimension_numbers = #tpu.dot_dimension_numbers<[2], [1], [1], [2], [0, 0, 0, 1, 1, 2], [0], [0]>} : vector<16x8x8xbf16>, vector<16x8x2xbf16>, vector<16x8x2xf32> -> vector<16x8x2xf32>
    "tpu.trace_stop"() : () -> ()
    %94 = vector.shape_cast %93 : vector<16x8x2xf32> to vector<128x2xf32>
    %95 = arith.truncf %94 : vector<128x2xf32> to vector<128x2xbf16>
    %96 = vector.extract_strided_slice %33 {offsets = [2, 0], sizes = [2, 8], strides = [1, 1]} : vector<8x8xbf16> to vector<2x8xbf16>
    %cst_29 = arith.constant dense<0.000000e+00> : vector<128x8xf32>
    %97 = tpu.matmul %95, %96, %cst_29 {dimension_numbers = #tpu.dot_dimension_numbers<[1], [0], [0], [1], [0, 0, 1, 1], [], []>} : vector<128x2xbf16>, vector<2x8xbf16>, vector<128x8xf32> -> vector<128x8xf32>
    %98 = arith.addf %67, %97 : vector<128x8xf32>
    %99 = vector.extract_strided_slice %32 {offsets = [0, 4], sizes = [128, 2], strides = [1, 1]} : vector<128x24xf32> to vector<128x2xf32>
    %100 = vector.shape_cast %99 : vector<128x2xf32> to vector<16x8x2xf32>
    %101 = vector.extract_strided_slice %32 {offsets = [0, 12], sizes = [128, 2], strides = [1, 1]} : vector<128x24xf32> to vector<128x2xf32>
    %102 = vector.shape_cast %101 : vector<128x2xf32> to vector<16x8x2xf32>
    %103 = vector.extract_strided_slice %32 {offsets = [0, 20], sizes = [128, 2], strides = [1, 1]} : vector<128x24xf32> to vector<128x2xf32>
    %104 = vector.shape_cast %103 : vector<128x2xf32> to vector<16x8x2xf32>
    %105 = arith.truncf %100 : vector<16x8x2xf32> to vector<16x8x2xbf16>
    %106 = arith.truncf %102 : vector<16x8x2xf32> to vector<16x8x2xbf16>
    "tpu.trace_start"() <{level = 10 : i32, message = "bqd,bkd->bqk"}> : () -> ()
    %cst_30 = arith.constant dense<0.000000e+00> : vector<16x8x8xf32>
    %107 = tpu.matmul %105, %106, %cst_30 {dimension_numbers = #tpu.dot_dimension_numbers<[2], [2], [1], [1], [0, 0, 0, 1, 1, 1], [0], [0]>} : vector<16x8x2xbf16>, vector<16x8x2xbf16>, vector<16x8x8xf32> -> vector<16x8x8xf32>
    "tpu.trace_stop"() : () -> ()
    %cst_31 = arith.constant 0.707106769 : f32
    %108 = vector.broadcast %cst_31 : f32 to vector<16x8x8xf32>
    %109 = arith.mulf %107, %108 : vector<16x8x8xf32>
    %110 = vector.broadcast %35 : vector<1x8x8xf32> to vector<16x8x8xf32>
    %111 = arith.addf %109, %110 : vector<16x8x8xf32>
    %cst_32 = arith.constant dense<0xFF800000> : vector<16x8xf32>
    %112 = vector.multi_reduction <maximumf>, %111, %cst_32 [2] : vector<16x8x8xf32> to vector<16x8xf32>
    %113 = vector.shape_cast %112 : vector<16x8xf32> to vector<16x8x1xf32>
    %114 = vector.broadcast %113 : vector<16x8x1xf32> to vector<16x8x8xf32>
    %115 = arith.subf %111, %114 : vector<16x8x8xf32>
    %116 = math.exp %115 : vector<16x8x8xf32>
    %cst_33 = arith.constant dense<0.000000e+00> : vector<16x8xf32>
    %117 = vector.multi_reduction <add>, %116, %cst_33 [2] : vector<16x8x8xf32> to vector<16x8xf32>
    %118 = vector.shape_cast %117 : vector<16x8xf32> to vector<16x8x1xf32>
    %119 = tpu.reciprocal %118 {approx = true} : vector<16x8x1xf32> -> vector<16x8x1xf32>
    %120 = vector.broadcast %119 : vector<16x8x1xf32> to vector<16x8x8xf32>
    %121 = arith.mulf %116, %120 : vector<16x8x8xf32>
    %122 = arith.truncf %121 : vector<16x8x8xf32> to vector<16x8x8xbf16>
    %123 = arith.truncf %104 : vector<16x8x2xf32> to vector<16x8x2xbf16>
    "tpu.trace_start"() <{level = 10 : i32, message = "bqk,bkd->bqd"}> : () -> ()
    %cst_34 = arith.constant dense<0.000000e+00> : vector<16x8x2xf32>
    %124 = tpu.matmul %122, %123, %cst_34 {dimension_numbers = #tpu.dot_dimension_numbers<[2], [1], [1], [2], [0, 0, 0, 1, 1, 2], [0], [0]>} : vector<16x8x8xbf16>, vector<16x8x2xbf16>, vector<16x8x2xf32> -> vector<16x8x2xf32>
    "tpu.trace_stop"() : () -> ()
    %125 = vector.shape_cast %124 : vector<16x8x2xf32> to vector<128x2xf32>
    %126 = arith.truncf %125 : vector<128x2xf32> to vector<128x2xbf16>
    %127 = vector.extract_strided_slice %33 {offsets = [4, 0], sizes = [2, 8], strides = [1, 1]} : vector<8x8xbf16> to vector<2x8xbf16>
    %cst_35 = arith.constant dense<0.000000e+00> : vector<128x8xf32>
    %128 = tpu.matmul %126, %127, %cst_35 {dimension_numbers = #tpu.dot_dimension_numbers<[1], [0], [0], [1], [0, 0, 1, 1], [], []>} : vector<128x2xbf16>, vector<2x8xbf16>, vector<128x8xf32> -> vector<128x8xf32>
    %129 = arith.addf %98, %128 : vector<128x8xf32>
    %130 = vector.extract_strided_slice %32 {offsets = [0, 6], sizes = [128, 2], strides = [1, 1]} : vector<128x24xf32> to vector<128x2xf32>
    %131 = vector.shape_cast %130 : vector<128x2xf32> to vector<16x8x2xf32>
    %132 = vector.extract_strided_slice %32 {offsets = [0, 14], sizes = [128, 2], strides = [1, 1]} : vector<128x24xf32> to vector<128x2xf32>
    %133 = vector.shape_cast %132 : vector<128x2xf32> to vector<16x8x2xf32>
    %134 = vector.extract_strided_slice %32 {offsets = [0, 22], sizes = [128, 2], strides = [1, 1]} : vector<128x24xf32> to vector<128x2xf32>
    %135 = vector.shape_cast %134 : vector<128x2xf32> to vector<16x8x2xf32>
    %136 = arith.truncf %131 : vector<16x8x2xf32> to vector<16x8x2xbf16>
    %137 = arith.truncf %133 : vector<16x8x2xf32> to vector<16x8x2xbf16>
    "tpu.trace_start"() <{level = 10 : i32, message = "bqd,bkd->bqk"}> : () -> ()
    %cst_36 = arith.constant dense<0.000000e+00> : vector<16x8x8xf32>
    %138 = tpu.matmul %136, %137, %cst_36 {dimension_numbers = #tpu.dot_dimension_numbers<[2], [2], [1], [1], [0, 0, 0, 1, 1, 1], [0], [0]>} : vector<16x8x2xbf16>, vector<16x8x2xbf16>, vector<16x8x8xf32> -> vector<16x8x8xf32>
    "tpu.trace_stop"() : () -> ()
    %cst_37 = arith.constant 0.707106769 : f32
    %139 = vector.broadcast %cst_37 : f32 to vector<16x8x8xf32>
    %140 = arith.mulf %138, %139 : vector<16x8x8xf32>
    %141 = vector.broadcast %35 : vector<1x8x8xf32> to vector<16x8x8xf32>
    %142 = arith.addf %140, %141 : vector<16x8x8xf32>
    %cst_38 = arith.constant dense<0xFF800000> : vector<16x8xf32>
    %143 = vector.multi_reduction <maximumf>, %142, %cst_38 [2] : vector<16x8x8xf32> to vector<16x8xf32>
    %144 = vector.shape_cast %143 : vector<16x8xf32> to vector<16x8x1xf32>
    %145 = vector.broadcast %144 : vector<16x8x1xf32> to vector<16x8x8xf32>
    %146 = arith.subf %142, %145 : vector<16x8x8xf32>
    %147 = math.exp %146 : vector<16x8x8xf32>
    %cst_39 = arith.constant dense<0.000000e+00> : vector<16x8xf32>
    %148 = vector.multi_reduction <add>, %147, %cst_39 [2] : vector<16x8x8xf32> to vector<16x8xf32>
    %149 = vector.shape_cast %148 : vector<16x8xf32> to vector<16x8x1xf32>
    %150 = tpu.reciprocal %149 {approx = true} : vector<16x8x1xf32> -> vector<16x8x1xf32>
    %151 = vector.broadcast %150 : vector<16x8x1xf32> to vector<16x8x8xf32>
    %152 = arith.mulf %147, %151 : vector<16x8x8xf32>
    %153 = arith.truncf %152 : vector<16x8x8xf32> to vector<16x8x8xbf16>
    %154 = arith.truncf %135 : vector<16x8x2xf32> to vector<16x8x2xbf16>
    "tpu.trace_start"() <{level = 10 : i32, message = "bqk,bkd->bqd"}> : () -> ()
    %cst_40 = arith.constant dense<0.000000e+00> : vector<16x8x2xf32>
    %155 = tpu.matmul %153, %154, %cst_40 {dimension_numbers = #tpu.dot_dimension_numbers<[2], [1], [1], [2], [0, 0, 0, 1, 1, 2], [0], [0]>} : vector<16x8x8xbf16>, vector<16x8x2xbf16>, vector<16x8x2xf32> -> vector<16x8x2xf32>
    "tpu.trace_stop"() : () -> ()
    %156 = vector.shape_cast %155 : vector<16x8x2xf32> to vector<128x2xf32>
    %157 = arith.truncf %156 : vector<128x2xf32> to vector<128x2xbf16>
    %158 = vector.extract_strided_slice %33 {offsets = [6, 0], sizes = [2, 8], strides = [1, 1]} : vector<8x8xbf16> to vector<2x8xbf16>
    %cst_41 = arith.constant dense<0.000000e+00> : vector<128x8xf32>
    %159 = tpu.matmul %157, %158, %cst_41 {dimension_numbers = #tpu.dot_dimension_numbers<[1], [0], [0], [1], [0, 0, 1, 1], [], []>} : vector<128x2xbf16>, vector<2x8xbf16>, vector<128x8xf32> -> vector<128x8xf32>
    %160 = arith.addf %129, %159 : vector<128x8xf32>
    %c0_42 = arith.constant 0 : index
    %c0_43 = arith.constant 0 : index
    %161 = vector.load %arg6[%c0_42, %c0_43] : memref<1x8xf32, #tpu.memory_space<vmem>>, vector<1x8xf32>
    %162 = vector.shape_cast %161 : vector<1x8xf32> to vector<8xf32>
    %163 = vector.shape_cast %162 : vector<8xf32> to vector<1x8xf32>
    %164 = vector.broadcast %163 : vector<1x8xf32> to vector<128x8xf32>
    %165 = arith.addf %160, %164 : vector<128x8xf32>
    %166 = arith.addf %165, %1 : vector<128x8xf32>
    %c0_44 = arith.constant 0 : index
    %c0_45 = arith.constant 0 : index
    %167 = vector.load %arg8[%c0_44, %c0_45] : memref<128x8xf32, #tpu.memory_space<vmem>>, vector<128x8xf32>
    tpu.vector_store %arg8[%c0_44, %c0_45], %166 {strides = array<i32>} : memref<128x8xf32, #tpu.memory_space<vmem>>, vector<128x8xf32>,
    return
  }
  func.func @transform_0(%arg0: i32) -> (i32, i32, i32) {
    %c0_i32 = arith.constant 0 : i32
    %c0_i32_0 = arith.constant 0 : i32
    %c0_i32_1 = arith.constant 0 : i32
    return %arg0, %c0_i32, %c0_i32_0 : i32, i32, i32
  }
  func.func @transform_1(%arg0: i32) -> (i32, i32) {
    %c0_i32 = arith.constant 0 : i32
    %c0_i32_0 = arith.constant 0 : i32
    %c0_i32_1 = arith.constant 0 : i32
    return %c0_i32, %c0_i32_0 : i32, i32
  }
  func.func @transform_2(%arg0: i32) -> (i32, i32) {
    %c0_i32 = arith.constant 0 : i32
    %c0_i32_0 = arith.constant 0 : i32
    %c0_i32_1 = arith.constant 0 : i32
    return %c0_i32, %c0_i32_0 : i32, i32
  }
  func.func @transform_3(%arg0: i32) -> (i32, i32) {
    %c0_i32 = arith.constant 0 : i32
    %c0_i32_0 = arith.constant 0 : i32
    %c0_i32_1 = arith.constant 0 : i32
    return %c0_i32, %c0_i32_0 : i32, i32
  }
  func.func @transform_4(%arg0: i32) -> (i32, i32) {
    %c0_i32 = arith.constant 0 : i32
    %c0_i32_0 = arith.constant 0 : i32
    %c0_i32_1 = arith.constant 0 : i32
    return %c0_i32, %c0_i32_0 : i32, i32
  }
  func.func @transform_5(%arg0: i32) -> (i32, i32) {
    %c0_i32 = arith.constant 0 : i32
    %c0_i32_0 = arith.constant 0 : i32
    %c0_i32_1 = arith.constant 0 : i32
    return %c0_i32, %c0_i32_0 : i32, i32
  }
  func.func @transform_6(%arg0: i32) -> (i32, i32) {
    %c0_i32 = arith.constant 0 : i32
    %c0_i32_0 = arith.constant 0 : i32
    %c0_i32_1 = arith.constant 0 : i32
    return %c0_i32, %c0_i32_0 : i32, i32
  }
  func.func @transform_7(%arg0: i32) -> (i32, i32) {
    %c0_i32 = arith.constant 0 : i32
    %c0_i32_0 = arith.constant 0 : i32
    return %arg0, %c0_i32 : i32, i32
  }
}

module attributes {stable_mosaic.version = 11 : i64} {
  func.func @matmul_bias_kernel(%arg0: i32, %arg1: memref<128x8xf32, #tpu.memory_space<vmem>>, %arg2: memref<8x128xbf16, #tpu.memory_space<vmem>>, %arg3: memref<1x128xf32, #tpu.memory_space<vmem>>, %arg4: memref<128x128xf32, #tpu.memory_space<vmem>>) attributes {dimension_semantics = [#tpu.dimension_semantics<parallel>], iteration_bounds = array<i64: 2>, scalar_prefetch = 0 : i64, scratch_operands = 0 : i64, tpu.core_type = #tpu.core_type<tc>, window_params = [{transform_indices = @transform_0, window_bounds = array<i64: 128, 8>}, {pipeline_mode = #tpu.pipeline_mode<synchronous>, transform_indices = @transform_1, window_bounds = array<i64: 8, 128>}, {pipeline_mode = #tpu.pipeline_mode<synchronous>, transform_indices = @transform_2, window_bounds = array<i64: 1, 128>}, {transform_indices = @transform_3, window_bounds = array<i64: 128, 128>}]} {
    %c0 = arith.constant 0 : index
    %c0_0 = arith.constant 0 : index
    %0 = vector.load %arg1[%c0, %c0_0] : memref<128x8xf32, #tpu.memory_space<vmem>>, vector<128x8xf32>
    %1 = arith.truncf %0 : vector<128x8xf32> to vector<128x8xbf16>
    %c0_1 = arith.constant 0 : index
    %c0_2 = arith.constant 0 : index
    %2 = vector.load %arg2[%c0_1, %c0_2] : memref<8x128xbf16, #tpu.memory_space<vmem>>, vector<8x128xbf16>
    %cst = arith.constant dense<0.000000e+00> : vector<128x128xf32>
    %3 = tpu.matmul %1, %2, %cst {dimension_numbers = #tpu.dot_dimension_numbers<[1], [0], [0], [1], [0, 0, 1, 1], [], []>} : vector<128x8xbf16>, vector<8x128xbf16>, vector<128x128xf32> -> vector<128x128xf32>
    %c0_3 = arith.constant 0 : index
    %c0_4 = arith.constant 0 : index
    %4 = vector.load %arg3[%c0_3, %c0_4] : memref<1x128xf32, #tpu.memory_space<vmem>>, vector<1x128xf32>
    %5 = vector.shape_cast %4 : vector<1x128xf32> to vector<128xf32>
    %6 = vector.shape_cast %5 : vector<128xf32> to vector<1x128xf32>
    %7 = vector.broadcast %6 : vector<1x128xf32> to vector<128x128xf32>
    %8 = arith.addf %3, %7 : vector<128x128xf32>
    %cst_5 = arith.constant 0.000000e+00 : f32
    %9 = vector.broadcast %cst_5 : f32 to vector<128x128xf32>
    %10 = arith.maximumf %8, %9 : vector<128x128xf32>
    %c0_6 = arith.constant 0 : index
    %c0_7 = arith.constant 0 : index
    %11 = vector.load %arg4[%c0_6, %c0_7] : memref<128x128xf32, #tpu.memory_space<vmem>>, vector<128x128xf32>
    tpu.vector_store %arg4[%c0_6, %c0_7], %10 {strides = array<i32>} : memref<128x128xf32, #tpu.memory_space<vmem>>, vector<128x128xf32>,
    return
  }
  func.func @transform_0(%arg0: i32) -> (i32, i32) {
    %c0_i32 = arith.constant 0 : i32
    %c0_i32_0 = arith.constant 0 : i32
    return %arg0, %c0_i32 : i32, i32
  }
  func.func @transform_1(%arg0: i32) -> (i32, i32) {
    %c0_i32 = arith.constant 0 : i32
    %c0_i32_0 = arith.constant 0 : i32
    %c0_i32_1 = arith.constant 0 : i32
    return %c0_i32, %c0_i32_0 : i32, i32
  }
  func.func @transform_2(%arg0: i32) -> (i32, i32) {
    %c0_i32 = arith.constant 0 : i32
    %c0_i32_0 = arith.constant 0 : i32
    %c0_i32_1 = arith.constant 0 : i32
    return %c0_i32, %c0_i32_0 : i32, i32
  }
  func.func @transform_3(%arg0: i32) -> (i32, i32) {
    %c0_i32 = arith.constant 0 : i32
    %c0_i32_0 = arith.constant 0 : i32
    return %arg0, %c0_i32 : i32, i32
  }
}

module attributes {stable_mosaic.version = 11 : i64} {
  func.func @conv3x3_kernel(%arg0: i32, %arg1: memref<8x16x128xf32, #tpu.memory_space<vmem>>, %arg2: memref<3x128x64xbf16, #tpu.memory_space<vmem>>, %arg3: memref<1x64xf32, #tpu.memory_space<vmem>>, %arg4: memref<8x16x64xf32, #tpu.memory_space<vmem>>) attributes {dimension_semantics = [#tpu.dimension_semantics<parallel>], iteration_bounds = array<i64: 2>, scalar_prefetch = 0 : i64, scratch_operands = 0 : i64, tpu.core_type = #tpu.core_type<tc>, window_params = [{transform_indices = @transform_0, window_bounds = array<i64: 8, 16, 128>}, {pipeline_mode = #tpu.pipeline_mode<synchronous>, transform_indices = @transform_1, window_bounds = array<i64: 3, 128, 64>}, {pipeline_mode = #tpu.pipeline_mode<synchronous>, transform_indices = @transform_2, window_bounds = array<i64: 1, 64>}, {transform_indices = @transform_3, window_bounds = array<i64: 8, 16, 64>}]} {
    %c0 = arith.constant 0 : index
    %c0_0 = arith.constant 0 : index
    %c0_1 = arith.constant 0 : index
    %0 = vector.load %arg1[%c0, %c0_0, %c0_1] : memref<8x16x128xf32, #tpu.memory_space<vmem>>, vector<8x16x128xf32>
    %1 = arith.truncf %0 : vector<8x16x128xf32> to vector<8x16x128xbf16>
    %cst = arith.constant 0.000000e+00 : bf16
    %2 = vector.broadcast %cst : bf16 to vector<8x1x128xbf16>
    %3 = tpu.concatenate %2, %1, %2 in 1 : vector<8x1x128xbf16>, vector<8x16x128xbf16>, vector<8x1x128xbf16> -> vector<8x18x128xbf16>
    %cst_2 = arith.constant 0.000000e+00 : f32
    %4 = vector.broadcast %cst_2 : f32 to vector<128x64xf32>
    %5 = vector.extract_strided_slice %3 {offsets = [0, 0, 0], sizes = [8, 16, 128], strides = [1, 1, 1]} : vector<8x18x128xbf16> to vector<8x16x128xbf16>
    %6 = vector.shape_cast %5 : vector<8x16x128xbf16> to vector<128x128xbf16>
    %c0_3 = arith.constant 0 : index
    %c0_4 = arith.constant 0 : index
    %c0_5 = arith.constant 0 : index
    %7 = vector.load %arg2[%c0_3, %c0_4, %c0_5] : memref<3x128x64xbf16, #tpu.memory_space<vmem>>, vector<1x128x64xbf16>
    %8 = vector.shape_cast %7 : vector<1x128x64xbf16> to vector<128x64xbf16>
    %cst_6 = arith.constant dense<0.000000e+00> : vector<128x64xf32>
    %9 = tpu.matmul %6, %8, %cst_6 {dimension_numbers = #tpu.dot_dimension_numbers<[1], [0], [0], [1], [0, 0, 1, 1], [], []>} : vector<128x128xbf16>, vector<128x64xbf16>, vector<128x64xf32> -> vector<128x64xf32>
    %10 = arith.addf %4, %9 : vector<128x64xf32>
    %11 = vector.extract_strided_slice %3 {offsets = [0, 1, 0], sizes = [8, 16, 128], strides = [1, 1, 1]} : vector<8x18x128xbf16> to vector<8x16x128xbf16>
    %12 = vector.shape_cast %11 : vector<8x16x128xbf16> to vector<128x128xbf16>
    %c1 = arith.constant 1 : index
    %c0_7 = arith.constant 0 : index
    %c0_8 = arith.constant 0 : index
    %13 = vector.load %arg2[%c1, %c0_7, %c0_8] : memref<3x128x64xbf16, #tpu.memory_space<vmem>>, vector<1x128x64xbf16>
    %14 = vector.shape_cast %13 : vector<1x128x64xbf16> to vector<128x64xbf16>
    %cst_9 = arith.constant dense<0.000000e+00> : vector<128x64xf32>
    %15 = tpu.matmul %12, %14, %cst_9 {dimension_numbers = #tpu.dot_dimension_numbers<[1], [0], [0], [1], [0, 0, 1, 1], [], []>} : vector<128x128xbf16>, vector<128x64xbf16>, vector<128x64xf32> -> vector<128x64xf32>
    %16 = arith.addf %10, %15 : vector<128x64xf32>
    %17 = vector.extract_strided_slice %3 {offsets = [0, 2, 0], sizes = [8, 16, 128], strides = [1, 1, 1]} : vector<8x18x128xbf16> to vector<8x16x128xbf16>
    %18 = vector.shape_cast %17 : vector<8x16x128xbf16> to vector<128x128xbf16>
    %c2 = arith.constant 2 : index
    %c0_10 = arith.constant 0 : index
    %c0_11 = arith.constant 0 : index
    %19 = vector.load %arg2[%c2, %c0_10, %c0_11] : memref<3x128x64xbf16, #tpu.memory_space<vmem>>, vector<1x128x64xbf16>
    %20 = vector.shape_cast %19 : vector<1x128x64xbf16> to vector<128x64xbf16>
    %cst_12 = arith.constant dense<0.000000e+00> : vector<128x64xf32>
    %21 = tpu.matmul %18, %20, %cst_12 {dimension_numbers = #tpu.dot_dimension_numbers<[1], [0], [0], [1], [0, 0, 1, 1], [], []>} : vector<128x128xbf16>, vector<128x64xbf16>, vector<128x64xf32> -> vector<128x64xf32>
    %22 = arith.addf %16, %21 : vector<128x64xf32>
    %c0_13 = arith.constant 0 : index
    %c0_14 = arith.constant 0 : index
    %23 = vector.load %arg3[%c0_13, %c0_14] : memref<1x64xf32, #tpu.memory_space<vmem>>, vector<1x64xf32>
    %24 = vector.shape_cast %23 : vector<1x64xf32> to vector<64xf32>
    %25 = vector.shape_cast %24 : vector<64xf32> to vector<1x64xf32>
    %26 = vector.broadcast %25 : vector<1x64xf32> to vector<128x64xf32>
    %27 = arith.addf %22, %26 : vector<128x64xf32>
    %28 = vector.shape_cast %27 : vector<128x64xf32> to vector<8x16x64xf32>
    %c0_15 = arith.constant 0 : index
    %c0_16 = arith.constant 0 : index
    %c0_17 = arith.constant 0 : index
    %29 = vector.load %arg4[%c0_15, %c0_16, %c0_17] : memref<8x16x64xf32, #tpu.memory_space<vmem>>, vector<8x16x64xf32>
    tpu.vector_store %arg4[%c0_15, %c0_16, %c0_17], %28 {strides = array<i32>} : memref<8x16x64xf32, #tpu.memory_space<vmem>>, vector<8x16x64xf32>,
    return
  }
  func.func @transform_0(%arg0: i32) -> (i32, i32, i32) {
    %c0_i32 = arith.constant 0 : i32
    %c0_i32_0 = arith.constant 0 : i32
    %c0_i32_1 = arith.constant 0 : i32
    return %arg0, %c0_i32, %c0_i32_0 : i32, i32, i32
  }
  func.func @transform_1(%arg0: i32) -> (i32, i32, i32) {
    %c0_i32 = arith.constant 0 : i32
    %c0_i32_0 = arith.constant 0 : i32
    %c0_i32_1 = arith.constant 0 : i32
    %c0_i32_2 = arith.constant 0 : i32
    return %c0_i32, %c0_i32_0, %c0_i32_1 : i32, i32, i32
  }
  func.func @transform_2(%arg0: i32) -> (i32, i32) {
    %c0_i32 = arith.constant 0 : i32
    %c0_i32_0 = arith.constant 0 : i32
    %c0_i32_1 = arith.constant 0 : i32
    return %c0_i32, %c0_i32_0 : i32, i32
  }
  func.func @transform_3(%arg0: i32) -> (i32, i32, i32) {
    %c0_i32 = arith.constant 0 : i32
    %c0_i32_0 = arith.constant 0 : i32
    %c0_i32_1 = arith.constant 0 : i32
    return %arg0, %c0_i32, %c0_i32_0 : i32, i32, i32
  }
}

</mosaic_0001>

<bundles_post_ra>
// kernel: temporal_adapter_forward.6
= control target key start
LH: loop header
LB: loop body
LE: loop exit
PB: predicated region body
PF: predicated region fallthrough
CT: control target
= control target key end

     0   :  { %s397_s12 = smov 0   ;;  %s475_s0 = inlined_call_operand.vmem [shape: f32[2,8,1024], index: 0, kind: input, shape index: {}]   ;;  %s476_s1 = inlined_call_operand.vmem [shape: f32[8,1], index: 1, kind: input, shape index: {}]   ;;  %s477_s2 = inlined_call_operand.vmem [shape: f32[8,1], index: 2, kind: input, shape index: {}]   ;;  %s478_s3 = inlined_call_operand.vmem [shape: f32[2,8,1024], index: 3, kind: output, shape index: {}]  }
   0x1 LB: > { %s336_s13 = sadd.s32 4294967295, %s374_s12   ;;  %p340_p0 = scmp.ge.s32.totalorder %s374_s12, 1  ;;  %s374_s12 = sphi %s397_s12, %s13_s12  }
   0x2   : > { %p137_p1 = scmp.lt.s32.totalorder %s374_s12, 3 }
   0x4   : > { %p138_p2 = pnand %p340_p0, %p137_p1 }
   0x5   : > { %p161_p3 = scmp.lt.s32.totalorder (!%p138_p2), %s336_s13, 1  ;;  %v376_v30 = vmov (!%p138_p2), 0   ;;  %v245_v31 = vld [vmem:[%s476_s1] sm:$0xff] (!%p138_p2) }
   0x6   : > { %141 = sbr.rel (%p138_p2) target bundleno = 318 (0x13e), region = 32  ;;  %364 = vset.pattern.permute.xlu1 (!%p138_p2), %v376_v30  ;;  %365 = vset.pattern.permute.xlu0 (!%p138_p2), %v376_v30  ;;  %v259_v32 = vld [vmem:[%s477_s2] sm:$0xff] (!%p138_p2) }
   0x7   : > { %248 = vperm.xlu1 (!%p138_p2), %364, %v245_v31  }
   0xb   : > { %262 = vperm.xlu1 (!%p138_p2), %364, %v259_v32  }
   0xd   : > { %s480_s13 = smov (!%p161_p3, %s336_s13), 1 }
   0xe   : > { %s347_s14 = sshll.u32 %s480_s13, 6 }
   0xf   : > { %s165_s17 = scalar_lea.vmem %s475_s0, %s347_s14  ;;  %s170_s5 = scalar_lea.vmem %s478_s3, %s347_s14 }
  0x10   : > { %v413_v0 = vld [vmem:[%s165_s17] sm:$0xff]  ;;  %v415_v1 = vld [vmem:[%s165_s17 + $0x8] sm:$0xff]  ;;  %v417_v2 = vld [vmem:[%s165_s17 + $0x10] sm:$0xff] }
  0x11   : > { %v179_v3 = vadd.f32 %v415_v1, %v413_v0  ;;  %v195_v4 = vmul.f32 %v413_v0, %v413_v0  ;;  %v196_v5 = vmul.f32 %v415_v1, %v415_v1  ;;  %v197_v6 = vmul.f32 %v417_v2, %v417_v2  ;;  %v427_v7 = vld [vmem:[%s165_s17 + $0x18] sm:$0xff]  ;;  %v432_v11 = vld [vmem:[%s165_s17 + $0x20] sm:$0xff]  ;;  %v437_v15 = vld [vmem:[%s165_s17 + $0x28] sm:$0xff] }
  0x12   : > { %v198_v9 = vmul.f32 %v427_v7, %v427_v7  ;;  %v199_v13 = vmul.f32 %v432_v11, %v432_v11  ;;  %v200_v17 = vmul.f32 %v437_v15, %v437_v15  ;;  %v442_v19 = vld [vmem:[%s165_s17 + $0x30] sm:$0xff]  ;;  %v447_v23 = vld [vmem:[%s165_s17 + $0x38] sm:$0xff] }
  0x13   : > { %v180_v8 = vadd.f32 %v179_v3, %v417_v2  ;;  %v203_v10 = vadd.f32 %v196_v5, %v195_v4  ;;  %v201_v21 = vmul.f32 %v442_v19, %v442_v19  ;;  %v202_v25 = vmul.f32 %v447_v23, %v447_v23 }
  0x15   : > { %v181_v12 = vadd.f32 %v180_v8, %v427_v7  ;;  %v204_v14 = vadd.f32 %v203_v10, %v197_v6 }
  0x17   : > { %v182_v16 = vadd.f32 %v181_v12, %v432_v11  ;;  %v205_v18 = vadd.f32 %v204_v14, %v198_v9 }
  0x19   : > { %v183_v20 = vadd.f32 %v182_v16, %v437_v15  ;;  %v206_v22 = vadd.f32 %v205_v18, %v199_v13 }
  0x1b   : > { %v184_v24 = vadd.f32 %v183_v20, %v442_v19  ;;  %v207_v26 = vadd.f32 %v206_v22, %v200_v17 }
  0x1d   : > { %v185_v27 = vadd.f32 %v184_v24, %v447_v23  ;;  %v208_v28 = vadd.f32 %v207_v26, %v201_v21 }
  0x1f   : > { %186 = vadd.xlane.f32.xlu0 %v185_v27  ;;  %v209_v29 = vadd.f32 %v208_v28, %v202_v25 }
  0x23   : > { %210 = vadd.xlane.f32.xlu0 %v209_v29 }
  0x86   : > { %v249_v50 = vpop.permute.xlu1 %248 }
  0x8a   : > { %v263_v8 = vpop.permute.xlu1 %262 }
  0xac   : > { %v187_v33 = vpop.xlane.xlu0 %186 }
  0xad   : > { %v188_v34 = vrot.slane %v187_v33, 4 }
  0xaf   : > { %v189_v35 = vadd.f32 %v188_v34, %v187_v33 }
  0xb0   : > { %v211_v36 = vpop.xlane.xlu0 %210 }
  0xb1   : > { %v190_v37 = vrot.slane %v189_v35, 2  ;;  %v212_v38 = vrot.slane %v211_v36, 4 }
  0xb3   : > { %v213_v39 = vadd.f32 %v212_v38, %v211_v36  ;;  %v191_v40 = vadd.f32 %v190_v37, %v189_v35 }
  0xb5   : > { %v214_v41 = vrot.slane %v213_v39, 2  ;;  %v192_v42 = vrot.slane %v191_v40, 1 }
  0xb7   : > { %v215_v43 = vadd.f32 %v214_v41, %v213_v39  ;;  %v193_v44 = vadd.f32 %v192_v42, %v191_v40 }
  0xb9   : > { %349 = vpush %v193_v44  ;;  %v216_v45 = vrot.slane %v215_v43, 1 }
  0xbb   : > { %v217_v46 = vadd.f32 %v216_v45, %v215_v43 }
  0xbd   : > { %351 = vpush %v217_v46 }
  0xea   : > { %s350_s22 = spop %349 }
  0xeb   : > { %s219_s23 = smul.f32 0.00012207031, %s350_s22 }
  0xed   : > { %s221_s24 = smul.f32 %s219_s23, %s219_s23  ;;  %v223_v49 = vstv %s219_s23 }
  0xee   : > { %s352_s25 = spop %351  ;;  %v224_v51 = vsub.f32 %v413_v0, %v223_v49  ;;  %v225_v52 = vsub.f32 %v415_v1, %v223_v49  ;;  %v226_v53 = vsub.f32 %v417_v2, %v223_v49  ;;  %v227_v54 = vsub.f32 %v427_v7, %v223_v49 }
  0xef   : > { %s220_s26 = smul.f32 0.00012207031, %s352_s25  ;;  %v228_v55 = vsub.f32 %v432_v11, %v223_v49  ;;  %v229_v56 = vsub.f32 %v437_v15, %v223_v49  ;;  %v230_v57 = vsub.f32 %v442_v19, %v223_v49  ;;  %v231_v58 = vsub.f32 %v447_v23, %v223_v49 }
  0xf1   : > { %s222_s27 = ssub.f32 %s220_s26, %s221_s24 }
  0xf3   : > { %s232_s28 = sadd.f32 1e-05, %s222_s27 }
  0xf5   : > { %v233_v47 = vstv %s232_s28 }
  0xf6   : > { %366 = vrsqrt.f32 %v233_v47 }
 0x100   : > { %v367_v48 = vpop.eup %366 }
 0x101   : > { %353 = vpush %v367_v48 }
 0x132   : > { %s354_s29 = spop %353 }
 0x133   : > { %v236_v59 = vstv %s354_s29 }
 0x134   : > { %v237_v60 = vmul.f32 %v236_v59, %v224_v51  ;;  %v238_v61 = vmul.f32 %v236_v59, %v225_v52  ;;  %v239_v62 = vmul.f32 %v236_v59, %v226_v53  ;;  %v240_v63 = vmul.f32 %v236_v59, %v227_v54 }
 0x135   : > { %v241_v0 = vmul.f32 %v236_v59, %v228_v55  ;;  %v242_v1 = vmul.f32 %v236_v59, %v229_v56  ;;  %v243_v2 = vmul.f32 %v236_v59, %v230_v57  ;;  %v244_v3 = vmul.f32 %v236_v59, %v231_v58 }
 0x136   : > { %v251_v4 = vmul.f32 %v249_v50, %v237_v60  ;;  %v252_v5 = vmul.f32 %v249_v50, %v238_v61  ;;  %v253_v6 = vmul.f32 %v249_v50, %v239_v62  ;;  %v254_v7 = vmul.f32 %v249_v50, %v240_v63 }
 0x137   : > { %v255_v9 = vmul.f32 %v249_v50, %v241_v0  ;;  %v256_v10 = vmul.f32 %v249_v50, %v242_v1  ;;  %v257_v11 = vmul.f32 %v249_v50, %v243_v2  ;;  %v258_v12 = vmul.f32 %v249_v50, %v244_v3 }
 0x138   : > { %v265_v13 = vadd.f32 %v263_v8, %v251_v4  ;;  %v266_v14 = vadd.f32 %v263_v8, %v252_v5  ;;  %v267_v15 = vadd.f32 %v263_v8, %v253_v6  ;;  %v268_v16 = vadd.f32 %v263_v8, %v254_v7 }
 0x139   : > { %v269_v17 = vadd.f32 %v263_v8, %v255_v9  ;;  %v270_v18 = vadd.f32 %v263_v8, %v256_v10  ;;  %v271_v19 = vadd.f32 %v263_v8, %v257_v11  ;;  %v272_v20 = vadd.f32 %v263_v8, %v258_v12 }
 0x13a   : > { %273 = vst [vmem:[%s170_s5] sm:$0xff] %v265_v13  ;;  %274 = vst [vmem:[%s170_s5 + $0x8] sm:$0xff] %v266_v14 }
 0x13b   : > { %275 = vst [vmem:[%s170_s5 + $0x10] sm:$0xff] %v267_v15  ;;  %276 = vst [vmem:[%s170_s5 + $0x18] sm:$0xff] %v268_v16 }
 0x13c   : > { %277 = vst [vmem:[%s170_s5 + $0x20] sm:$0xff] %v269_v17  ;;  %278 = vst [vmem:[%s170_s5 + $0x28] sm:$0xff] %v270_v18 }
 0x13d   : > { %279 = vst [vmem:[%s170_s5 + $0x30] sm:$0xff] %v271_v19  ;;  %280 = vst [vmem:[%s170_s5 + $0x38] sm:$0xff] %v272_v20 }
 0x13e PF: > { %s13_s12 = sadd.s32 1, %s374_s12  }
 0x13f   : > { %p10_p4 = scmp.ge.s32.totalorder %s13_s12, 4  }
 0x141   :  { %12 = sbr.rel (!%p10_p4) target bundleno = 1 (0x1), region = 62 }

// kernel: tile.18
= control target key start
LH: loop header
LB: loop body
LE: loop exit
PB: predicated region body
PF: predicated region fallthrough
CT: control target
= control target key end

     0   :  { %s28_s0 = inlined_call_operand.vmem [shape: f32[8], index: 0, kind: input, shape index: {}]   ;;  %s29_s1 = inlined_call_operand.vmem [shape: f32[16,8], index: 1, kind: output, shape index: {}]  }
   0x1   :  { %v4_v0 = vld [vmem:[%s28_s0] ss:$0 sm:$0xff] }
   0x2   :  { %5 = vst [vmem:[%s29_s1] sm:$0xff] %v4_v0  ;;  %8 = vst [vmem:[%s29_s1 + $0x8] sm:$0xff] %v4_v0 }

// kernel: tile.19
= control target key start
LH: loop header
LB: loop body
LE: loop exit
PB: predicated region body
PF: predicated region fallthrough
CT: control target
= control target key end

     0   :  { %s131_s10 = smov 120   ;;  %s132_s11 = smov 104   ;;  %vm3_vm0 = vcmask 64512   ;;  %vm9_vm1 = vcmask 1048512   ;;  %vm15_vm2 = vcmask 982912   ;;  %vm21_vm3 = vcmask 917312   ;;  %s207_s0 = inlined_call_operand.vmem [shape: f32[16,8], index: 0, kind: input, shape index: {}]   ;;  %s208_s1 = inlined_call_operand.vmem [shape: f32[1,128], index: 1, kind: output, shape index: {}]  }
   0x1   :  { %v101_v0 = vld [vmem:[%s207_s0 + $0xf] sm:$0x1]   ;;  %v103_v1 = vld [vmem:[%s207_s0 + $0xd] sm:$0x1]   ;;  %v102_v2 = vld [vmem:[%s207_s0 + $0xe] sm:$0x1]  }
   0x2   :  { %7 = vrot.lane.b32.xlu0 %v101_v0, %s131_s10  ;;  %19 = vrot.lane.b32.xlu1 %v103_v1, %s132_s11  ;;  %v104_v3 = vld [vmem:[%s207_s0 + $0xc] sm:$0x1]   ;;  %s133_s16 = smov 112   ;;  %s134_s17 = smov 96   ;;  %v105_v4 = vld [vmem:[%s207_s0 + $0xb] sm:$0x1]  }
   0x3   :  { %v106_v5 = vld [vmem:[%s207_s0 + $0xa] sm:$0x1]   ;;  %v2_v6 = vld [vmem:[%s207_s0] sm:$0x1]   ;;  %s135_s24 = smov 88   ;;  %s136_s25 = smov 80  }
   0x4   :  { %4 = vst.msk [vmem:[#allocation0] sm:$0x1] %vm3_vm0, %v2_v6   ;;  %v107_v7 = vld [vmem:[%s207_s0 + $0x9] sm:$0x1]   ;;  %v108_v8 = vld [vmem:[%s207_s0 + $0x8] sm:$0x1]  }
   0x5   :  { %s137_s30 = smov 72   ;;  %s138_s2 = smov 64   ;;  %v109_v9 = vld [vmem:[%s207_s0 + $0x7] sm:$0x1]   ;;  %v110_v10 = vld [vmem:[%s207_s0 + $0x6] sm:$0x1]  }
   0x6   :  { %13 = vrot.lane.b32.xlu0 %v102_v2, %s133_s16  ;;  %25 = vrot.lane.b32.xlu1 %v104_v3, %s134_s17  ;;  %s139_s7 = smov 56   ;;  %s140_s8 = smov 48   ;;  %v111_v11 = vld [vmem:[%s207_s0 + $0x5] sm:$0x1]   ;;  %v112_v12 = vld [vmem:[%s207_s0 + $0x4] sm:$0x1]  }
   0x7   :  { %s141_s13 = smov 40   ;;  %s142_s14 = smov 32   ;;  %v113_v13 = vld [vmem:[%s207_s0 + $0x3] sm:$0x1]   ;;  %v114_v14 = vld [vmem:[%s207_s0 + $0x2] sm:$0x1]  }
   0x8   :  { %s143_s19 = smov 24   ;;  %s144_s20 = smov 16   ;;  %v115_v15 = vld [vmem:[%s207_s0 + $0x1] sm:$0x1]   ;;  %vm27_vm4 = vcmask 851712   ;;  %vm33_vm5 = vcmask 786112  }
   0x9   :  { %s145_s0 = smov 8   ;;  %vm39_vm6 = vcmask 720512   ;;  %vm45_vm7 = vcmask 654912   ;;  %vm51_vm8 = vcmask 589312   ;;  %vm57_vm9 = vcmask 523712  }
   0xa   :  { %31 = vrot.lane.b32.xlu0 %v105_v4, %s135_s24  ;;  %37 = vrot.lane.b32.xlu1 %v106_v5, %s136_s25  ;;  %vm63_vm10 = vcmask 458112   ;;  %vm69_vm11 = vcmask 392512   ;;  %vm75_vm12 = vcmask 326912   ;;  %vm81_vm13 = vcmask 261312  }
   0xb   :  { %vm87_vm14 = vcmask 195712   ;;  %vm93_vm15 = vcmask 130112  }
   0xe   :  { %43 = vrot.lane.b32.xlu0 %v107_v7, %s137_s30  ;;  %49 = vrot.lane.b32.xlu1 %v108_v8, %s138_s2 }
  0x12   :  { %55 = vrot.lane.b32.xlu0 %v109_v9, %s139_s7  ;;  %61 = vrot.lane.b32.xlu1 %v110_v10, %s140_s8 }
  0x16   :  { %67 = vrot.lane.b32.xlu0 %v111_v11, %s141_s13  ;;  %73 = vrot.lane.b32.xlu1 %v112_v12, %s142_s14 }
  0x1a   :  { %79 = vrot.lane.b32.xlu0 %v113_v13, %s143_s19  ;;  %85 = vrot.lane.b32.xlu1 %v114_v14, %s144_s20 }
  0x1e   :  { %91 = vrot.lane.b32.xlu0 %v115_v15, %s145_s0 }
  0x74   :  { %v8_v16 = vpop.permute.xlu0 %7   ;;  %v20_v17 = vpop.permute.xlu1 %19  }
  0x75   :  { %10 = vst.msk [vmem:[#allocation0] sm:$0x1] %vm9_vm1, %v8_v16  }
  0x78   :  { %v14_v18 = vpop.permute.xlu0 %13   ;;  %v26_v19 = vpop.permute.xlu1 %25  }
  0x79   :  { %16 = vst.msk [vmem:[#allocation0] sm:$0x1] %vm15_vm2, %v14_v18  }
  0x7a   :  { %22 = vst.msk [vmem:[#allocation0] sm:$0x1] %vm21_vm3, %v20_v17  }
  0x7b   :  { %28 = vst.msk [vmem:[#allocation0] sm:$0x1] %vm27_vm4, %v26_v19  }
  0x7c   :  { %v32_v20 = vpop.permute.xlu0 %31   ;;  %v38_v21 = vpop.permute.xlu1 %37  }
  0x7d   :  { %34 = vst.msk [vmem:[#allocation0] sm:$0x1] %vm33_vm5, %v32_v20  }
  0x7e   :  { %40 = vst.msk [vmem:[#allocation0] sm:$0x1] %vm39_vm6, %v38_v21  }
  0x80   :  { %v44_v22 = vpop.permute.xlu0 %43   ;;  %v50_v23 = vpop.permute.xlu1 %49  }
  0x81   :  { %46 = vst.msk [vmem:[#allocation0] sm:$0x1] %vm45_vm7, %v44_v22  }
  0x82   :  { %52 = vst.msk [vmem:[#allocation0] sm:$0x1] %vm51_vm8, %v50_v23  }
  0x84   :  { %v56_v24 = vpop.permute.xlu0 %55   ;;  %v62_v25 = vpop.permute.xlu1 %61  }
  0x85   :  { %58 = vst.msk [vmem:[#allocation0] sm:$0x1] %vm57_vm9, %v56_v24  }
  0x86   :  { %64 = vst.msk [vmem:[#allocation0] sm:$0x1] %vm63_vm10, %v62_v25  }
  0x88   :  { %v68_v26 = vpop.permute.xlu0 %67   ;;  %v74_v27 = vpop.permute.xlu1 %73  }
  0x89   :  { %70 = vst.msk [vmem:[#allocation0] sm:$0x1] %vm69_vm11, %v68_v26  }
  0x8a   :  { %76 = vst.msk [vmem:[#allocation0] sm:$0x1] %vm75_vm12, %v74_v27  }
  0x8c   :  { %v80_v28 = vpop.permute.xlu0 %79   ;;  %v86_v29 = vpop.permute.xlu1 %85  }
  0x8d   :  { %82 = vst.msk [vmem:[#allocation0] sm:$0x1] %vm81_vm13, %v80_v28  }
  0x8e   :  { %88 = vst.msk [vmem:[#allocation0] sm:$0x1] %vm87_vm14, %v86_v29  }
  0x90   :  { %v92_v30 = vpop.permute.xlu0 %91  }
  0x91   :  { %94 = vst.msk [vmem:[#allocation0] sm:$0x1] %vm93_vm15, %v92_v30  }
  0x98   :  { %v98_v31 = vld [vmem:[#allocation0] sm:$0x1] }
  0x99   :  { %100 = vst [vmem:[%s208_s1] sm:$0x1] %v98_v31 }

// kernel: temporal_adapter_forward.7
= control target key start
LH: loop header
LB: loop body
LE: loop exit
PB: predicated region body
PF: predicated region fallthrough
CT: control target
= control target key end

     0   :  { %s1280_s12 = smov 0   ;;  %s1538_s0 = inlined_call_operand.vmem [shape: f32[16,16,64], index: 0, kind: input, shape index: {}]   ;;  %s1539_s1 = inlined_call_operand.vmem [shape: bf16[3,64,128], index: 1, kind: input, shape index: {}]   ;;  %s1540_s2 = inlined_call_operand.vmem [shape: f32[1,128], index: 2, kind: input, shape index: {}]   ;;  %s1541_s3 = inlined_call_operand.vmem [shape: f32[16,16,128], index: 3, kind: output, shape index: {}]  }
   0x1 LB: > { %s1016_s13 = sadd.s32 4294967295, %s1258_s12   ;;  %p1020_p0 = scmp.ge.s32.totalorder %s1258_s12, 1  ;;  %s1258_s12 = sphi %s1280_s12, %s13_s12  }
   0x2   : > { %p139_p1 = scmp.lt.s32.totalorder %s1258_s12, 3 }
   0x4   : > { %p140_p2 = pnand %p1020_p0, %p139_p1 }
   0x5   : > { %v1291_v0 = vld [vmem:[%s1539_s1] sm:$0xff] (!%p140_p2)   ;;  %s1021_s16 = sshll.u32 (!%p140_p2), %s1016_s13, 3  ;;  %v1296_v1 = vld [vmem:[%s1539_s1 + $0x8] sm:$0xff] (!%p140_p2)   ;;  %v1306_v3 = vld [vmem:[%s1539_s1 + $0x10] sm:$0xff] (!%p140_p2)   ;;  %vm276_vm0 = vcmask (!%p140_p2), 1040384   ;;  %vm433_vm2 = vcmask (!%p140_p2), 523264  }
   0x6   : > { %143 = sbr.rel (%p140_p2) target bundleno = 296 (0x128), region = 32  ;;  %p166_p3 = scmp.lt.s32.totalorder (!%p140_p2), %s1021_s16, 15  ;;  %1144 = vmatprep.subr.bf16.mxu0 (!%p140_p2), %v1291_v0  ;;  %v1242_v2 = vld [vmem:[%s1539_s1 + $0x20] sm:$0xff] (!%p140_p2)   ;;  %v1244_v4 = vld [vmem:[%s1539_s1 + $0x28] sm:$0xff] (!%p140_p2)   ;;  %v1246_v5 = vld [vmem:[%s1539_s1 + $0x30] sm:$0xff] (!%p140_p2)   ;;  %vm708_vm5 = vcmask (!%p140_p2), 1046528  }
   0x7   : > { %1145 = vmatpush3.bf16.msra.mxu0 (!%p140_p2), %v1291_v0  ;;  %1120 = vmatprep.subr.bf16.mxu1 (!%p140_p2), %v1242_v2  ;;  %v1333_v9 = vld [vmem:[%s1539_s1 + $0x18] sm:$0xff] (!%p140_p2)   ;;  %vm277_vm1 = vsmask.f32 (!%p140_p2), 256  ;;  %v1247_v15 = vld [vmem:[%s1539_s1 + $0x40] sm:$0xff] (!%p140_p2)   ;;  %vm303_vm4 = vsmask.f32 (!%p140_p2), 7424 }
   0x8   : > { %1146 = vmatprep.subr.bf16.mxu0 (!%p140_p2), %v1296_v1  ;;  %1121 = vmatpush3.bf16.msra.mxu1 (!%p140_p2), %v1242_v2  ;;  %v1248_v16 = vld [vmem:[%s1539_s1 + $0x38] sm:$0xff] (!%p140_p2)   ;;  %vm1344_vm3 = vmand (!%p140_p2), %vm276_vm0, %vm277_vm1  ;;  %v1249_v34 = vld [vmem:[%s1539_s1 + $0x48] sm:$0xff] (!%p140_p2)  }
   0x9   : > { %1122 = vmatprep.subr.bf16.mxu1 (!%p140_p2), %v1244_v4  ;;  %v1250_v60 = vld [vmem:[%s1539_s1 + $0x50] sm:$0xff] (!%p140_p2)  }
   0xb   : > { %1147 = vmatpush3.bf16.msra.mxu0 (!%p140_p2), %v1296_v1 }
   0xc   : > { %1148 = vmatprep.subr.bf16.mxu0 (!%p140_p2), %v1306_v3  ;;  %1123 = vmatpush3.bf16.msra.mxu1 (!%p140_p2), %v1244_v4 }
   0xd   : > { %s1545_s16 = smov (!%p166_p3, %s1021_s16), 15  ;;  %1124 = vmatprep.subr.bf16.mxu1 %v1246_v5 }
   0xe   : > { %s1082_s25 = sshll.u32 %s1545_s16, 4 }
   0xf   : > { %s1323_s30 = scalar_lea.vmem %s1538_s0, %s1082_s25  ;;  %1149 = vmatpush3.bf16.msra.mxu0 %v1306_v3  ;;  %s1502_s22 = scalar_lea.vmem %s1541_s3, %s1082_s25 }
  0x10   : > { %v180_v6 = vld [vmem:[%s1323_s30] sm:$0xff]  ;;  %v181_v7 = vld [vmem:[%s1323_s30 + $0x8] sm:$0xff]  ;;  %v182_v8 = vld [vmem:[%s1323_s30 + $0x10] sm:$0xff]  ;;  %1150 = vmatprep.subr.bf16.mxu0 %v1333_v9  ;;  %1125 = vmatpush3.bf16.msra.mxu1 %v1246_v5 }
  0x11   : > { %v196_v10 = vpack.c.bf16 %v181_v7, %v180_v6  ;;  %v183_v11 = vld [vmem:[%s1323_s30 + $0x18] sm:$0xff]  ;;  %v184_v21 = vld [vmem:[%s1323_s30 + $0x20] sm:$0xff]  ;;  %v185_v22 = vld [vmem:[%s1323_s30 + $0x28] sm:$0xff]  ;;  %1126 = vmatprep.subr.bf16.mxu1 %v1248_v16 }
  0x12   : > { %v197_v12 = vpack.c.bf16 %v183_v11, %v182_v8  ;;  %v186_v23 = vld [vmem:[%s1323_s30 + $0x30] sm:$0xff]  ;;  %v198_v25 = vpack.c.bf16 %v185_v22, %v184_v21  ;;  %v187_v26 = vld [vmem:[%s1323_s30 + $0x38] sm:$0xff]  ;;  %v188_v50 = vld [vmem:[%s1323_s30 + $0x40] sm:$0xff] }
  0x13   : > { %v205_v13 = vshrl.u32 %v196_v10, 16  ;;  %v208_v14 = vshll.u32 %v196_v10, 16  ;;  %1151 = vmatpush3.bf16.msra.mxu0 %v1333_v9  ;;  %v199_v32 = vpack.c.bf16 %v187_v26, %v186_v23  ;;  %v189_v51 = vld [vmem:[%s1323_s30 + $0x48] sm:$0xff]  ;;  %v190_v56 = vld [vmem:[%s1323_s30 + $0x50] sm:$0xff]  ;;  %v191_v57 = vld [vmem:[%s1323_s30 + $0x58] sm:$0xff] }
  0x14   : > { %v212_v18 = vshrl.u32 %v197_v12, 16  ;;  %v215_v19 = vshll.u32 %v197_v12, 16  ;;  %1168 = vmatprep.subr.bf16.mxu0 %v1247_v15  ;;  %v219_v37 = vshrl.u32 %v198_v25, 16  ;;  %1127 = vmatpush3.bf16.msra.mxu1 %v1248_v16  ;;  %v222_v49 = vshll.u32 %v198_v25, 16 }
  0x15   : > { %v207_v20 = vrot.slane %v205_v13, 7  ;;  %1192 = vmatprep.subr.bf16.mxu1 %v1291_v0  ;;  %v226_v54 = vshrl.u32 %v199_v32, 16  ;;  %v229_v55 = vshll.u32 %v199_v32, 16  ;;  %v200_v5 = vpack.c.bf16 %v189_v51, %v188_v50  ;;  %v193_v32 = vld [vmem:[%s1323_s30 + $0x68] sm:$0xff] }
  0x16   : > { %v214_v24 = vrot.slane %v212_v18, 7  ;;  %v221_v48 = vrot.slane %v219_v37, 7  ;;  %v201_v8 = vpack.c.bf16 %v191_v57, %v190_v56 }
  0x17   : > { %v210_v27 = vor.u32 %v208_v14, %v207_v20  ;;  %v287_v28 = vsel %vm1344_vm3, %v207_v20, 0  ;;  %v228_v2 = vrot.slane %v226_v54, 7  ;;  %v233_v20 = vshrl.u32 %v200_v5, 16 }
  0x18   : > { %v217_v29 = vor.u32 %v215_v19, %v214_v24  ;;  %v312_v30 = vshll.u32 %v287_v28, 16  ;;  %v1358_v31 = vsel %vm1344_vm3, %v214_v24, 0  ;;  %v710_v35 = vrot.slane %v287_v28, 1 }
  0x19   : > { %v279_v33 = vsel %vm1344_vm3, 0, %v210_v27  ;;  %v324_v36 = vshll.u32 %v1358_v31, 16  ;;  %v713_v45 = vrot.slane %v1358_v31, 1  ;;  %v224_v59 = vor.u32 %v222_v49, %v221_v48  ;;  %v192_v31 = vld [vmem:[%s1323_s30 + $0x60] sm:$0xff]  ;;  %v195_v49 = vld [vmem:[%s1323_s30 + $0x78] sm:$0xff] }
  0x1a   : > { %1152 = vmatprep.mubr.msk.bf16.mxu0 %vm433_vm2, %v279_v33  ;;  %v709_v38 = vrot.slane %v279_v33, 1  ;;  %v1369_v39 = vsel %vm1344_vm3, 0, %v217_v29  ;;  %v305_v40 = vshrl.u32 %v279_v33, 16  ;;  %v307_v41 = vshll.u32 %v279_v33, 16 }
  0x1b   : > { %v317_v42 = vshrl.u32 %v1369_v39, 16  ;;  %v319_v43 = vshll.u32 %v1369_v39, 16  ;;  %1153 = vmatmul.mubr.msk.bf16.vlgmr.msra.gmra.mrb[0].mxu0 %vm433_vm2, %v1369_v39  ;;  %v712_v44 = vrot.slane %v1369_v39, 1  ;;  %v314_v47 = vrot.slane %v312_v30, 1 }
  0x1c   : > { %1169 = vmatpush3.bf16.msra.mxu0 %v1247_v15  ;;  %v309_v46 = vrot.slane %v307_v41, 1  ;;  %v326_v53 = vrot.slane %v324_v36, 1  ;;  %v289_v61 = vsel %vm1344_vm3, %v221_v48, 0  ;;  %v711_v62 = vsel %vm708_vm5, %v709_v38, %v710_v35  ;;  %v1251_v15 = vld [vmem:[%s1539_s1 + $0x58] sm:$0xff]   ;;  %v194_v48 = vld [vmem:[%s1323_s30 + $0x70] sm:$0xff] }
  0x1d   : > { %v321_v52 = vrot.slane %v319_v43, 1  ;;  %1170 = vmatprep.subr.bf16.mxu0 %v1249_v34  ;;  %v336_v4 = vshll.u32 %v289_v61, 16  ;;  %v281_v7 = vsel %vm1344_vm3, 0, %v224_v59  ;;  %v716_v10 = vrot.slane %v289_v61, 1 }
  0x1e   : > { %v310_v58 = vor.u32 %v309_v46, %v305_v40  ;;  %v329_v12 = vshrl.u32 %v281_v7, 16  ;;  %v331_v13 = vshll.u32 %v281_v7, 16  ;;  %1156 = vmatprep.mubr.msk.bf16.mxu0 %vm433_vm2, %v281_v7  ;;  %v715_v14 = vrot.slane %v281_v7, 1 }
  0x1f   : > { %v322_v63 = vor.u32 %v321_v52, %v317_v42  ;;  %v231_v16 = vor.u32 %v229_v55, %v228_v2  ;;  %v338_v18 = vrot.slane %v336_v4, 1  ;;  %v1400_v19 = vsel %vm1344_vm3, %v228_v2, 0 }
  0x20   : > { %v315_v6 = vsel %vm303_vm4, %v310_v58, %v314_v47  ;;  %1171 = vmatpush3.bf16.msra.mxu0 %v1249_v34  ;;  %v333_v21 = vrot.slane %v331_v13, 1  ;;  %v348_v22 = vshll.u32 %v1400_v19, 16  ;;  %v236_v23 = vshll.u32 %v200_v5, 16 }
  0x21   : > { %1128 = vmatprep.mubr.msk.bf16.mxu1 %vm433_vm2, %v315_v6  ;;  %v327_v11 = vsel %vm303_vm4, %v322_v63, %v326_v53  ;;  %1172 = vmatprep.subr.bf16.mxu0 %v1250_v60  ;;  %v240_v24 = vshrl.u32 %v201_v8, 16  ;;  %v1406_v25 = vsel %vm1344_vm3, 0, %v231_v16  ;;  %v235_v26 = vrot.slane %v233_v20, 7 }
  0x22   : > { %1129 = vmatmul.mubr.msk.bf16.vlgmr.msra.gmra.mrb[0].mxu1 %vm433_vm2, %v327_v11  ;;  %v243_v27 = vshll.u32 %v201_v8, 16  ;;  %v341_v28 = vshrl.u32 %v1406_v25, 16  ;;  %v334_v29 = vor.u32 %v333_v21, %v329_v12  ;;  %v714_v30 = vsel %vm708_vm5, %v712_v44, %v713_v45 }
  0x23   : > { %1196 = vmatpush3.bf16.msra.mxu1 %v1291_v0  ;;  %v343_v0 = vshll.u32 %v1406_v25, 16  ;;  %1157 = vmatmul.mubr.msk.bf16.gmra.mrb[4].mxu0 %vm433_vm2, %v1406_v25  ;;  %v238_v33 = vor.u32 %v236_v23, %v235_v26  ;;  %v1419_v34 = vsel %vm1344_vm3, %v235_v26, 0  ;;  %v242_v35 = vrot.slane %v240_v24, 7 }
  0x24   : > { %1173 = vmatpush3.bf16.msra.mxu0 %v1250_v60  ;;  %1193 = vmatprep.subr.bf16.mxu1 %v1296_v1  ;;  %v717_v36 = vsel %vm708_vm5, %v715_v14, %v716_v10  ;;  %v339_v38 = vsel %vm303_vm4, %v334_v29, %v338_v18  ;;  %v350_v39 = vrot.slane %v348_v22, 1  ;;  %v360_v40 = vshll.u32 %v1419_v34, 16 }
  0x25   : > { %1174 = vmatprep.subr.bf16.mxu0 %v1251_v15  ;;  %1176 = vmatprep.mubr.msk.bf16.mxu0 %vm433_vm2, %v711_v62  ;;  %v345_v37 = vrot.slane %v343_v0, 1  ;;  %v1428_v41 = vsel %vm1344_vm3, 0, %v238_v33  ;;  %v245_v42 = vor.u32 %v243_v27, %v242_v35  ;;  %v1432_v43 = vsel %vm1344_vm3, %v242_v35, 0 }
  0x26   : > { %1132 = vmatprep.mubr.msk.bf16.mxu1 %vm433_vm2, %v339_v38  ;;  %v202_v44 = vpack.c.bf16 %v193_v32, %v192_v31  ;;  %v718_v45 = vrot.slane %v1406_v25, 1  ;;  %v355_v47 = vshll.u32 %v1428_v41, 16  ;;  %v362_v50 = vrot.slane %v360_v40, 1 }
  0x27   : > { %1197 = vmatpush3.bf16.msra.mxu1 %v1296_v1  ;;  %v346_v46 = vor.u32 %v345_v37, %v341_v28  ;;  %v353_v1 = vshrl.u32 %v1428_v41, 16  ;;  %v1442_v51 = vsel %vm1344_vm3, 0, %v245_v42  ;;  %v372_v52 = vshll.u32 %v1432_v43, 16 }
  0x28   : > { %1175 = vmatpush3.bf16.msra.mxu0 %v1251_v15  ;;  %1194 = vmatprep.subr.bf16.mxu1 %v1306_v3  ;;  %v247_v53 = vshrl.u32 %v202_v44, 16  ;;  %v357_v55 = vrot.slane %v355_v47, 1  ;;  %v365_v56 = vshrl.u32 %v1442_v51, 16  ;;  %v367_v57 = vshll.u32 %v1442_v51, 16  ;;  %v1494_v47 = vld [vmem:[%s1540_s2] ss:$0 sm:$0xff] }
  0x29   : > { %v351_v54 = vsel %vm303_vm4, %v346_v46, %v350_v39  ;;  %v719_v58 = vrot.slane %v1400_v19, 1  ;;  %v250_v60 = vshll.u32 %v202_v44, 16  ;;  %v203_v61 = vpack.c.bf16 %v195_v49, %v194_v48 }
  0x2a   : > { %1133 = vmatmul.mubr.msk.bf16.gmra.mrb[4].mxu1 %vm433_vm2, %v351_v54  ;;  %v249_v59 = vrot.slane %v247_v53, 7  ;;  %v358_v62 = vor.u32 %v357_v55, %v353_v1  ;;  %v369_v63 = vrot.slane %v367_v57, 1  ;;  %v374_v2 = vrot.slane %v372_v52, 1 }
  0x2b   : > { %1198 = vmatpush3.bf16.msra.mxu1 %v1306_v3  ;;  %1177 = vmatmul.mubr.msk.bf16.vlgmr.msra.gmra.mrb[0].mxu0 %vm433_vm2, %v714_v30  ;;  %v721_v4 = vrot.slane %v1428_v41, 1  ;;  %v254_v6 = vshrl.u32 %v203_v61, 16  ;;  %v257_v7 = vshll.u32 %v203_v61, 16  ;;  %v722_v12 = vrot.slane %v1419_v34, 1 }
  0x2c   : > { %1195 = vmatprep.subr.bf16.mxu1 %v1333_v9  ;;  %1180 = vmatprep.mubr.msk.bf16.mxu0 %vm433_vm2, %v717_v36  ;;  %v252_v5 = vor.u32 %v250_v60, %v249_v59  ;;  %v293_v3 = vsel %vm1344_vm3, %v249_v59, 0  ;;  %v363_v8 = vsel %vm303_vm4, %v358_v62, %v362_v50  ;;  %v370_v10 = vor.u32 %v369_v63, %v365_v56 }
  0x2d   : > { %v384_v11 = vshll.u32 %v293_v3, 16  ;;  %1136 = vmatprep.mubr.msk.bf16.mxu1 %vm433_vm2, %v363_v8  ;;  %v256_v14 = vrot.slane %v254_v6, 7  ;;  %v720_v19 = vsel %vm708_vm5, %v718_v45, %v719_v58  ;;  %v723_v24 = vsel %vm708_vm5, %v721_v4, %v722_v12 }
  0x2e   : > { %v285_v13 = vsel %vm1344_vm3, 0, %v252_v5  ;;  %v375_v15 = vsel %vm303_vm4, %v370_v10, %v374_v2  ;;  %v724_v0 = vrot.slane %v1442_v51, 1  ;;  %v725_v29 = vrot.slane %v1432_v43, 1 }
  0x2f   : > { %1199 = vmatpush3.bf16.msra.mxu1 %v1333_v9  ;;  %v377_v16 = vshrl.u32 %v285_v13, 16  ;;  %v379_v18 = vshll.u32 %v285_v13, 16  ;;  %v259_v20 = vor.u32 %v257_v7, %v256_v14  ;;  %v294_v21 = vsel %vm1344_vm3, %v256_v14, 0 }
  0x30   : > { %v386_v9 = vrot.slane %v384_v11, 1  ;;  %v396_v23 = vshll.u32 %v294_v21, 16  ;;  %v727_v30 = vrot.slane %v285_v13, 1  ;;  %v728_v34 = vrot.slane %v293_v3, 1 }
  0x31   : > { %v381_v22 = vrot.slane %v379_v18, 1  ;;  %v286_v25 = vsel %vm1344_vm3, 0, %v259_v20  ;;  %v726_v35 = vsel %vm708_vm5, %v724_v0, %v725_v29  ;;  %v731_v39 = vrot.slane %v294_v21, 1 }
  0x32   : > { %1137 = vmatmul.mubr.msk.bf16.gmra.mrb[8].mxu1 %vm433_vm2, %v375_v15  ;;  %v389_v27 = vshrl.u32 %v286_v25, 16  ;;  %v391_v28 = vshll.u32 %v286_v25, 16  ;;  %v398_v33 = vrot.slane %v396_v23, 1  ;;  %v729_v37 = vsel %vm708_vm5, %v727_v30, %v728_v34 }
  0x33   : > { %1181 = vmatmul.mubr.msk.bf16.gmra.mrb[4].mxu0 %vm433_vm2, %v720_v19  ;;  %v382_v26 = vor.u32 %v381_v22, %v377_v16  ;;  %v730_v38 = vrot.slane %v286_v25, 1 }
  0x34   : > { %1184 = vmatprep.mubr.msk.bf16.mxu0 %vm433_vm2, %v723_v24  ;;  %v393_v32 = vrot.slane %v391_v28, 1 }
  0x35   : > { %v387_v31 = vsel %vm303_vm4, %v382_v26, %v386_v9  ;;  %v732_v40 = vsel %vm708_vm5, %v730_v38, %v731_v39 }
  0x36   : > { %1140 = vmatprep.mubr.msk.bf16.mxu1 %vm433_vm2, %v387_v31  ;;  %v394_v17 = vor.u32 %v393_v32, %v389_v27 }
  0x38   : > { %v399_v36 = vsel %vm303_vm4, %v394_v17, %v398_v33 }
  0x3a   : > { %1141 = vmatmul.mubr.msk.bf16.gmra.mrb[12].mxu1 %vm433_vm2, %v399_v36 }
  0x3b   : > { %1185 = vmatmul.mubr.msk.bf16.gmra.mrb[8].mxu0 %vm433_vm2, %v726_v35  ;;  %1160 = vmatprep.mubr.msk.bf16.mxu1 %vm433_vm2, %v1428_v41 }
  0x3c   : > { %1188 = vmatprep.mubr.msk.bf16.mxu0 %vm433_vm2, %v729_v37 }
  0x42   : > { %1161 = vmatmul.mubr.msk.bf16.vlgmr.msra.gmra.mrb[8].mxu1 %vm433_vm2, %v1442_v51 }
  0x43   : > { %1189 = vmatmul.mubr.msk.bf16.gmra.mrb[12].mxu0 %vm433_vm2, %v732_v40  ;;  %1164 = vmatprep.mubr.msk.bf16.mxu1 %vm433_vm2, %v285_v13 }
  0x4a   : > { %1165 = vmatmul.mubr.msk.bf16.gmra.mrb[12].mxu1 %vm433_vm2, %v286_v25 }
  0xf5   : > { %v1130_v42 = vpop.f32.mrb[0].mxu1 }
  0xf6   : > { %v492_v43 = vpop.f32.mrb[1].mxu1 }
  0xf7   : > { %v1131_v44 = vpop.f32.mrb[2].mxu1 }
  0xf8   : > { %v495_v41 = vpop.f32.mrb[3].mxu1 }
  0xfd   : > { %v1134_v45 = vpop.f32.mrb[4].mxu1 }
  0xfe   : > { %v508_v46 = vpop.f32.mrb[5].mxu1  ;;  %v1178_v1 = vpop.f32.mrb[0].mxu0 }
  0xff   : > { %v1135_v48 = vpop.f32.mrb[6].mxu1  ;;  %v1200_v49 = vadd.f32 %v1178_v1, %v1130_v42  ;;  %v824_v50 = vpop.f32.mrb[1].mxu0 }
 0x100   : > { %v511_v51 = vpop.f32.mrb[7].mxu1  ;;  %v1201_v52 = vadd.f32 %v824_v50, %v492_v43  ;;  %v1179_v53 = vpop.f32.mrb[2].mxu0 }
 0x101   : > { %v912_v54 = vadd.f32 %v1200_v49, %v1494_v47  ;;  %v1202_v55 = vadd.f32 %v1179_v53, %v1131_v44  ;;  %v827_v56 = vpop.f32.mrb[3].mxu0 }
 0x102   : > { %v910_v57 = vadd.f32 %v1201_v52, %v1494_v47  ;;  %v1203_v58 = vadd.f32 %v827_v56, %v495_v41 }
 0x103   : > { %v928_v59 = vmax.f32 %v912_v54, 0.0  ;;  %v913_v60 = vadd.f32 %v1202_v55, %v1494_v47 }
 0x104   : > { %v926_v61 = vmax.f32 %v910_v57, 0.0  ;;  %v911_v62 = vadd.f32 %v1203_v58, %v1494_v47 }
 0x105   : > { %944 = vst [vmem:[%s1502_s22 + $0x10] sm:$0xff] %v928_v59  ;;  %v929_v63 = vmax.f32 %v913_v60, 0.0 }
 0x106   : > { %942 = vst [vmem:[%s1502_s22] sm:$0xff] %v926_v61  ;;  %v927_v2 = vmax.f32 %v911_v62, 0.0  ;;  %v1182_v4 = vpop.f32.mrb[4].mxu0 }
 0x107   : > { %945 = vst [vmem:[%s1502_s22 + $0x18] sm:$0xff] %v929_v63  ;;  %v1204_v5 = vadd.f32 %v1182_v4, %v1134_v45  ;;  %v840_v3 = vpop.f32.mrb[5].mxu0 }
 0x108   : > { %943 = vst [vmem:[%s1502_s22 + $0x8] sm:$0xff] %v927_v2  ;;  %v1205_v6 = vadd.f32 %v840_v3, %v508_v46  ;;  %v1183_v7 = vpop.f32.mrb[6].mxu0 }
 0x109   : > { %v916_v8 = vadd.f32 %v1204_v5, %v1494_v47  ;;  %v1206_v10 = vadd.f32 %v1183_v7, %v1135_v48  ;;  %v843_v11 = vpop.f32.mrb[7].mxu0 }
 0x10a   : > { %v914_v12 = vadd.f32 %v1205_v6, %v1494_v47  ;;  %v1207_v13 = vadd.f32 %v843_v11, %v511_v51 }
 0x10b   : > { %v932_v14 = vmax.f32 %v916_v8, 0.0  ;;  %v917_v15 = vadd.f32 %v1206_v10, %v1494_v47 }
 0x10c   : > { %v930_v16 = vmax.f32 %v914_v12, 0.0  ;;  %v915_v18 = vadd.f32 %v1207_v13, %v1494_v47 }
 0x10d   : > { %948 = vst [vmem:[%s1502_s22 + $0x30] sm:$0xff] %v932_v14  ;;  %v933_v19 = vmax.f32 %v917_v15, 0.0 }
 0x10e   : > { %946 = vst [vmem:[%s1502_s22 + $0x20] sm:$0xff] %v930_v16  ;;  %v931_v20 = vmax.f32 %v915_v18, 0.0  ;;  %v1186_v21 = vpop.f32.mrb[8].mxu0 }
 0x10f   : > { %949 = vst [vmem:[%s1502_s22 + $0x38] sm:$0xff] %v933_v19  ;;  %v856_v22 = vpop.f32.mrb[9].mxu0 }
 0x110   : > { %947 = vst [vmem:[%s1502_s22 + $0x28] sm:$0xff] %v931_v20  ;;  %v1187_v9 = vpop.f32.mrb[10].mxu0 }
 0x111   : > { %v859_v23 = vpop.f32.mrb[11].mxu0 }
 0x115   : > { %v1162_v24 = vpop.f32.mrb[8].mxu1 }
 0x116   : > { %v1208_v25 = vadd.f32 %v1186_v21, %v1162_v24  ;;  %v661_v26 = vpop.f32.mrb[9].mxu1  ;;  %v1190_v27 = vpop.f32.mrb[12].mxu0 }
 0x117   : > { %v1209_v28 = vadd.f32 %v856_v22, %v661_v26  ;;  %v1163_v0 = vpop.f32.mrb[10].mxu1  ;;  %v872_v29 = vpop.f32.mrb[13].mxu0 }
 0x118   : > { %v920_v30 = vadd.f32 %v1208_v25, %v1494_v47  ;;  %v1210_v31 = vadd.f32 %v1187_v9, %v1163_v0  ;;  %v664_v32 = vpop.f32.mrb[11].mxu1  ;;  %v1191_v33 = vpop.f32.mrb[14].mxu0 }
 0x119   : > { %v918_v34 = vadd.f32 %v1209_v28, %v1494_v47  ;;  %v1211_v17 = vadd.f32 %v859_v23, %v664_v32  ;;  %v875_v35 = vpop.f32.mrb[15].mxu0 }
 0x11a   : > { %v936_v36 = vmax.f32 %v920_v30, 0.0  ;;  %v921_v37 = vadd.f32 %v1210_v31, %v1494_v47 }
 0x11b   : > { %v934_v38 = vmax.f32 %v918_v34, 0.0  ;;  %v919_v39 = vadd.f32 %v1211_v17, %v1494_v47 }
 0x11c   : > { %952 = vst [vmem:[%s1502_s22 + $0x50] sm:$0xff] %v936_v36  ;;  %v937_v40 = vmax.f32 %v921_v37, 0.0 }
 0x11d   : > { %950 = vst [vmem:[%s1502_s22 + $0x40] sm:$0xff] %v934_v38  ;;  %v935_v42 = vmax.f32 %v919_v39, 0.0  ;;  %v1166_v43 = vpop.f32.mrb[12].mxu1 }
 0x11e   : > { %953 = vst [vmem:[%s1502_s22 + $0x58] sm:$0xff] %v937_v40  ;;  %v1212_v44 = vadd.f32 %v1190_v27, %v1166_v43  ;;  %v677_v41 = vpop.f32.mrb[13].mxu1 }
 0x11f   : > { %951 = vst [vmem:[%s1502_s22 + $0x48] sm:$0xff] %v935_v42  ;;  %v1213_v45 = vadd.f32 %v872_v29, %v677_v41  ;;  %v1167_v46 = vpop.f32.mrb[14].mxu1 }
 0x120   : > { %v924_v1 = vadd.f32 %v1212_v44, %v1494_v47  ;;  %v1214_v48 = vadd.f32 %v1191_v33, %v1167_v46  ;;  %v680_v49 = vpop.f32.mrb[15].mxu1 }
 0x121   : > { %v922_v50 = vadd.f32 %v1213_v45, %v1494_v47  ;;  %v1215_v51 = vadd.f32 %v875_v35, %v680_v49 }
 0x122   : > { %v940_v52 = vmax.f32 %v924_v1, 0.0  ;;  %v925_v53 = vadd.f32 %v1214_v48, %v1494_v47 }
 0x123   : > { %v938_v54 = vmax.f32 %v922_v50, 0.0  ;;  %v923_v55 = vadd.f32 %v1215_v51, %v1494_v47 }
 0x124   : > { %956 = vst [vmem:[%s1502_s22 + $0x70] sm:$0xff] %v940_v52  ;;  %v941_v56 = vmax.f32 %v925_v53, 0.0 }
 0x125   : > { %954 = vst [vmem:[%s1502_s22 + $0x60] sm:$0xff] %v938_v54  ;;  %v939_v57 = vmax.f32 %v923_v55, 0.0 }
 0x126   : > { %957 = vst [vmem:[%s1502_s22 + $0x78] sm:$0xff] %v941_v56 }
 0x127   : > { %955 = vst [vmem:[%s1502_s22 + $0x68] sm:$0xff] %v939_v57 }
 0x128 PF: > { %s13_s12 = sadd.s32 1, %s1258_s12  }
 0x129   : > { %p10_p4 = scmp.ge.s32.totalorder %s13_s12, 4  }
 0x12b   :  { %12 = sbr.rel (!%p10_p4) target bundleno = 1 (0x1), region = 64 }

// kernel: temporal_adapter_forward.8
= control target key start
LH: loop header
LB: loop body
LE: loop exit
PB: predicated region body
PF: predicated region fallthrough
CT: control target
= control target key end

     0   :  { %s584_s12 = smov 0   ;;  %s687_s0 = inlined_call_operand.vmem [shape: f32[256,128], index: 0, kind: input, shape index: {}]   ;;  %s688_s1 = inlined_call_operand.vmem [shape: bf16[128,8], index: 1, kind: input, shape index: {}]   ;;  %s689_s2 = inlined_call_operand.vmem [shape: f32[1,8], index: 2, kind: input, shape index: {}]   ;;  %s690_s3 = inlined_call_operand.vmem [shape: f32[256,8], index: 3, kind: output, shape index: {}]  }
   0x1 LB: > { %s456_s13 = sadd.s32 4294967295, %s562_s12   ;;  %p460_p0 = scmp.ge.s32.totalorder %s562_s12, 1  ;;  %s562_s12 = sphi %s584_s12, %s13_s12  }
   0x2   : > { %p138_p1 = scmp.lt.s32.totalorder %s562_s12, 3 }
   0x4   : > { %p139_p2 = pnand %p460_p0, %p138_p1 }
   0x5   : > { %v548_v0 = vld [vmem:[%s688_s1] sm:$0xff] (!%p139_p2)   ;;  %s461_s16 = sshll.u32 (!%p139_p2), %s456_s13, 4  ;;  %v549_v1 = vld [vmem:[%s688_s1 + $0x8] sm:$0xff] (!%p139_p2)   ;;  %v550_v2 = vld [vmem:[%s688_s1 + $0x10] sm:$0xff] (!%p139_p2)   ;;  %vm383_vm0 = vcmask (!%p139_p2), 64512  }
   0x6   : > { %142 = sbr.rel (%p139_p2) target bundleno = 267 (0x10b), region = 32  ;;  %p163_p3 = scmp.lt.s32.totalorder (!%p139_p2), %s461_s16, 31  ;;  %492 = vmatprep.subr.bf16.mxu0 (!%p139_p2), %v548_v0  ;;  %524 = vmatprep.subr.bf16.mxu1 (!%p139_p2), %v548_v0  ;;  %v551_v3 = vld [vmem:[%s688_s1 + $0x18] sm:$0xff] (!%p139_p2)   ;;  %v552_v10 = vld [vmem:[%s688_s1 + $0x20] sm:$0xff] (!%p139_p2)   ;;  %v553_v11 = vld [vmem:[%s688_s1 + $0x28] sm:$0xff] (!%p139_p2)  }
   0x7   : > { %493 = vmatpush3.bf16.msra.mxu0 (!%p139_p2), %v548_v0  ;;  %532 = vmatpush3.bf16.msra.mxu1 (!%p139_p2), %v548_v0  ;;  %v554_v12 = vld [vmem:[%s688_s1 + $0x30] sm:$0xff] (!%p139_p2)   ;;  %v555_v13 = vld [vmem:[%s688_s1 + $0x38] sm:$0xff] (!%p139_p2)   ;;  %v465_v32 = vld [vmem:[%s689_s2] ss:$0 sm:$0xff] (!%p139_p2) }
   0x8   : > { %494 = vmatprep.subr.bf16.mxu0 (!%p139_p2), %v549_v1  ;;  %525 = vmatprep.subr.bf16.mxu1 (!%p139_p2), %v549_v1 }
   0xb   : > { %495 = vmatpush3.bf16.msra.mxu0 (!%p139_p2), %v549_v1  ;;  %533 = vmatpush3.bf16.msra.mxu1 (!%p139_p2), %v549_v1 }
   0xc   : > { %496 = vmatprep.subr.bf16.mxu0 (!%p139_p2), %v550_v2  ;;  %526 = vmatprep.subr.bf16.mxu1 (!%p139_p2), %v550_v2 }
   0xd   : > { %s692_s16 = smov (!%p163_p3, %s461_s16), 31 }
   0xe   : > { %s462_s21 = sshll.u32 %s692_s16, 3 }
   0xf   : > { %s609_s24 = scalar_lea.vmem %s687_s0, %s462_s21  ;;  %497 = vmatpush3.bf16.msra.mxu0 %v550_v2  ;;  %534 = vmatpush3.bf16.msra.mxu1 %v550_v2  ;;  %s650_s13 = scalar_lea.vmem %s690_s3, %s462_s21 }
  0x10   : > { %v175_v4 = vld [vmem:[%s609_s24] sm:$0xff]  ;;  %v176_v5 = vld [vmem:[%s609_s24 + $0x8] sm:$0xff]  ;;  %498 = vmatprep.subr.bf16.mxu0 %v551_v3  ;;  %527 = vmatprep.subr.bf16.mxu1 %v551_v3  ;;  %v177_v14 = vld [vmem:[%s609_s24 + $0x10] sm:$0xff] }
  0x11   : > { %v183_v6 = vld [vmem:[%s609_s24 + $0x40] sm:$0xff]  ;;  %v191_v7 = vpack.c.bf16 %v176_v5, %v175_v4  ;;  %v184_v8 = vld [vmem:[%s609_s24 + $0x48] sm:$0xff]  ;;  %v178_v15 = vld [vmem:[%s609_s24 + $0x18] sm:$0xff] }
  0x12   : > { %v195_v9 = vpack.c.bf16 %v184_v8, %v183_v6  ;;  %v185_v16 = vld [vmem:[%s609_s24 + $0x50] sm:$0xff]  ;;  %v186_v17 = vld [vmem:[%s609_s24 + $0x58] sm:$0xff]  ;;  %v179_v18 = vld [vmem:[%s609_s24 + $0x20] sm:$0xff]  ;;  %v192_v22 = vpack.c.bf16 %v178_v15, %v177_v14 }
  0x13   : > { %508 = vmatprep.mubr.bf16.mxu0 %v191_v7  ;;  %499 = vmatpush3.bf16.msra.mxu0 %v551_v3  ;;  %v180_v19 = vld [vmem:[%s609_s24 + $0x28] sm:$0xff]  ;;  %v187_v20 = vld [vmem:[%s609_s24 + $0x60] sm:$0xff]  ;;  %v196_v23 = vpack.c.bf16 %v186_v17, %v185_v16  ;;  %v181_v26 = vld [vmem:[%s609_s24 + $0x30] sm:$0xff] }
  0x14   : > { %516 = vmatprep.mubr.bf16.mxu1 %v195_v9  ;;  %535 = vmatpush3.bf16.msra.mxu1 %v551_v3  ;;  %v188_v21 = vld [vmem:[%s609_s24 + $0x68] sm:$0xff]  ;;  %v193_v24 = vpack.c.bf16 %v180_v19, %v179_v18  ;;  %v182_v27 = vld [vmem:[%s609_s24 + $0x38] sm:$0xff]  ;;  %v189_v28 = vld [vmem:[%s609_s24 + $0x70] sm:$0xff] }
  0x15   : > { %500 = vmatprep.subr.bf16.mxu0 %v552_v10  ;;  %528 = vmatprep.subr.bf16.mxu1 %v552_v10  ;;  %v197_v25 = vpack.c.bf16 %v188_v21, %v187_v20  ;;  %v190_v29 = vld [vmem:[%s609_s24 + $0x78] sm:$0xff]  ;;  %v194_v30 = vpack.c.bf16 %v182_v27, %v181_v26 }
  0x16   : > { %v198_v31 = vpack.c.bf16 %v190_v29, %v189_v28 }
  0x17   : > { %501 = vmatpush3.bf16.msra.mxu0 %v552_v10 }
  0x18   : > { %536 = vmatpush3.bf16.msra.mxu1 %v552_v10  ;;  %502 = vmatprep.subr.bf16.mxu0 %v553_v11 }
  0x19   : > { %529 = vmatprep.subr.bf16.mxu1 %v553_v11 }
  0x1b   : > { %503 = vmatpush3.bf16.msra.mxu0 %v553_v11 }
  0x1c   : > { %537 = vmatpush3.bf16.msra.mxu1 %v553_v11  ;;  %504 = vmatprep.subr.bf16.mxu0 %v554_v12 }
  0x1d   : > { %530 = vmatprep.subr.bf16.mxu1 %v554_v12 }
  0x1f   : > { %505 = vmatpush3.bf16.msra.mxu0 %v554_v12 }
  0x20   : > { %538 = vmatpush3.bf16.msra.mxu1 %v554_v12  ;;  %506 = vmatprep.subr.bf16.mxu0 %v555_v13 }
  0x21   : > { %531 = vmatprep.subr.bf16.mxu1 %v555_v13 }
  0x23   : > { %507 = vmatpush3.bf16.msra.mxu0 %v555_v13 }
  0x24   : > { %539 = vmatpush3.bf16.msra.mxu1 %v555_v13 }
  0x26   : > { %509 = vmatmul.mubr.bf16.vlgmr.msra.gmra.mrb[0].mxu0 %v192_v22 }
  0x27   : > { %517 = vmatmul.mubr.bf16.vlgmr.msra.gmra.mrb[0].mxu1 %v196_v23  ;;  %512 = vmatprep.mubr.bf16.mxu0 %v193_v24 }
  0x28   : > { %520 = vmatprep.mubr.bf16.mxu1 %v197_v25 }
  0x2e   : > { %513 = vmatmul.mubr.bf16.gmra.mrb[4].mxu0 %v194_v30 }
  0x2f   : > { %521 = vmatmul.mubr.bf16.gmra.mrb[4].mxu1 %v198_v31 }
  0xf9   : > { %v510_v33 = vpop.f32.mrb[0].mxu0 }
  0xfa   : > { %v518_v34 = vpop.f32.mrb[0].mxu1  ;;  %v313_v35 = vadd.f32 %v510_v33, %v465_v32  ;;  %v304_v37 = vpop.f32.mrb[1].mxu0 }
  0xfb   : > { %v345_v36 = vadd.f32 %v518_v34, %v465_v32  ;;  %v336_v38 = vpop.f32.mrb[1].mxu1  ;;  %v305_v39 = vadd.f32 %v465_v32, %v304_v37  ;;  %v511_v41 = vpop.f32.mrb[2].mxu0 }
  0xfc   : > { %v337_v40 = vadd.f32 %v465_v32, %v336_v38  ;;  %v519_v42 = vpop.f32.mrb[2].mxu1  ;;  %v369_v43 = vmax.f32 %v313_v35, 0.0  ;;  %v316_v45 = vadd.f32 %v511_v41, %v465_v32  ;;  %v307_v47 = vpop.f32.mrb[3].mxu0 }
  0xfd   : > { %v377_v44 = vmax.f32 %v345_v36, 0.0  ;;  %v348_v46 = vadd.f32 %v519_v42, %v465_v32  ;;  %v339_v48 = vpop.f32.mrb[3].mxu1  ;;  %v367_v49 = vmax.f32 %v305_v39, 0.0  ;;  %v308_v51 = vadd.f32 %v465_v32, %v307_v47 }
  0xfe   : > { %v375_v50 = vmax.f32 %v337_v40, 0.0  ;;  %v340_v52 = vadd.f32 %v465_v32, %v339_v48  ;;  %386 = vst.msk [vmem:[%s650_s13 + $0x10] sm:$0xff] %vm383_vm0, %v369_v43  ;;  %v370_v53 = vmax.f32 %v316_v45, 0.0 }
  0xff   : > { %394 = vst.msk [vmem:[%s650_s13 + $0x50] sm:$0xff] %vm383_vm0, %v377_v44  ;;  %v378_v54 = vmax.f32 %v348_v46, 0.0  ;;  %384 = vst.msk [vmem:[%s650_s13] sm:$0xff] %vm383_vm0, %v367_v49  ;;  %v368_v55 = vmax.f32 %v308_v51, 0.0 }
 0x100   : > { %392 = vst.msk [vmem:[%s650_s13 + $0x40] sm:$0xff] %vm383_vm0, %v375_v50  ;;  %v376_v56 = vmax.f32 %v340_v52, 0.0  ;;  %387 = vst.msk [vmem:[%s650_s13 + $0x18] sm:$0xff] %vm383_vm0, %v370_v53 }
 0x101   : > { %395 = vst.msk [vmem:[%s650_s13 + $0x58] sm:$0xff] %vm383_vm0, %v378_v54  ;;  %385 = vst.msk [vmem:[%s650_s13 + $0x8] sm:$0xff] %vm383_vm0, %v368_v55  ;;  %v514_v57 = vpop.f32.mrb[4].mxu0 }
 0x102   : > { %393 = vst.msk [vmem:[%s650_s13 + $0x48] sm:$0xff] %vm383_vm0, %v376_v56  ;;  %v522_v58 = vpop.f32.mrb[4].mxu1  ;;  %v329_v59 = vadd.f32 %v514_v57, %v465_v32  ;;  %v320_v61 = vpop.f32.mrb[5].mxu0 }
 0x103   : > { %v361_v60 = vadd.f32 %v522_v58, %v465_v32  ;;  %v352_v62 = vpop.f32.mrb[5].mxu1  ;;  %v321_v63 = vadd.f32 %v465_v32, %v320_v61  ;;  %v515_v1 = vpop.f32.mrb[6].mxu0 }
 0x104   : > { %v353_v0 = vadd.f32 %v465_v32, %v352_v62  ;;  %v523_v2 = vpop.f32.mrb[6].mxu1  ;;  %v373_v3 = vmax.f32 %v329_v59, 0.0  ;;  %v332_v5 = vadd.f32 %v515_v1, %v465_v32  ;;  %v323_v7 = vpop.f32.mrb[7].mxu0 }
 0x105   : > { %v381_v4 = vmax.f32 %v361_v60, 0.0  ;;  %v364_v6 = vadd.f32 %v523_v2, %v465_v32  ;;  %v355_v8 = vpop.f32.mrb[7].mxu1  ;;  %v371_v9 = vmax.f32 %v321_v63, 0.0  ;;  %v324_v11 = vadd.f32 %v465_v32, %v323_v7 }
 0x106   : > { %v379_v10 = vmax.f32 %v353_v0, 0.0  ;;  %v356_v12 = vadd.f32 %v465_v32, %v355_v8  ;;  %390 = vst.msk [vmem:[%s650_s13 + $0x30] sm:$0xff] %vm383_vm0, %v373_v3  ;;  %v374_v13 = vmax.f32 %v332_v5, 0.0 }
 0x107   : > { %398 = vst.msk [vmem:[%s650_s13 + $0x70] sm:$0xff] %vm383_vm0, %v381_v4  ;;  %v382_v14 = vmax.f32 %v364_v6, 0.0  ;;  %388 = vst.msk [vmem:[%s650_s13 + $0x20] sm:$0xff] %vm383_vm0, %v371_v9  ;;  %v372_v15 = vmax.f32 %v324_v11, 0.0 }
 0x108   : > { %396 = vst.msk [vmem:[%s650_s13 + $0x60] sm:$0xff] %vm383_vm0, %v379_v10  ;;  %v380_v16 = vmax.f32 %v356_v12, 0.0  ;;  %391 = vst.msk [vmem:[%s650_s13 + $0x38] sm:$0xff] %vm383_vm0, %v374_v13 }
 0x109   : > { %399 = vst.msk [vmem:[%s650_s13 + $0x78] sm:$0xff] %vm383_vm0, %v382_v14  ;;  %389 = vst.msk [vmem:[%s650_s13 + $0x28] sm:$0xff] %vm383_vm0, %v372_v15 }
 0x10a   : > { %397 = vst.msk [vmem:[%s650_s13 + $0x68] sm:$0xff] %vm383_vm0, %v380_v16 }
 0x10b PF: > { %s13_s12 = sadd.s32 1, %s562_s12  }
 0x10c   : > { %p10_p4 = scmp.ge.s32.totalorder %s13_s12, 4  }
 0x10e   :  { %12 = sbr.rel (!%p10_p4) target bundleno = 1 (0x1), region = 62 }

// kernel: temporal_adapter_forward.10
= control target key start
LH: loop header
LB: loop body
LE: loop exit
PB: predicated region body
PF: predicated region fallthrough
CT: control target
= control target key end

     0   :  { %s508_s12 = smov 0   ;;  %s564_s0 = inlined_call_operand.vmem [shape: f32[256,8], index: 0, kind: input, shape index: {}]   ;;  %s565_s1 = inlined_call_operand.vmem [shape: bf16[8,128], index: 1, kind: input, shape index: {}]   ;;  %s566_s2 = inlined_call_operand.vmem [shape: f32[1,128], index: 2, kind: input, shape index: {}]   ;;  %s567_s3 = inlined_call_operand.vmem [shape: f32[256,128], index: 3, kind: output, shape index: {}]  }
   0x1 LB: > { %s421_s13 = sadd.s32 4294967295, %s486_s12   ;;  %p425_p0 = scmp.ge.s32.totalorder %s486_s12, 1  ;;  %s486_s12 = sphi %s508_s12, %s13_s12  }
   0x2   : > { %p138_p1 = scmp.lt.s32.totalorder %s486_s12, 3 }
   0x4   : > { %p139_p2 = pnand %p425_p0, %p138_p1 }
   0x5   : > { %v199_v0 = vld [vmem:[%s565_s1] sm:$0xf] (!%p139_p2)  ;;  %vm232_vm0 = vcmask (!%p139_p2), 1043456   ;;  %s426_s16 = sshll.u32 (!%p139_p2), %s421_s13, 4  ;;  %vm207_vm1 = vcmask (!%p139_p2), 64512  }
   0x6   : > { %142 = sbr.rel (%p139_p2) target bundleno = 249 (0xf9), region = 32  ;;  %470 = vmatprep.subr.msk.bf16.mxu0 (!%p139_p2), %vm232_vm0, %v199_v0  ;;  %471 = vmatprep.subr.msk.bf16.mxu1 (!%p139_p2), %vm232_vm0, %v199_v0  ;;  %v234_v1 = vsel (!%p139_p2), %vm232_vm0, %v199_v0, 0  ;;  %p163_p3 = scmp.lt.s32.totalorder (!%p139_p2), %s426_s16, 31  ;;  %v430_v26 = vld [vmem:[%s566_s2] ss:$0 sm:$0xff] (!%p139_p2) }
   0x7   : > { %451 = vmatpush3.bf16.msra.mxu0 (!%p139_p2), %v234_v1  ;;  %469 = vmatpush3.bf16.msra.mxu1 (!%p139_p2), %v234_v1 }
   0xd   : > { %s569_s16 = smov (!%p163_p3, %s426_s16), 31 }
   0xe   : > { %s427_s17 = sshll.u32 %s569_s16, 3 }
   0xf   : > { %s166_s20 = scalar_lea.vmem %s564_s0, %s427_s17  ;;  %s543_s25 = scalar_lea.vmem %s567_s3, %s427_s17 }
  0x10   : > { %v175_v2 = vld [vmem:[%s166_s20] sm:$0xff]  ;;  %v176_v3 = vld [vmem:[%s166_s20 + $0x8] sm:$0xff]  ;;  %v177_v7 = vld [vmem:[%s166_s20 + $0x10] sm:$0xff] }
  0x11   : > { %v183_v4 = vld [vmem:[%s166_s20 + $0x40] sm:$0xff]  ;;  %v191_v5 = vpack.c.bf16 %v176_v3, %v175_v2  ;;  %v184_v6 = vld [vmem:[%s166_s20 + $0x48] sm:$0xff]  ;;  %v178_v8 = vld [vmem:[%s166_s20 + $0x18] sm:$0xff] }
  0x12   : > { %v195_v9 = vpack.c.bf16 %v184_v6, %v183_v4  ;;  %v192_v10 = vpack.c.bf16 %v178_v8, %v177_v7  ;;  %v185_v11 = vld [vmem:[%s166_s20 + $0x50] sm:$0xff]  ;;  %v186_v12 = vld [vmem:[%s166_s20 + $0x58] sm:$0xff]  ;;  %v179_v13 = vld [vmem:[%s166_s20 + $0x20] sm:$0xff] }
  0x13   : > { %452 = vmatprep.mubr.msk.bf16.mxu0 %vm207_vm1, %v191_v5  ;;  %v196_v14 = vpack.c.bf16 %v186_v12, %v185_v11  ;;  %v180_v15 = vld [vmem:[%s166_s20 + $0x28] sm:$0xff]  ;;  %v187_v16 = vld [vmem:[%s166_s20 + $0x60] sm:$0xff]  ;;  %v181_v20 = vld [vmem:[%s166_s20 + $0x30] sm:$0xff] }
  0x14   : > { %v188_v17 = vld [vmem:[%s166_s20 + $0x68] sm:$0xff]  ;;  %460 = vmatprep.mubr.msk.bf16.mxu1 %vm207_vm1, %v195_v9  ;;  %453 = vmatmul.mubr.msk.bf16.vlgmr.msra.gmra.mrb[0].mxu0 %vm207_vm1, %v192_v10  ;;  %v193_v18 = vpack.c.bf16 %v180_v15, %v179_v13  ;;  %v182_v21 = vld [vmem:[%s166_s20 + $0x38] sm:$0xff]  ;;  %v189_v22 = vld [vmem:[%s166_s20 + $0x70] sm:$0xff] }
  0x15   : > { %v197_v19 = vpack.c.bf16 %v188_v17, %v187_v16  ;;  %461 = vmatmul.mubr.msk.bf16.vlgmr.msra.gmra.mrb[0].mxu1 %vm207_vm1, %v196_v14  ;;  %v190_v23 = vld [vmem:[%s166_s20 + $0x78] sm:$0xff]  ;;  %v194_v24 = vpack.c.bf16 %v182_v21, %v181_v20 }
  0x16   : > { %456 = vmatprep.mubr.msk.bf16.mxu0 %vm207_vm1, %v193_v18  ;;  %v198_v25 = vpack.c.bf16 %v190_v23, %v189_v22 }
  0x17   : > { %464 = vmatprep.mubr.msk.bf16.mxu1 %vm207_vm1, %v197_v19 }
  0x1c   : > { %457 = vmatmul.mubr.msk.bf16.gmra.mrb[4].mxu0 %vm207_vm1, %v194_v24 }
  0x1d   : > { %465 = vmatmul.mubr.msk.bf16.gmra.mrb[4].mxu1 %vm207_vm1, %v198_v25 }
  0xe7   : > { %v454_v27 = vpop.f32.mrb[0].mxu0 }
  0xe8   : > { %v279_v28 = vadd.f32 %v454_v27, %v430_v26  ;;  %v462_v29 = vpop.f32.mrb[0].mxu1  ;;  %v270_v30 = vpop.f32.mrb[1].mxu0 }
  0xe9   : > { %v311_v31 = vadd.f32 %v462_v29, %v430_v26  ;;  %v271_v32 = vadd.f32 %v430_v26, %v270_v30  ;;  %v302_v33 = vpop.f32.mrb[1].mxu1  ;;  %v455_v34 = vpop.f32.mrb[2].mxu0 }
  0xea   : > { %v335_v35 = vmax.f32 %v279_v28, 0.0  ;;  %v303_v36 = vadd.f32 %v430_v26, %v302_v33  ;;  %v282_v37 = vadd.f32 %v455_v34, %v430_v26  ;;  %v463_v38 = vpop.f32.mrb[2].mxu1  ;;  %v273_v39 = vpop.f32.mrb[3].mxu0 }
  0xeb   : > { %v343_v40 = vmax.f32 %v311_v31, 0.0  ;;  %v333_v41 = vmax.f32 %v271_v32, 0.0  ;;  %v314_v42 = vadd.f32 %v463_v38, %v430_v26  ;;  %v274_v43 = vadd.f32 %v430_v26, %v273_v39  ;;  %v305_v44 = vpop.f32.mrb[3].mxu1 }
  0xec   : > { %351 = vst [vmem:[%s543_s25 + $0x10] sm:$0xff] %v335_v35  ;;  %v341_v45 = vmax.f32 %v303_v36, 0.0  ;;  %v336_v46 = vmax.f32 %v282_v37, 0.0  ;;  %v306_v47 = vadd.f32 %v430_v26, %v305_v44 }
  0xed   : > { %359 = vst [vmem:[%s543_s25 + $0x50] sm:$0xff] %v343_v40  ;;  %349 = vst [vmem:[%s543_s25] sm:$0xff] %v333_v41  ;;  %v344_v48 = vmax.f32 %v314_v42, 0.0  ;;  %v334_v49 = vmax.f32 %v274_v43, 0.0 }
  0xee   : > { %357 = vst [vmem:[%s543_s25 + $0x40] sm:$0xff] %v341_v45  ;;  %352 = vst [vmem:[%s543_s25 + $0x18] sm:$0xff] %v336_v46  ;;  %v342_v50 = vmax.f32 %v306_v47, 0.0 }
  0xef   : > { %360 = vst [vmem:[%s543_s25 + $0x58] sm:$0xff] %v344_v48  ;;  %350 = vst [vmem:[%s543_s25 + $0x8] sm:$0xff] %v334_v49  ;;  %v458_v51 = vpop.f32.mrb[4].mxu0 }
  0xf0   : > { %358 = vst [vmem:[%s543_s25 + $0x48] sm:$0xff] %v342_v50  ;;  %v295_v52 = vadd.f32 %v458_v51, %v430_v26  ;;  %v466_v53 = vpop.f32.mrb[4].mxu1  ;;  %v286_v54 = vpop.f32.mrb[5].mxu0 }
  0xf1   : > { %v327_v55 = vadd.f32 %v466_v53, %v430_v26  ;;  %v287_v56 = vadd.f32 %v430_v26, %v286_v54  ;;  %v318_v57 = vpop.f32.mrb[5].mxu1  ;;  %v459_v58 = vpop.f32.mrb[6].mxu0 }
  0xf2   : > { %v339_v59 = vmax.f32 %v295_v52, 0.0  ;;  %v319_v60 = vadd.f32 %v430_v26, %v318_v57  ;;  %v298_v61 = vadd.f32 %v459_v58, %v430_v26  ;;  %v467_v62 = vpop.f32.mrb[6].mxu1  ;;  %v289_v63 = vpop.f32.mrb[7].mxu0 }
  0xf3   : > { %v347_v0 = vmax.f32 %v327_v55, 0.0  ;;  %v337_v1 = vmax.f32 %v287_v56, 0.0  ;;  %v330_v2 = vadd.f32 %v467_v62, %v430_v26  ;;  %v290_v3 = vadd.f32 %v430_v26, %v289_v63  ;;  %v321_v4 = vpop.f32.mrb[7].mxu1 }
  0xf4   : > { %355 = vst [vmem:[%s543_s25 + $0x30] sm:$0xff] %v339_v59  ;;  %v345_v5 = vmax.f32 %v319_v60, 0.0  ;;  %v340_v6 = vmax.f32 %v298_v61, 0.0  ;;  %v322_v7 = vadd.f32 %v430_v26, %v321_v4 }
  0xf5   : > { %363 = vst [vmem:[%s543_s25 + $0x70] sm:$0xff] %v347_v0  ;;  %353 = vst [vmem:[%s543_s25 + $0x20] sm:$0xff] %v337_v1  ;;  %v348_v8 = vmax.f32 %v330_v2, 0.0  ;;  %v338_v9 = vmax.f32 %v290_v3, 0.0 }
  0xf6   : > { %361 = vst [vmem:[%s543_s25 + $0x60] sm:$0xff] %v345_v5  ;;  %356 = vst [vmem:[%s543_s25 + $0x38] sm:$0xff] %v340_v6  ;;  %v346_v10 = vmax.f32 %v322_v7, 0.0 }
  0xf7   : > { %364 = vst [vmem:[%s543_s25 + $0x78] sm:$0xff] %v348_v8  ;;  %354 = vst [vmem:[%s543_s25 + $0x28] sm:$0xff] %v338_v9 }
  0xf8   : > { %362 = vst [vmem:[%s543_s25 + $0x68] sm:$0xff] %v346_v10 }
  0xf9 PF: > { %s13_s12 = sadd.s32 1, %s486_s12  }
  0xfa   : > { %p10_p4 = scmp.ge.s32.totalorder %s13_s12, 4  }
  0xfc   :  { %12 = sbr.rel (!%p10_p4) target bundleno = 1 (0x1), region = 62 }

// kernel: tile.28
= control target key start
LH: loop header
LB: loop body
LE: loop exit
PB: predicated region body
PF: predicated region fallthrough
CT: control target
= control target key end

     0   :  { %s28_s0 = inlined_call_operand.vmem [shape: f32[4], index: 0, kind: input, shape index: {}]   ;;  %s29_s1 = inlined_call_operand.vmem [shape: f32[16,4], index: 1, kind: output, shape index: {}]  }
   0x1   :  { %v4_v0 = vld [vmem:[%s28_s0] ss:$0 sm:$0xff] }
   0x2   :  { %5 = vst [vmem:[%s29_s1] sm:$0xff] %v4_v0  ;;  %8 = vst [vmem:[%s29_s1 + $0x8] sm:$0xff] %v4_v0 }

// kernel: tile.29
= control target key start
LH: loop header
LB: loop body
LE: loop exit
PB: predicated region body
PF: predicated region fallthrough
CT: control target
= control target key end

     0   :  { %s131_s10 = smov 60   ;;  %s132_s11 = smov 52   ;;  %vm3_vm0 = vcmask 31744   ;;  %vm9_vm1 = vcmask 523744   ;;  %vm15_vm2 = vcmask 490944   ;;  %vm21_vm3 = vcmask 458144   ;;  %s207_s0 = inlined_call_operand.vmem [shape: f32[16,4], index: 0, kind: input, shape index: {}]   ;;  %s208_s1 = inlined_call_operand.vmem [shape: f32[1,64], index: 1, kind: output, shape index: {}]  }
   0x1   :  { %v101_v0 = vld [vmem:[%s207_s0 + $0xf] sm:$0x1]   ;;  %v103_v1 = vld [vmem:[%s207_s0 + $0xd] sm:$0x1]   ;;  %v102_v2 = vld [vmem:[%s207_s0 + $0xe] sm:$0x1]  }
   0x2   :  { %7 = vrot.lane.b32.xlu0 %v101_v0, %s131_s10  ;;  %19 = vrot.lane.b32.xlu1 %v103_v1, %s132_s11  ;;  %v104_v3 = vld [vmem:[%s207_s0 + $0xc] sm:$0x1]   ;;  %s133_s16 = smov 56   ;;  %s134_s17 = smov 48   ;;  %v105_v4 = vld [vmem:[%s207_s0 + $0xb] sm:$0x1]  }
   0x3   :  { %v106_v5 = vld [vmem:[%s207_s0 + $0xa] sm:$0x1]   ;;  %v2_v6 = vld [vmem:[%s207_s0] sm:$0x1]   ;;  %s135_s24 = smov 44   ;;  %s136_s25 = smov 40  }
   0x4   :  { %4 = vst.msk [vmem:[#allocation0] sm:$0x1] %vm3_vm0, %v2_v6   ;;  %v107_v7 = vld [vmem:[%s207_s0 + $0x9] sm:$0x1]   ;;  %v108_v8 = vld [vmem:[%s207_s0 + $0x8] sm:$0x1]  }
   0x5   :  { %s137_s30 = smov 36   ;;  %s138_s2 = smov 32   ;;  %v109_v9 = vld [vmem:[%s207_s0 + $0x7] sm:$0x1]   ;;  %v110_v10 = vld [vmem:[%s207_s0 + $0x6] sm:$0x1]  }
   0x6   :  { %13 = vrot.lane.b32.xlu0 %v102_v2, %s133_s16  ;;  %25 = vrot.lane.b32.xlu1 %v104_v3, %s134_s17  ;;  %s139_s7 = smov 28   ;;  %s140_s8 = smov 24   ;;  %v111_v11 = vld [vmem:[%s207_s0 + $0x5] sm:$0x1]   ;;  %v112_v12 = vld [vmem:[%s207_s0 + $0x4] sm:$0x1]  }
   0x7   :  { %s141_s13 = smov 20   ;;  %s142_s14 = smov 16   ;;  %v113_v13 = vld [vmem:[%s207_s0 + $0x3] sm:$0x1]   ;;  %v114_v14 = vld [vmem:[%s207_s0 + $0x2] sm:$0x1]  }
   0x8   :  { %s143_s19 = smov 12   ;;  %s144_s20 = smov 8   ;;  %v115_v15 = vld [vmem:[%s207_s0 + $0x1] sm:$0x1]   ;;  %vm27_vm4 = vcmask 425344   ;;  %vm33_vm5 = vcmask 392544  }
   0x9   :  { %s145_s0 = smov 4   ;;  %vm39_vm6 = vcmask 359744   ;;  %vm45_vm7 = vcmask 326944   ;;  %vm51_vm8 = vcmask 294144   ;;  %vm57_vm9 = vcmask 261344  }
   0xa   :  { %31 = vrot.lane.b32.xlu0 %v105_v4, %s135_s24  ;;  %37 = vrot.lane.b32.xlu1 %v106_v5, %s136_s25  ;;  %vm63_vm10 = vcmask 228544   ;;  %vm69_vm11 = vcmask 195744   ;;  %vm75_vm12 = vcmask 162944   ;;  %vm81_vm13 = vcmask 130144  }
   0xb   :  { %vm87_vm14 = vcmask 97344   ;;  %vm93_vm15 = vcmask 64544  }
   0xe   :  { %43 = vrot.lane.b32.xlu0 %v107_v7, %s137_s30  ;;  %49 = vrot.lane.b32.xlu1 %v108_v8, %s138_s2 }
  0x12   :  { %55 = vrot.lane.b32.xlu0 %v109_v9, %s139_s7  ;;  %61 = vrot.lane.b32.xlu1 %v110_v10, %s140_s8 }
  0x16   :  { %67 = vrot.lane.b32.xlu0 %v111_v11, %s141_s13  ;;  %73 = vrot.lane.b32.xlu1 %v112_v12, %s142_s14 }
  0x1a   :  { %79 = vrot.lane.b32.xlu0 %v113_v13, %s143_s19  ;;  %85 = vrot.lane.b32.xlu1 %v114_v14, %s144_s20 }
  0x1e   :  { %91 = vrot.lane.b32.xlu0 %v115_v15, %s145_s0 }
  0x74   :  { %v8_v16 = vpop.permute.xlu0 %7   ;;  %v20_v17 = vpop.permute.xlu1 %19  }
  0x75   :  { %10 = vst.msk [vmem:[#allocation0] sm:$0x1] %vm9_vm1, %v8_v16  }
  0x78   :  { %v14_v18 = vpop.permute.xlu0 %13   ;;  %v26_v19 = vpop.permute.xlu1 %25  }
  0x79   :  { %16 = vst.msk [vmem:[#allocation0] sm:$0x1] %vm15_vm2, %v14_v18  }
  0x7a   :  { %22 = vst.msk [vmem:[#allocation0] sm:$0x1] %vm21_vm3, %v20_v17  }
  0x7b   :  { %28 = vst.msk [vmem:[#allocation0] sm:$0x1] %vm27_vm4, %v26_v19  }
  0x7c   :  { %v32_v20 = vpop.permute.xlu0 %31   ;;  %v38_v21 = vpop.permute.xlu1 %37  }
  0x7d   :  { %34 = vst.msk [vmem:[#allocation0] sm:$0x1] %vm33_vm5, %v32_v20  }
  0x7e   :  { %40 = vst.msk [vmem:[#allocation0] sm:$0x1] %vm39_vm6, %v38_v21  }
  0x80   :  { %v44_v22 = vpop.permute.xlu0 %43   ;;  %v50_v23 = vpop.permute.xlu1 %49  }
  0x81   :  { %46 = vst.msk [vmem:[#allocation0] sm:$0x1] %vm45_vm7, %v44_v22  }
  0x82   :  { %52 = vst.msk [vmem:[#allocation0] sm:$0x1] %vm51_vm8, %v50_v23  }
  0x84   :  { %v56_v24 = vpop.permute.xlu0 %55   ;;  %v62_v25 = vpop.permute.xlu1 %61  }
  0x85   :  { %58 = vst.msk [vmem:[#allocation0] sm:$0x1] %vm57_vm9, %v56_v24  }
  0x86   :  { %64 = vst.msk [vmem:[#allocation0] sm:$0x1] %vm63_vm10, %v62_v25  }
  0x88   :  { %v68_v26 = vpop.permute.xlu0 %67   ;;  %v74_v27 = vpop.permute.xlu1 %73  }
  0x89   :  { %70 = vst.msk [vmem:[#allocation0] sm:$0x1] %vm69_vm11, %v68_v26  }
  0x8a   :  { %76 = vst.msk [vmem:[#allocation0] sm:$0x1] %vm75_vm12, %v74_v27  }
  0x8c   :  { %v80_v28 = vpop.permute.xlu0 %79   ;;  %v86_v29 = vpop.permute.xlu1 %85  }
  0x8d   :  { %82 = vst.msk [vmem:[#allocation0] sm:$0x1] %vm81_vm13, %v80_v28  }
  0x8e   :  { %88 = vst.msk [vmem:[#allocation0] sm:$0x1] %vm87_vm14, %v86_v29  }
  0x90   :  { %v92_v30 = vpop.permute.xlu0 %91  }
  0x91   :  { %94 = vst.msk [vmem:[#allocation0] sm:$0x1] %vm93_vm15, %v92_v30  }
  0x98   :  { %v98_v31 = vld [vmem:[#allocation0] sm:$0x1] }
  0x99   :  { %100 = vst [vmem:[%s208_s1] sm:$0x1] %v98_v31 }

// kernel: temporal_adapter_forward.11
= control target key start
LH: loop header
LB: loop body
LE: loop exit
PB: predicated region body
PF: predicated region fallthrough
CT: control target
= control target key end

     0   :  { %s1372_s12 = smov 0   ;;  %s1687_s0 = inlined_call_operand.vmem [shape: f32[16,16,128], index: 0, kind: input, shape index: {}]   ;;  %s1688_s1 = inlined_call_operand.vmem [shape: bf16[3,128,64], index: 1, kind: input, shape index: {}]   ;;  %s1689_s2 = inlined_call_operand.vmem [shape: f32[1,64], index: 2, kind: input, shape index: {}]   ;;  %s1690_s3 = inlined_call_operand.vmem [shape: f32[16,16,64], index: 3, kind: output, shape index: {}]  }
   0x1 LB: > { %s1048_s13 = sadd.s32 4294967295, %s1350_s12   ;;  %p1052_p0 = scmp.ge.s32.totalorder %s1350_s12, 1  ;;  %s1350_s12 = sphi %s1372_s12, %s13_s12  }
   0x2   : > { %p139_p1 = scmp.lt.s32.totalorder %s1350_s12, 3 }
   0x4   : > { %p140_p2 = pnand %p1052_p0, %p139_p1 }
   0x5   : > { %v1320_v0 = vld [vmem:[%s1688_s1 + $0x40] sm:$0xff] (!%p140_p2)   ;;  %s1053_s16 = sshll.u32 (!%p140_p2), %s1048_s13, 3  ;;  %v1322_v2 = vld [vmem:[%s1688_s1 + $0x48] sm:$0xff] (!%p140_p2)   ;;  %v1324_v4 = vld [vmem:[%s1688_s1 + $0x50] sm:$0xff] (!%p140_p2)   ;;  %vm276_vm0 = vcmask (!%p140_p2), 1040384   ;;  %vm739_vm4 = vcmask (!%p140_p2), 1046528  }
   0x6   : > { %143 = sbr.rel (%p140_p2) target bundleno = 299 (0x12b), region = 32  ;;  %v1321_v1 = vld [vmem:[%s1688_s1] sm:$0xff] (!%p140_p2)   ;;  %1168 = vmatprep.subr.bf16.mxu1 (!%p140_p2), %v1320_v0  ;;  %p166_p3 = scmp.lt.s32.totalorder (!%p140_p2), %s1053_s16, 15  ;;  %v1323_v3 = vld [vmem:[%s1688_s1 + $0x8] sm:$0xff] (!%p140_p2)   ;;  %v1325_v5 = vld [vmem:[%s1688_s1 + $0x10] sm:$0xff] (!%p140_p2)   ;;  %vm973_vm5 = vcmask (!%p140_p2), 523264  }
   0x7   : > { %1200 = vmatprep.subr.bf16.mxu0 (!%p140_p2), %v1321_v1  ;;  %1169 = vmatpush3.bf16.msra.mxu1 (!%p140_p2), %v1320_v0  ;;  %v1326_v6 = vld [vmem:[%s1688_s1 + $0x58] sm:$0xff] (!%p140_p2)   ;;  %v1328_v8 = vld [vmem:[%s1688_s1 + $0x60] sm:$0xff] (!%p140_p2)   ;;  %v1330_v10 = vld [vmem:[%s1688_s1 + $0x68] sm:$0xff] (!%p140_p2)   ;;  %vm277_vm1 = vsmask.f32 (!%p140_p2), 256 }
   0x8   : > { %1201 = vmatpush3.bf16.msra.mxu0 (!%p140_p2), %v1321_v1  ;;  %1170 = vmatprep.subr.bf16.mxu1 (!%p140_p2), %v1322_v2  ;;  %v1327_v7 = vld [vmem:[%s1688_s1 + $0x18] sm:$0xff] (!%p140_p2)   ;;  %v1329_v9 = vld [vmem:[%s1688_s1 + $0x20] sm:$0xff] (!%p140_p2)   ;;  %v1331_v13 = vld [vmem:[%s1688_s1 + $0x28] sm:$0xff] (!%p140_p2)   ;;  %vm311_vm2 = vsmask.f32 (!%p140_p2), 7424 }
   0x9   : > { %1202 = vmatprep.subr.bf16.mxu0 (!%p140_p2), %v1323_v3  ;;  %v1332_v17 = vld [vmem:[%s1688_s1 + $0x70] sm:$0xff] (!%p140_p2)   ;;  %vm1442_vm3 = vmand (!%p140_p2), %vm276_vm0, %vm277_vm1  ;;  %v1334_v37 = vld [vmem:[%s1688_s1 + $0x78] sm:$0xff] (!%p140_p2)  }
   0xa   : > { %v1333_v21 = vld [vmem:[%s1688_s1 + $0x30] sm:$0xff] (!%p140_p2)   ;;  %v1335_v42 = vld [vmem:[%s1688_s1 + $0x38] sm:$0xff] (!%p140_p2)   ;;  %v1336_v55 = vld [vmem:[%s1688_s1 + $0x80] sm:$0xff] (!%p140_p2)  }
   0xb   : > { %1171 = vmatpush3.bf16.msra.mxu1 (!%p140_p2), %v1322_v2 }
   0xc   : > { %1203 = vmatpush3.bf16.msra.mxu0 (!%p140_p2), %v1323_v3  ;;  %1172 = vmatprep.subr.bf16.mxu1 (!%p140_p2), %v1324_v4  ;;  %v1337_v3 = vld [vmem:[%s1688_s1 + $0x88] sm:$0xff] (!%p140_p2)  }
   0xd   : > { %s1694_s16 = smov (!%p166_p3, %s1053_s16), 15  ;;  %1204 = vmatprep.subr.bf16.mxu0 %v1325_v5 }
   0xe   : > { %s1118_s4 = sshll.u32 %s1694_s16, 4 }
   0xf   : > { %1173 = vmatpush3.bf16.msra.mxu1 %v1324_v4  ;;  %s1418_s11 = scalar_lea.vmem %s1687_s0, %s1118_s4  ;;  %s1630_s22 = scalar_lea.vmem %s1690_s3, %s1118_s4 }
  0x10   : > { %1205 = vmatpush3.bf16.msra.mxu0 %v1325_v5  ;;  %1174 = vmatprep.subr.bf16.mxu1 %v1326_v6  ;;  %v180_v11 = vld [vmem:[%s1418_s11] sm:$0xff]  ;;  %v181_v12 = vld [vmem:[%s1418_s11 + $0x8] sm:$0xff]  ;;  %v182_v15 = vld [vmem:[%s1418_s11 + $0x10] sm:$0xff] }
  0x11   : > { %1206 = vmatprep.subr.bf16.mxu0 %v1327_v7  ;;  %v196_v14 = vpack.c.bf16 %v181_v12, %v180_v11  ;;  %v183_v16 = vld [vmem:[%s1418_s11 + $0x18] sm:$0xff]  ;;  %v184_v24 = vld [vmem:[%s1418_s11 + $0x20] sm:$0xff]  ;;  %v185_v25 = vld [vmem:[%s1418_s11 + $0x28] sm:$0xff] }
  0x12   : > { %v197_v18 = vpack.c.bf16 %v183_v16, %v182_v15  ;;  %v198_v27 = vpack.c.bf16 %v185_v25, %v184_v24  ;;  %v186_v28 = vld [vmem:[%s1418_s11 + $0x30] sm:$0xff]  ;;  %v187_v29 = vld [vmem:[%s1418_s11 + $0x38] sm:$0xff]  ;;  %v188_v46 = vld [vmem:[%s1418_s11 + $0x40] sm:$0xff] }
  0x13   : > { %1175 = vmatpush3.bf16.msra.mxu1 %v1326_v6  ;;  %v205_v19 = vshrl.u32 %v196_v14, 16  ;;  %v208_v20 = vshll.u32 %v196_v14, 16  ;;  %v199_v32 = vpack.c.bf16 %v187_v29, %v186_v28  ;;  %v189_v47 = vld [vmem:[%s1418_s11 + $0x48] sm:$0xff]  ;;  %v190_v1 = vld [vmem:[%s1418_s11 + $0x50] sm:$0xff] }
  0x14   : > { %1207 = vmatpush3.bf16.msra.mxu0 %v1327_v7  ;;  %1176 = vmatprep.subr.bf16.mxu1 %v1328_v8  ;;  %v212_v22 = vshrl.u32 %v197_v18, 16  ;;  %v215_v23 = vshll.u32 %v197_v18, 16  ;;  %v219_v35 = vshrl.u32 %v198_v27, 16  ;;  %v222_v36 = vshll.u32 %v198_v27, 16  ;;  %v191_v7 = vld [vmem:[%s1418_s11 + $0x58] sm:$0xff]  ;;  %v194_v14 = vld [vmem:[%s1418_s11 + $0x70] sm:$0xff] }
  0x15   : > { %1208 = vmatprep.subr.bf16.mxu0 %v1329_v9  ;;  %v207_v26 = vrot.slane %v205_v19, 7  ;;  %v226_v41 = vshrl.u32 %v199_v32, 16  ;;  %v229_v60 = vshll.u32 %v199_v32, 16  ;;  %v200_v0 = vpack.c.bf16 %v189_v47, %v188_v46  ;;  %v195_v19 = vld [vmem:[%s1418_s11 + $0x78] sm:$0xff] }
  0x16   : > { %v214_v31 = vrot.slane %v212_v22, 7  ;;  %v221_v45 = vrot.slane %v219_v35, 7  ;;  %v201_v27 = vpack.c.bf16 %v191_v7, %v190_v1  ;;  %v203_v32 = vpack.c.bf16 %v195_v19, %v194_v14  ;;  %v1338_v35 = vld [vmem:[%s1688_s1 + $0x90] sm:$0xff]  }
  0x17   : > { %1177 = vmatpush3.bf16.msra.mxu1 %v1328_v8  ;;  %v210_v33 = vor.u32 %v208_v20, %v207_v26  ;;  %v1448_v34 = vsel %vm1442_vm3, %v207_v26, 0  ;;  %v228_v59 = vrot.slane %v226_v41, 7  ;;  %v192_v8 = vld [vmem:[%s1418_s11 + $0x60] sm:$0xff]  ;;  %v236_v26 = vshll.u32 %v200_v0, 16 }
  0x18   : > { %1209 = vmatpush3.bf16.msra.mxu0 %v1329_v9  ;;  %1178 = vmatprep.subr.bf16.mxu1 %v1330_v10  ;;  %v320_v38 = vshll.u32 %v1448_v34, 16  ;;  %v217_v39 = vor.u32 %v215_v23, %v214_v31  ;;  %v1456_v40 = vsel %vm1442_vm3, %v214_v31, 0  ;;  %v224_v56 = vor.u32 %v222_v36, %v221_v45  ;;  %v193_v9 = vld [vmem:[%s1418_s11 + $0x68] sm:$0xff] }
  0x19   : > { %1210 = vmatprep.subr.bf16.mxu0 %v1331_v13  ;;  %v1463_v43 = vsel %vm1442_vm3, 0, %v210_v33  ;;  %v332_v44 = vshll.u32 %v1456_v40, 16  ;;  %v1482_v58 = vsel %vm1442_vm3, %v221_v45, 0  ;;  %v231_v6 = vor.u32 %v229_v60, %v228_v59 }
  0x1a   : > { %v313_v48 = vshrl.u32 %v1463_v43, 16  ;;  %v315_v49 = vshll.u32 %v1463_v43, 16  ;;  %v322_v50 = vrot.slane %v320_v38, 1  ;;  %1216 = vmatprep.mubr.bf16.mxu0 %v1463_v43  ;;  %v1473_v51 = vsel %vm1442_vm3, 0, %v217_v39 }
  0x1b   : > { %1179 = vmatpush3.bf16.msra.mxu1 %v1330_v10  ;;  %v325_v52 = vshrl.u32 %v1473_v51, 16  ;;  %v327_v53 = vshll.u32 %v1473_v51, 16  ;;  %v334_v54 = vrot.slane %v332_v44, 1  ;;  %v1486_v62 = vsel %vm1442_vm3, 0, %v224_v56 }
  0x1c   : > { %1211 = vmatpush3.bf16.msra.mxu0 %v1331_v13  ;;  %1180 = vmatprep.subr.bf16.mxu1 %v1332_v17  ;;  %v317_v57 = vrot.slane %v315_v49, 1  ;;  %v344_v63 = vshll.u32 %v1482_v58, 16  ;;  %v337_v4 = vshrl.u32 %v1486_v62, 16  ;;  %v339_v5 = vshll.u32 %v1486_v62, 16 }
  0x1d   : > { %1212 = vmatprep.subr.bf16.mxu0 %v1333_v21  ;;  %v329_v61 = vrot.slane %v327_v53, 1  ;;  %v1500_v12 = vsel %vm1442_vm3, %v228_v59, 0  ;;  %v233_v13 = vshrl.u32 %v200_v0, 16  ;;  %v202_v31 = vpack.c.bf16 %v193_v9, %v192_v8  ;;  %v1339_v53 = vld [vmem:[%s1688_s1 + $0x98] sm:$0xff]   ;;  %v1340_v8 = vld [vmem:[%s1688_s1 + $0xa0] sm:$0xff]  }
  0x1e   : > { %v318_v2 = vor.u32 %v317_v57, %v313_v48  ;;  %v346_v11 = vrot.slane %v344_v63, 1  ;;  %v341_v16 = vrot.slane %v339_v5, 1  ;;  %v356_v18 = vshll.u32 %v1500_v12, 16 }
  0x1f   : > { %1181 = vmatpush3.bf16.msra.mxu1 %v1332_v17  ;;  %v330_v10 = vor.u32 %v329_v61, %v325_v52  ;;  %v1506_v17 = vsel %vm1442_vm3, 0, %v231_v6  ;;  %v235_v23 = vrot.slane %v233_v13, 7  ;;  %v240_v38 = vshrl.u32 %v201_v27, 16 }
  0x20   : > { %1213 = vmatpush3.bf16.msra.mxu0 %v1333_v21  ;;  %1182 = vmatprep.subr.bf16.mxu1 %v1334_v37  ;;  %v323_v15 = vsel %vm311_vm2, %v318_v2, %v322_v50  ;;  %v349_v21 = vshrl.u32 %v1506_v17, 16  ;;  %v351_v22 = vshll.u32 %v1506_v17, 16  ;;  %v342_v24 = vor.u32 %v341_v16, %v337_v4 }
  0x21   : > { %1214 = vmatprep.subr.bf16.mxu0 %v1335_v42  ;;  %1184 = vmatprep.mubr.bf16.mxu1 %v323_v15  ;;  %v335_v20 = vsel %vm311_vm2, %v330_v10, %v334_v54  ;;  %v358_v25 = vrot.slane %v356_v18, 1  ;;  %v1516_v29 = vsel %vm1442_vm3, %v235_v23, 0  ;;  %v238_v36 = vor.u32 %v236_v26, %v235_v23  ;;  %v1341_v23 = vld [vmem:[%s1688_s1 + $0xa8] sm:$0xff]  }
  0x22   : > { %v353_v28 = vrot.slane %v351_v22, 1  ;;  %v347_v33 = vsel %vm311_vm2, %v342_v24, %v346_v11  ;;  %v243_v41 = vshll.u32 %v201_v27, 16  ;;  %v250_v44 = vshll.u32 %v202_v31, 16 }
  0x23   : > { %1183 = vmatpush3.bf16.msra.mxu1 %v1334_v37  ;;  %v368_v37 = vshll.u32 %v1516_v29, 16  ;;  %v1526_v45 = vsel %vm1442_vm3, 0, %v238_v36  ;;  %v242_v46 = vrot.slane %v240_v38, 7  ;;  %v254_v47 = vshrl.u32 %v203_v32, 16 }
  0x24   : > { %1215 = vmatpush3.bf16.msra.mxu0 %v1335_v42  ;;  %1264 = vmatprep.subr.bf16.mxu1 %v1336_v55  ;;  %v354_v39 = vor.u32 %v353_v28, %v349_v21  ;;  %v247_v42 = vshrl.u32 %v202_v31, 16  ;;  %v361_v49 = vshrl.u32 %v1526_v45, 16  ;;  %v363_v50 = vshll.u32 %v1526_v45, 16 }
  0x25   : > { %1232 = vmatprep.subr.bf16.mxu0 %v1336_v55  ;;  %v245_v54 = vor.u32 %v243_v41, %v242_v46  ;;  %v256_v56 = vrot.slane %v254_v47, 7  ;;  %v257_v57 = vshll.u32 %v203_v32, 16  ;;  %v370_v60 = vrot.slane %v368_v37, 1  ;;  %v1342_v32 = vld [vmem:[%s1688_s1 + $0xb0] sm:$0xff]  }
  0x26   : > { %1185 = vmatmul.mubr.bf16.vlgmr.msra.gmra.mrb[0].mxu1 %v335_v20  ;;  %v359_v48 = vsel %vm311_vm2, %v354_v39, %v358_v25  ;;  %v249_v52 = vrot.slane %v247_v42, 7  ;;  %v365_v59 = vrot.slane %v363_v50, 1  ;;  %v752_v37 = vrot.slane %v1526_v45, 1  ;;  %v1343_v39 = vld [vmem:[%s1688_s1 + $0xb8] sm:$0xff]  }
  0x27   : > { %1217 = vmatmul.mubr.bf16.vlgmr.msra.gmra.mrb[0].mxu0 %v1473_v51  ;;  %1272 = vmatpush3.bf16.msra.mxu1 %v1336_v55  ;;  %v1541_v0 = vsel %vm1442_vm3, 0, %v245_v54  ;;  %v259_v2 = vor.u32 %v257_v57, %v256_v56  ;;  %v1552_v6 = vsel %vm1442_vm3, %v256_v56, 0  ;;  %v753_v38 = vrot.slane %v1516_v29, 1 }
  0x28   : > { %1233 = vmatpush3.bf16.msra.mxu0 %v1336_v55  ;;  %1265 = vmatprep.subr.bf16.mxu1 %v1337_v3  ;;  %v1536_v55 = vsel %vm1442_vm3, %v242_v46, 0  ;;  %v252_v63 = vor.u32 %v250_v44, %v249_v52  ;;  %v1545_v1 = vsel %vm1442_vm3, %v249_v52, 0  ;;  %v373_v4 = vshrl.u32 %v1541_v0, 16 }
  0x29   : > { %1234 = vmatprep.subr.bf16.mxu0 %v1337_v3  ;;  %1188 = vmatprep.mubr.bf16.mxu1 %v347_v33  ;;  %v380_v61 = vshll.u32 %v1536_v55, 16  ;;  %v375_v5 = vshll.u32 %v1541_v0, 16  ;;  %v392_v10 = vshll.u32 %v1545_v1, 16  ;;  %v1564_v11 = vsel %vm1442_vm3, 0, %v259_v2 }
  0x2a   : > { %1220 = vmatprep.mubr.bf16.mxu0 %v1486_v62  ;;  %v1559_v9 = vsel %vm1442_vm3, 0, %v252_v63  ;;  %v399_v18 = vshll.u32 %v1564_v11, 16  ;;  %v404_v19 = vshll.u32 %v1552_v6, 16  ;;  %v397_v22 = vshrl.u32 %v1564_v11, 16 }
  0x2b   : > { %1273 = vmatpush3.bf16.msra.mxu1 %v1337_v3  ;;  %v382_v7 = vrot.slane %v380_v61, 1  ;;  %v377_v14 = vrot.slane %v375_v5, 1  ;;  %v385_v15 = vshrl.u32 %v1559_v9, 16  ;;  %v387_v16 = vshll.u32 %v1559_v9, 16 }
  0x2c   : > { %1235 = vmatpush3.bf16.msra.mxu0 %v1337_v3  ;;  %1266 = vmatprep.subr.bf16.mxu1 %v1338_v35  ;;  %v366_v3 = vor.u32 %v365_v59, %v361_v49  ;;  %v394_v21 = vrot.slane %v392_v10, 1  ;;  %v401_v24 = vrot.slane %v399_v18, 1  ;;  %v406_v31 = vrot.slane %v404_v19, 1 }
  0x2d   : > { %1236 = vmatprep.subr.bf16.mxu0 %v1338_v35  ;;  %v378_v20 = vor.u32 %v377_v14, %v373_v4  ;;  %v389_v30 = vrot.slane %v387_v16, 1  ;;  %v740_v33 = vrot.slane %v1463_v43, 1  ;;  %v754_v41 = vsel %vm739_vm4, %v752_v37, %v753_v38 }
  0x2e   : > { %1189 = vmatmul.mubr.bf16.gmra.mrb[4].mxu1 %v359_v48  ;;  %v371_v13 = vsel %vm311_vm2, %v366_v3, %v370_v60  ;;  %v402_v28 = vor.u32 %v401_v24, %v397_v22  ;;  %v755_v42 = vrot.slane %v1541_v0, 1  ;;  %v744_v29 = vrot.slane %v1456_v40, 1 }
  0x2f   : > { %1221 = vmatmul.mubr.bf16.gmra.mrb[4].mxu0 %v1506_v17  ;;  %1274 = vmatpush3.bf16.msra.mxu1 %v1338_v35  ;;  %v383_v25 = vsel %vm311_vm2, %v378_v20, %v382_v7  ;;  %v390_v26 = vor.u32 %v389_v30, %v385_v15  ;;  %v743_v44 = vrot.slane %v1473_v51, 1  ;;  %v759_v46 = vrot.slane %v1545_v1, 1 }
  0x30   : > { %1237 = vmatpush3.bf16.msra.mxu0 %v1338_v35  ;;  %1267 = vmatprep.subr.bf16.mxu1 %v1339_v53  ;;  %v741_v35 = vrot.slane %v1448_v34, 1  ;;  %v407_v36 = vsel %vm311_vm2, %v402_v28, %v406_v31  ;;  %v756_v34 = vrot.slane %v1536_v55, 1  ;;  %v746_v47 = vrot.slane %v1486_v62, 1 }
  0x31   : > { %1238 = vmatprep.subr.bf16.mxu0 %v1339_v53  ;;  %1224 = vmatprep.mubr.bf16.mxu0 %v1526_v45  ;;  %v395_v27 = vsel %vm311_vm2, %v390_v26, %v394_v21  ;;  %v758_v45 = vrot.slane %v1559_v9, 1  ;;  %v747_v48 = vrot.slane %v1482_v58, 1  ;;  %v745_v40 = vsel %vm739_vm4, %v743_v44, %v744_v29 }
  0x32   : > { %1192 = vmatprep.mubr.bf16.mxu1 %v371_v13  ;;  %v742_v43 = vsel %vm739_vm4, %v740_v33, %v741_v35  ;;  %v757_v49 = vsel %vm739_vm4, %v755_v42, %v756_v34  ;;  %v761_v52 = vrot.slane %v1564_v11, 1  ;;  %v762_v62 = vrot.slane %v1552_v6, 1 }
  0x33   : > { %1275 = vmatpush3.bf16.msra.mxu1 %v1339_v53  ;;  %v760_v50 = vsel %vm739_vm4, %v758_v45, %v759_v46  ;;  %v748_v51 = vsel %vm739_vm4, %v746_v47, %v747_v48  ;;  %v749_v58 = vrot.slane %v1506_v17, 1 }
  0x34   : > { %1239 = vmatpush3.bf16.msra.mxu0 %v1339_v53  ;;  %1268 = vmatprep.subr.bf16.mxu1 %v1340_v8  ;;  %v750_v53 = vrot.slane %v1500_v12, 1  ;;  %v763_v54 = vsel %vm739_vm4, %v761_v52, %v762_v62 }
  0x35   : > { %1240 = vmatprep.subr.bf16.mxu0 %v1340_v8 }
  0x36   : > { %1193 = vmatmul.mubr.bf16.gmra.mrb[8].mxu1 %v383_v25  ;;  %v751_v55 = vsel %vm739_vm4, %v749_v58, %v750_v53  ;;  %v1623_v25 = vld [vmem:[%s1689_s2] ss:$0 sm:$0xff] }
  0x37   : > { %1225 = vmatmul.mubr.bf16.gmra.mrb[8].mxu0 %v1541_v0  ;;  %1276 = vmatpush3.bf16.msra.mxu1 %v1340_v8 }
  0x38   : > { %1241 = vmatpush3.bf16.msra.mxu0 %v1340_v8  ;;  %1269 = vmatprep.subr.bf16.mxu1 %v1341_v23 }
  0x39   : > { %1242 = vmatprep.subr.bf16.mxu0 %v1341_v23  ;;  %1196 = vmatprep.mubr.bf16.mxu1 %v395_v27 }
  0x3a   : > { %1228 = vmatprep.mubr.bf16.mxu0 %v1559_v9 }
  0x3b   : > { %1277 = vmatpush3.bf16.msra.mxu1 %v1341_v23 }
  0x3c   : > { %1243 = vmatpush3.bf16.msra.mxu0 %v1341_v23  ;;  %1270 = vmatprep.subr.bf16.mxu1 %v1342_v32 }
  0x3d   : > { %1244 = vmatprep.subr.bf16.mxu0 %v1342_v32 }
  0x3e   : > { %1197 = vmatmul.mubr.bf16.gmra.mrb[12].mxu1 %v407_v36 }
  0x3f   : > { %1229 = vmatmul.mubr.bf16.gmra.mrb[12].mxu0 %v1564_v11  ;;  %1278 = vmatpush3.bf16.msra.mxu1 %v1342_v32 }
  0x40   : > { %1245 = vmatpush3.bf16.msra.mxu0 %v1342_v32  ;;  %1271 = vmatprep.subr.bf16.mxu1 %v1343_v39 }
  0x41   : > { %1246 = vmatprep.subr.bf16.mxu0 %v1343_v39  ;;  %1248 = vmatprep.mubr.bf16.mxu0 %v742_v43 }
  0x42   : > { %1256 = vmatprep.mubr.bf16.mxu1 %v754_v41 }
  0x43   : > { %1279 = vmatpush3.bf16.msra.mxu1 %v1343_v39 }
  0x44   : > { %1247 = vmatpush3.bf16.msra.mxu0 %v1343_v39 }
  0x46   : > { %1257 = vmatmul.mubr.bf16.vlgmr.msra.gmra.mrb[16].mxu1 %v757_v49 }
  0x47   : > { %1249 = vmatmul.mubr.bf16.vlgmr.msra.gmra.mrb[0].mxu0 %v745_v40  ;;  %1260 = vmatprep.mubr.bf16.mxu1 %v760_v50 }
  0x48   : > { %1252 = vmatprep.mubr.bf16.mxu0 %v748_v51 }
  0x4e   : > { %1261 = vmatmul.mubr.bf16.gmra.mrb[20].mxu1 %v763_v54 }
  0x4f   : > { %1253 = vmatmul.mubr.bf16.gmra.mrb[4].mxu0 %v751_v55 }
  0xf9   : > { %v1186_v56 = vpop.f32.mrb[0].mxu1 }
  0xfa   : > { %v515_v57 = vpop.f32.mrb[1].mxu1 }
  0xfb   : > { %v1187_v59 = vpop.f32.mrb[2].mxu1 }
  0xfc   : > { %v518_v60 = vpop.f32.mrb[3].mxu1 }
 0x101   : > { %v1612_v61 = vpop.f32.mrb[4].mxu1 }
 0x102   : > { %v1614_v63 = vpop.f32.mrb[5].mxu1 }
 0x103   : > { %v1616_v0 = vpop.f32.mrb[6].mxu1 }
 0x104   : > { %v1618_v1 = vpop.f32.mrb[7].mxu1 }
 0x109   : > { %v1194_v17 = vpop.f32.mrb[8].mxu1 }
 0x10a   : > { %v1226_v12 = vpop.f32.mrb[8].mxu0  ;;  %v547_v2 = vpop.f32.mrb[9].mxu1 }
 0x10b   : > { %v701_v3 = vadd.f32 %v1226_v12, %v1194_v17  ;;  %v692_v4 = vpop.f32.mrb[9].mxu0  ;;  %v1195_v5 = vpop.f32.mrb[10].mxu1 }
 0x10c   : > { %v693_v6 = vadd.f32 %v692_v4, %v547_v2  ;;  %v1227_v7 = vpop.f32.mrb[10].mxu0  ;;  %v550_v8 = vpop.f32.mrb[11].mxu1 }
 0x10d   : > { %v704_v9 = vadd.f32 %v1227_v7, %v1195_v5  ;;  %v695_v10 = vpop.f32.mrb[11].mxu0 }
 0x10e   : > { %v696_v11 = vadd.f32 %v695_v10, %v550_v8 }
 0x111   : > { %v1198_v13 = vpop.f32.mrb[12].mxu1 }
 0x112   : > { %v1230_v14 = vpop.f32.mrb[12].mxu0  ;;  %v563_v15 = vpop.f32.mrb[13].mxu1 }
 0x113   : > { %v717_v16 = vadd.f32 %v1230_v14, %v1198_v13  ;;  %v708_v18 = vpop.f32.mrb[13].mxu0  ;;  %v1199_v19 = vpop.f32.mrb[14].mxu1 }
 0x114   : > { %v709_v20 = vadd.f32 %v708_v18, %v563_v15  ;;  %v1231_v30 = vpop.f32.mrb[14].mxu0  ;;  %v566_v21 = vpop.f32.mrb[15].mxu1 }
 0x115   : > { %v720_v22 = vadd.f32 %v1231_v30, %v1199_v19  ;;  %v711_v23 = vpop.f32.mrb[15].mxu0 }
 0x116   : > { %v712_v24 = vadd.f32 %v711_v23, %v566_v21 }
 0x119   : > { %v1258_v26 = vpop.f32.mrb[16].mxu1 }
 0x11a   : > { %v1250_v27 = vpop.f32.mrb[0].mxu0  ;;  %v944_v28 = vadd.f32 %v1258_v26, %v701_v3  ;;  %v903_v31 = vpop.f32.mrb[17].mxu1 }
 0x11b   : > { %v1280_v32 = vadd.f32 %v1250_v27, %v1186_v56  ;;  %v871_v33 = vpop.f32.mrb[1].mxu0  ;;  %v942_v35 = vadd.f32 %v903_v31, %v693_v6  ;;  %v1259_v36 = vpop.f32.mrb[18].mxu1 }
 0x11c   : > { %v967_v37 = vadd.f32 %v1623_v25, %v944_v28  ;;  %v1281_v38 = vadd.f32 %v871_v33, %v515_v57  ;;  %v1251_v39 = vpop.f32.mrb[2].mxu0  ;;  %v945_v43 = vadd.f32 %v1259_v36, %v704_v9  ;;  %v906_v34 = vpop.f32.mrb[19].mxu1 }
 0x11d   : > { %v959_v41 = vadd.f32 %v1280_v32, %v1623_v25  ;;  %v965_v42 = vadd.f32 %v1623_v25, %v942_v35  ;;  %v1282_v29 = vadd.f32 %v1251_v39, %v1187_v59  ;;  %v874_v44 = vpop.f32.mrb[3].mxu0  ;;  %v943_v45 = vadd.f32 %v906_v34, %v696_v11 }
 0x11e   : > { %984 = vst.msk [vmem:[%s1630_s22 + $0x50] sm:$0xff] %vm973_vm5, %v967_v37  ;;  %v957_v46 = vadd.f32 %v1281_v38, %v1623_v25  ;;  %v968_v47 = vadd.f32 %v1623_v25, %v945_v43  ;;  %v1283_v48 = vadd.f32 %v874_v44, %v518_v60 }
 0x11f   : > { %976 = vst.msk [vmem:[%s1630_s22 + $0x10] sm:$0xff] %vm973_vm5, %v959_v41  ;;  %982 = vst.msk [vmem:[%s1630_s22 + $0x40] sm:$0xff] %vm973_vm5, %v965_v42  ;;  %v960_v49 = vadd.f32 %v1282_v29, %v1623_v25  ;;  %v966_v40 = vadd.f32 %v1623_v25, %v943_v45 }
 0x120   : > { %974 = vst.msk [vmem:[%s1630_s22] sm:$0xff] %vm973_vm5, %v957_v46  ;;  %985 = vst.msk [vmem:[%s1630_s22 + $0x58] sm:$0xff] %vm973_vm5, %v968_v47  ;;  %v958_v50 = vadd.f32 %v1283_v48, %v1623_v25 }
 0x121   : > { %977 = vst.msk [vmem:[%s1630_s22 + $0x18] sm:$0xff] %vm973_vm5, %v960_v49  ;;  %983 = vst.msk [vmem:[%s1630_s22 + $0x48] sm:$0xff] %vm973_vm5, %v966_v40  ;;  %v1262_v51 = vpop.f32.mrb[20].mxu1 }
 0x122   : > { %975 = vst.msk [vmem:[%s1630_s22 + $0x8] sm:$0xff] %vm973_vm5, %v958_v50  ;;  %v1254_v52 = vpop.f32.mrb[4].mxu0  ;;  %v948_v62 = vadd.f32 %v1262_v51, %v717_v16  ;;  %v919_v58 = vpop.f32.mrb[21].mxu1 }
 0x123   : > { %v1284_v53 = vadd.f32 %v1254_v52, %v1612_v61  ;;  %v887_v54 = vpop.f32.mrb[5].mxu0  ;;  %v946_v55 = vadd.f32 %v919_v58, %v709_v20  ;;  %v1263_v56 = vpop.f32.mrb[22].mxu1 }
 0x124   : > { %v971_v57 = vadd.f32 %v1623_v25, %v948_v62  ;;  %v1285_v59 = vadd.f32 %v887_v54, %v1614_v63  ;;  %v1255_v60 = vpop.f32.mrb[6].mxu0  ;;  %v949_v17 = vadd.f32 %v1263_v56, %v720_v22  ;;  %v922_v12 = vpop.f32.mrb[23].mxu1 }
 0x125   : > { %v963_v2 = vadd.f32 %v1284_v53, %v1623_v25  ;;  %v969_v3 = vadd.f32 %v1623_v25, %v946_v55  ;;  %v1286_v61 = vadd.f32 %v1255_v60, %v1616_v0  ;;  %v890_v4 = vpop.f32.mrb[7].mxu0  ;;  %v947_v5 = vadd.f32 %v922_v12, %v712_v24 }
 0x126   : > { %988 = vst.msk [vmem:[%s1630_s22 + $0x70] sm:$0xff] %vm973_vm5, %v971_v57  ;;  %v961_v63 = vadd.f32 %v1285_v59, %v1623_v25  ;;  %v972_v6 = vadd.f32 %v1623_v25, %v949_v17  ;;  %v1287_v7 = vadd.f32 %v890_v4, %v1618_v1 }
 0x127   : > { %980 = vst.msk [vmem:[%s1630_s22 + $0x30] sm:$0xff] %vm973_vm5, %v963_v2  ;;  %986 = vst.msk [vmem:[%s1630_s22 + $0x60] sm:$0xff] %vm973_vm5, %v969_v3  ;;  %v964_v8 = vadd.f32 %v1286_v61, %v1623_v25  ;;  %v970_v9 = vadd.f32 %v1623_v25, %v947_v5 }
 0x128   : > { %978 = vst.msk [vmem:[%s1630_s22 + $0x20] sm:$0xff] %vm973_vm5, %v961_v63  ;;  %989 = vst.msk [vmem:[%s1630_s22 + $0x78] sm:$0xff] %vm973_vm5, %v972_v6  ;;  %v962_v0 = vadd.f32 %v1287_v7, %v1623_v25 }
 0x129   : > { %981 = vst.msk [vmem:[%s1630_s22 + $0x38] sm:$0xff] %vm973_vm5, %v964_v8  ;;  %987 = vst.msk [vmem:[%s1630_s22 + $0x68] sm:$0xff] %vm973_vm5, %v970_v9 }
 0x12a   : > { %979 = vst.msk [vmem:[%s1630_s22 + $0x28] sm:$0xff] %vm973_vm5, %v962_v0 }
 0x12b PF: > { %s13_s12 = sadd.s32 1, %s1350_s12  }
 0x12c   : > { %p10_p4 = scmp.ge.s32.totalorder %s13_s12, 4  }
 0x12e   :  { %12 = sbr.rel (!%p10_p4) target bundleno = 1 (0x1), region = 64 }

// kernel: temporal_adapter_forward.9
= control target key start
LH: loop header
LB: loop body
LE: loop exit
PB: predicated region body
PF: predicated region fallthrough
CT: control target
= control target key end

     0   :  { %s10326_s24 = smov 0   ;;  %s12683_s0 = inlined_call_operand.vmem [shape: f32[32,8,8], index: 0, kind: input, shape index: {}]   ;;  %s12684_s1 = inlined_call_operand.vmem [shape: f32[1,8], index: 1, kind: input, shape index: {}]   ;;  %s12685_s2 = inlined_call_operand.vmem [shape: f32[1,8], index: 2, kind: input, shape index: {}]   ;;  %s12686_s3 = inlined_call_operand.vmem [shape: bf16[8,24], index: 3, kind: input, shape index: {}]   ;;  %s12687_s4 = inlined_call_operand.vmem [shape: bf16[8,8], index: 4, kind: input, shape index: {}]   ;;  %s12688_s5 = inlined_call_operand.vmem [shape: f32[1,8], index: 5, kind: input, shape index: {}]   ;;  %s12689_s6 = inlined_call_operand.vmem [shape: f32[8,8], index: 6, kind: input, shape index: {}]   ;;  %s12690_s7 = inlined_call_operand.vmem [shape: f32[256,8], index: 7, kind: output, shape index: {}]  }
   0x1 LB: > { %s8538_s25 = sadd.s32 4294967295, %s10271_s24   ;;  %p8542_p0 = scmp.ge.s32.totalorder %s10271_s24, 1  ;;  %s10271_s24 = sphi %s10326_s24, %s17_s24  }
   0x2   : > { %p238_p1 = scmp.lt.s32.totalorder %s10271_s24, 3 }
   0x4   : > { %p239_p2 = pnand %p8542_p0, %p238_p1 }
   0x6   : > { %242 = sbr.rel (%p239_p2) target bundleno = 4148 (0x1034), region = 48 }
   0xd   : > { %s8543_s26 = sshll.u32 %s8538_s25, 4  ;;  %vm299_vm0 = vcmask 64512   ;;  %vm588_vm1 = vcmask 1043456   ;;  %vm10274_vm2 = vmmov 0   ;;  %s10275_s14 = smov 120   ;;  %vm710_vm3 = vcmask 15360  }
   0xe   : > { %p271_p3 = scmp.lt.s32.totalorder %s8543_s26, 31  ;;  %s10276_s15 = smov 112   ;;  %vm4320_vm4 = vcmask 1040384  }
   0xf   : > { %s10277_s18 = smov 118   ;;  %s10278_s19 = smov 126  }
  0x10   : > { %s12709_s26 = smov (!%p271_p3, %s8543_s26), 31  ;;  %s10279_s20 = smov 110  }
  0x11   : > { %s8544_s27 = sshll.u32 %s12709_s26, 3  ;;  %s10280_s23 = smov 124  }
  0x12   : > { %s10342_s30 = scalar_lea.vmem %s12683_s0, %s8544_s27  ;;  %s10281_s25 = smov 116  }
  0x13   : > { %v283_v0 = vld [vmem:[%s10342_s30] sm:$0xff]  ;;  %v285_v1 = vld [vmem:[%s10342_s30 + $0x10] sm:$0xff]  ;;  %v284_v2 = vld [vmem:[%s10342_s30 + $0x8] sm:$0xff]  ;;  %s10282_s28 = smov 108   ;;  %s10283_s11 = smov 114  }
  0x14   : > { %v300_v3 = vsel %vm299_vm0, %v283_v0, 0.0  ;;  %v306_v4 = vsel %vm299_vm0, %v285_v1, 0.0  ;;  %v286_v5 = vld [vmem:[%s10342_s30 + $0x18] sm:$0xff]  ;;  %v303_v6 = vsel %vm299_vm0, %v284_v2, 0.0  ;;  %v287_v8 = vld [vmem:[%s10342_s30 + $0x20] sm:$0xff]  ;;  %v288_v9 = vld [vmem:[%s10342_s30 + $0x28] sm:$0xff] }
  0x15   : > { %301 = vadd.xlane.f32.xlu0 %v300_v3  ;;  %307 = vadd.xlane.f32.xlu1 %v306_v4  ;;  %v309_v7 = vsel %vm299_vm0, %v286_v5, 0.0  ;;  %v312_v10 = vsel %vm299_vm0, %v287_v8, 0.0  ;;  %v315_v11 = vsel %vm299_vm0, %v288_v9, 0.0  ;;  %v10357_v12 = vld [vmem:[%s10342_s30 + $0x30] sm:$0xff]  ;;  %v10360_v13 = vld [vmem:[%s10342_s30 + $0x38] sm:$0xff]  ;;  %v10367_v16 = vld [vmem:[%s10342_s30 + $0x40] sm:$0xff] }
  0x16   : > { %v318_v14 = vsel %vm299_vm0, %v10357_v12, 0.0  ;;  %v321_v15 = vsel %vm299_vm0, %v10360_v13, 0.0  ;;  %v10370_v17 = vld [vmem:[%s10342_s30 + $0x48] sm:$0xff]  ;;  %v324_v18 = vsel %vm299_vm0, %v10367_v16, 0.0  ;;  %v10377_v20 = vld [vmem:[%s10342_s30 + $0x50] sm:$0xff]  ;;  %v10380_v21 = vld [vmem:[%s10342_s30 + $0x58] sm:$0xff] }
  0x17   : > { %v327_v19 = vsel %vm299_vm0, %v10370_v17, 0.0  ;;  %v330_v22 = vsel %vm299_vm0, %v10377_v20, 0.0  ;;  %v333_v23 = vsel %vm299_vm0, %v10380_v21, 0.0  ;;  %v10387_v24 = vld [vmem:[%s10342_s30 + $0x60] sm:$0xff]  ;;  %v10390_v25 = vld [vmem:[%s10342_s30 + $0x68] sm:$0xff]  ;;  %v10397_v28 = vld [vmem:[%s10342_s30 + $0x70] sm:$0xff] }
  0x18   : > { %v336_v26 = vsel %vm299_vm0, %v10387_v24, 0.0  ;;  %v339_v27 = vsel %vm299_vm0, %v10390_v25, 0.0  ;;  %v10400_v29 = vld [vmem:[%s10342_s30 + $0x78] sm:$0xff]  ;;  %v342_v30 = vsel %vm299_vm0, %v10397_v28, 0.0  ;;  %s10284_s12 = smov 122   ;;  %s10285_s13 = smov 106  }
  0x19   : > { %304 = vadd.xlane.f32.xlu0 %v303_v6  ;;  %310 = vadd.xlane.f32.xlu1 %v309_v7  ;;  %v345_v31 = vsel %vm299_vm0, %v10400_v29, 0.0 }
  0x1d   : > { %313 = vadd.xlane.f32.xlu0 %v312_v10  ;;  %316 = vadd.xlane.f32.xlu1 %v315_v11 }
  0x21   : > { %319 = vadd.xlane.f32.xlu0 %v318_v14  ;;  %322 = vadd.xlane.f32.xlu1 %v321_v15 }
  0x25   : > { %325 = vadd.xlane.f32.xlu0 %v324_v18  ;;  %328 = vadd.xlane.f32.xlu1 %v327_v19 }
  0x29   : > { %331 = vadd.xlane.f32.xlu0 %v330_v22  ;;  %334 = vadd.xlane.f32.xlu1 %v333_v23 }
  0x2d   : > { %337 = vadd.xlane.f32.xlu0 %v336_v26  ;;  %340 = vadd.xlane.f32.xlu1 %v339_v27 }
  0x31   : > { %343 = vadd.xlane.f32.xlu0 %v342_v30  ;;  %346 = vadd.xlane.f32.xlu1 %v345_v31 }
  0xa2   : > { %v302_v32 = vpop.xlane.xlu0 %301  ;;  %v308_v33 = vpop.xlane.xlu1 %307 }
  0xa3   : > { %v349_v34 = vmul.f32 0.125, %v302_v32  ;;  %v351_v35 = vmul.f32 0.125, %v308_v33 }
  0xa5   : > { %v10406_v36 = vsub.f32 %v283_v0, %v349_v34  ;;  %v10408_v37 = vsub.f32 %v285_v1, %v351_v35 }
  0xa6   : > { %v305_v38 = vpop.xlane.xlu0 %304  ;;  %v311_v39 = vpop.xlane.xlu1 %310 }
  0xa7   : > { %v350_v40 = vmul.f32 0.125, %v305_v38  ;;  %v352_v41 = vmul.f32 0.125, %v311_v39  ;;  %v381_v42 = vmul.f32 %v10406_v36, %v10406_v36  ;;  %v383_v43 = vmul.f32 %v10408_v37, %v10408_v37 }
  0xa9   : > { %v10414_v44 = vsub.f32 %v284_v2, %v350_v40  ;;  %v10416_v45 = vsub.f32 %v286_v5, %v352_v41  ;;  %v397_v46 = vsel %vm299_vm0, %v381_v42, 0.0  ;;  %v403_v49 = vsel %vm299_vm0, %v383_v43, 0.0 }
  0xaa   : > { %398 = vadd.xlane.f32.xlu0 %v397_v46  ;;  %v314_v47 = vpop.xlane.xlu0 %313  ;;  %v317_v48 = vpop.xlane.xlu1 %316 }
  0xab   : > { %v353_v50 = vmul.f32 0.125, %v314_v47  ;;  %v354_v51 = vmul.f32 0.125, %v317_v48  ;;  %v382_v52 = vmul.f32 %v10414_v44, %v10414_v44  ;;  %v384_v53 = vmul.f32 %v10416_v45, %v10416_v45 }
  0xad   : > { %v10424_v54 = vsub.f32 %v287_v8, %v353_v50  ;;  %v10426_v55 = vsub.f32 %v288_v9, %v354_v51  ;;  %v400_v56 = vsel %vm299_vm0, %v382_v52, 0.0  ;;  %v406_v59 = vsel %vm299_vm0, %v384_v53, 0.0 }
  0xae   : > { %404 = vadd.xlane.f32.xlu0 %v403_v49  ;;  %401 = vadd.xlane.f32.xlu1 %v400_v56  ;;  %v320_v57 = vpop.xlane.xlu0 %319  ;;  %v323_v58 = vpop.xlane.xlu1 %322 }
  0xaf   : > { %v355_v60 = vmul.f32 0.125, %v320_v57  ;;  %v356_v61 = vmul.f32 0.125, %v323_v58  ;;  %v385_v62 = vmul.f32 %v10424_v54, %v10424_v54  ;;  %v386_v63 = vmul.f32 %v10426_v55, %v10426_v55 }
  0xb1   : > { %v10435_v0 = vsub.f32 %v10357_v12, %v355_v60  ;;  %v10438_v1 = vsub.f32 %v10360_v13, %v356_v61  ;;  %v409_v2 = vsel %vm299_vm0, %v385_v62, 0.0  ;;  %v412_v5 = vsel %vm299_vm0, %v386_v63, 0.0 }
  0xb2   : > { %407 = vadd.xlane.f32.xlu1 %v406_v59  ;;  %410 = vadd.xlane.f32.xlu0 %v409_v2  ;;  %v326_v3 = vpop.xlane.xlu0 %325  ;;  %v329_v4 = vpop.xlane.xlu1 %328 }
  0xb3   : > { %v357_v6 = vmul.f32 0.125, %v326_v3  ;;  %v358_v7 = vmul.f32 0.125, %v329_v4  ;;  %v387_v8 = vmul.f32 %v10435_v0, %v10435_v0  ;;  %v388_v9 = vmul.f32 %v10438_v1, %v10438_v1 }
  0xb5   : > { %v10447_v10 = vsub.f32 %v10367_v16, %v357_v6  ;;  %v10450_v11 = vsub.f32 %v10370_v17, %v358_v7  ;;  %v415_v12 = vsel %vm299_vm0, %v387_v8, 0.0  ;;  %v418_v15 = vsel %vm299_vm0, %v388_v9, 0.0 }
  0xb6   : > { %413 = vadd.xlane.f32.xlu1 %v412_v5  ;;  %416 = vadd.xlane.f32.xlu0 %v415_v12  ;;  %v332_v13 = vpop.xlane.xlu0 %331  ;;  %v335_v14 = vpop.xlane.xlu1 %334 }
  0xb7   : > { %v359_v18 = vmul.f32 0.125, %v332_v13  ;;  %v360_v19 = vmul.f32 0.125, %v335_v14  ;;  %v389_v22 = vmul.f32 %v10447_v10, %v10447_v10  ;;  %v390_v16 = vmul.f32 %v10450_v11, %v10450_v11 }
  0xb9   : > { %v10459_v23 = vsub.f32 %v10377_v20, %v359_v18  ;;  %v10462_v17 = vsub.f32 %v10380_v21, %v360_v19  ;;  %v421_v26 = vsel %vm299_vm0, %v389_v22, 0.0  ;;  %v424_v31 = vsel %vm299_vm0, %v390_v16, 0.0 }
  0xba   : > { %419 = vadd.xlane.f32.xlu1 %v418_v15  ;;  %422 = vadd.xlane.f32.xlu0 %v421_v26  ;;  %v338_v27 = vpop.xlane.xlu0 %337  ;;  %v341_v30 = vpop.xlane.xlu1 %340 }
  0xbb   : > { %v361_v32 = vmul.f32 0.125, %v338_v27  ;;  %v362_v33 = vmul.f32 0.125, %v341_v30  ;;  %v391_v34 = vmul.f32 %v10459_v23, %v10459_v23  ;;  %v392_v20 = vmul.f32 %v10462_v17, %v10462_v17 }
  0xbd   : > { %v10471_v35 = vsub.f32 %v10387_v24, %v361_v32  ;;  %v10474_v21 = vsub.f32 %v10390_v25, %v362_v33  ;;  %v427_v38 = vsel %vm299_vm0, %v391_v34, 0.0  ;;  %v430_v41 = vsel %vm299_vm0, %v392_v20, 0.0 }
  0xbe   : > { %425 = vadd.xlane.f32.xlu1 %v424_v31  ;;  %428 = vadd.xlane.f32.xlu0 %v427_v38  ;;  %v344_v39 = vpop.xlane.xlu0 %343  ;;  %v347_v40 = vpop.xlane.xlu1 %346  ;;  %v10506_v31 = vld [vmem:[%s12684_s1] ss:$0 sm:$0xff] }
  0xbf   : > { %v363_v42 = vmul.f32 0.125, %v344_v39  ;;  %v364_v43 = vmul.f32 0.125, %v347_v40  ;;  %v393_v46 = vmul.f32 %v10471_v35, %v10471_v35  ;;  %v394_v24 = vmul.f32 %v10474_v21, %v10474_v21 }
  0xc1   : > { %v10483_v47 = vsub.f32 %v10397_v28, %v363_v42  ;;  %v10486_v25 = vsub.f32 %v10400_v29, %v364_v43  ;;  %v433_v48 = vsel %vm299_vm0, %v393_v46, 0.0  ;;  %v436_v49 = vsel %vm299_vm0, %v394_v24, 0.0  ;;  %v563_v29 = vld [vmem:[%s12686_s3] sm:$0xf] }
  0xc2   : > { %431 = vadd.xlane.f32.xlu1 %v430_v41  ;;  %434 = vadd.xlane.f32.xlu0 %v433_v48  ;;  %v590_v53 = vsel %vm588_vm1, %v563_v29, 0  ;;  %v10513_v43 = vld [vmem:[%s12685_s2] ss:$0 sm:$0xff] }
  0xc3   : > { %v395_v50 = vmul.f32 %v10483_v47, %v10483_v47  ;;  %v396_v51 = vmul.f32 %v10486_v25, %v10486_v25  ;;  %9930 = vmatprep.subr.msk.bf16.mxu0 %vm588_vm1, %v563_v29  ;;  %9931 = vmatprep.subr.msk.bf16.mxu1 %vm588_vm1, %v563_v29 }
  0xc4   : > { %9023 = vmatpush3.bf16.msra.mxu0 %v590_v53  ;;  %9881 = vmatpush3.bf16.msra.mxu1 %v590_v53 }
  0xc5   : > { %v439_v52 = vsel %vm299_vm0, %v395_v50, 0.0  ;;  %v442_v28 = vsel %vm299_vm0, %v396_v51, 0.0 }
  0xc6   : > { %437 = vadd.xlane.f32.xlu1 %v436_v49  ;;  %440 = vadd.xlane.f32.xlu0 %v439_v52 }
  0xca   : > { %443 = vadd.xlane.f32.xlu1 %v442_v28 }
 0x137   : > { %v399_v56 = vpop.xlane.xlu0 %398 }
 0x138   : > { %v445_v57 = vmul.f32 0.125, %v399_v56 }
 0x13a   : > { %v461_v58 = vadd.f32 1e-05, %v445_v57 }
 0x13b   : > { %v402_v59 = vpop.xlane.xlu1 %401  ;;  %v405_v60 = vpop.xlane.xlu0 %404 }
 0x13c   : > { %9958 = vrsqrt.f32 %v461_v58  ;;  %v446_v61 = vmul.f32 0.125, %v402_v59  ;;  %v447_v62 = vmul.f32 0.125, %v405_v60 }
 0x13e   : > { %v462_v63 = vadd.f32 1e-05, %v446_v61  ;;  %v463_v2 = vadd.f32 1e-05, %v447_v62 }
 0x13f   : > { %v408_v3 = vpop.xlane.xlu1 %407  ;;  %v411_v4 = vpop.xlane.xlu0 %410 }
 0x140   : > { %9960 = vrsqrt.f32 %v462_v63  ;;  %v448_v5 = vmul.f32 0.125, %v408_v3  ;;  %v449_v6 = vmul.f32 0.125, %v411_v4 }
 0x141   : > { %9962 = vrsqrt.f32 %v463_v2 }
 0x142   : > { %v464_v7 = vadd.f32 1e-05, %v448_v5  ;;  %v465_v8 = vadd.f32 1e-05, %v449_v6 }
 0x143   : > { %v414_v9 = vpop.xlane.xlu1 %413  ;;  %v417_v12 = vpop.xlane.xlu0 %416 }
 0x144   : > { %9964 = vrsqrt.f32 %v464_v7  ;;  %v450_v13 = vmul.f32 0.125, %v414_v9  ;;  %v451_v14 = vmul.f32 0.125, %v417_v12 }
 0x145   : > { %9966 = vrsqrt.f32 %v465_v8 }
 0x146   : > { %v9959_v15 = vpop.eup %9958  ;;  %v466_v18 = vadd.f32 1e-05, %v450_v13  ;;  %v467_v19 = vadd.f32 1e-05, %v451_v14 }
 0x147   : > { %v420_v22 = vpop.xlane.xlu1 %419  ;;  %v423_v16 = vpop.xlane.xlu0 %422  ;;  %v493_v26 = vmul.f32 %v9959_v15, %v10406_v36 }
 0x148   : > { %9968 = vrsqrt.f32 %v466_v18  ;;  %v452_v27 = vmul.f32 0.125, %v420_v22  ;;  %v453_v30 = vmul.f32 0.125, %v423_v16 }
 0x149   : > { %9970 = vrsqrt.f32 %v467_v19  ;;  %v516_v41 = vmul.f32 %v10506_v31, %v493_v26 }
 0x14a   : > { %v9961_v32 = vpop.eup %9960  ;;  %v468_v33 = vadd.f32 1e-05, %v452_v27  ;;  %v469_v34 = vadd.f32 1e-05, %v453_v30 }
 0x14b   : > { %v9963_v20 = vpop.eup %9962  ;;  %v426_v38 = vpop.xlane.xlu1 %425  ;;  %v494_v40 = vmul.f32 %v9961_v32, %v10414_v44  ;;  %v539_v28 = vadd.f32 %v10513_v43, %v516_v41 }
 0x14c   : > { %v429_v39 = vpop.xlane.xlu0 %428  ;;  %9972 = vrsqrt.f32 %v468_v33  ;;  %v454_v36 = vmul.f32 0.125, %v426_v38  ;;  %v495_v46 = vmul.f32 %v9963_v20, %v10408_v37 }
 0x14d   : > { %v455_v42 = vmul.f32 0.125, %v429_v39  ;;  %9974 = vrsqrt.f32 %v469_v34  ;;  %v517_v24 = vmul.f32 %v10506_v31, %v494_v40 }
 0x14e   : > { %v9965_v48 = vpop.eup %9964  ;;  %v470_v49 = vadd.f32 1e-05, %v454_v36  ;;  %v518_v56 = vmul.f32 %v10506_v31, %v495_v46 }
 0x14f   : > { %v471_v50 = vadd.f32 1e-05, %v455_v42  ;;  %v9967_v51 = vpop.eup %9966  ;;  %v432_v44 = vpop.xlane.xlu1 %431  ;;  %v540_v29 = vadd.f32 %v10513_v43, %v517_v24  ;;  %v496_v53 = vmul.f32 %v9965_v48, %v10416_v45 }
 0x150   : > { %v435_v52 = vpop.xlane.xlu0 %434  ;;  %9976 = vrsqrt.f32 %v470_v49  ;;  %v456_v57 = vmul.f32 0.125, %v432_v44  ;;  %v497_v60 = vmul.f32 %v9967_v51, %v10424_v54  ;;  %v541_v45 = vadd.f32 %v10513_v43, %v518_v56 }
 0x151   : > { %v457_v37 = vmul.f32 0.125, %v435_v52  ;;  %9978 = vrsqrt.f32 %v471_v50  ;;  %v555_v58 = vpack.c.bf16 %v540_v29, %v539_v28  ;;  %v519_v59 = vmul.f32 %v10506_v31, %v496_v53 }
 0x152   : > { %v9969_v61 = vpop.eup %9968  ;;  %v472_v62 = vadd.f32 1e-05, %v456_v57  ;;  %v520_v7 = vmul.f32 %v10506_v31, %v497_v60 }
 0x153   : > { %v473_v63 = vadd.f32 1e-05, %v457_v37  ;;  %v9971_v2 = vpop.eup %9970  ;;  %v438_v3 = vpop.xlane.xlu1 %437  ;;  %9024 = vmatprep.mubr.msk.bf16.mxu0 %vm299_vm0, %v555_v58  ;;  %v542_v5 = vadd.f32 %v10513_v43, %v519_v59  ;;  %v498_v6 = vmul.f32 %v9969_v61, %v10426_v55 }
 0x154   : > { %v441_v4 = vpop.xlane.xlu0 %440  ;;  %9980 = vrsqrt.f32 %v472_v62  ;;  %v458_v8 = vmul.f32 0.125, %v438_v3  ;;  %v499_v54 = vmul.f32 %v9971_v2, %v10435_v0  ;;  %v543_v55 = vadd.f32 %v10513_v43, %v520_v7 }
 0x155   : > { %v459_v9 = vmul.f32 0.125, %v441_v4  ;;  %9982 = vrsqrt.f32 %v473_v63  ;;  %v556_v12 = vpack.c.bf16 %v542_v5, %v541_v45  ;;  %v521_v13 = vmul.f32 %v10506_v31, %v498_v6 }
 0x156   : > { %v9973_v14 = vpop.eup %9972  ;;  %v474_v15 = vadd.f32 1e-05, %v458_v8  ;;  %v522_v27 = vmul.f32 %v10506_v31, %v499_v54  ;;  %v12691_v4 = vmov 0.0  }
 0x157   : > { %v475_v18 = vadd.f32 1e-05, %v459_v9  ;;  %v9975_v19 = vpop.eup %9974  ;;  %v444_v22 = vpop.xlane.xlu1 %443  ;;  %9025 = vmatmul.mubr.msk.bf16.vlgmr.msra.gmra.mrb[0].mxu0 %vm299_vm0, %v556_v12  ;;  %v544_v16 = vadd.f32 %v10513_v43, %v521_v13  ;;  %v500_v26 = vmul.f32 %v9973_v14, %v10438_v1  ;;  %9040 = vmatprep.subr.bf16.mxu1 %v12691_v4 }
 0x158   : > { %9984 = vrsqrt.f32 %v474_v15  ;;  %v460_v0 = vmul.f32 0.125, %v444_v22  ;;  %v501_v30 = vmul.f32 %v9975_v19, %v10447_v10  ;;  %v545_v39 = vadd.f32 %v10513_v43, %v522_v27  ;;  %9064 = vmatprep.subr.bf16.mxu0 %v12691_v4 }
 0x159   : > { %9986 = vrsqrt.f32 %v475_v18  ;;  %v557_v32 = vpack.c.bf16 %v544_v16, %v543_v55  ;;  %v523_v33 = vmul.f32 %v10506_v31, %v500_v26 }
 0x15a   : > { %v9977_v34 = vpop.eup %9976  ;;  %v476_v20 = vadd.f32 1e-05, %v460_v0  ;;  %v524_v41 = vmul.f32 %v10506_v31, %v501_v30 }
 0x15b   : > { %v9979_v38 = vpop.eup %9978  ;;  %9028 = vmatprep.mubr.msk.bf16.mxu0 %vm299_vm0, %v557_v32  ;;  %v546_v40 = vadd.f32 %v10513_v43, %v523_v33  ;;  %v502_v1 = vmul.f32 %v9977_v34, %v10450_v11 }
 0x15c   : > { %9988 = vrsqrt.f32 %v476_v20  ;;  %v503_v10 = vmul.f32 %v9979_v38, %v10459_v23  ;;  %v547_v48 = vadd.f32 %v10513_v43, %v524_v41 }
 0x15d   : > { %v558_v36 = vpack.c.bf16 %v546_v40, %v545_v39  ;;  %v525_v42 = vmul.f32 %v10506_v31, %v502_v1 }
 0x15e   : > { %v9981_v46 = vpop.eup %9980  ;;  %v526_v11 = vmul.f32 %v10506_v31, %v503_v10 }
 0x15f   : > { %v9983_v24 = vpop.eup %9982  ;;  %9029 = vmatmul.mubr.msk.bf16.gmra.mrb[4].mxu0 %vm299_vm0, %v558_v36  ;;  %v548_v49 = vadd.f32 %v10513_v43, %v525_v42  ;;  %v504_v50 = vmul.f32 %v9981_v46, %v10462_v17 }
 0x160   : > { %v505_v51 = vmul.f32 %v9983_v24, %v10471_v35  ;;  %v549_v29 = vadd.f32 %v10513_v43, %v526_v11  ;;  %9066 = vmatprep.mubr.msk.bf16.mxu0 %vm10274_vm2, %v12691_v4 }
 0x161   : > { %v559_v44 = vpack.c.bf16 %v548_v49, %v547_v48  ;;  %v527_v23 = vmul.f32 %v10506_v31, %v504_v50 }
 0x162   : > { %v9985_v52 = vpop.eup %9984  ;;  %v528_v57 = vmul.f32 %v10506_v31, %v505_v51 }
 0x163   : > { %v9987_v28 = vpop.eup %9986  ;;  %9032 = vmatprep.mubr.msk.bf16.mxu1 %vm299_vm0, %v559_v44  ;;  %v550_v53 = vadd.f32 %v10513_v43, %v527_v23  ;;  %v506_v56 = vmul.f32 %v9985_v52, %v10474_v21 }
 0x164   : > { %v507_v17 = vmul.f32 %v9987_v28, %v10483_v47  ;;  %v551_v59 = vadd.f32 %v10513_v43, %v528_v57 }
 0x165   : > { %v560_v37 = vpack.c.bf16 %v550_v53, %v549_v29  ;;  %v529_v35 = vmul.f32 %v10506_v31, %v506_v56 }
 0x166   : > { %v9989_v58 = vpop.eup %9988  ;;  %v530_v62 = vmul.f32 %v10506_v31, %v507_v17 }
 0x167   : > { %9033 = vmatmul.mubr.msk.bf16.vlgmr.msra.gmra.mrb[0].mxu1 %vm299_vm0, %v560_v37  ;;  %v552_v60 = vadd.f32 %v10513_v43, %v529_v35  ;;  %v508_v61 = vmul.f32 %v9989_v58, %v10486_v25 }
 0x168   : > { %v553_v47 = vadd.f32 %v10513_v43, %v530_v62 }
 0x169   : > { %v561_v63 = vpack.c.bf16 %v552_v60, %v551_v59  ;;  %v531_v21 = vmul.f32 %v10506_v31, %v508_v61 }
 0x16b   : > { %9036 = vmatprep.mubr.msk.bf16.mxu1 %vm299_vm0, %v561_v63  ;;  %v554_v2 = vadd.f32 %v10513_v43, %v531_v21 }
 0x16d   : > { %v562_v3 = vpack.c.bf16 %v554_v2, %v553_v47 }
 0x16f   : > { %9037 = vmatmul.mubr.msk.bf16.gmra.mrb[4].mxu1 %vm299_vm0, %v562_v3 }
 0x170   : > { %9042 = vmatprep.mubr.msk.bf16.mxu1 %vm10274_vm2, %v12691_v4 }
 0x22a   : > { %v9026_v25 = vpop.f32.mrb[0].mxu0 }
 0x22b   : > { %v626_v31 = vpop.f32.mrb[1].mxu0  ;;  %v10582_v7 = vpack.c.bf16 %v9026_v25, %v9026_v25 }
 0x22c   : > { %v10574_v45 = vpack.c.bf16 %v626_v31, %v626_v31  ;;  %v9027_v43 = vpop.f32.mrb[2].mxu0 }
 0x22d   : > { %v629_v5 = vpop.f32.mrb[3].mxu0  ;;  %v10588_v14 = vpack.c.bf16 %v9027_v43, %v9027_v43 }
 0x22e   : > { %v10576_v6 = vpack.c.bf16 %v629_v5, %v629_v5  ;;  %708 = vrot.lane.b32.xlu0 %v10574_v45, %s10275_s14 }
 0x230   : > { %758 = vrot.lane.b32.xlu1 %v10576_v6, %s10275_s14 }
 0x232   : > { %v9030_v8 = vpop.f32.mrb[4].mxu0 }
 0x233   : > { %v642_v9 = vpop.f32.mrb[5].mxu0  ;;  %v10592_v15 = vpack.c.bf16 %v9030_v8, %v9030_v8 }
 0x234   : > { %v10584_v54 = vpack.c.bf16 %v642_v9, %v642_v9  ;;  %807 = vrot.lane.b32.xlu1 %v10582_v7, %s10275_s14  ;;  %v9031_v12 = vpop.f32.mrb[6].mxu0 }
 0x235   : > { %v645_v13 = vpop.f32.mrb[7].mxu0  ;;  %v10604_v27 = vpack.c.bf16 %v9031_v12, %v9031_v12  ;;  %v10763_v12 = vld [vmem:[%s12689_s6] sm:$0xff] }
 0x236   : > { %905 = vrot.lane.b32.xlu0 %v10584_v54, %s10275_s14  ;;  %v10596_v18 = vpack.c.bf16 %v645_v13, %v645_v13 }
 0x238   : > { %856 = vrot.lane.b32.xlu1 %v10588_v14, %s10275_s14 }
 0x23a   : > { %1003 = vrot.lane.b32.xlu0 %v10592_v15, %s10275_s14  ;;  %v9034_v19 = vpop.f32.mrb[0].mxu1 }
 0x23b   : > { %v658_v22 = vpop.f32.mrb[1].mxu1  ;;  %v10608_v0 = vpack.c.bf16 %v9034_v19, %v9034_v19 }
 0x23c   : > { %v10600_v55 = vpack.c.bf16 %v658_v22, %v658_v22  ;;  %954 = vrot.lane.b32.xlu1 %v10596_v18, %s10275_s14  ;;  %v9035_v16 = vpop.f32.mrb[2].mxu1 }
 0x23d   : > { %v661_v26 = vpop.f32.mrb[3].mxu1  ;;  %v10620_v39 = vpack.c.bf16 %v9035_v16, %v9035_v16 }
 0x23e   : > { %1101 = vrot.lane.b32.xlu0 %v10600_v55, %s10275_s14  ;;  %v10612_v30 = vpack.c.bf16 %v661_v26, %v661_v26 }
 0x240   : > { %1052 = vrot.lane.b32.xlu1 %v10604_v27, %s10275_s14 }
 0x242   : > { %1199 = vrot.lane.b32.xlu0 %v10608_v0, %s10275_s14  ;;  %v9038_v32 = vpop.f32.mrb[4].mxu1 }
 0x243   : > { %v674_v33 = vpop.f32.mrb[5].mxu1  ;;  %v10624_v40 = vpack.c.bf16 %v9038_v32, %v9038_v32 }
 0x244   : > { %v10616_v34 = vpack.c.bf16 %v674_v33, %v674_v33  ;;  %1150 = vrot.lane.b32.xlu1 %v10612_v30, %s10275_s14  ;;  %v9039_v20 = vpop.f32.mrb[6].mxu1 }
 0x245   : > { %v677_v38 = vpop.f32.mrb[7].mxu1  ;;  %v10634_v41 = vpack.c.bf16 %v9039_v20, %v9039_v20 }
 0x246   : > { %1297 = vrot.lane.b32.xlu0 %v10616_v34, %s10275_s14  ;;  %v10628_v1 = vpack.c.bf16 %v677_v38, %v677_v38 }
 0x248   : > { %1248 = vrot.lane.b32.xlu1 %v10620_v39, %s10275_s14 }
 0x24a   : > { %1395 = vrot.lane.b32.xlu0 %v10624_v40, %s10275_s14 }
 0x24c   : > { %1346 = vrot.lane.b32.xlu1 %v10628_v1, %s10275_s14 }
 0x24e   : > { %1716 = vrot.lane.b32.xlu0 %v10574_v45, %s10276_s15 }
 0x250   : > { %1444 = vrot.lane.b32.xlu1 %v10634_v41, %s10275_s14 }
 0x252   : > { %1812 = vrot.lane.b32.xlu0 %v10582_v7, %s10276_s15 }
 0x254   : > { %1764 = vrot.lane.b32.xlu1 %v10576_v6, %s10276_s15 }
 0x256   : > { %1908 = vrot.lane.b32.xlu0 %v10584_v54, %s10276_s15 }
 0x258   : > { %1860 = vrot.lane.b32.xlu1 %v10588_v14, %s10276_s15 }
 0x25a   : > { %2004 = vrot.lane.b32.xlu0 %v10592_v15, %s10276_s15 }
 0x25c   : > { %2052 = vrot.lane.b32.xlu1 %v10604_v27, %s10276_s15 }
 0x25e   : > { %2100 = vrot.lane.b32.xlu0 %v10600_v55, %s10276_s15 }
 0x260   : > { %2148 = vrot.lane.b32.xlu1 %v10612_v30, %s10276_s15 }
 0x264   : > { %2196 = vrot.lane.b32.xlu1 %v10608_v0, %s10276_s15 }
 0x268   : > { %1956 = vrot.lane.b32.xlu1 %v10596_v18, %s10276_s15 }
 0x2a0   : > { %v709_v10 = vpop.permute.xlu0 %708 }
 0x2a1   : > { %v715_v36 = vsel %vm710_vm3, %v709_v10, 0 }
 0x2a2   : > { %9041 = vmatpush3.bf16.xpose.msra.mxu1 %v715_v36  ;;  %v759_v42 = vpop.permute.xlu1 %758 }
 0x2a3   : > { %9046 = vmatprep.subr.bf16.mxu1 %v12691_v4  ;;  %v764_v24 = vsel %vm710_vm3, %v759_v42, 0 }
 0x2a6   : > { %v808_v49 = vpop.permute.xlu1 %807 }
 0x2a7   : > { %v813_v11 = vsel %vm710_vm3, %v808_v49, 0 }
 0x2a8   : > { %v906_v46 = vpop.permute.xlu0 %905 }
 0x2a9   : > { %v911_v48 = vsel %vm710_vm3, %v906_v46, 0  ;;  %9043 = vmatmul.mubr.msk.bf16.vlgmr.msra.gmra.mrb[8].mxu1 %vm710_vm3, %v10574_v45 }
 0x2aa   : > { %9047 = vmatpush3.bf16.xpose.msra.mxu1 %v764_v24  ;;  %9065 = vmatpush3.bf16.xpose.msra.mxu0 %v911_v48  ;;  %v857_v44 = vpop.permute.xlu1 %856 }
 0x2ab   : > { %9048 = vmatprep.mubr.msk.bf16.mxu1 %vm10274_vm2, %v12691_v4  ;;  %9052 = vmatprep.subr.bf16.mxu1 %v12691_v4  ;;  %v862_v52 = vsel %vm710_vm3, %v857_v44, 0 }
 0x2ac   : > { %9076 = vmatprep.subr.bf16.mxu0 %v12691_v4  ;;  %v1004_v50 = vpop.permute.xlu0 %1003 }
 0x2ad   : > { %v1009_v51 = vsel %vm710_vm3, %v1004_v50, 0 }
 0x2ae   : > { %v955_v29 = vpop.permute.xlu1 %954 }
 0x2af   : > { %v960_v56 = vsel %vm710_vm3, %v955_v29, 0 }
 0x2b0   : > { %v1102_v23 = vpop.permute.xlu0 %1101 }
 0x2b1   : > { %9049 = vmatmul.mubr.msk.bf16.vlgmr.msra.gmra.mrb[12].mxu1 %vm710_vm3, %v10576_v6  ;;  %9067 = vmatmul.mubr.msk.bf16.vlgmr.msra.gmra.mrb[8].mxu0 %vm710_vm3, %v10584_v54  ;;  %v1107_v28 = vsel %vm710_vm3, %v1102_v23, 0 }
 0x2b2   : > { %9053 = vmatpush3.bf16.xpose.msra.mxu1 %v813_v11  ;;  %9077 = vmatpush3.bf16.xpose.msra.mxu0 %v1009_v51  ;;  %v1053_v17 = vpop.permute.xlu1 %1052 }
 0x2b3   : > { %9054 = vmatprep.mubr.msk.bf16.mxu1 %vm10274_vm2, %v12691_v4  ;;  %9078 = vmatprep.mubr.msk.bf16.mxu0 %vm10274_vm2, %v12691_v4  ;;  %v1058_v35 = vsel %vm710_vm3, %v1053_v17, 0 }
 0x2b4   : > { %9058 = vmatprep.subr.bf16.mxu1 %v12691_v4  ;;  %9088 = vmatprep.subr.bf16.mxu0 %v12691_v4  ;;  %v1200_v53 = vpop.permute.xlu0 %1199 }
 0x2b5   : > { %v1205_v57 = vsel %vm710_vm3, %v1200_v53, 0 }
 0x2b6   : > { %v1151_v59 = vpop.permute.xlu1 %1150 }
 0x2b7   : > { %v1156_v61 = vsel %vm710_vm3, %v1151_v59, 0 }
 0x2b8   : > { %v1298_v37 = vpop.permute.xlu0 %1297 }
 0x2b9   : > { %9055 = vmatmul.mubr.msk.bf16.vlgmr.msra.gmra.mrb[16].mxu1 %vm710_vm3, %v10582_v7  ;;  %9079 = vmatmul.mubr.msk.bf16.vlgmr.msra.gmra.mrb[12].mxu0 %vm710_vm3, %v10592_v15  ;;  %v1303_v58 = vsel %vm710_vm3, %v1298_v37, 0 }
 0x2ba   : > { %9059 = vmatpush3.bf16.xpose.msra.mxu1 %v862_v52  ;;  %9089 = vmatpush3.bf16.xpose.msra.mxu0 %v1107_v28  ;;  %v1249_v63 = vpop.permute.xlu1 %1248 }
 0x2bb   : > { %9060 = vmatprep.mubr.msk.bf16.mxu1 %vm10274_vm2, %v12691_v4  ;;  %9090 = vmatprep.mubr.msk.bf16.mxu0 %vm10274_vm2, %v12691_v4  ;;  %v1254_v47 = vsel %vm710_vm3, %v1249_v63, 0 }
 0x2bc   : > { %9070 = vmatprep.subr.bf16.mxu1 %v12691_v4  ;;  %9100 = vmatprep.subr.bf16.mxu0 %v12691_v4  ;;  %v1396_v60 = vpop.permute.xlu0 %1395 }
 0x2bd   : > { %v1401_v62 = vsel %vm710_vm3, %v1396_v60, 0 }
 0x2be   : > { %v1347_v3 = vpop.permute.xlu1 %1346 }
 0x2bf   : > { %v1352_v25 = vsel %vm710_vm3, %v1347_v3, 0 }
 0x2c0   : > { %v1717_v21 = vpop.permute.xlu0 %1716 }
 0x2c1   : > { %9061 = vmatmul.mubr.msk.bf16.vlgmr.msra.gmra.mrb[20].mxu1 %vm710_vm3, %v10588_v14  ;;  %9091 = vmatmul.mubr.msk.bf16.vlgmr.msra.gmra.mrb[16].mxu0 %vm710_vm3, %v10600_v55  ;;  %v1722_v2 = vsel %vm588_vm1, %v1717_v21, 0 }
 0x2c2   : > { %9071 = vmatpush3.bf16.xpose.msra.mxu1 %v960_v56  ;;  %9101 = vmatpush3.bf16.xpose.msra.mxu0 %v1205_v57  ;;  %v1445_v31 = vpop.permute.xlu1 %1444 }
 0x2c3   : > { %9072 = vmatprep.mubr.msk.bf16.mxu1 %vm10274_vm2, %v12691_v4  ;;  %9102 = vmatprep.mubr.msk.bf16.mxu0 %vm10274_vm2, %v12691_v4  ;;  %v1450_v43 = vsel %vm710_vm3, %v1445_v31, 0 }
 0x2c4   : > { %9082 = vmatprep.subr.bf16.mxu1 %v12691_v4  ;;  %9112 = vmatprep.subr.bf16.mxu0 %v12691_v4 }
 0x2c6   : > { %v1765_v5 = vpop.permute.xlu1 %1764 }
 0x2c7   : > { %v1770_v8 = vsel %vm588_vm1, %v1765_v5, 0 }
 0x2c9   : > { %9073 = vmatmul.mubr.msk.bf16.vlgmr.msra.gmra.mrb[24].mxu1 %vm710_vm3, %v10596_v18  ;;  %9103 = vmatmul.mubr.msk.bf16.vlgmr.msra.gmra.mrb[20].mxu0 %vm710_vm3, %v10608_v0 }
 0x2ca   : > { %9083 = vmatpush3.bf16.xpose.msra.mxu1 %v1058_v35  ;;  %9113 = vmatpush3.bf16.xpose.msra.mxu0 %v1303_v58 }
 0x2cb   : > { %9084 = vmatprep.mubr.msk.bf16.mxu1 %vm10274_vm2, %v12691_v4  ;;  %9114 = vmatprep.mubr.msk.bf16.mxu0 %vm10274_vm2, %v12691_v4 }
 0x2cc   : > { %9094 = vmatprep.subr.bf16.mxu1 %v12691_v4  ;;  %9124 = vmatprep.subr.bf16.mxu0 %v12691_v4 }
 0x2d1   : > { %9085 = vmatmul.mubr.msk.bf16.vlgmr.msra.gmra.mrb[28].mxu1 %vm710_vm3, %v10604_v27  ;;  %9115 = vmatmul.mubr.msk.bf16.vlgmr.msra.gmra.mrb[24].mxu0 %vm710_vm3, %v10616_v34 }
 0x2d2   : > { %9095 = vmatpush3.bf16.xpose.msra.mxu1 %v1156_v61  ;;  %9125 = vmatpush3.bf16.xpose.msra.mxu0 %v1401_v62 }
 0x2d3   : > { %9096 = vmatprep.mubr.msk.bf16.mxu1 %vm10274_vm2, %v12691_v4  ;;  %9126 = vmatprep.mubr.msk.bf16.mxu0 %vm10274_vm2, %v12691_v4 }
 0x2d4   : > { %9106 = vmatprep.subr.bf16.mxu1 %v12691_v4  ;;  %9136 = vmatprep.subr.bf16.mxu0 %v12691_v4 }
 0x2d9   : > { %9097 = vmatmul.mubr.msk.bf16.vlgmr.msra.gmra.mrb[32].mxu1 %vm710_vm3, %v10612_v30  ;;  %9127 = vmatmul.mubr.msk.bf16.vlgmr.msra.gmra.mrb[28].mxu0 %vm710_vm3, %v10624_v40 }
 0x2da   : > { %9107 = vmatpush3.bf16.xpose.msra.mxu1 %v1254_v47  ;;  %9137 = vmatpush3.bf16.msra.mxu0 %v1722_v2 }
 0x2db   : > { %9108 = vmatprep.mubr.msk.bf16.mxu1 %vm10274_vm2, %v12691_v4  ;;  %9118 = vmatprep.subr.bf16.mxu1 %v12691_v4 }
 0x2dc   : > { %9138 = vmatprep.mubr.msk.bf16.mxu0 %vm10274_vm2, %v12691_v4  ;;  %9148 = vmatprep.subr.bf16.mxu0 %v12691_v4 }
 0x2e1   : > { %9109 = vmatmul.mubr.msk.bf16.vlgmr.msra.gmra.mrb[36].mxu1 %vm710_vm3, %v10620_v39 }
 0x2e2   : > { %9119 = vmatpush3.bf16.xpose.msra.mxu1 %v1352_v25  ;;  %9120 = vmatprep.mubr.msk.bf16.mxu1 %vm10274_vm2, %v12691_v4 }
 0x2e3   : > { %9130 = vmatprep.subr.bf16.mxu1 %v12691_v4 }
 0x2e9   : > { %9121 = vmatmul.mubr.msk.bf16.vlgmr.msra.gmra.mrb[40].mxu1 %vm710_vm3, %v10628_v1 }
 0x2ea   : > { %9131 = vmatpush3.bf16.xpose.msra.mxu1 %v1450_v43  ;;  %9132 = vmatprep.mubr.msk.bf16.mxu1 %vm10274_vm2, %v12691_v4 }
 0x2eb   : > { %9142 = vmatprep.subr.bf16.mxu1 %v12691_v4 }
 0x2f1   : > { %9133 = vmatmul.mubr.msk.bf16.vlgmr.msra.gmra.mrb[44].mxu1 %vm710_vm3, %v10634_v41 }
 0x2f2   : > { %9143 = vmatpush3.bf16.msra.mxu1 %v1770_v8  ;;  %9144 = vmatprep.mubr.msk.bf16.mxu1 %vm10274_vm2, %v12691_v4 }
 0x2f3   : > { %9154 = vmatprep.subr.bf16.mxu1 %v12691_v4 }
 0x37c   : > { %v751_v9 = vpop.f32.mrb[8].mxu1 }
 0x37d   : > { %v1492_v13 = vmul.f32 0.70710677, %v751_v9  ;;  %v9044_v19 = vpop.f32.mrb[9].mxu1 }
 0x37e   : > { %v754_v22 = vpop.f32.mrb[10].mxu1 }
 0x37f   : > { %v9045_v16 = vpop.f32.mrb[11].mxu1  ;;  %v10766_v26 = vadd.f32 %v1492_v13, %v10763_v12 }
 0x381   : > { %v1524_v32 = vsel %vm299_vm0, %v10766_v26, -inf }
 0x382   : > { %1525 = vmax.xlane.f32.xlu0 %v1524_v32 }
 0x384   : > { %v800_v33 = vpop.f32.mrb[12].mxu1  ;;  %v947_v20 = vpop.f32.mrb[8].mxu0 }
 0x385   : > { %v1493_v38 = vmul.f32 0.70710677, %v800_v33  ;;  %v1496_v10 = vmul.f32 0.70710677, %v947_v20  ;;  %v9050_v36 = vpop.f32.mrb[13].mxu1  ;;  %v9068_v42 = vpop.f32.mrb[9].mxu0 }
 0x386   : > { %v803_v46 = vpop.f32.mrb[14].mxu1  ;;  %v950_v24 = vpop.f32.mrb[10].mxu0 }
 0x387   : > { %v9051_v48 = vpop.f32.mrb[15].mxu1  ;;  %v9069_v49 = vpop.f32.mrb[11].mxu0  ;;  %v10771_v50 = vadd.f32 %v1493_v38, %v10763_v12  ;;  %v10774_v11 = vadd.f32 %v1496_v10, %v10763_v12 }
 0x389   : > { %v1527_v51 = vsel %vm299_vm0, %v10771_v50, -inf  ;;  %v1536_v44 = vsel %vm299_vm0, %v10774_v11, -inf }
 0x38a   : > { %1528 = vmax.xlane.f32.xlu1 %v1527_v51  ;;  %1537 = vmax.xlane.f32.xlu0 %v1536_v44 }
 0x38c   : > { %v849_v23 = vpop.f32.mrb[16].mxu1  ;;  %v1045_v52 = vpop.f32.mrb[12].mxu0 }
 0x38d   : > { %v1494_v28 = vmul.f32 0.70710677, %v849_v23  ;;  %v1498_v29 = vmul.f32 0.70710677, %v1045_v52  ;;  %v9056_v53 = vpop.f32.mrb[17].mxu1  ;;  %v9080_v56 = vpop.f32.mrb[13].mxu0 }
 0x38e   : > { %v852_v57 = vpop.f32.mrb[18].mxu1  ;;  %v1048_v17 = vpop.f32.mrb[14].mxu0 }
 0x38f   : > { %v9057_v37 = vpop.f32.mrb[19].mxu1  ;;  %v9081_v35 = vpop.f32.mrb[15].mxu0  ;;  %v10781_v58 = vadd.f32 %v1494_v28, %v10763_v12  ;;  %v10784_v59 = vadd.f32 %v1498_v29, %v10763_v12 }
 0x391   : > { %v1530_v60 = vsel %vm299_vm0, %v10781_v58, -inf  ;;  %v1542_v63 = vsel %vm299_vm0, %v10784_v59, -inf }
 0x392   : > { %1531 = vmax.xlane.f32.xlu0 %v1530_v60 }
 0x394   : > { %v898_v61 = vpop.f32.mrb[20].mxu1  ;;  %v1143_v62 = vpop.f32.mrb[16].mxu0 }
 0x395   : > { %v1495_v21 = vmul.f32 0.70710677, %v898_v61  ;;  %v1500_v47 = vmul.f32 0.70710677, %v1143_v62  ;;  %v9062_v2 = vpop.f32.mrb[21].mxu1  ;;  %v9092_v3 = vpop.f32.mrb[17].mxu0 }
 0x396   : > { %v901_v25 = vpop.f32.mrb[22].mxu1  ;;  %1543 = vmax.xlane.f32.xlu0 %v1542_v63  ;;  %v1146_v31 = vpop.f32.mrb[18].mxu0 }
 0x397   : > { %v9063_v43 = vpop.f32.mrb[23].mxu1  ;;  %v9093_v5 = vpop.f32.mrb[19].mxu0  ;;  %v10791_v8 = vadd.f32 %v1495_v21, %v10763_v12  ;;  %v10794_v9 = vadd.f32 %v1500_v47, %v10763_v12 }
 0x399   : > { %v1533_v13 = vsel %vm299_vm0, %v10791_v8, -inf  ;;  %v1548_v16 = vsel %vm299_vm0, %v10794_v9, -inf }
 0x39a   : > { %1534 = vmax.xlane.f32.xlu0 %v1533_v13 }
 0x39c   : > { %v996_v19 = vpop.f32.mrb[24].mxu1  ;;  %v1241_v22 = vpop.f32.mrb[20].mxu0 }
 0x39d   : > { %v1497_v32 = vmul.f32 0.70710677, %v996_v19  ;;  %v1502_v33 = vmul.f32 0.70710677, %v1241_v22  ;;  %v9074_v20 = vpop.f32.mrb[25].mxu1  ;;  %v9104_v38 = vpop.f32.mrb[21].mxu0 }
 0x39e   : > { %v999_v10 = vpop.f32.mrb[26].mxu1  ;;  %1549 = vmax.xlane.f32.xlu0 %v1548_v16  ;;  %v1244_v36 = vpop.f32.mrb[22].mxu0 }
 0x39f   : > { %v9075_v42 = vpop.f32.mrb[27].mxu1  ;;  %v9105_v46 = vpop.f32.mrb[23].mxu0  ;;  %v10801_v24 = vadd.f32 %v1497_v32, %v10763_v12  ;;  %v10804_v48 = vadd.f32 %v1502_v33, %v10763_v12 }
 0x3a1   : > { %v1539_v49 = vsel %vm299_vm0, %v10801_v24, -inf  ;;  %v1554_v51 = vsel %vm299_vm0, %v10804_v48, -inf }
 0x3a2   : > { %1540 = vmax.xlane.f32.xlu1 %v1539_v49  ;;  %1555 = vmax.xlane.f32.xlu0 %v1554_v51 }
 0x3a4   : > { %v1094_v44 = vpop.f32.mrb[28].mxu1  ;;  %v1339_v23 = vpop.f32.mrb[24].mxu0 }
 0x3a5   : > { %v1499_v52 = vmul.f32 0.70710677, %v1094_v44  ;;  %v1504_v28 = vmul.f32 0.70710677, %v1339_v23  ;;  %v9086_v29 = vpop.f32.mrb[29].mxu1  ;;  %v9116_v53 = vpop.f32.mrb[25].mxu0 }
 0x3a6   : > { %v1097_v56 = vpop.f32.mrb[30].mxu1  ;;  %v1342_v57 = vpop.f32.mrb[26].mxu0 }
 0x3a7   : > { %v9087_v17 = vpop.f32.mrb[31].mxu1  ;;  %v9117_v37 = vpop.f32.mrb[27].mxu0  ;;  %v10811_v35 = vadd.f32 %v1499_v52, %v10763_v12  ;;  %v10814_v60 = vadd.f32 %v1504_v28, %v10763_v12 }
 0x3a9   : > { %v1545_v61 = vsel %vm299_vm0, %v10811_v35, -inf  ;;  %v1560_v62 = vsel %vm299_vm0, %v10814_v60, -inf }
 0x3aa   : > { %1546 = vmax.xlane.f32.xlu1 %v1545_v61  ;;  %1561 = vmax.xlane.f32.xlu0 %v1560_v62 }
 0x3ac   : > { %v1192_v63 = vpop.f32.mrb[32].mxu1  ;;  %v1437_v21 = vpop.f32.mrb[28].mxu0 }
 0x3ad   : > { %v1501_v47 = vmul.f32 0.70710677, %v1192_v63  ;;  %v1506_v2 = vmul.f32 0.70710677, %v1437_v21  ;;  %v9098_v3 = vpop.f32.mrb[33].mxu1  ;;  %v9128_v25 = vpop.f32.mrb[29].mxu0 }
 0x3ae   : > { %v1195_v31 = vpop.f32.mrb[34].mxu1  ;;  %v1440_v43 = vpop.f32.mrb[30].mxu0 }
 0x3af   : > { %v9099_v5 = vpop.f32.mrb[35].mxu1  ;;  %v9129_v13 = vpop.f32.mrb[31].mxu0  ;;  %v10821_v19 = vadd.f32 %v1501_v47, %v10763_v12  ;;  %v10824_v22 = vadd.f32 %v1506_v2, %v10763_v12 }
 0x3b0   : > { %v10849_v63 = vpop.permute.xlu0 %1812  ;;  %v10851_v21 = vpop.permute.xlu1 %1860 }
 0x3b1   : > { %v1551_v16 = vsel %vm299_vm0, %v10821_v19, -inf  ;;  %v1566_v32 = vsel %vm299_vm0, %v10824_v22, -inf }
 0x3b2   : > { %1552 = vmax.xlane.f32.xlu1 %v1551_v16  ;;  %1567 = vmax.xlane.f32.xlu0 %v1566_v32 }
 0x3b4   : > { %v1290_v33 = vpop.f32.mrb[36].mxu1  ;;  %v10853_v47 = vpop.permute.xlu0 %1908 }
 0x3b5   : > { %v9110_v20 = vpop.f32.mrb[37].mxu1  ;;  %v1503_v28 = vmul.f32 0.70710677, %v1290_v33  ;;  %v10855_v2 = vpop.permute.xlu1 %2052 }
 0x3b6   : > { %v1293_v38 = vpop.f32.mrb[38].mxu1 }
 0x3b7   : > { %v9111_v10 = vpop.f32.mrb[39].mxu1  ;;  %v10835_v53 = vadd.f32 %v1503_v28, %v10763_v12 }
 0x3b8   : > { %v10857_v3 = vpop.permute.xlu0 %2004 }
 0x3b9   : > { %v1557_v57 = vsel %vm299_vm0, %v10835_v53, -inf  ;;  %v10859_v25 = vpop.permute.xlu1 %2148 }
 0x3bc   : > { %v1388_v36 = vpop.f32.mrb[40].mxu1  ;;  %v10861_v31 = vpop.permute.xlu0 %2100 }
 0x3bd   : > { %v9122_v42 = vpop.f32.mrb[41].mxu1  ;;  %v1505_v29 = vmul.f32 0.70710677, %v1388_v36 }
 0x3be   : > { %v1391_v46 = vpop.f32.mrb[42].mxu1 }
 0x3bf   : > { %v9123_v49 = vpop.f32.mrb[43].mxu1  ;;  %v10840_v17 = vadd.f32 %v1505_v29, %v10763_v12 }
 0x3c1   : > { %v1563_v37 = vsel %vm299_vm0, %v10840_v17, -inf }
 0x3c3   : > { %2244 = vrot.lane.b32.xlu1 %v10620_v39, %s10276_s15 }
 0x3c4   : > { %v1486_v51 = vpop.f32.mrb[44].mxu1 }
 0x3c5   : > { %v9134_v44 = vpop.f32.mrb[45].mxu1  ;;  %v1507_v56 = vmul.f32 0.70710677, %v1486_v51 }
 0x3c6   : > { %v1489_v23 = vpop.f32.mrb[46].mxu1 }
 0x3c7   : > { %v9135_v52 = vpop.f32.mrb[47].mxu1  ;;  %v10845_v61 = vadd.f32 %v1507_v56, %v10763_v12  ;;  %v10863_v12 = vpop.permute.xlu1 %2196 }
 0x3c8   : > { %2292 = vrot.lane.b32.xlu0 %v10616_v34, %s10276_s15 }
 0x3c9   : > { %v1569_v62 = vsel %vm299_vm0, %v10845_v61, -inf }
 0x3cb   : > { %v10866_v16 = vpop.permute.xlu1 %1956 }
 0x3e7   : > { %1558 = vmax.xlane.f32.xlu1 %v1557_v57 }
 0x3eb   : > { %1564 = vmax.xlane.f32.xlu1 %v1563_v37 }
 0x3ef   : > { %1570 = vmax.xlane.f32.xlu1 %v1569_v62 }
 0x40f   : > { %v1526_v43 = vpop.xlane.xlu0 %1525 }
 0x410   : > { %v1572_v5 = vsub.f32 %v10766_v26, %v1526_v43 }
 0x412   : > { %v1588_v13 = vmul.f32 1.442695, %v1572_v5 }
 0x414   : > { %9990 = vpow2.f32 %v1588_v13 }
 0x417   : > { %v1529_v32 = vpop.xlane.xlu1 %1528  ;;  %v1538_v33 = vpop.xlane.xlu0 %1537 }
 0x418   : > { %v1573_v20 = vsub.f32 %v10771_v50, %v1529_v32  ;;  %v1576_v38 = vsub.f32 %v10774_v11, %v1538_v33 }
 0x41a   : > { %v1590_v10 = vmul.f32 1.442695, %v1573_v20  ;;  %v1596_v36 = vmul.f32 1.442695, %v1576_v38 }
 0x41c   : > { %9992 = vpow2.f32 %v1590_v10 }
 0x41d   : > { %9994 = vpow2.f32 %v1596_v36 }
 0x41e   : > { %v10870_v42 = vpop.eup %9990 }
 0x41f   : > { %v1532_v46 = vpop.xlane.xlu0 %1531  ;;  %v1620_v26 = vsel %vm299_vm0, %v10870_v42, 0.0 }
 0x420   : > { %v1574_v49 = vsub.f32 %v10781_v58, %v1532_v46  ;;  %1621 = vadd.xlane.f32.xlu0 %v1620_v26 }
 0x422   : > { %v1592_v51 = vmul.f32 1.442695, %v1574_v49 }
 0x423   : > { %v1544_v44 = vpop.xlane.xlu0 %1543 }
 0x424   : > { %9996 = vpow2.f32 %v1592_v51  ;;  %v1578_v50 = vsub.f32 %v10784_v59, %v1544_v44 }
 0x426   : > { %v10876_v23 = vpop.eup %9992  ;;  %v1600_v11 = vmul.f32 1.442695, %v1578_v50 }
 0x427   : > { %v10878_v52 = vpop.eup %9994  ;;  %v1535_v28 = vpop.xlane.xlu0 %1534  ;;  %v1623_v29 = vsel %vm299_vm0, %v10876_v23, 0.0 }
 0x428   : > { %9998 = vpow2.f32 %v1600_v11  ;;  %v1575_v56 = vsub.f32 %v10791_v8, %v1535_v28  ;;  %1624 = vadd.xlane.f32.xlu1 %v1623_v29  ;;  %v1632_v58 = vsel %vm299_vm0, %v10878_v52, 0.0 }
 0x429   : > { %1633 = vadd.xlane.f32.xlu0 %v1632_v58 }
 0x42a   : > { %v1594_v57 = vmul.f32 1.442695, %v1575_v56 }
 0x42b   : > { %v1550_v37 = vpop.xlane.xlu0 %1549 }
 0x42c   : > { %10000 = vpow2.f32 %v1594_v57  ;;  %v1580_v59 = vsub.f32 %v10794_v9, %v1550_v37 }
 0x42e   : > { %v10886_v62 = vpop.eup %9996  ;;  %v1604_v43 = vmul.f32 1.442695, %v1580_v59 }
 0x42f   : > { %v1541_v5 = vpop.xlane.xlu1 %1540  ;;  %v1556_v13 = vpop.xlane.xlu0 %1555  ;;  %v1626_v32 = vsel %vm299_vm0, %v10886_v62, 0.0 }
 0x430   : > { %10002 = vpow2.f32 %v1604_v43  ;;  %v1577_v8 = vsub.f32 %v10801_v24, %v1541_v5  ;;  %v1582_v33 = vsub.f32 %v10804_v48, %v1556_v13  ;;  %1627 = vadd.xlane.f32.xlu0 %v1626_v32 }
 0x432   : > { %v10892_v20 = vpop.eup %9998  ;;  %v1598_v38 = vmul.f32 1.442695, %v1577_v8  ;;  %v1608_v10 = vmul.f32 1.442695, %v1582_v33 }
 0x433   : > { %v1638_v9 = vsel %vm299_vm0, %v10892_v20, 0.0 }
 0x434   : > { %10004 = vpow2.f32 %v1598_v38  ;;  %1639 = vadd.xlane.f32.xlu0 %v1638_v9 }
 0x435   : > { %10006 = vpow2.f32 %v1608_v10 }
 0x436   : > { %v10896_v36 = vpop.eup %10000 }
 0x437   : > { %v1547_v46 = vpop.xlane.xlu1 %1546  ;;  %v1629_v26 = vsel %vm299_vm0, %v10896_v36, 0.0 }
 0x438   : > { %v1579_v24 = vsub.f32 %v10811_v35, %v1547_v46  ;;  %1630 = vadd.xlane.f32.xlu1 %v1629_v26 }
 0x43a   : > { %v10901_v48 = vpop.eup %10002  ;;  %v1602_v49 = vmul.f32 1.442695, %v1579_v24 }
 0x43b   : > { %v1644_v51 = vsel %vm299_vm0, %v10901_v48, 0.0 }
 0x43c   : > { %10008 = vpow2.f32 %v1602_v49  ;;  %1645 = vadd.xlane.f32.xlu1 %v1644_v51 }
 0x43e   : > { %v10905_v44 = vpop.eup %10004 }
 0x43f   : > { %v1553_v50 = vpop.xlane.xlu1 %1552  ;;  %v1635_v11 = vsel %vm299_vm0, %v10905_v44, 0.0  ;;  %v10909_v28 = vpop.eup %10006 }
 0x440   : > { %v1581_v29 = vsub.f32 %v10821_v19, %v1553_v50  ;;  %1636 = vadd.xlane.f32.xlu1 %v1635_v11  ;;  %v1650_v56 = vsel %vm299_vm0, %v10909_v28, 0.0  ;;  %v1562_v19 = vpop.xlane.xlu0 %1561 }
 0x441   : > { %v1584_v43 = vsub.f32 %v10814_v60, %v1562_v19 }
 0x442   : > { %v1606_v35 = vmul.f32 1.442695, %v1581_v29 }
 0x443   : > { %v1612_v13 = vmul.f32 1.442695, %v1584_v43  ;;  %v10926_v33 = vpop.permute.xlu1 %2244 }
 0x444   : > { %10010 = vpow2.f32 %v1606_v35  ;;  %1651 = vadd.xlane.f32.xlu1 %v1650_v56  ;;  %v1568_v5 = vpop.xlane.xlu0 %1567 }
 0x445   : > { %v1586_v32 = vsub.f32 %v10824_v22, %v1568_v5  ;;  %10012 = vpow2.f32 %v1612_v13 }
 0x446   : > { %v10914_v58 = vpop.eup %10008 }
 0x447   : > { %v1641_v57 = vsel %vm299_vm0, %v10914_v58, 0.0  ;;  %v1616_v8 = vmul.f32 1.442695, %v1586_v32 }
 0x448   : > { %1642 = vadd.xlane.f32.xlu1 %v1641_v57  ;;  %v10961_v56 = vpop.permute.xlu0 %2292 }
 0x449   : > { %10014 = vpow2.f32 %v1616_v8  ;;  %v1818_v8 = vsel %vm588_vm1, %v10849_v63, 0 }
 0x44e   : > { %v10918_v37 = vpop.eup %10010 }
 0x44f   : > { %v1647_v59 = vsel %vm299_vm0, %v10918_v37, 0.0  ;;  %v10929_v26 = vpop.eup %10012 }
 0x450   : > { %1648 = vadd.xlane.f32.xlu0 %v1647_v59  ;;  %v1656_v49 = vsel %vm299_vm0, %v10929_v26, 0.0 }
 0x453   : > { %v10934_v22 = vpop.eup %10014 }
 0x454   : > { %v1662_v51 = vsel %vm299_vm0, %v10934_v22, 0.0 }
 0x459   : > { %2340 = vrot.lane.b32.xlu1 %v10628_v1, %s10276_s15 }
 0x474   : > { %v1559_v38 = vpop.xlane.xlu1 %1558 }
 0x475   : > { %v1583_v10 = vsub.f32 %v10835_v53, %v1559_v38 }
 0x477   : > { %v1610_v9 = vmul.f32 1.442695, %v1583_v10 }
 0x478   : > { %v1565_v46 = vpop.xlane.xlu1 %1564 }
 0x479   : > { %10016 = vpow2.f32 %v1610_v9  ;;  %v1585_v24 = vsub.f32 %v10840_v17, %v1565_v46  ;;  %v1866_v46 = vsel %vm588_vm1, %v10851_v21, 0 }
 0x47b   : > { %v1614_v60 = vmul.f32 1.442695, %v1585_v24 }
 0x47c   : > { %v1571_v29 = vpop.xlane.xlu1 %1570 }
 0x47d   : > { %10018 = vpow2.f32 %v1614_v60  ;;  %1657 = vadd.xlane.f32.xlu1 %v1656_v49  ;;  %v1587_v35 = vsub.f32 %v10845_v61, %v1571_v29 }
 0x47f   : > { %v1618_v57 = vmul.f32 1.442695, %v1587_v35 }
 0x481   : > { %1663 = vadd.xlane.f32.xlu1 %v1662_v51 }
 0x483   : > { %v10938_v53 = vpop.eup %10016 }
 0x484   : > { %v1653_v50 = vsel %vm299_vm0, %v10938_v53, 0.0 }
 0x485   : > { %1654 = vadd.xlane.f32.xlu0 %v1653_v50 }
 0x487   : > { %v10942_v11 = vpop.eup %10018 }
 0x488   : > { %v1659_v17 = vsel %vm299_vm0, %v10942_v11, 0.0 }
 0x489   : > { %1660 = vadd.xlane.f32.xlu0 %v1659_v17  ;;  %v1914_v17 = vsel %vm588_vm1, %v10853_v47, 0 }
 0x492   : > { %2436 = vrot.lane.b32.xlu1 %v10634_v41, %s10276_s15 }
 0x496   : > { %2544 = vrot.lane.b32.xlu1 %v10576_v6, %s10277_s18 }
 0x49a   : > { %2542 = vrot.lane.b32.xlu1 %v10576_v6, %s10278_s19 }
 0x49e   : > { %2644 = vrot.lane.b32.xlu1 %v10588_v14, %s10277_s18 }
 0x49f   : > { %2388 = vrot.lane.b32.xlu0 %v10624_v40, %s10276_s15 }
 0x4a2   : > { %2642 = vrot.lane.b32.xlu1 %v10588_v14, %s10278_s19 }
 0x4a6   : > { %2744 = vrot.lane.b32.xlu1 %v10596_v18, %s10277_s18 }
 0x4aa   : > { %2742 = vrot.lane.b32.xlu1 %v10596_v18, %s10278_s19 }
 0x4ad   : > { %v1622_v59 = vpop.xlane.xlu0 %1621 }
 0x4ae   : > { %10020 = vrcp.f32 %v1622_v59  ;;  %2844 = vrot.lane.b32.xlu1 %v10604_v27, %s10277_s18 }
 0x4af   : > { %10022 = vpow2.f32 %v1618_v57 }
 0x4b2   : > { %2842 = vrot.lane.b32.xlu1 %v10604_v27, %s10278_s19 }
 0x4b5   : > { %v1625_v19 = vpop.xlane.xlu1 %1624 }
 0x4b6   : > { %10024 = vrcp.f32 %v1625_v19  ;;  %2944 = vrot.lane.b32.xlu1 %v10612_v30, %s10277_s18  ;;  %v1634_v43 = vpop.xlane.xlu0 %1633 }
 0x4b8   : > { %v10021_v61 = vpop.eup %10020 }
 0x4b9   : > { %v1684_v5 = vmul.f32 %v10021_v61, %v10870_v42  ;;  %v10972_v13 = vpop.eup %10022 }
 0x4ba   : > { %2942 = vrot.lane.b32.xlu1 %v10612_v30, %s10278_s19  ;;  %v1665_v10 = vsel %vm299_vm0, %v10972_v13, 0.0 }
 0x4bb   : > { %v1700_v32 = vpack.c.bf16 %v1684_v5, %v1684_v5 }
 0x4bd   : > { %9139 = vmatmul.mubr.msk.bf16.vlgmr.msra.gmra.mrb[32].mxu0 %vm299_vm0, %v1700_v32  ;;  %v1628_v38 = vpop.xlane.xlu0 %1627 }
 0x4be   : > { %9149 = vmatpush3.bf16.msra.mxu0 %v1818_v8  ;;  %10026 = vrcp.f32 %v1628_v38  ;;  %1666 = vadd.xlane.f32.xlu0 %v1665_v10  ;;  %v2058_v38 = vsel %vm588_vm1, %v10855_v2, 0  ;;  %v2106_v10 = vsel %vm588_vm1, %v10861_v31, 0 }
 0x4bf   : > { %3044 = vrot.lane.b32.xlu1 %v10620_v39, %s10277_s18  ;;  %9150 = vmatprep.mubr.msk.bf16.mxu0 %vm10274_vm2, %v12691_v4  ;;  %10028 = vrcp.f32 %v1634_v43  ;;  %v2010_v43 = vsel %vm588_vm1, %v10857_v3, 0 }
 0x4c0   : > { %v10025_v42 = vpop.eup %10024  ;;  %9160 = vmatprep.subr.bf16.mxu0 %v12691_v4 }
 0x4c1   : > { %v1685_v63 = vmul.f32 %v10025_v42, %v10876_v23  ;;  %v1640_v60 = vpop.xlane.xlu0 %1639 }
 0x4c3   : > { %3042 = vrot.lane.b32.xlu1 %v10620_v39, %s10278_s19  ;;  %v1701_v9 = vpack.c.bf16 %v1685_v63, %v1685_v63 }
 0x4c5   : > { %9145 = vmatmul.mubr.msk.bf16.vlgmr.msra.gmra.mrb[48].mxu1 %vm299_vm0, %v1701_v9  ;;  %v1631_v24 = vpop.xlane.xlu1 %1630 }
 0x4c6   : > { %9155 = vmatpush3.bf16.msra.mxu1 %v1866_v46  ;;  %10030 = vrcp.f32 %v1631_v24  ;;  %9156 = vmatprep.mubr.msk.bf16.mxu1 %vm10274_vm2, %v12691_v4  ;;  %v2202_v24 = vsel %vm588_vm1, %v10863_v12, 0 }
 0x4c7   : > { %3144 = vrot.lane.b32.xlu1 %v10628_v1, %s10277_s18  ;;  %9166 = vmatprep.subr.bf16.mxu1 %v12691_v4  ;;  %10032 = vrcp.f32 %v1640_v60 }
 0x4c8   : > { %v10027_v23 = vpop.eup %10026 }
 0x4c9   : > { %v1646_v49 = vpop.xlane.xlu1 %1645  ;;  %v1686_v51 = vmul.f32 %v10027_v23, %v10886_v62  ;;  %v10029_v50 = vpop.eup %10028 }
 0x4ca   : > { %v1688_v62 = vmul.f32 %v10029_v50, %v10878_v52  ;;  %v1962_v52 = vsel %vm588_vm1, %v10866_v16, 0 }
 0x4cb   : > { %3142 = vrot.lane.b32.xlu1 %v10628_v1, %s10278_s19  ;;  %v1702_v21 = vpack.c.bf16 %v1686_v51, %v1686_v51 }
 0x4cc   : > { %v1704_v19 = vpack.c.bf16 %v1688_v62, %v1688_v62 }
 0x4cd   : > { %v1637_v29 = vpop.xlane.xlu1 %1636  ;;  %9151 = vmatmul.mubr.msk.bf16.vlgmr.msra.gmra.mrb[36].mxu0 %vm299_vm0, %v1702_v21 }
 0x4ce   : > { %10034 = vrcp.f32 %v1637_v29  ;;  %9161 = vmatpush3.bf16.msra.mxu0 %v1914_v17  ;;  %9162 = vmatprep.mubr.msk.bf16.mxu0 %vm10274_vm2, %v12691_v4 }
 0x4cf   : > { %3244 = vrot.lane.b32.xlu1 %v10634_v41, %s10277_s18  ;;  %9172 = vmatprep.subr.bf16.mxu0 %v12691_v4  ;;  %10036 = vrcp.f32 %v1646_v49  ;;  %v2250_v49 = vsel %vm588_vm1, %v10926_v33, 0 }
 0x4d0   : > { %v10031_v35 = vpop.eup %10030 }
 0x4d1   : > { %v1652_v57 = vpop.xlane.xlu1 %1651  ;;  %v1687_v59 = vmul.f32 %v10031_v35, %v10896_v36  ;;  %v10033_v61 = vpop.eup %10032 }
 0x4d2   : > { %v1690_v3 = vmul.f32 %v10033_v61, %v10892_v20 }
 0x4d3   : > { %3242 = vrot.lane.b32.xlu1 %v10634_v41, %s10278_s19  ;;  %v1703_v47 = vpack.c.bf16 %v1687_v59, %v1687_v59 }
 0x4d4   : > { %2494 = vrot.lane.b32.xlu0 %v10574_v45, %s10277_s18  ;;  %v1706_v8 = vpack.c.bf16 %v1690_v3, %v1690_v3 }
 0x4d5   : > { %9157 = vmatmul.mubr.msk.bf16.vlgmr.msra.gmra.mrb[52].mxu1 %vm299_vm0, %v1703_v47  ;;  %v1643_v5 = vpop.xlane.xlu1 %1642  ;;  %9163 = vmatmul.mubr.msk.bf16.vlgmr.msra.gmra.mrb[40].mxu0 %vm299_vm0, %v1704_v19 }
 0x4d6   : > { %9167 = vmatpush3.bf16.msra.mxu1 %v1962_v52  ;;  %10038 = vrcp.f32 %v1643_v5  ;;  %9173 = vmatpush3.bf16.msra.mxu0 %v2010_v43 }
 0x4d7   : > { %3564 = vrot.lane.b32.xlu1 %v10576_v6, %s10279_s20  ;;  %9168 = vmatprep.mubr.msk.bf16.mxu1 %vm10274_vm2, %v12691_v4  ;;  %10040 = vrcp.f32 %v1652_v57 }
 0x4d8   : > { %v10035_v36 = vpop.eup %10034  ;;  %2492 = vrot.lane.b32.xlu0 %v10574_v45, %s10278_s19  ;;  %9174 = vmatprep.mubr.msk.bf16.mxu0 %vm10274_vm2, %v12691_v4 }
 0x4d9   : > { %9178 = vmatprep.subr.bf16.mxu1 %v12691_v4  ;;  %9184 = vmatprep.subr.bf16.mxu0 %v12691_v4  ;;  %v1689_v16 = vmul.f32 %v10035_v36, %v10905_v44  ;;  %v10037_v20 = vpop.eup %10036 }
 0x4da   : > { %v1692_v42 = vmul.f32 %v10037_v20, %v10901_v48  ;;  %v2154_v48 = vsel %vm588_vm1, %v10859_v25, 0 }
 0x4db   : > { %3660 = vrot.lane.b32.xlu1 %v10588_v14, %s10279_s20  ;;  %v1705_v32 = vpack.c.bf16 %v1689_v16, %v1689_v16 }
 0x4dc   : > { %2594 = vrot.lane.b32.xlu0 %v10582_v7, %s10277_s18  ;;  %v1708_v9 = vpack.c.bf16 %v1692_v42, %v1692_v42 }
 0x4dd   : > { %9169 = vmatmul.mubr.msk.bf16.vlgmr.msra.gmra.mrb[56].mxu1 %vm299_vm0, %v1705_v32  ;;  %9175 = vmatmul.mubr.msk.bf16.vlgmr.msra.gmra.mrb[44].mxu0 %vm299_vm0, %v1706_v8  ;;  %v1649_v44 = vpop.xlane.xlu0 %1648 }
 0x4de   : > { %9179 = vmatpush3.bf16.msra.mxu1 %v2058_v38  ;;  %9185 = vmatpush3.bf16.msra.mxu0 %v2106_v10  ;;  %10042 = vrcp.f32 %v1649_v44 }
 0x4df   : > { %3756 = vrot.lane.b32.xlu1 %v10596_v18, %s10279_s20  ;;  %9180 = vmatprep.mubr.msk.bf16.mxu1 %vm10274_vm2, %v12691_v4 }
 0x4e0   : > { %v10039_v2 = vpop.eup %10038  ;;  %2592 = vrot.lane.b32.xlu0 %v10582_v7, %s10278_s19  ;;  %9186 = vmatprep.mubr.msk.bf16.mxu0 %vm10274_vm2, %v12691_v4 }
 0x4e1   : > { %9190 = vmatprep.subr.bf16.mxu1 %v12691_v4  ;;  %9196 = vmatprep.subr.bf16.mxu0 %v12691_v4  ;;  %v1691_v31 = vmul.f32 %v10039_v2, %v10914_v58  ;;  %v10041_v46 = vpop.eup %10040 }
 0x4e2   : > { %v1694_v58 = vmul.f32 %v10041_v46, %v10909_v28  ;;  %v2298_v28 = vsel %vm588_vm1, %v10961_v56, 0 }
 0x4e3   : > { %3852 = vrot.lane.b32.xlu1 %v10604_v27, %s10279_s20  ;;  %v1707_v63 = vpack.c.bf16 %v1691_v31, %v1691_v31 }
 0x4e4   : > { %2694 = vrot.lane.b32.xlu0 %v10584_v54, %s10277_s18  ;;  %v1710_v23 = vpack.c.bf16 %v1694_v58, %v1694_v58 }
 0x4e5   : > { %9181 = vmatmul.mubr.msk.bf16.vlgmr.msra.gmra.mrb[60].mxu1 %vm299_vm0, %v1707_v63  ;;  %9187 = vmatmul.mubr.msk.bf16.vlgmr.msra.gmra.mrb[48].mxu0 %vm299_vm0, %v1708_v9 }
 0x4e6   : > { %9191 = vmatpush3.bf16.msra.mxu1 %v2154_v48  ;;  %9197 = vmatpush3.bf16.msra.mxu0 %v2202_v24 }
 0x4e7   : > { %9192 = vmatprep.mubr.msk.bf16.mxu1 %vm10274_vm2, %v12691_v4  ;;  %9198 = vmatprep.mubr.msk.bf16.mxu0 %vm10274_vm2, %v12691_v4 }
 0x4e8   : > { %v10043_v60 = vpop.eup %10042  ;;  %2692 = vrot.lane.b32.xlu0 %v10584_v54, %s10278_s19  ;;  %9202 = vmatprep.subr.bf16.mxu1 %v12691_v4 }
 0x4e9   : > { %9208 = vmatprep.subr.bf16.mxu0 %v12691_v4  ;;  %v1693_v25 = vmul.f32 %v10043_v60, %v10918_v37  ;;  %v2341_v37 = vpop.permute.xlu1 %2340 }
 0x4ea   : > { %v2346_v52 = vsel %vm588_vm1, %v2341_v37, 0 }
 0x4eb   : > { %v1709_v12 = vpack.c.bf16 %v1693_v25, %v1693_v25 }
 0x4ec   : > { %2794 = vrot.lane.b32.xlu0 %v10592_v15, %s10277_s18 }
 0x4ed   : > { %9193 = vmatmul.mubr.msk.bf16.vlgmr.msra.gmra.mrb[64].mxu1 %vm299_vm0, %v1709_v12  ;;  %9199 = vmatmul.mubr.msk.bf16.vlgmr.msra.gmra.mrb[52].mxu0 %vm299_vm0, %v1710_v23 }
 0x4ee   : > { %9203 = vmatpush3.bf16.msra.mxu1 %v2250_v49  ;;  %9209 = vmatpush3.bf16.msra.mxu0 %v2298_v28 }
 0x4ef   : > { %9210 = vmatprep.mubr.msk.bf16.mxu0 %vm10274_vm2, %v12691_v4  ;;  %9220 = vmatprep.subr.bf16.mxu0 %v12691_v4 }
 0x4f0   : > { %2792 = vrot.lane.b32.xlu0 %v10592_v15, %s10278_s19  ;;  %9204 = vmatprep.mubr.msk.bf16.mxu1 %vm10274_vm2, %v12691_v4 }
 0x4f1   : > { %9214 = vmatprep.subr.bf16.mxu1 %v12691_v4 }
 0x4f4   : > { %2894 = vrot.lane.b32.xlu0 %v10600_v55, %s10277_s18 }
 0x4f8   : > { %2892 = vrot.lane.b32.xlu0 %v10600_v55, %s10278_s19 }
 0x4fc   : > { %2994 = vrot.lane.b32.xlu0 %v10608_v0, %s10277_s18 }
 0x500   : > { %2992 = vrot.lane.b32.xlu0 %v10608_v0, %s10278_s19 }
 0x504   : > { %3094 = vrot.lane.b32.xlu0 %v10616_v34, %s10277_s18 }
 0x508   : > { %3092 = vrot.lane.b32.xlu0 %v10616_v34, %s10278_s19 }
 0x50a   : > { %v1658_v33 = vpop.xlane.xlu1 %1657 }
 0x50b   : > { %10044 = vrcp.f32 %v1658_v33 }
 0x50c   : > { %3194 = vrot.lane.b32.xlu0 %v10624_v40, %s10277_s18 }
 0x50e   : > { %v1664_v56 = vpop.xlane.xlu1 %1663 }
 0x50f   : > { %10046 = vrcp.f32 %v1664_v56 }
 0x510   : > { %3192 = vrot.lane.b32.xlu0 %v10624_v40, %s10278_s19 }
 0x512   : > { %v1655_v51 = vpop.xlane.xlu0 %1654 }
 0x513   : > { %10048 = vrcp.f32 %v1655_v51 }
 0x514   : > { %3516 = vrot.lane.b32.xlu0 %v10574_v45, %s10279_s20 }
 0x515   : > { %v10045_v21 = vpop.eup %10044 }
 0x516   : > { %v1661_v50 = vpop.xlane.xlu0 %1660  ;;  %v1696_v17 = vmul.f32 %v10045_v21, %v10929_v26 }
 0x517   : > { %10050 = vrcp.f32 %v1661_v50 }
 0x518   : > { %3612 = vrot.lane.b32.xlu0 %v10582_v7, %s10279_s20  ;;  %v1712_v29 = vpack.c.bf16 %v1696_v17, %v1696_v17 }
 0x519   : > { %v10047_v62 = vpop.eup %10046 }
 0x51a   : > { %9211 = vmatmul.mubr.msk.bf16.vlgmr.msra.gmra.mrb[56].mxu0 %vm299_vm0, %v1712_v29  ;;  %v2389_v35 = vpop.permute.xlu0 %2388  ;;  %v1698_v26 = vmul.f32 %v10047_v62, %v10934_v22 }
 0x51b   : > { %v2394_v57 = vsel %vm588_vm1, %v2389_v35, 0  ;;  %9222 = vmatprep.mubr.msk.bf16.mxu0 %vm10274_vm2, %v12691_v4 }
 0x51c   : > { %3708 = vrot.lane.b32.xlu0 %v10584_v54, %s10279_s20  ;;  %9221 = vmatpush3.bf16.msra.mxu0 %v2394_v57  ;;  %v1714_v61 = vpack.c.bf16 %v1698_v26, %v1698_v26 }
 0x51d   : > { %v10049_v59 = vpop.eup %10048  ;;  %9232 = vmatprep.subr.bf16.mxu0 %v12691_v4 }
 0x51e   : > { %v1695_v47 = vmul.f32 %v10049_v59, %v10938_v53  ;;  %v2437_v53 = vpop.permute.xlu1 %2436 }
 0x51f   : > { %v2442_v3 = vsel %vm588_vm1, %v2437_v53, 0 }
 0x520   : > { %3804 = vrot.lane.b32.xlu0 %v10592_v15, %s10279_s20  ;;  %v1711_v19 = vpack.c.bf16 %v1695_v47, %v1695_v47 }
 0x521   : > { %v10051_v43 = vpop.eup %10050 }
 0x522   : > { %9205 = vmatmul.mubr.msk.bf16.vlgmr.msra.gmra.mrb[68].mxu1 %vm299_vm0, %v1711_v19  ;;  %9223 = vmatmul.mubr.msk.bf16.vlgmr.msra.gmra.mrb[60].mxu0 %vm299_vm0, %v1714_v61  ;;  %v1697_v22 = vmul.f32 %v10051_v43, %v10942_v11  ;;  %v2545_v36 = vpop.permute.xlu1 %2544 }
 0x523   : > { %9215 = vmatpush3.bf16.msra.mxu1 %v2346_v52  ;;  %9216 = vmatprep.mubr.msk.bf16.mxu1 %vm10274_vm2, %v12691_v4  ;;  %v2550_v48 = vsel %vm710_vm3, %v2545_v36, 0 }
 0x524   : > { %9226 = vmatprep.subr.bf16.mxu1 %v12691_v4  ;;  %9234 = vmatprep.mubr.msk.bf16.mxu0 %vm10274_vm2, %v12691_v4  ;;  %v1713_v5 = vpack.c.bf16 %v1697_v22, %v1697_v22 }
 0x526   : > { %v2543_v16 = vpop.permute.xlu1 %2542 }
 0x52a   : > { %9217 = vmatmul.mubr.msk.bf16.vlgmr.msra.gmra.mrb[72].mxu1 %vm299_vm0, %v1713_v5  ;;  %v2645_v32 = vpop.permute.xlu1 %2644 }
 0x52b   : > { %9227 = vmatpush3.bf16.msra.mxu1 %v2442_v3  ;;  %9228 = vmatprep.mubr.msk.bf16.mxu1 %vm10274_vm2, %v12691_v4  ;;  %v2650_v12 = vsel %vm710_vm3, %v2645_v32, 0 }
 0x52c   : > { %9238 = vmatprep.subr.bf16.mxu1 %v12691_v4 }
 0x52e   : > { %v2643_v8 = vpop.permute.xlu1 %2642 }
 0x532   : > { %v2745_v38 = vpop.permute.xlu1 %2744 }
 0x533   : > { %v2750_v33 = vsel %vm710_vm3, %v2745_v38, 0 }
 0x536   : > { %v2743_v2 = vpop.permute.xlu1 %2742 }
 0x53a   : > { %v2845_v58 = vpop.permute.xlu1 %2844 }
 0x53b   : > { %v2850_v17 = vsel %vm710_vm3, %v2845_v58, 0 }
 0x53e   : > { %v2843_v25 = vpop.permute.xlu1 %2842 }
 0x542   : > { %v2945_v28 = vpop.permute.xlu1 %2944 }
 0x543   : > { %v2950_v59 = vsel %vm710_vm3, %v2945_v28, 0 }
 0x546   : > { %v2943_v51 = vpop.permute.xlu1 %2942 }
 0x54a   : > { %v3045_v62 = vpop.permute.xlu1 %3044 }
 0x54b   : > { %v1667_v11 = vpop.xlane.xlu0 %1666  ;;  %v3050_v52 = vsel %vm710_vm3, %v3045_v62, 0 }
 0x54c   : > { %10052 = vrcp.f32 %v1667_v11 }
 0x54e   : > { %v3043_v26 = vpop.permute.xlu1 %3042 }
 0x54f   : > { %v2495_v20 = vpop.permute.xlu0 %2494 }
 0x550   : > { %v2500_v10 = vsel %vm710_vm3, %v2495_v20, 0 }
 0x551   : > { %9233 = vmatpush3.bf16.xpose.msra.mxu0 %v2500_v10 }
 0x552   : > { %9244 = vmatprep.subr.bf16.mxu0 %v12691_v4  ;;  %v3145_v61 = vpop.permute.xlu1 %3144 }
 0x553   : > { %v2493_v44 = vpop.permute.xlu0 %2492  ;;  %v3150_v36 = vsel %vm710_vm3, %v3145_v61, 0 }
 0x556   : > { %v10053_v42 = vpop.eup %10052  ;;  %v3143_v53 = vpop.permute.xlu1 %3142 }
 0x557   : > { %v2595_v31 = vpop.permute.xlu0 %2594  ;;  %v1699_v63 = vmul.f32 %v10053_v42, %v10972_v13 }
 0x558   : > { %v2600_v9 = vsel %vm710_vm3, %v2595_v31, 0  ;;  %9235 = vmatmul.mubr.msk.bf16.vlgmr.msra.gmra.mrb[64].mxu0 %vm710_vm3, %v2493_v44 }
 0x559   : > { %9245 = vmatpush3.bf16.xpose.msra.mxu0 %v2600_v9  ;;  %v1715_v46 = vpack.c.bf16 %v1699_v63, %v1699_v63  ;;  %9246 = vmatprep.mubr.msk.bf16.mxu0 %vm10274_vm2, %v12691_v4 }
 0x55a   : > { %9256 = vmatprep.subr.bf16.mxu0 %v12691_v4  ;;  %v3245_v32 = vpop.permute.xlu1 %3244 }
 0x55b   : > { %9229 = vmatmul.mubr.msk.bf16.vlgmr.msra.gmra.mrb[76].mxu1 %vm299_vm0, %v1715_v46  ;;  %v2593_v24 = vpop.permute.xlu0 %2592  ;;  %v3250_v42 = vsel %vm710_vm3, %v3245_v32, 0 }
 0x55c   : > { %9239 = vmatpush3.bf16.xpose.msra.mxu1 %v2550_v48  ;;  %9240 = vmatprep.mubr.msk.bf16.mxu1 %vm10274_vm2, %v12691_v4 }
 0x55d   : > { %9250 = vmatprep.subr.bf16.mxu1 %v12691_v4 }
 0x55e   : > { %v3243_v10 = vpop.permute.xlu1 %3242 }
 0x55f   : > { %v2695_v13 = vpop.permute.xlu0 %2694 }
 0x560   : > { %v2700_v60 = vsel %vm710_vm3, %v2695_v13, 0  ;;  %9247 = vmatmul.mubr.msk.bf16.vlgmr.msra.gmra.mrb[68].mxu0 %vm710_vm3, %v2593_v24 }
 0x561   : > { %9257 = vmatpush3.bf16.xpose.msra.mxu0 %v2700_v60  ;;  %9258 = vmatprep.mubr.msk.bf16.mxu0 %vm10274_vm2, %v12691_v4 }
 0x562   : > { %9268 = vmatprep.subr.bf16.mxu0 %v12691_v4  ;;  %v3565_v31 = vpop.permute.xlu1 %3564 }
 0x563   : > { %9241 = vmatmul.mubr.msk.bf16.vlgmr.msra.gmra.mrb[80].mxu1 %vm710_vm3, %v2543_v16  ;;  %v2693_v23 = vpop.permute.xlu0 %2692  ;;  %v3570_v24 = vsel %vm588_vm1, %v3565_v31, 0 }
 0x564   : > { %9251 = vmatpush3.bf16.xpose.msra.mxu1 %v2650_v12  ;;  %9252 = vmatprep.mubr.msk.bf16.mxu1 %vm10274_vm2, %v12691_v4 }
 0x565   : > { %9262 = vmatprep.subr.bf16.mxu1 %v12691_v4 }
 0x567   : > { %v2795_v49 = vpop.permute.xlu0 %2794 }
 0x568   : > { %v2800_v37 = vsel %vm710_vm3, %v2795_v49, 0  ;;  %9259 = vmatmul.mubr.msk.bf16.vlgmr.msra.gmra.mrb[72].mxu0 %vm710_vm3, %v2693_v23 }
 0x569   : > { %9269 = vmatpush3.bf16.xpose.msra.mxu0 %v2800_v37  ;;  %9270 = vmatprep.mubr.msk.bf16.mxu0 %vm10274_vm2, %v12691_v4 }
 0x56a   : > { %9280 = vmatprep.subr.bf16.mxu0 %v12691_v4 }
 0x56b   : > { %9253 = vmatmul.mubr.msk.bf16.vlgmr.msra.gmra.mrb[84].mxu1 %vm710_vm3, %v2643_v8  ;;  %v2793_v56 = vpop.permute.xlu0 %2792 }
 0x56c   : > { %9263 = vmatpush3.bf16.xpose.msra.mxu1 %v2750_v33  ;;  %9264 = vmatprep.mubr.msk.bf16.mxu1 %vm10274_vm2, %v12691_v4 }
 0x56d   : > { %9274 = vmatprep.subr.bf16.mxu1 %v12691_v4 }
 0x56f   : > { %v2895_v21 = vpop.permute.xlu0 %2894 }
 0x570   : > { %v2900_v50 = vsel %vm710_vm3, %v2895_v21, 0  ;;  %9271 = vmatmul.mubr.msk.bf16.vlgmr.msra.gmra.mrb[76].mxu0 %vm710_vm3, %v2793_v56 }
 0x571   : > { %9281 = vmatpush3.bf16.xpose.msra.mxu0 %v2900_v50  ;;  %9282 = vmatprep.mubr.msk.bf16.mxu0 %vm10274_vm2, %v12691_v4 }
 0x572   : > { %9292 = vmatprep.subr.bf16.mxu0 %v12691_v4 }
 0x573   : > { %9265 = vmatmul.mubr.msk.bf16.vlgmr.msra.gmra.mrb[88].mxu1 %vm710_vm3, %v2743_v2  ;;  %v2893_v29 = vpop.permute.xlu0 %2892 }
 0x574   : > { %9275 = vmatpush3.bf16.xpose.msra.mxu1 %v2850_v17  ;;  %9276 = vmatprep.mubr.msk.bf16.mxu1 %vm10274_vm2, %v12691_v4 }
 0x575   : > { %9286 = vmatprep.subr.bf16.mxu1 %v12691_v4 }
 0x577   : > { %v2995_v35 = vpop.permute.xlu0 %2994 }
 0x578   : > { %v3000_v57 = vsel %vm710_vm3, %v2995_v35, 0  ;;  %9283 = vmatmul.mubr.msk.bf16.vlgmr.msra.gmra.mrb[80].mxu0 %vm710_vm3, %v2893_v29 }
 0x579   : > { %9293 = vmatpush3.bf16.xpose.msra.mxu0 %v3000_v57  ;;  %9294 = vmatprep.mubr.msk.bf16.mxu0 %vm10274_vm2, %v12691_v4 }
 0x57a   : > { %9304 = vmatprep.subr.bf16.mxu0 %v12691_v4 }
 0x57b   : > { %9277 = vmatmul.mubr.msk.bf16.vlgmr.msra.gmra.mrb[92].mxu1 %vm710_vm3, %v2843_v25  ;;  %v2993_v47 = vpop.permute.xlu0 %2992 }
 0x57c   : > { %9287 = vmatpush3.bf16.xpose.msra.mxu1 %v2950_v59  ;;  %9288 = vmatprep.mubr.msk.bf16.mxu1 %vm10274_vm2, %v12691_v4 }
 0x57d   : > { %9298 = vmatprep.subr.bf16.mxu1 %v12691_v4 }
 0x57f   : > { %v3095_v19 = vpop.permute.xlu0 %3094 }
 0x580   : > { %v3100_v43 = vsel %vm710_vm3, %v3095_v19, 0  ;;  %9295 = vmatmul.mubr.msk.bf16.vlgmr.msra.gmra.mrb[84].mxu0 %vm710_vm3, %v2993_v47 }
 0x581   : > { %9305 = vmatpush3.bf16.xpose.msra.mxu0 %v3100_v43  ;;  %9306 = vmatprep.mubr.msk.bf16.mxu0 %vm10274_vm2, %v12691_v4 }
 0x582   : > { %9316 = vmatprep.subr.bf16.mxu0 %v12691_v4 }
 0x583   : > { %9289 = vmatmul.mubr.msk.bf16.vlgmr.msra.gmra.mrb[96].mxu1 %vm710_vm3, %v2943_v51  ;;  %v3093_v22 = vpop.permute.xlu0 %3092 }
 0x584   : > { %9299 = vmatpush3.bf16.xpose.msra.mxu1 %v3050_v52  ;;  %9300 = vmatprep.mubr.msk.bf16.mxu1 %vm10274_vm2, %v12691_v4 }
 0x585   : > { %9310 = vmatprep.subr.bf16.mxu1 %v12691_v4 }
 0x587   : > { %v3195_v5 = vpop.permute.xlu0 %3194 }
 0x588   : > { %v3200_v3 = vsel %vm710_vm3, %v3195_v5, 0  ;;  %9307 = vmatmul.mubr.msk.bf16.vlgmr.msra.gmra.mrb[88].mxu0 %vm710_vm3, %v3093_v22 }
 0x589   : > { %9317 = vmatpush3.bf16.xpose.msra.mxu0 %v3200_v3  ;;  %9318 = vmatprep.mubr.msk.bf16.mxu0 %vm10274_vm2, %v12691_v4 }
 0x58a   : > { %9328 = vmatprep.subr.bf16.mxu0 %v12691_v4 }
 0x58b   : > { %9301 = vmatmul.mubr.msk.bf16.vlgmr.msra.gmra.mrb[100].mxu1 %vm710_vm3, %v3043_v26  ;;  %v3193_v16 = vpop.permute.xlu0 %3192 }
 0x58c   : > { %9311 = vmatpush3.bf16.xpose.msra.mxu1 %v3150_v36  ;;  %9312 = vmatprep.mubr.msk.bf16.mxu1 %vm10274_vm2, %v12691_v4 }
 0x58d   : > { %9322 = vmatprep.subr.bf16.mxu1 %v12691_v4 }
 0x58f   : > { %v3517_v8 = vpop.permute.xlu0 %3516 }
 0x590   : > { %v3522_v11 = vsel %vm588_vm1, %v3517_v8, 0  ;;  %v11210_v20 = vpop.f32.mrb[32].mxu0  ;;  %9319 = vmatmul.mubr.msk.bf16.vlgmr.msra.gmra.mrb[92].mxu0 %vm710_vm3, %v3193_v16 }
 0x591   : > { %v9140_v38 = vpop.f32.mrb[33].mxu0  ;;  %9329 = vmatpush3.bf16.msra.mxu0 %v3522_v11  ;;  %9330 = vmatprep.mubr.msk.bf16.mxu0 %vm10274_vm2, %v12691_v4 }
 0x592   : > { %v1761_v44 = vpop.f32.mrb[34].mxu0  ;;  %9340 = vmatprep.subr.bf16.mxu0 %v12691_v4 }
 0x593   : > { %v9141_v2 = vpop.f32.mrb[35].mxu0  ;;  %9313 = vmatmul.mubr.msk.bf16.vlgmr.msra.gmra.mrb[104].mxu1 %vm710_vm3, %v3143_v53 }
 0x594   : > { %9323 = vmatpush3.bf16.xpose.msra.mxu1 %v3250_v42  ;;  %9324 = vmatprep.mubr.msk.bf16.mxu1 %vm10274_vm2, %v12691_v4 }
 0x595   : > { %9334 = vmatprep.subr.bf16.mxu1 %v12691_v4 }
 0x598   : > { %v11221_v63 = vpop.f32.mrb[48].mxu1 }
 0x599   : > { %v9146_v46 = vpop.f32.mrb[49].mxu1 }
 0x59a   : > { %v1809_v48 = vpop.f32.mrb[50].mxu1 }
 0x59b   : > { %v9147_v58 = vpop.f32.mrb[51].mxu1  ;;  %9325 = vmatmul.mubr.msk.bf16.vlgmr.msra.gmra.mrb[108].mxu1 %vm710_vm3, %v3243_v10 }
 0x59c   : > { %9335 = vmatpush3.bf16.msra.mxu1 %v3570_v24  ;;  %9336 = vmatprep.mubr.msk.bf16.mxu1 %vm10274_vm2, %v12691_v4 }
 0x59d   : > { %9346 = vmatprep.subr.bf16.mxu1 %v12691_v4 }
 0x5a0   : > { %v11230_v13 = vpop.f32.mrb[36].mxu0 }
 0x5a1   : > { %v9152_v60 = vpop.f32.mrb[37].mxu0 }
 0x5a2   : > { %v1857_v25 = vpop.f32.mrb[38].mxu0 }
 0x5a3   : > { %v9153_v12 = vpop.f32.mrb[39].mxu0 }
 0x5a8   : > { %v11232_v23 = vpop.f32.mrb[52].mxu1  ;;  %v11234_v49 = vpop.f32.mrb[40].mxu0 }
 0x5a9   : > { %v9158_v37 = vpop.f32.mrb[53].mxu1  ;;  %v9164_v33 = vpop.f32.mrb[41].mxu0 }
 0x5aa   : > { %v1905_v56 = vpop.f32.mrb[54].mxu1  ;;  %v1953_v51 = vpop.f32.mrb[42].mxu0 }
 0x5ab   : > { %v9159_v21 = vpop.f32.mrb[55].mxu1  ;;  %v9165_v50 = vpop.f32.mrb[43].mxu0 }
 0x5b0   : > { %v11238_v17 = vpop.f32.mrb[56].mxu1  ;;  %v11240_v29 = vpop.f32.mrb[44].mxu0 }
 0x5b1   : > { %v9170_v35 = vpop.f32.mrb[57].mxu1  ;;  %v9176_v57 = vpop.f32.mrb[45].mxu0 }
 0x5b2   : > { %v2001_v26 = vpop.f32.mrb[58].mxu1  ;;  %v2049_v59 = vpop.f32.mrb[46].mxu0 }
 0x5b3   : > { %v9171_v47 = vpop.f32.mrb[59].mxu1  ;;  %v9177_v19 = vpop.f32.mrb[47].mxu0 }
 0x5b8   : > { %v11244_v61 = vpop.f32.mrb[60].mxu1  ;;  %v11246_v43 = vpop.f32.mrb[48].mxu0 }
 0x5b9   : > { %v9182_v22 = vpop.f32.mrb[61].mxu1  ;;  %v9188_v53 = vpop.f32.mrb[49].mxu0 }
 0x5ba   : > { %v2097_v5 = vpop.f32.mrb[62].mxu1  ;;  %v2145_v3 = vpop.f32.mrb[50].mxu0 }
 0x5bb   : > { %v9183_v36 = vpop.f32.mrb[63].mxu1  ;;  %v9189_v16 = vpop.f32.mrb[51].mxu0  ;;  %v11271_v3 = vld [vmem:[%s12689_s6] sm:$0xff] }
 0x5c0   : > { %v11250_v32 = vpop.f32.mrb[64].mxu1  ;;  %v11252_v8 = vpop.f32.mrb[52].mxu0 }
 0x5c1   : > { %v9194_v38 = vpop.f32.mrb[65].mxu1  ;;  %v9200_v10 = vpop.f32.mrb[53].mxu0 }
 0x5c2   : > { %v2193_v44 = vpop.f32.mrb[66].mxu1  ;;  %v2241_v42 = vpop.f32.mrb[54].mxu0 }
 0x5c3   : > { %v9195_v2 = vpop.f32.mrb[67].mxu1  ;;  %v9201_v31 = vpop.f32.mrb[55].mxu0 }
 0x5ed   : > { %v11256_v46 = vpop.f32.mrb[56].mxu0 }
 0x5ee   : > { %v9212_v48 = vpop.f32.mrb[57].mxu0 }
 0x5ef   : > { %v2337_v24 = vpop.f32.mrb[58].mxu0 }
 0x5f0   : > { %v9213_v58 = vpop.f32.mrb[59].mxu0 }
 0x5f5   : > { %v11258_v60 = vpop.f32.mrb[68].mxu1  ;;  %v11260_v25 = vpop.f32.mrb[60].mxu0 }
 0x5f6   : > { %12695 = vst [vmem:[#allocation2_spill] sm:$0xff] %v11260_v25  ;;  %v9206_v37 = vpop.f32.mrb[69].mxu1  ;;  %v9224_v33 = vpop.f32.mrb[61].mxu0 }
 0x5f7   : > { %v2289_v56 = vpop.f32.mrb[70].mxu1  ;;  %v2433_v51 = vpop.f32.mrb[62].mxu0 }
 0x5f8   : > { %v9207_v21 = vpop.f32.mrb[71].mxu1  ;;  %v9225_v50 = vpop.f32.mrb[63].mxu0 }
 0x5fd   : > { %v11264_v35 = vpop.f32.mrb[72].mxu1 }
 0x5fe   : > { %v9218_v26 = vpop.f32.mrb[73].mxu1 }
 0x5ff   : > { %v2385_v59 = vpop.f32.mrb[74].mxu1 }
 0x600   : > { %v9219_v47 = vpop.f32.mrb[75].mxu1 }
 0x62b   : > { %v2536_v19 = vpop.f32.mrb[64].mxu0 }
 0x62c   : > { %v3292_v22 = vmul.f32 0.70710677, %v2536_v19  ;;  %v9236_v53 = vpop.f32.mrb[65].mxu0 }
 0x62d   : > { %v2539_v5 = vpop.f32.mrb[66].mxu0 }
 0x62e   : > { %v11274_v36 = vadd.f32 %v11271_v3, %v3292_v22  ;;  %v11276_v16 = vpop.f32.mrb[76].mxu1  ;;  %v9237_v38 = vpop.f32.mrb[67].mxu0 }
 0x62f   : > { %12696 = vst [vmem:[#allocation3_spill] sm:$0xff] %v11276_v16  ;;  %v9230_v44 = vpop.f32.mrb[77].mxu1 }
 0x630   : > { %v2481_v42 = vpop.f32.mrb[78].mxu1  ;;  %v3324_v2 = vsel %vm299_vm0, %v11274_v36, -inf }
 0x631   : > { %v9231_v31 = vpop.f32.mrb[79].mxu1  ;;  %3325 = vmax.xlane.f32.xlu0 %v3324_v2 }
 0x633   : > { %v2636_v48 = vpop.f32.mrb[68].mxu0 }
 0x634   : > { %v3294_v24 = vmul.f32 0.70710677, %v2636_v48  ;;  %v9248_v58 = vpop.f32.mrb[69].mxu0 }
 0x635   : > { %v2639_v37 = vpop.f32.mrb[70].mxu0 }
 0x636   : > { %v11283_v33 = vadd.f32 %v11271_v3, %v3294_v24  ;;  %v2586_v56 = vpop.f32.mrb[80].mxu1  ;;  %v9249_v51 = vpop.f32.mrb[71].mxu0 }
 0x637   : > { %v3293_v21 = vmul.f32 0.70710677, %v2586_v56  ;;  %v9242_v50 = vpop.f32.mrb[81].mxu1 }
 0x638   : > { %v2589_v26 = vpop.f32.mrb[82].mxu1  ;;  %v3330_v59 = vsel %vm299_vm0, %v11283_v33, -inf }
 0x639   : > { %v11288_v47 = vadd.f32 %v11271_v3, %v3293_v21  ;;  %v9243_v19 = vpop.f32.mrb[83].mxu1  ;;  %3331 = vmax.xlane.f32.xlu0 %v3330_v59 }
 0x63b   : > { %v2736_v22 = vpop.f32.mrb[72].mxu0  ;;  %v3327_v53 = vsel %vm299_vm0, %v11288_v47, -inf }
 0x63c   : > { %3328 = vmax.xlane.f32.xlu1 %v3327_v53  ;;  %v9260_v5 = vpop.f32.mrb[73].mxu0  ;;  %v3296_v2 = vmul.f32 0.70710677, %v2736_v22 }
 0x63d   : > { %v2739_v38 = vpop.f32.mrb[74].mxu0 }
 0x63e   : > { %v2686_v44 = vpop.f32.mrb[84].mxu1  ;;  %v9261_v42 = vpop.f32.mrb[75].mxu0  ;;  %v11296_v56 = vadd.f32 %v11271_v3, %v3296_v2 }
 0x63f   : > { %v3295_v31 = vmul.f32 0.70710677, %v2686_v44  ;;  %v9254_v48 = vpop.f32.mrb[85].mxu1 }
 0x640   : > { %v2689_v24 = vpop.f32.mrb[86].mxu1  ;;  %v3336_v44 = vsel %vm299_vm0, %v11296_v56, -inf }
 0x641   : > { %v11293_v58 = vadd.f32 %v11271_v3, %v3295_v31  ;;  %v9255_v37 = vpop.f32.mrb[87].mxu1 }
 0x643   : > { %v2836_v51 = vpop.f32.mrb[76].mxu0  ;;  %v3333_v21 = vsel %vm299_vm0, %v11293_v58, -inf }
 0x644   : > { %v3298_v50 = vmul.f32 0.70710677, %v2836_v51  ;;  %3334 = vmax.xlane.f32.xlu0 %v3333_v21  ;;  %v9272_v26 = vpop.f32.mrb[77].mxu0 }
 0x645   : > { %v2839_v59 = vpop.f32.mrb[78].mxu0 }
 0x646   : > { %v2786_v19 = vpop.f32.mrb[88].mxu1  ;;  %v9273_v22 = vpop.f32.mrb[79].mxu0  ;;  %v11301_v53 = vadd.f32 %v11271_v3, %v3298_v50 }
 0x647   : > { %v3297_v5 = vmul.f32 0.70710677, %v2786_v19  ;;  %v9266_v38 = vpop.f32.mrb[89].mxu1 }
 0x648   : > { %v2789_v42 = vpop.f32.mrb[90].mxu1  ;;  %3337 = vmax.xlane.f32.xlu0 %v3336_v44  ;;  %v3342_v37 = vsel %vm299_vm0, %v11301_v53, -inf }
 0x649   : > { %v11306_v2 = vadd.f32 %v11271_v3, %v3297_v5  ;;  %v9267_v31 = vpop.f32.mrb[91].mxu1 }
 0x64b   : > { %v2936_v48 = vpop.f32.mrb[80].mxu0  ;;  %v3339_v24 = vsel %vm299_vm0, %v11306_v2, -inf }
 0x64c   : > { %v3300_v51 = vmul.f32 0.70710677, %v2936_v48  ;;  %3340 = vmax.xlane.f32.xlu1 %v3339_v24  ;;  %3343 = vmax.xlane.f32.xlu0 %v3342_v37  ;;  %v9284_v21 = vpop.f32.mrb[81].mxu0 }
 0x64d   : > { %v2939_v50 = vpop.f32.mrb[82].mxu0 }
 0x64e   : > { %v11313_v26 = vadd.f32 %v11271_v3, %v3300_v51  ;;  %v2886_v59 = vpop.f32.mrb[92].mxu1  ;;  %v9285_v19 = vpop.f32.mrb[83].mxu0 }
 0x64f   : > { %v3299_v22 = vmul.f32 0.70710677, %v2886_v59  ;;  %v9278_v5 = vpop.f32.mrb[93].mxu1 }
 0x650   : > { %v2889_v38 = vpop.f32.mrb[94].mxu1  ;;  %v3348_v44 = vsel %vm299_vm0, %v11313_v26, -inf }
 0x651   : > { %v11318_v42 = vadd.f32 %v11271_v3, %v3299_v22  ;;  %v9279_v31 = vpop.f32.mrb[95].mxu1  ;;  %3349 = vmax.xlane.f32.xlu0 %v3348_v44 }
 0x653   : > { %v3036_v48 = vpop.f32.mrb[84].mxu0  ;;  %v3345_v24 = vsel %vm299_vm0, %v11318_v42, -inf }
 0x654   : > { %v3302_v37 = vmul.f32 0.70710677, %v3036_v48  ;;  %3346 = vmax.xlane.f32.xlu1 %v3345_v24  ;;  %v9296_v51 = vpop.f32.mrb[85].mxu0 }
 0x655   : > { %v3039_v21 = vpop.f32.mrb[86].mxu0 }
 0x656   : > { %v11323_v50 = vadd.f32 %v11271_v3, %v3302_v37  ;;  %v2986_v59 = vpop.f32.mrb[96].mxu1  ;;  %v9297_v19 = vpop.f32.mrb[87].mxu0 }
 0x657   : > { %v3301_v5 = vmul.f32 0.70710677, %v2986_v59  ;;  %v9290_v38 = vpop.f32.mrb[97].mxu1 }
 0x658   : > { %v2989_v10 = vpop.f32.mrb[98].mxu1  ;;  %v3354_v22 = vsel %vm299_vm0, %v11323_v50, -inf }
 0x659   : > { %v11328_v44 = vadd.f32 %v11271_v3, %v3301_v5  ;;  %v9291_v31 = vpop.f32.mrb[99].mxu1  ;;  %3355 = vmax.xlane.f32.xlu0 %v3354_v22 }
 0x65b   : > { %v3136_v48 = vpop.f32.mrb[88].mxu0  ;;  %v3351_v24 = vsel %vm299_vm0, %v11328_v44, -inf }
 0x65c   : > { %v3304_v51 = vmul.f32 0.70710677, %v3136_v48  ;;  %3352 = vmax.xlane.f32.xlu1 %v3351_v24  ;;  %v9308_v37 = vpop.f32.mrb[89].mxu0 }
 0x65d   : > { %v3139_v21 = vpop.f32.mrb[90].mxu0 }
 0x65e   : > { %v11333_v59 = vadd.f32 %v11271_v3, %v3304_v51  ;;  %v3086_v10 = vpop.f32.mrb[100].mxu1  ;;  %v9309_v19 = vpop.f32.mrb[91].mxu0 }
 0x65f   : > { %v3303_v38 = vmul.f32 0.70710677, %v3086_v10  ;;  %v9302_v57 = vpop.f32.mrb[101].mxu1 }
 0x660   : > { %v3089_v12 = vpop.f32.mrb[102].mxu1  ;;  %v3360_v5 = vsel %vm299_vm0, %v11333_v59, -inf }
 0x661   : > { %v11338_v22 = vadd.f32 %v11271_v3, %v3303_v38  ;;  %v9303_v31 = vpop.f32.mrb[103].mxu1  ;;  %3361 = vmax.xlane.f32.xlu0 %v3360_v5 }
 0x663   : > { %v3236_v48 = vpop.f32.mrb[92].mxu0  ;;  %v3357_v24 = vsel %vm299_vm0, %v11338_v22, -inf }
 0x664   : > { %v3306_v37 = vmul.f32 0.70710677, %v3236_v48  ;;  %3358 = vmax.xlane.f32.xlu1 %v3357_v24  ;;  %v9320_v51 = vpop.f32.mrb[93].mxu0 }
 0x665   : > { %v3239_v21 = vpop.f32.mrb[94].mxu0 }
 0x666   : > { %v11343_v10 = vadd.f32 %v11271_v3, %v3306_v37  ;;  %v3186_v12 = vpop.f32.mrb[104].mxu1  ;;  %v9321_v57 = vpop.f32.mrb[95].mxu0 }
 0x667   : > { %v3305_v19 = vmul.f32 0.70710677, %v3186_v12  ;;  %v9314_v11 = vpop.f32.mrb[105].mxu1  ;;  %v11365_v57 = vpop.permute.xlu0 %3612 }
 0x668   : > { %v3189_v52 = vpop.f32.mrb[106].mxu1  ;;  %v3366_v38 = vsel %vm299_vm0, %v11343_v10, -inf }
 0x669   : > { %v11348_v5 = vadd.f32 %v11271_v3, %v3305_v19  ;;  %v9315_v31 = vpop.f32.mrb[107].mxu1  ;;  %3367 = vmax.xlane.f32.xlu0 %v3366_v38  ;;  %v11369_v38 = vpop.permute.xlu1 %3660 }
 0x66b   : > { %v3363_v48 = vsel %vm299_vm0, %v11348_v5, -inf  ;;  %v11367_v19 = vpop.permute.xlu0 %3708 }
 0x66c   : > { %3364 = vmax.xlane.f32.xlu1 %v3363_v48 }
 0x66e   : > { %v3286_v24 = vpop.f32.mrb[108].mxu1 }
 0x66f   : > { %v9326_v37 = vpop.f32.mrb[109].mxu1  ;;  %v3307_v52 = vmul.f32 0.70710677, %v3286_v24  ;;  %v11371_v31 = vpop.permute.xlu0 %3804 }
 0x670   : > { %v3289_v51 = vpop.f32.mrb[110].mxu1  ;;  %v11373_v37 = vpop.permute.xlu1 %3756 }
 0x671   : > { %v9327_v21 = vpop.f32.mrb[111].mxu1  ;;  %v11361_v11 = vadd.f32 %v11271_v3, %v3307_v52 }
 0x673   : > { %v3369_v12 = vsel %vm299_vm0, %v11361_v11, -inf }
 0x674   : > { %v11376_v3 = vpop.permute.xlu1 %3852 }
 0x67d   : > { %3948 = vrot.lane.b32.xlu1 %v10612_v30, %s10279_s20 }
 0x67f   : > { %3900 = vrot.lane.b32.xlu0 %v10600_v55, %s10279_s20 }
 0x681   : > { %3996 = vrot.lane.b32.xlu1 %v10608_v0, %s10279_s20 }
 0x685   : > { %4044 = vrot.lane.b32.xlu1 %v10620_v39, %s10279_s20 }
 0x6a9   : > { %3370 = vmax.xlane.f32.xlu1 %v3369_v12 }
 0x6be   : > { %v3326_v48 = vpop.xlane.xlu0 %3325 }
 0x6bf   : > { %v3372_v24 = vsub.f32 %v11274_v36, %v3326_v48 }
 0x6c1   : > { %v3388_v51 = vmul.f32 1.442695, %v3372_v24 }
 0x6c3   : > { %10054 = vpow2.f32 %v3388_v51 }
 0x6c6   : > { %v3332_v21 = vpop.xlane.xlu0 %3331 }
 0x6c7   : > { %v3374_v52 = vsub.f32 %v11283_v33, %v3332_v21 }
 0x6c9   : > { %v3392_v12 = vmul.f32 1.442695, %v3374_v52  ;;  %v3329_v62 = vpop.xlane.xlu1 %3328 }
 0x6ca   : > { %v3373_v28 = vsub.f32 %v11288_v47, %v3329_v62 }
 0x6cb   : > { %10056 = vpow2.f32 %v3392_v12 }
 0x6cc   : > { %v3390_v9 = vmul.f32 1.442695, %v3373_v28 }
 0x6cd   : > { %v11380_v4 = vpop.eup %10054 }
 0x6ce   : > { %10058 = vpow2.f32 %v3390_v9  ;;  %v3420_v25 = vsel %vm299_vm0, %v11380_v4, 0.0 }
 0x6cf   : > { %3421 = vadd.xlane.f32.xlu0 %v3420_v25 }
 0x6d1   : > { %v3335_v36 = vpop.xlane.xlu0 %3334 }
 0x6d2   : > { %v3375_v48 = vsub.f32 %v11293_v58, %v3335_v36 }
 0x6d4   : > { %v3394_v24 = vmul.f32 1.442695, %v3375_v48 }
 0x6d5   : > { %v11385_v51 = vpop.eup %10056  ;;  %v3338_v33 = vpop.xlane.xlu0 %3337 }
 0x6d6   : > { %10060 = vpow2.f32 %v3394_v24  ;;  %v3376_v21 = vsub.f32 %v11296_v56, %v3338_v33  ;;  %v3426_v28 = vsel %vm299_vm0, %v11385_v51, 0.0 }
 0x6d7   : > { %3427 = vadd.xlane.f32.xlu0 %v3426_v28 }
 0x6d8   : > { %v11390_v62 = vpop.eup %10058  ;;  %v3396_v9 = vmul.f32 1.442695, %v3376_v21 }
 0x6d9   : > { %v3341_v47 = vpop.xlane.xlu1 %3340  ;;  %v3344_v52 = vpop.xlane.xlu0 %3343  ;;  %v3423_v25 = vsel %vm299_vm0, %v11390_v62, 0.0 }
 0x6da   : > { %10062 = vpow2.f32 %v3396_v9  ;;  %v3377_v58 = vsub.f32 %v11306_v2, %v3341_v47  ;;  %v3378_v12 = vsub.f32 %v11301_v53, %v3344_v52  ;;  %3424 = vadd.xlane.f32.xlu1 %v3423_v25 }
 0x6dc   : > { %v3398_v36 = vmul.f32 1.442695, %v3377_v58  ;;  %v3400_v56 = vmul.f32 1.442695, %v3378_v12 }
 0x6de   : > { %10064 = vpow2.f32 %v3398_v36  ;;  %v3350_v48 = vpop.xlane.xlu0 %3349 }
 0x6df   : > { %10066 = vpow2.f32 %v3400_v56  ;;  %v3380_v33 = vsub.f32 %v11313_v26, %v3350_v48 }
 0x6e0   : > { %v11396_v24 = vpop.eup %10060 }
 0x6e1   : > { %v3347_v21 = vpop.xlane.xlu1 %3346  ;;  %v3429_v28 = vsel %vm299_vm0, %v11396_v24, 0.0  ;;  %v3404_v53 = vmul.f32 1.442695, %v3380_v33 }
 0x6e2   : > { %v3379_v9 = vsub.f32 %v11318_v42, %v3347_v21  ;;  %3430 = vadd.xlane.f32.xlu1 %v3429_v28 }
 0x6e4   : > { %v11402_v2 = vpop.eup %10062  ;;  %v3402_v47 = vmul.f32 1.442695, %v3379_v9 }
 0x6e5   : > { %v3432_v52 = vsel %vm299_vm0, %v11402_v2, 0.0 }
 0x6e6   : > { %10068 = vpow2.f32 %v3402_v47  ;;  %3433 = vadd.xlane.f32.xlu0 %v3432_v52  ;;  %v3356_v25 = vpop.xlane.xlu0 %3355 }
 0x6e7   : > { %v3382_v58 = vsub.f32 %v11323_v50, %v3356_v25  ;;  %10070 = vpow2.f32 %v3404_v53 }
 0x6e8   : > { %v11407_v26 = vpop.eup %10064 }
 0x6e9   : > { %v11409_v12 = vpop.eup %10066  ;;  %v3408_v36 = vmul.f32 1.442695, %v3382_v58  ;;  %v3353_v42 = vpop.xlane.xlu1 %3352  ;;  %v3435_v56 = vsel %vm299_vm0, %v11407_v26, 0.0 }
 0x6ea   : > { %v3381_v48 = vsub.f32 %v11328_v44, %v3353_v42  ;;  %3436 = vadd.xlane.f32.xlu1 %v3435_v56  ;;  %v3438_v33 = vsel %vm299_vm0, %v11409_v12, 0.0 }
 0x6eb   : > { %3439 = vadd.xlane.f32.xlu0 %v3438_v33  ;;  %10072 = vpow2.f32 %v3408_v36 }
 0x6ec   : > { %v3406_v21 = vmul.f32 1.442695, %v3381_v48 }
 0x6ee   : > { %10074 = vpow2.f32 %v3406_v21  ;;  %v3362_v48 = vpop.xlane.xlu0 %3361 }
 0x6ef   : > { %v3384_v33 = vsub.f32 %v11333_v59, %v3362_v48 }
 0x6f0   : > { %v11416_v50 = vpop.eup %10068 }
 0x6f1   : > { %v3359_v28 = vpop.xlane.xlu1 %3358  ;;  %v3441_v9 = vsel %vm299_vm0, %v11416_v50, 0.0  ;;  %v11420_v53 = vpop.eup %10070 }
 0x6f2   : > { %v3383_v47 = vsub.f32 %v11338_v22, %v3359_v28  ;;  %3442 = vadd.xlane.f32.xlu1 %v3441_v9  ;;  %v3444_v52 = vsel %vm299_vm0, %v11420_v53, 0.0  ;;  %v3412_v28 = vmul.f32 1.442695, %v3384_v33 }
 0x6f4   : > { %v3410_v44 = vmul.f32 1.442695, %v3383_v47 }
 0x6f5   : > { %v11425_v25 = vpop.eup %10072 }
 0x6f6   : > { %10076 = vpow2.f32 %v3410_v44  ;;  %3445 = vadd.xlane.f32.xlu1 %v3444_v52  ;;  %v3450_v42 = vsel %vm299_vm0, %v11425_v25, 0.0  ;;  %v3368_v21 = vpop.xlane.xlu0 %3367 }
 0x6f7   : > { %v3386_v9 = vsub.f32 %v11343_v10, %v3368_v21  ;;  %10078 = vpow2.f32 %v3412_v28 }
 0x6f8   : > { %v11427_v58 = vpop.eup %10074 }
 0x6f9   : > { %v3447_v36 = vsel %vm299_vm0, %v11427_v58, 0.0  ;;  %v3365_v47 = vpop.xlane.xlu1 %3364  ;;  %v3416_v44 = vmul.f32 1.442695, %v3386_v9 }
 0x6fa   : > { %3448 = vadd.xlane.f32.xlu0 %v3447_v36  ;;  %3451 = vadd.xlane.f32.xlu1 %v3450_v42  ;;  %v3385_v52 = vsub.f32 %v11348_v5, %v3365_v47 }
 0x6fb   : > { %10080 = vpow2.f32 %v3416_v44 }
 0x6fc   : > { %v3414_v36 = vmul.f32 1.442695, %v3385_v52 }
 0x6fd   : > { %v11444_v42 = vpop.permute.xlu1 %3948 }
 0x6fe   : > { %10082 = vpow2.f32 %v3414_v36 }
 0x700   : > { %v11433_v22 = vpop.eup %10076 }
 0x701   : > { %v3453_v56 = vsel %vm299_vm0, %v11433_v22, 0.0  ;;  %v11448_v16 = vpop.permute.xlu1 %3996 }
 0x702   : > { %3454 = vadd.xlane.f32.xlu0 %v3453_v56  ;;  %v11446_v56 = vpop.eup %10078 }
 0x703   : > { %v3456_v59 = vsel %vm299_vm0, %v11446_v56, 0.0 }
 0x705   : > { %v11452_v48 = vpop.eup %10080  ;;  %v11454_v10 = vpop.permute.xlu1 %4044 }
 0x706   : > { %v3462_v5 = vsel %vm299_vm0, %v11452_v48, 0.0 }
 0x708   : > { %v11458_v33 = vpop.eup %10082 }
 0x709   : > { %v3459_v28 = vsel %vm299_vm0, %v11458_v33, 0.0 }
 0x70b   : > { %4140 = vrot.lane.b32.xlu1 %v10628_v1, %s10279_s20 }
 0x718   : > { %4092 = vrot.lane.b32.xlu0 %v10616_v34, %s10279_s20 }
 0x72f   : > { %3457 = vadd.xlane.f32.xlu1 %v3456_v59 }
 0x733   : > { %3463 = vadd.xlane.f32.xlu1 %v3462_v5 }
 0x736   : > { %v3371_v21 = vpop.xlane.xlu1 %3370 }
 0x737   : > { %v3387_v9 = vsub.f32 %v11361_v11, %v3371_v21  ;;  %3460 = vadd.xlane.f32.xlu0 %v3459_v28  ;;  %v11477_v11 = vpop.permute.xlu0 %3900 }
 0x739   : > { %v3418_v47 = vmul.f32 1.442695, %v3387_v9 }
 0x73b   : > { %10084 = vpow2.f32 %v3418_v47  ;;  %v3618_v47 = vsel %vm588_vm1, %v11365_v57, 0 }
 0x744   : > { %4236 = vrot.lane.b32.xlu1 %v10634_v41, %s10279_s20 }
 0x745   : > { %v11465_v44 = vpop.eup %10084 }
 0x746   : > { %v3465_v52 = vsel %vm299_vm0, %v11465_v44, 0.0 }
 0x747   : > { %3466 = vadd.xlane.f32.xlu0 %v3465_v52  ;;  %v12697_v52 = vmov 0.0  }
 0x748   : > { %4545 = vrot.lane.b32.xlu1 %v10574_v45, %s10280_s23 }
 0x74c   : > { %4595 = vrot.lane.b32.xlu1 %v10576_v6, %s10280_s23 }
 0x750   : > { %4645 = vrot.lane.b32.xlu1 %v10582_v7, %s10280_s23 }
 0x754   : > { %4695 = vrot.lane.b32.xlu1 %v10588_v14, %s10280_s23 }
 0x758   : > { %4745 = vrot.lane.b32.xlu1 %v10584_v54, %s10280_s23 }
 0x75c   : > { %4795 = vrot.lane.b32.xlu1 %v10596_v18, %s10280_s23  ;;  %v3422_v36 = vpop.xlane.xlu0 %3421 }
 0x75d   : > { %10086 = vrcp.f32 %v3422_v36  ;;  %4188 = vrot.lane.b32.xlu0 %v10624_v40, %s10279_s20  ;;  %s12615_s20 = scalar_lea.vmem %s12690_s7, %s8544_s27 }
 0x760   : > { %4845 = vrot.lane.b32.xlu1 %v10592_v15, %s10280_s23 }
 0x761   : > { %4547 = vrot.lane.b32.xlu0 %v10574_v45, %s10281_s25 }
 0x764   : > { %4895 = vrot.lane.b32.xlu1 %v10604_v27, %s10280_s23  ;;  %v3428_v59 = vpop.xlane.xlu0 %3427 }
 0x765   : > { %10088 = vrcp.f32 %v3428_v59  ;;  %4597 = vrot.lane.b32.xlu0 %v10576_v6, %s10281_s25 }
 0x767   : > { %v10087_v5 = vpop.eup %10086  ;;  %v3425_v21 = vpop.xlane.xlu1 %3424 }
 0x768   : > { %10090 = vrcp.f32 %v3425_v21  ;;  %4997 = vrot.lane.b32.xlu1 %v10612_v30, %s10281_s25  ;;  %v3484_v28 = vmul.f32 %v10087_v5, %v11380_v4 }
 0x769   : > { %4647 = vrot.lane.b32.xlu0 %v10582_v7, %s10281_s25 }
 0x76a   : > { %v3500_v9 = vpack.c.bf16 %v3484_v28, %v3484_v28 }
 0x76c   : > { %4995 = vrot.lane.b32.xlu1 %v10612_v30, %s10280_s23  ;;  %9331 = vmatmul.mubr.msk.bf16.vlgmr.msra.gmra.mrb[96].mxu0 %vm299_vm0, %v3500_v9  ;;  %v3714_v9 = vsel %vm588_vm1, %v11367_v19, 0 }
 0x76d   : > { %9341 = vmatpush3.bf16.msra.mxu0 %v3618_v47  ;;  %4697 = vrot.lane.b32.xlu0 %v10588_v14, %s10281_s25 }
 0x76e   : > { %9342 = vmatprep.mubr.msk.bf16.mxu0 %vm10274_vm2, %v12697_v52  ;;  %9352 = vmatprep.subr.bf16.mxu0 %v12697_v52 }
 0x76f   : > { %v10089_v4 = vpop.eup %10088  ;;  %v3431_v36 = vpop.xlane.xlu1 %3430 }
 0x770   : > { %10092 = vrcp.f32 %v3431_v36  ;;  %5097 = vrot.lane.b32.xlu1 %v10620_v39, %s10281_s25  ;;  %v3486_v57 = vmul.f32 %v10089_v4, %v11385_v51 }
 0x771   : > { %4747 = vrot.lane.b32.xlu0 %v10584_v54, %s10281_s25 }
 0x772   : > { %v10091_v59 = vpop.eup %10090  ;;  %v3502_v5 = vpack.c.bf16 %v3486_v57, %v3486_v57 }
 0x773   : > { %v3434_v21 = vpop.xlane.xlu0 %3433  ;;  %v3485_v28 = vmul.f32 %v10091_v59, %v11390_v62  ;;  %v3666_v62 = vsel %vm588_vm1, %v11369_v38, 0  ;;  %v3762_v59 = vsel %vm588_vm1, %v11373_v37, 0 }
 0x774   : > { %10094 = vrcp.f32 %v3434_v21  ;;  %5095 = vrot.lane.b32.xlu1 %v10620_v39, %s10280_s23  ;;  %9343 = vmatmul.mubr.msk.bf16.vlgmr.msra.gmra.mrb[100].mxu0 %vm299_vm0, %v3502_v5 }
 0x775   : > { %9353 = vmatpush3.bf16.msra.mxu0 %v3714_v9  ;;  %4797 = vrot.lane.b32.xlu0 %v10596_v18, %s10281_s25  ;;  %v3501_v51 = vpack.c.bf16 %v3485_v28, %v3485_v28  ;;  %v3810_v9 = vsel %vm588_vm1, %v11371_v31, 0  ;;  %v3858_v31 = vsel %vm588_vm1, %v11376_v3, 0  ;;  %v3906_v3 = vsel %vm588_vm1, %v11477_v11, 0 }
 0x776   : > { %9354 = vmatprep.mubr.msk.bf16.mxu0 %vm10274_vm2, %v12697_v52  ;;  %9364 = vmatprep.subr.bf16.mxu0 %v12697_v52  ;;  %v3954_v11 = vsel %vm588_vm1, %v11444_v42, 0  ;;  %v4002_v42 = vsel %vm588_vm1, %v11448_v16, 0 }
 0x777   : > { %9337 = vmatmul.mubr.msk.bf16.vlgmr.msra.gmra.mrb[112].mxu1 %vm299_vm0, %v3501_v51  ;;  %v3437_v19 = vpop.xlane.xlu1 %3436 }
 0x778   : > { %9347 = vmatpush3.bf16.msra.mxu1 %v3666_v62  ;;  %10096 = vrcp.f32 %v3437_v19  ;;  %v3440_v47 = vpop.xlane.xlu0 %3439  ;;  %5197 = vrot.lane.b32.xlu1 %v10628_v1, %s10281_s25 }
 0x779   : > { %10098 = vrcp.f32 %v3440_v47  ;;  %4847 = vrot.lane.b32.xlu0 %v10592_v15, %s10281_s25  ;;  %9348 = vmatprep.mubr.msk.bf16.mxu1 %vm10274_vm2, %v12697_v52 }
 0x77a   : > { %v10093_v4 = vpop.eup %10092  ;;  %9358 = vmatprep.subr.bf16.mxu1 %v12697_v52 }
 0x77b   : > { %v3487_v38 = vmul.f32 %v10093_v4, %v11396_v24 }
 0x77c   : > { %5195 = vrot.lane.b32.xlu1 %v10628_v1, %s10280_s23 }
 0x77d   : > { %4897 = vrot.lane.b32.xlu0 %v10604_v27, %s10281_s25  ;;  %v3503_v36 = vpack.c.bf16 %v3487_v38, %v3487_v38 }
 0x77e   : > { %v10095_v57 = vpop.eup %10094 }
 0x77f   : > { %9349 = vmatmul.mubr.msk.bf16.vlgmr.msra.gmra.mrb[116].mxu1 %vm299_vm0, %v3503_v36  ;;  %v3443_v5 = vpop.xlane.xlu1 %3442  ;;  %v3488_v21 = vmul.f32 %v10095_v57, %v11402_v2 }
 0x780   : > { %9359 = vmatpush3.bf16.msra.mxu1 %v3762_v59  ;;  %10100 = vrcp.f32 %v3443_v5  ;;  %5297 = vrot.lane.b32.xlu1 %v10634_v41, %s10281_s25 }
 0x781   : > { %4947 = vrot.lane.b32.xlu0 %v10600_v55, %s10281_s25  ;;  %v3504_v24 = vpack.c.bf16 %v3488_v21, %v3488_v21  ;;  %9360 = vmatprep.mubr.msk.bf16.mxu1 %vm10274_vm2, %v12697_v52 }
 0x782   : > { %v10097_v28 = vpop.eup %10096  ;;  %9370 = vmatprep.subr.bf16.mxu1 %v12697_v52 }
 0x783   : > { %v10099_v37 = vpop.eup %10098  ;;  %v3446_v2 = vpop.xlane.xlu1 %3445  ;;  %9355 = vmatmul.mubr.msk.bf16.vlgmr.msra.gmra.mrb[104].mxu0 %vm299_vm0, %v3504_v24  ;;  %v3489_v51 = vmul.f32 %v10097_v28, %v11407_v26 }
 0x784   : > { %10102 = vrcp.f32 %v3446_v2  ;;  %9365 = vmatpush3.bf16.msra.mxu0 %v3810_v9  ;;  %5295 = vrot.lane.b32.xlu1 %v10634_v41, %s10280_s23  ;;  %v3490_v19 = vmul.f32 %v10099_v37, %v11409_v12  ;;  %v4050_v9 = vsel %vm588_vm1, %v11454_v10, 0 }
 0x785   : > { %4945 = vrot.lane.b32.xlu0 %v10600_v55, %s10280_s23  ;;  %v3505_v62 = vpack.c.bf16 %v3489_v51, %v3489_v51  ;;  %9366 = vmatprep.mubr.msk.bf16.mxu0 %vm10274_vm2, %v12697_v52 }
 0x786   : > { %9376 = vmatprep.subr.bf16.mxu0 %v12697_v52  ;;  %v3506_v12 = vpack.c.bf16 %v3490_v19, %v3490_v19 }
 0x787   : > { %9361 = vmatmul.mubr.msk.bf16.vlgmr.msra.gmra.mrb[120].mxu1 %vm299_vm0, %v3505_v62  ;;  %v3452_v26 = vpop.xlane.xlu1 %3451  ;;  %v3449_v47 = vpop.xlane.xlu0 %3448 }
 0x788   : > { %9371 = vmatpush3.bf16.msra.mxu1 %v3858_v31  ;;  %10104 = vrcp.f32 %v3452_v26  ;;  %5617 = vrot.lane.b32.xlu1 %v10576_v6, %s10282_s28 }
 0x789   : > { %10106 = vrcp.f32 %v3449_v47  ;;  %5047 = vrot.lane.b32.xlu0 %v10608_v0, %s10281_s25  ;;  %9372 = vmatprep.mubr.msk.bf16.mxu1 %vm10274_vm2, %v12697_v52 }
 0x78a   : > { %v10101_v4 = vpop.eup %10100  ;;  %9382 = vmatprep.subr.bf16.mxu1 %v12697_v52 }
 0x78b   : > { %9367 = vmatmul.mubr.msk.bf16.vlgmr.msra.gmra.mrb[108].mxu0 %vm299_vm0, %v3506_v12  ;;  %v3491_v38 = vmul.f32 %v10101_v4, %v11416_v50  ;;  %v4141_v51 = vpop.permute.xlu1 %4140 }
 0x78c   : > { %9377 = vmatpush3.bf16.msra.mxu0 %v3906_v3  ;;  %5713 = vrot.lane.b32.xlu1 %v10588_v14, %s10282_s28  ;;  %v4146_v19 = vsel %vm588_vm1, %v4141_v51, 0 }
 0x78d   : > { %5045 = vrot.lane.b32.xlu0 %v10608_v0, %s10280_s23  ;;  %v3507_v36 = vpack.c.bf16 %v3491_v38, %v3491_v38  ;;  %9378 = vmatprep.mubr.msk.bf16.mxu0 %vm10274_vm2, %v12697_v52 }
 0x78e   : > { %v10103_v57 = vpop.eup %10102  ;;  %9388 = vmatprep.subr.bf16.mxu0 %v12697_v52 }
 0x78f   : > { %9373 = vmatmul.mubr.msk.bf16.vlgmr.msra.gmra.mrb[124].mxu1 %vm299_vm0, %v3507_v36  ;;  %v3455_v50 = vpop.xlane.xlu0 %3454  ;;  %v3492_v59 = vmul.f32 %v10103_v57, %v11420_v53  ;;  %v11635_v36 = vld [vmem:[%s12687_s4] sm:$0xf] }
 0x790   : > { %9383 = vmatpush3.bf16.msra.mxu1 %v3954_v11  ;;  %10108 = vrcp.f32 %v3455_v50  ;;  %9384 = vmatprep.mubr.msk.bf16.mxu1 %vm10274_vm2, %v12697_v52 }
 0x791   : > { %5147 = vrot.lane.b32.xlu0 %v10616_v34, %s10281_s25  ;;  %v3508_v5 = vpack.c.bf16 %v3492_v59, %v3492_v59  ;;  %9394 = vmatprep.subr.bf16.mxu1 %v12697_v52 }
 0x792   : > { %v10105_v21 = vpop.eup %10104 }
 0x793   : > { %v10107_v24 = vpop.eup %10106  ;;  %9379 = vmatmul.mubr.msk.bf16.vlgmr.msra.gmra.mrb[112].mxu0 %vm299_vm0, %v3508_v5  ;;  %v3494_v28 = vmul.f32 %v10105_v21, %v11425_v25  ;;  %v4093_v16 = vpop.permute.xlu0 %4092 }
 0x794   : > { %9389 = vmatpush3.bf16.msra.mxu0 %v4002_v42  ;;  %v3493_v53 = vmul.f32 %v10107_v24, %v11427_v58  ;;  %9390 = vmatprep.mubr.msk.bf16.mxu0 %vm10274_vm2, %v12697_v52  ;;  %v4098_v25 = vsel %vm588_vm1, %v4093_v16, 0 }
 0x795   : > { %5145 = vrot.lane.b32.xlu0 %v10616_v34, %s10280_s23  ;;  %9400 = vmatprep.subr.bf16.mxu0 %v12697_v52  ;;  %v3510_v58 = vpack.c.bf16 %v3494_v28, %v3494_v28 }
 0x796   : > { %v3509_v37 = vpack.c.bf16 %v3493_v53, %v3493_v53 }
 0x798   : > { %9385 = vmatmul.mubr.msk.bf16.vlgmr.msra.gmra.mrb[128].mxu1 %vm299_vm0, %v3509_v37 }
 0x799   : > { %9395 = vmatpush3.bf16.msra.mxu1 %v4050_v9  ;;  %5247 = vrot.lane.b32.xlu0 %v10624_v40, %s10281_s25 }
 0x79a   : > { %v10109_v2 = vpop.eup %10108  ;;  %9396 = vmatprep.mubr.msk.bf16.mxu1 %vm10274_vm2, %v12697_v52  ;;  %9406 = vmatprep.subr.bf16.mxu1 %v12697_v52 }
 0x79b   : > { %9391 = vmatmul.mubr.msk.bf16.vlgmr.msra.gmra.mrb[116].mxu0 %vm299_vm0, %v3510_v58  ;;  %v3495_v10 = vmul.f32 %v10109_v2, %v11433_v22 }
 0x79c   : > { %9401 = vmatpush3.bf16.msra.mxu0 %v4098_v25  ;;  %9402 = vmatprep.mubr.msk.bf16.mxu0 %vm10274_vm2, %v12697_v52 }
 0x79d   : > { %5245 = vrot.lane.b32.xlu0 %v10624_v40, %s10280_s23  ;;  %v3511_v62 = vpack.c.bf16 %v3495_v10, %v3495_v10  ;;  %9412 = vmatprep.subr.bf16.mxu0 %v12697_v52 }
 0x7a0   : > { %9397 = vmatmul.mubr.msk.bf16.vlgmr.msra.gmra.mrb[132].mxu1 %vm299_vm0, %v3511_v62 }
 0x7a1   : > { %9407 = vmatpush3.bf16.msra.mxu1 %v4146_v19  ;;  %5569 = vrot.lane.b32.xlu0 %v10574_v45, %s10282_s28 }
 0x7a2   : > { %9408 = vmatprep.mubr.msk.bf16.mxu1 %vm10274_vm2, %v12697_v52  ;;  %9418 = vmatprep.subr.bf16.mxu1 %v12697_v52 }
 0x7a5   : > { %5665 = vrot.lane.b32.xlu0 %v10582_v7, %s10282_s28 }
 0x7bc   : > { %v3458_v22 = vpop.xlane.xlu1 %3457 }
 0x7bd   : > { %10110 = vrcp.f32 %v3458_v22 }
 0x7c0   : > { %v3464_v47 = vpop.xlane.xlu1 %3463 }
 0x7c4   : > { %v3461_v31 = vpop.xlane.xlu0 %3460  ;;  %v4237_v57 = vpop.permute.xlu1 %4236 }
 0x7c5   : > { %10112 = vrcp.f32 %v3461_v31  ;;  %v4242_v59 = vsel %vm588_vm1, %v4237_v57, 0 }
 0x7c6   : > { %10114 = vrcp.f32 %v3464_v47 }
 0x7c7   : > { %v10111_v26 = vpop.eup %10110 }
 0x7c8   : > { %v3496_v12 = vmul.f32 %v10111_v26, %v11446_v56  ;;  %v11639_v56 = vcombine.low %v11635_v36, %v11635_v36  ;;  %v4546_v9 = vpop.permute.xlu1 %4545 }
 0x7ca   : > { %v3512_v4 = vpack.c.bf16 %v3496_v12, %v3496_v12  ;;  %v4295_v21 = vrot.slane %v11639_v56, 1 }
 0x7cc   : > { %9403 = vmatmul.mubr.msk.bf16.vlgmr.msra.gmra.mrb[120].mxu0 %vm299_vm0, %v3512_v4  ;;  %v4322_v28 = vsel %vm4320_vm4, %v4295_v21, 0  ;;  %v4596_v25 = vpop.permute.xlu1 %4595 }
 0x7cd   : > { %9414 = vmatprep.mubr.msk.bf16.mxu0 %vm10274_vm2, %v12697_v52 }
 0x7cf   : > { %v10113_v3 = vpop.eup %10112 }
 0x7d0   : > { %v3497_v38 = vmul.f32 %v10113_v3, %v11458_v33  ;;  %v10115_v50 = vpop.eup %10114 }
 0x7d1   : > { %v3498_v33 = vmul.f32 %v10115_v50, %v11452_v48 }
 0x7d2   : > { %v3513_v11 = vpack.c.bf16 %v3497_v38, %v3497_v38 }
 0x7d3   : > { %v3514_v53 = vpack.c.bf16 %v3498_v33, %v3498_v33 }
 0x7d4   : > { %9409 = vmatmul.mubr.msk.bf16.vlgmr.msra.gmra.mrb[136].mxu1 %vm299_vm0, %v3513_v11  ;;  %v3467_v5 = vpop.xlane.xlu0 %3466 }
 0x7d5   : > { %9419 = vmatpush3.bf16.msra.mxu1 %v4242_v59  ;;  %10116 = vrcp.f32 %v3467_v5  ;;  %9420 = vmatprep.mubr.msk.bf16.mxu1 %vm10274_vm2, %v12697_v52 }
 0x7d6   : > { %9460 = vmatprep.subr.bf16.mxu1 %v12697_v52 }
 0x7d8   : > { %v4189_v24 = vpop.permute.xlu0 %4188 }
 0x7d9   : > { %v4194_v42 = vsel %vm588_vm1, %v4189_v24, 0 }
 0x7da   : > { %9413 = vmatpush3.bf16.msra.mxu0 %v4194_v42 }
 0x7db   : > { %9932 = vmatprep.subr.msk.bf16.mxu0 %vm4320_vm4, %v4295_v21 }
 0x7dc   : > { %v4548_v16 = vpop.permute.xlu0 %4547 }
 0x7dd   : > { %9415 = vmatmul.mubr.msk.bf16.vlgmr.msra.gmra.mrb[124].mxu0 %vm299_vm0, %v3514_v53  ;;  %v4553_v2 = vsel %vm710_vm3, %v4548_v16, 0 }
 0x7de   : > { %9425 = vmatpush3.bf16.msra.mxu0 %v4322_v28 }
 0x7df   : > { %v10117_v37 = vpop.eup %10116  ;;  %9933 = vmatprep.subr.msk.bf16.mxu0 %vm4320_vm4, %v11635_v36 }
 0x7e0   : > { %v3499_v48 = vmul.f32 %v10117_v37, %v11465_v44  ;;  %v4598_v10 = vpop.permute.xlu0 %4597  ;;  %v4646_v44 = vpop.permute.xlu1 %4645 }
 0x7e1   : > { %v4603_v51 = vsel %vm710_vm3, %v4598_v10, 0 }
 0x7e2   : > { %v3515_v58 = vpack.c.bf16 %v3499_v48, %v3499_v48 }
 0x7e4   : > { %9421 = vmatmul.mubr.msk.bf16.vlgmr.msra.gmra.mrb[140].mxu1 %vm299_vm0, %v3515_v58  ;;  %v4648_v62 = vpop.permute.xlu0 %4647  ;;  %v4696_v19 = vpop.permute.xlu1 %4695 }
 0x7e5   : > { %9461 = vmatpush3.bf16.xpose.msra.mxu1 %v4553_v2  ;;  %9462 = vmatprep.mubr.msk.bf16.mxu1 %vm10274_vm2, %v12697_v52  ;;  %v4653_v22 = vsel %vm710_vm3, %v4648_v62, 0 }
 0x7e6   : > { %9466 = vmatprep.subr.bf16.mxu1 %v12697_v52 }
 0x7e8   : > { %v4746_v31 = vpop.permute.xlu1 %4745  ;;  %v4698_v26 = vpop.permute.xlu0 %4697 }
 0x7e9   : > { %v4703_v47 = vsel %vm710_vm3, %v4698_v26, 0 }
 0x7ec   : > { %9463 = vmatmul.mubr.msk.bf16.vlgmr.msra.gmra.mrb[144].mxu1 %vm710_vm3, %v4546_v9  ;;  %v4796_v12 = vpop.permute.xlu1 %4795  ;;  %v4748_v4 = vpop.permute.xlu0 %4747 }
 0x7ed   : > { %9467 = vmatpush3.bf16.xpose.msra.mxu1 %v4603_v51  ;;  %9468 = vmatprep.mubr.msk.bf16.mxu1 %vm10274_vm2, %v12697_v52  ;;  %v4753_v3 = vsel %vm710_vm3, %v4748_v4, 0 }
 0x7ee   : > { %9472 = vmatprep.subr.bf16.mxu1 %v12697_v52 }
 0x7f0   : > { %v4846_v38 = vpop.permute.xlu1 %4845  ;;  %v4798_v57 = vpop.permute.xlu0 %4797 }
 0x7f1   : > { %v4803_v50 = vsel %vm710_vm3, %v4798_v57, 0 }
 0x7f4   : > { %9469 = vmatmul.mubr.msk.bf16.vlgmr.msra.gmra.mrb[148].mxu1 %vm710_vm3, %v4596_v25  ;;  %v4896_v11 = vpop.permute.xlu1 %4895  ;;  %v4848_v5 = vpop.permute.xlu0 %4847 }
 0x7f5   : > { %9473 = vmatpush3.bf16.xpose.msra.mxu1 %v4653_v22  ;;  %9474 = vmatprep.mubr.msk.bf16.mxu1 %vm10274_vm2, %v12697_v52  ;;  %v4853_v33 = vsel %vm710_vm3, %v4848_v5, 0 }
 0x7f6   : > { %9478 = vmatprep.subr.bf16.mxu1 %v12697_v52 }
 0x7f8   : > { %v4998_v59 = vpop.permute.xlu1 %4997  ;;  %v4898_v24 = vpop.permute.xlu0 %4897 }
 0x7f9   : > { %v4903_v42 = vsel %vm710_vm3, %v4898_v24, 0  ;;  %v5003_v37 = vsel %vm710_vm3, %v4998_v59, 0 }
 0x7fc   : > { %9475 = vmatmul.mubr.msk.bf16.vlgmr.msra.gmra.mrb[152].mxu1 %vm710_vm3, %v4646_v44  ;;  %v4996_v21 = vpop.permute.xlu1 %4995 }
 0x7fd   : > { %9479 = vmatpush3.bf16.xpose.msra.mxu1 %v4703_v47  ;;  %9480 = vmatprep.mubr.msk.bf16.mxu1 %vm10274_vm2, %v12697_v52 }
 0x7fe   : > { %9484 = vmatprep.subr.bf16.mxu1 %v12697_v52 }
 0x800   : > { %v5098_v53 = vpop.permute.xlu1 %5097 }
 0x801   : > { %v5103_v9 = vsel %vm710_vm3, %v5098_v53, 0 }
 0x804   : > { %9481 = vmatmul.mubr.msk.bf16.vlgmr.msra.gmra.mrb[156].mxu1 %vm710_vm3, %v4696_v19  ;;  %v5096_v28 = vpop.permute.xlu1 %5095 }
 0x805   : > { %9485 = vmatpush3.bf16.xpose.msra.mxu1 %v4753_v3  ;;  %9486 = vmatprep.mubr.msk.bf16.mxu1 %vm10274_vm2, %v12697_v52 }
 0x806   : > { %9490 = vmatprep.subr.bf16.mxu1 %v12697_v52 }
 0x808   : > { %v5198_v48 = vpop.permute.xlu1 %5197 }
 0x809   : > { %v5203_v58 = vsel %vm710_vm3, %v5198_v48, 0 }
 0x80c   : > { %9487 = vmatmul.mubr.msk.bf16.vlgmr.msra.gmra.mrb[160].mxu1 %vm710_vm3, %v4746_v31  ;;  %v5196_v16 = vpop.permute.xlu1 %5195 }
 0x80d   : > { %9491 = vmatpush3.bf16.xpose.msra.mxu1 %v4803_v50  ;;  %9492 = vmatprep.mubr.msk.bf16.mxu1 %vm10274_vm2, %v12697_v52 }
 0x80e   : > { %9496 = vmatprep.subr.bf16.mxu1 %v12697_v52 }
 0x810   : > { %v5298_v2 = vpop.permute.xlu1 %5297 }
 0x811   : > { %v5303_v10 = vsel %vm710_vm3, %v5298_v2, 0 }
 0x814   : > { %9493 = vmatmul.mubr.msk.bf16.vlgmr.msra.gmra.mrb[164].mxu1 %vm710_vm3, %v4796_v12  ;;  %v5296_v25 = vpop.permute.xlu1 %5295 }
 0x815   : > { %9497 = vmatpush3.bf16.xpose.msra.mxu1 %v4853_v33  ;;  %9498 = vmatprep.mubr.msk.bf16.mxu1 %vm10274_vm2, %v12697_v52 }
 0x816   : > { %9502 = vmatprep.subr.bf16.mxu1 %v12697_v52 }
 0x818   : > { %v5618_v62 = vpop.permute.xlu1 %5617 }
 0x819   : > { %v5623_v31 = vsel %vm588_vm1, %v5618_v62, 0 }
 0x81c   : > { %9499 = vmatmul.mubr.msk.bf16.vlgmr.msra.gmra.mrb[168].mxu1 %vm710_vm3, %v4846_v38 }
 0x81d   : > { %9503 = vmatpush3.bf16.xpose.msra.mxu1 %v4903_v42  ;;  %9504 = vmatprep.mubr.msk.bf16.mxu1 %vm10274_vm2, %v12697_v52 }
 0x81e   : > { %9514 = vmatprep.subr.bf16.mxu1 %v12697_v52 }
 0x824   : > { %9505 = vmatmul.mubr.msk.bf16.vlgmr.msra.gmra.mrb[172].mxu1 %vm710_vm3, %v4896_v11 }
 0x825   : > { %9515 = vmatpush3.bf16.xpose.msra.mxu1 %v5003_v37  ;;  %9516 = vmatprep.mubr.msk.bf16.mxu1 %vm10274_vm2, %v12697_v52 }
 0x826   : > { %9526 = vmatprep.subr.bf16.mxu1 %v12697_v52 }
 0x82c   : > { %9517 = vmatmul.mubr.msk.bf16.vlgmr.msra.gmra.mrb[176].mxu1 %vm710_vm3, %v4996_v21  ;;  %v4446_v21 = vsel %vm4320_vm4, %v11635_v36, 0 }
 0x82d   : > { %9527 = vmatpush3.bf16.xpose.msra.mxu1 %v5103_v9  ;;  %9528 = vmatprep.mubr.msk.bf16.mxu1 %vm10274_vm2, %v12697_v52 }
 0x82e   : > { %9538 = vmatprep.subr.bf16.mxu1 %v12697_v52 }
 0x834   : > { %9529 = vmatmul.mubr.msk.bf16.vlgmr.msra.gmra.mrb[180].mxu1 %vm710_vm3, %v5096_v28 }
 0x835   : > { %9539 = vmatpush3.bf16.xpose.msra.mxu1 %v5203_v58  ;;  %9540 = vmatprep.mubr.msk.bf16.mxu1 %vm10274_vm2, %v12697_v52 }
 0x836   : > { %9550 = vmatprep.subr.bf16.mxu1 %v12697_v52 }
 0x83c   : > { %9541 = vmatmul.mubr.msk.bf16.vlgmr.msra.gmra.mrb[184].mxu1 %vm710_vm3, %v5196_v16 }
 0x83d   : > { %9551 = vmatpush3.bf16.xpose.msra.mxu1 %v5303_v10  ;;  %9552 = vmatprep.mubr.msk.bf16.mxu1 %vm10274_vm2, %v12697_v52 }
 0x83e   : > { %9562 = vmatprep.subr.bf16.mxu1 %v12697_v52 }
 0x83f   : > { %v3558_v51 = vpop.f32.mrb[96].mxu0 }
 0x840   : > { %v9332_v44 = vpop.f32.mrb[97].mxu0 }
 0x841   : > { %v3561_v19 = vpop.f32.mrb[98].mxu0 }
 0x842   : > { %v9333_v22 = vpop.f32.mrb[99].mxu0 }
 0x844   : > { %9553 = vmatmul.mubr.msk.bf16.vlgmr.msra.gmra.mrb[188].mxu1 %vm710_vm3, %v5296_v25 }
 0x845   : > { %9563 = vmatpush3.bf16.msra.mxu1 %v5623_v31  ;;  %9564 = vmatprep.mubr.msk.bf16.mxu1 %vm10274_vm2, %v12697_v52 }
 0x846   : > { %9574 = vmatprep.subr.bf16.mxu1 %v12697_v52 }
 0x847   : > { %v3654_v26 = vpop.f32.mrb[100].mxu0 }
 0x848   : > { %v9344_v47 = vpop.f32.mrb[101].mxu0 }
 0x849   : > { %v3657_v12 = vpop.f32.mrb[102].mxu0 }
 0x84a   : > { %v3606_v4 = vpop.f32.mrb[112].mxu1  ;;  %v9345_v3 = vpop.f32.mrb[103].mxu0 }
 0x84b   : > { %v4284_v38 = vpack.c.bf16 %v3606_v4, %v3558_v51  ;;  %v9338_v57 = vpop.f32.mrb[113].mxu1 }
 0x84c   : > { %v3609_v11 = vpop.f32.mrb[114].mxu1 }
 0x84d   : > { %v9339_v50 = vpop.f32.mrb[115].mxu1  ;;  %9426 = vmatprep.mubr.msk.bf16.mxu0 %vm710_vm3, %v4284_v38 }
 0x852   : > { %v3702_v59 = vpop.f32.mrb[116].mxu1 }
 0x853   : > { %v4285_v5 = vpack.c.bf16 %v3702_v59, %v3654_v26  ;;  %v9350_v33 = vpop.f32.mrb[117].mxu1 }
 0x854   : > { %v3705_v24 = vpop.f32.mrb[118].mxu1 }
 0x855   : > { %v9351_v42 = vpop.f32.mrb[119].mxu1  ;;  %9427 = vmatmul.mubr.msk.bf16.vlgmr.msra.gmra.mrb[128].mxu0 %vm710_vm3, %v4285_v5 }
 0x856   : > { %v3750_v53 = vpop.f32.mrb[104].mxu0  ;;  %9443 = vmatpush3.bf16.msra.mxu0 %v4446_v21 }
 0x857   : > { %v9356_v28 = vpop.f32.mrb[105].mxu0  ;;  %9508 = vmatprep.subr.bf16.mxu0 %v12697_v52 }
 0x858   : > { %v3753_v37 = vpop.f32.mrb[106].mxu0 }
 0x859   : > { %v9357_v48 = vpop.f32.mrb[107].mxu0 }
 0x85a   : > { %v3798_v9 = vpop.f32.mrb[120].mxu1 }
 0x85b   : > { %v4286_v16 = vpack.c.bf16 %v3798_v9, %v3750_v53  ;;  %v9362_v58 = vpop.f32.mrb[121].mxu1 }
 0x85c   : > { %v3801_v2 = vpop.f32.mrb[122].mxu1 }
 0x85d   : > { %v9363_v25 = vpop.f32.mrb[123].mxu1  ;;  %9430 = vmatprep.mubr.msk.bf16.mxu0 %vm710_vm3, %v4286_v16 }
 0x85e   : > { %v3846_v10 = vpop.f32.mrb[108].mxu0 }
 0x85f   : > { %v9368_v36 = vpop.f32.mrb[109].mxu0 }
 0x860   : > { %v3849_v51 = vpop.f32.mrb[110].mxu0 }
 0x861   : > { %v9369_v44 = vpop.f32.mrb[111].mxu0 }
 0x862   : > { %v3894_v62 = vpop.f32.mrb[124].mxu1 }
 0x863   : > { %v4287_v19 = vpack.c.bf16 %v3894_v62, %v3846_v10  ;;  %v9374_v22 = vpop.f32.mrb[125].mxu1 }
 0x864   : > { %v3897_v31 = vpop.f32.mrb[126].mxu1 }
 0x865   : > { %v9375_v26 = vpop.f32.mrb[127].mxu1  ;;  %9431 = vmatmul.mubr.msk.bf16.gmra.mrb[132].mxu0 %vm710_vm3, %v4287_v19 }
 0x866   : > { %v3942_v47 = vpop.f32.mrb[112].mxu0 }
 0x867   : > { %v9380_v12 = vpop.f32.mrb[113].mxu0 }
 0x868   : > { %v3945_v4 = vpop.f32.mrb[114].mxu0 }
 0x869   : > { %v9381_v3 = vpop.f32.mrb[115].mxu0 }
 0x86b   : > { %v3990_v38 = vpop.f32.mrb[128].mxu1 }
 0x86c   : > { %v4288_v57 = vpack.c.bf16 %v3990_v38, %v3942_v47  ;;  %v9386_v11 = vpop.f32.mrb[129].mxu1  ;;  %v12698_v38 = vpack.c.bf16 %v11221_v63, %v11210_v20  ;;  %v12699_v20 = vpack.c.bf16 %v11232_v23, %v11230_v13  ;;  %v12701_v23 = vpack.c.bf16 %v11244_v61, %v11240_v29 }
 0x86d   : > { %v3993_v50 = vpop.f32.mrb[130].mxu1  ;;  %v12703_v29 = vpack.c.bf16 %v11258_v60, %v11252_v8  ;;  %v12705_v60 = vld [vmem:[#allocation3_spill] sm:$0xff] }
 0x86e   : > { %v9387_v59 = vpop.f32.mrb[131].mxu1  ;;  %9434 = vmatprep.mubr.msk.bf16.mxu0 %vm710_vm3, %v4288_v57  ;;  %v4038_v5 = vpop.f32.mrb[116].mxu0 }
 0x86f   : > { %v9392_v33 = vpop.f32.mrb[117].mxu0  ;;  %v4948_v57 = vpop.permute.xlu0 %4947 }
 0x870   : > { %v4041_v21 = vpop.f32.mrb[118].mxu0  ;;  %v4953_v33 = vsel %vm710_vm3, %v4948_v57, 0 }
 0x871   : > { %v9393_v24 = vpop.f32.mrb[119].mxu0  ;;  %v11739_v21 = vld [vmem:[%s12689_s6] sm:$0xff] }
 0x873   : > { %v4086_v42 = vpop.f32.mrb[132].mxu1 }
 0x874   : > { %v4289_v53 = vpack.c.bf16 %v4086_v42, %v4038_v5  ;;  %v9398_v28 = vpop.f32.mrb[133].mxu1  ;;  %v12700_v42 = vpack.c.bf16 %v11238_v17, %v11234_v49  ;;  %v12702_v17 = vpack.c.bf16 %v11250_v32, %v11246_v43  ;;  %v12704_v32 = vpack.c.bf16 %v11264_v35, %v11256_v46 }
 0x875   : > { %v4089_v37 = vpop.f32.mrb[134].mxu1 }
 0x876   : > { %v9399_v48 = vpop.f32.mrb[135].mxu1  ;;  %9435 = vmatmul.mubr.msk.bf16.gmra.mrb[136].mxu0 %vm710_vm3, %v4289_v53 }
 0x89f   : > { %v4134_v9 = vpop.f32.mrb[120].mxu0 }
 0x8a0   : > { %v9404_v16 = vpop.f32.mrb[121].mxu0 }
 0x8a1   : > { %v4137_v58 = vpop.f32.mrb[122].mxu0 }
 0x8a2   : > { %v9405_v2 = vpop.f32.mrb[123].mxu0  ;;  %v4946_v58 = vpop.permute.xlu0 %4945 }
 0x8a6   : > { %v5048_v43 = vpop.permute.xlu0 %5047 }
 0x8a7   : > { %v4182_v25 = vpop.f32.mrb[136].mxu1 }
 0x8a8   : > { %v4290_v10 = vpack.c.bf16 %v4182_v25, %v4134_v9  ;;  %v9410_v36 = vpop.f32.mrb[137].mxu1 }
 0x8a9   : > { %v4185_v51 = vpop.f32.mrb[138].mxu1 }
 0x8aa   : > { %v9411_v44 = vpop.f32.mrb[139].mxu1  ;;  %9438 = vmatprep.mubr.msk.bf16.mxu0 %vm710_vm3, %v4290_v10 }
 0x8b0   : > { %v4230_v62 = vpop.f32.mrb[124].mxu0 }
 0x8b1   : > { %v9416_v19 = vpop.f32.mrb[125].mxu0 }
 0x8b2   : > { %v4233_v22 = vpop.f32.mrb[126].mxu0 }
 0x8b3   : > { %v9417_v31 = vpop.f32.mrb[127].mxu0 }
 0x8b4   : > { %v5046_v31 = vpop.permute.xlu0 %5045 }
 0x8b7   : > { %v4278_v26 = vpop.f32.mrb[140].mxu1 }
 0x8b8   : > { %v4291_v47 = vpack.c.bf16 %v4278_v26, %v4230_v62  ;;  %v9422_v12 = vpop.f32.mrb[141].mxu1 }
 0x8b9   : > { %v4281_v4 = vpop.f32.mrb[142].mxu1 }
 0x8ba   : > { %v9423_v3 = vpop.f32.mrb[143].mxu1  ;;  %9439 = vmatmul.mubr.msk.bf16.gmra.mrb[140].mxu0 %vm710_vm3, %v4291_v47  ;;  %v12706_v47 = vld [vmem:[#allocation2_spill] sm:$0xff]  ;;  %v5148_v4 = vpop.permute.xlu0 %5147 }
 0x8bb   : > { %9444 = vmatprep.mubr.msk.bf16.mxu0 %vm710_vm3, %v12698_v38  ;;  %v12707_v12 = vpack.c.bf16 %v12705_v60, %v12706_v47 }
 0x8bf   : > { %v4589_v11 = vpop.f32.mrb[144].mxu1 }
 0x8c0   : > { %v5345_v50 = vmul.f32 0.70710677, %v4589_v11  ;;  %v9464_v59 = vpop.f32.mrb[145].mxu1 }
 0x8c1   : > { %v4592_v5 = vpop.f32.mrb[146].mxu1 }
 0x8c2   : > { %v11742_v24 = vadd.f32 %v11739_v21, %v5345_v50  ;;  %9445 = vmatmul.mubr.msk.bf16.vlgmr.msra.gmra.mrb[128].mxu0 %vm710_vm3, %v12699_v20  ;;  %v9465_v63 = vpop.f32.mrb[147].mxu1  ;;  %v5053_v50 = vsel %vm710_vm3, %v5048_v43, 0  ;;  %v5146_v20 = vpop.permute.xlu0 %5145 }
 0x8c3   : > { %9509 = vmatpush3.bf16.xpose.msra.mxu0 %v4953_v33  ;;  %9448 = vmatprep.mubr.msk.bf16.mxu0 %vm710_vm3, %v12700_v42 }
 0x8c4   : > { %v5377_v53 = vsel %vm299_vm0, %v11742_v24, -inf  ;;  %9520 = vmatprep.subr.bf16.mxu0 %v12697_v52 }
 0x8c5   : > { %5378 = vmax.xlane.f32.xlu0 %v5377_v53 }
 0x8c7   : > { %v4639_v28 = vpop.f32.mrb[148].mxu1 }
 0x8c8   : > { %v5346_v37 = vmul.f32 0.70710677, %v4639_v28  ;;  %v9470_v48 = vpop.f32.mrb[149].mxu1 }
 0x8c9   : > { %v4642_v9 = vpop.f32.mrb[150].mxu1 }
 0x8ca   : > { %v11756_v13 = vadd.f32 %v11739_v21, %v5346_v37  ;;  %9449 = vmatmul.mubr.msk.bf16.gmra.mrb[132].mxu0 %vm710_vm3, %v12701_v23  ;;  %v9471_v49 = vpop.f32.mrb[151].mxu1  ;;  %v5153_v37 = vsel %vm710_vm3, %v5148_v4, 0  ;;  %v5248_v23 = vpop.permute.xlu0 %5247 }
 0x8cb   : > { %9452 = vmatprep.mubr.msk.bf16.mxu0 %vm710_vm3, %v12702_v17 }
 0x8cc   : > { %v5380_v16 = vsel %vm299_vm0, %v11756_v13, -inf }
 0x8cd   : > { %5381 = vmax.xlane.f32.xlu1 %v5380_v16 }
 0x8cf   : > { %v4689_v2 = vpop.f32.mrb[152].mxu1 }
 0x8d0   : > { %v5347_v25 = vmul.f32 0.70710677, %v4689_v2  ;;  %v9476_v10 = vpop.f32.mrb[153].mxu1  ;;  %v5246_v2 = vpop.permute.xlu0 %5245 }
 0x8d1   : > { %v4692_v36 = vpop.f32.mrb[154].mxu1  ;;  %v5253_v10 = vsel %vm710_vm3, %v5248_v23, 0 }
 0x8d2   : > { %v11769_v51 = vadd.f32 %v11739_v21, %v5347_v25  ;;  %9453 = vmatmul.mubr.msk.bf16.gmra.mrb[136].mxu0 %vm710_vm3, %v12703_v29  ;;  %v9477_v61 = vpop.f32.mrb[155].mxu1 }
 0x8d3   : > { %9456 = vmatprep.mubr.msk.bf16.mxu0 %vm710_vm3, %v12704_v32 }
 0x8d4   : > { %v5383_v44 = vsel %vm299_vm0, %v11769_v51, -inf  ;;  %v5570_v43 = vpop.permute.xlu0 %5569 }
 0x8d5   : > { %5384 = vmax.xlane.f32.xlu0 %v5383_v44 }
 0x8d7   : > { %v4739_v62 = vpop.f32.mrb[156].mxu1 }
 0x8d8   : > { %v5348_v19 = vmul.f32 0.70710677, %v4739_v62  ;;  %v9482_v22 = vpop.f32.mrb[157].mxu1 }
 0x8d9   : > { %v4742_v26 = vpop.f32.mrb[158].mxu1  ;;  %v5575_v22 = vsel %vm588_vm1, %v5570_v43, 0 }
 0x8da   : > { %v11782_v8 = vadd.f32 %v11739_v21, %v5348_v19  ;;  %9457 = vmatmul.mubr.msk.bf16.gmra.mrb[140].mxu0 %vm710_vm3, %v12707_v12  ;;  %v9483_v46 = vpop.f32.mrb[159].mxu1 }
 0x8db   : > { %9510 = vmatprep.mubr.msk.bf16.mxu0 %vm10274_vm2, %v12697_v52 }
 0x8dc   : > { %v5386_v35 = vsel %vm299_vm0, %v11782_v8, -inf }
 0x8dd   : > { %5387 = vmax.xlane.f32.xlu0 %v5386_v35 }
 0x8df   : > { %v4789_v3 = vpop.f32.mrb[160].mxu1 }
 0x8e0   : > { %v5349_v38 = vmul.f32 0.70710677, %v4789_v3  ;;  %v9488_v57 = vpop.f32.mrb[161].mxu1 }
 0x8e1   : > { %v4792_v11 = vpop.f32.mrb[162].mxu1 }
 0x8e2   : > { %v11794_v59 = vadd.f32 %v11739_v21, %v5349_v38  ;;  %v9489_v5 = vpop.f32.mrb[163].mxu1  ;;  %9511 = vmatmul.mubr.msk.bf16.vlgmr.msra.gmra.mrb[144].mxu0 %vm710_vm3, %v4946_v58 }
 0x8e3   : > { %9521 = vmatpush3.bf16.xpose.msra.mxu0 %v5053_v50  ;;  %9522 = vmatprep.mubr.msk.bf16.mxu0 %vm10274_vm2, %v12697_v52 }
 0x8e4   : > { %v5389_v33 = vsel %vm299_vm0, %v11794_v59, -inf  ;;  %9532 = vmatprep.subr.bf16.mxu0 %v12697_v52 }
 0x8e5   : > { %5390 = vmax.xlane.f32.xlu0 %v5389_v33 }
 0x8e7   : > { %v4839_v63 = vpop.f32.mrb[164].mxu1 }
 0x8e8   : > { %v5350_v42 = vmul.f32 0.70710677, %v4839_v63  ;;  %v9494_v53 = vpop.f32.mrb[165].mxu1 }
 0x8e9   : > { %v4842_v28 = vpop.f32.mrb[166].mxu1 }
 0x8ea   : > { %v11804_v48 = vadd.f32 %v11739_v21, %v5350_v42  ;;  %v9495_v9 = vpop.f32.mrb[167].mxu1  ;;  %9523 = vmatmul.mubr.msk.bf16.vlgmr.msra.gmra.mrb[148].mxu0 %vm710_vm3, %v5046_v31 }
 0x8eb   : > { %9533 = vmatpush3.bf16.xpose.msra.mxu0 %v5153_v37  ;;  %9534 = vmatprep.mubr.msk.bf16.mxu0 %vm10274_vm2, %v12697_v52 }
 0x8ec   : > { %v5392_v49 = vsel %vm299_vm0, %v11804_v48, -inf  ;;  %9544 = vmatprep.subr.bf16.mxu0 %v12697_v52 }
 0x8ed   : > { %5393 = vmax.xlane.f32.xlu1 %v5392_v49 }
 0x8ef   : > { %v4889_v17 = vpop.f32.mrb[168].mxu1 }
 0x8f0   : > { %v5351_v16 = vmul.f32 0.70710677, %v4889_v17  ;;  %v9500_v58 = vpop.f32.mrb[169].mxu1 }
 0x8f1   : > { %v4892_v25 = vpop.f32.mrb[170].mxu1 }
 0x8f2   : > { %v11814_v36 = vadd.f32 %v11739_v21, %v5351_v16  ;;  %v9501_v29 = vpop.f32.mrb[171].mxu1  ;;  %9535 = vmatmul.mubr.msk.bf16.vlgmr.msra.gmra.mrb[152].mxu0 %vm710_vm3, %v5146_v20 }
 0x8f3   : > { %9545 = vmatpush3.bf16.xpose.msra.mxu0 %v5253_v10  ;;  %9546 = vmatprep.mubr.msk.bf16.mxu0 %vm10274_vm2, %v12697_v52 }
 0x8f4   : > { %v5395_v61 = vsel %vm299_vm0, %v11814_v36, -inf  ;;  %9556 = vmatprep.subr.bf16.mxu0 %v12697_v52 }
 0x8f5   : > { %5396 = vmax.xlane.f32.xlu0 %v5395_v61  ;;  %v11852_v61 = vpop.permute.xlu0 %5665 }
 0x8f7   : > { %v4939_v32 = vpop.f32.mrb[172].mxu1 }
 0x8f8   : > { %v5352_v44 = vmul.f32 0.70710677, %v4939_v32  ;;  %v9506_v62 = vpop.f32.mrb[173].mxu1 }
 0x8f9   : > { %v4942_v19 = vpop.f32.mrb[174].mxu1  ;;  %v11855_v62 = vpop.permute.xlu1 %5713 }
 0x8fa   : > { %v11824_v31 = vadd.f32 %v11739_v21, %v5352_v44  ;;  %v9507_v26 = vpop.f32.mrb[175].mxu1  ;;  %9547 = vmatmul.mubr.msk.bf16.vlgmr.msra.gmra.mrb[156].mxu0 %vm710_vm3, %v5246_v2 }
 0x8fb   : > { %9557 = vmatpush3.bf16.msra.mxu0 %v5575_v22  ;;  %9558 = vmatprep.mubr.msk.bf16.mxu0 %vm10274_vm2, %v12697_v52 }
 0x8fc   : > { %v5398_v60 = vsel %vm299_vm0, %v11824_v31, -inf  ;;  %9568 = vmatprep.subr.bf16.mxu0 %v12697_v52 }
 0x8fd   : > { %5399 = vmax.xlane.f32.xlu1 %v5398_v60 }
 0x8ff   : > { %v5039_v47 = vpop.f32.mrb[176].mxu1 }
 0x900   : > { %v5354_v12 = vmul.f32 0.70710677, %v5039_v47  ;;  %v9518_v46 = vpop.f32.mrb[177].mxu1 }
 0x901   : > { %v5042_v35 = vpop.f32.mrb[178].mxu1 }
 0x902   : > { %v11833_v4 = vadd.f32 %v11739_v21, %v5354_v12  ;;  %v9519_v3 = vpop.f32.mrb[179].mxu1 }
 0x904   : > { %v5404_v38 = vsel %vm299_vm0, %v11833_v4, -inf }
 0x905   : > { %5405 = vmax.xlane.f32.xlu1 %v5404_v38 }
 0x907   : > { %v5139_v57 = vpop.f32.mrb[180].mxu1 }
 0x908   : > { %v5356_v11 = vmul.f32 0.70710677, %v5139_v57  ;;  %v9530_v50 = vpop.f32.mrb[181].mxu1 }
 0x909   : > { %v5142_v5 = vpop.f32.mrb[182].mxu1 }
 0x90a   : > { %v11838_v33 = vadd.f32 %v11739_v21, %v5356_v11  ;;  %v9531_v20 = vpop.f32.mrb[183].mxu1 }
 0x90c   : > { %v5410_v63 = vsel %vm299_vm0, %v11838_v33, -inf }
 0x90d   : > { %5411 = vmax.xlane.f32.xlu1 %v5410_v63 }
 0x90f   : > { %v5239_v42 = vpop.f32.mrb[184].mxu1 }
 0x910   : > { %v5358_v53 = vmul.f32 0.70710677, %v5239_v42  ;;  %v9542_v28 = vpop.f32.mrb[185].mxu1 }
 0x911   : > { %v5242_v37 = vpop.f32.mrb[186].mxu1 }
 0x912   : > { %v11843_v9 = vadd.f32 %v11739_v21, %v5358_v53  ;;  %v9543_v23 = vpop.f32.mrb[187].mxu1 }
 0x914   : > { %v5416_v49 = vsel %vm299_vm0, %v11843_v9, -inf }
 0x915   : > { %5417 = vmax.xlane.f32.xlu1 %v5416_v49 }
 0x917   : > { %v5339_v17 = vpop.f32.mrb[188].mxu1 }
 0x918   : > { %v5360_v16 = vmul.f32 0.70710677, %v5339_v17  ;;  %v9554_v58 = vpop.f32.mrb[189].mxu1 }
 0x919   : > { %v5342_v2 = vpop.f32.mrb[190].mxu1 }
 0x91a   : > { %v11848_v25 = vadd.f32 %v11739_v21, %v5360_v16  ;;  %v9555_v10 = vpop.f32.mrb[191].mxu1 }
 0x91c   : > { %v5422_v29 = vsel %vm299_vm0, %v11848_v25, -inf }
 0x91d   : > { %5423 = vmax.xlane.f32.xlu1 %v5422_v29 }
 0x952   : > { %v5379_v43 = vpop.xlane.xlu0 %5378 }
 0x953   : > { %v5425_v32 = vsub.f32 %v11742_v24, %v5379_v43 }
 0x955   : > { %v5441_v44 = vmul.f32 1.442695, %v5425_v32 }
 0x957   : > { %10118 = vpow2.f32 %v5441_v44 }
 0x95a   : > { %v5382_v19 = vpop.xlane.xlu1 %5381 }
 0x95b   : > { %v5426_v22 = vsub.f32 %v11756_v13, %v5382_v19 }
 0x95d   : > { %v5443_v26 = vmul.f32 1.442695, %v5426_v22 }
 0x95f   : > { %10120 = vpow2.f32 %v5443_v26 }
 0x961   : > { %v11858_v60 = vpop.eup %10118 }
 0x962   : > { %v5385_v47 = vpop.xlane.xlu0 %5384  ;;  %v5473_v12 = vsel %vm299_vm0, %v11858_v60, 0.0 }
 0x963   : > { %v5427_v46 = vsub.f32 %v11769_v51, %v5385_v47  ;;  %5474 = vadd.xlane.f32.xlu0 %v5473_v12 }
 0x965   : > { %v5445_v35 = vmul.f32 1.442695, %v5427_v46 }
 0x967   : > { %10122 = vpow2.f32 %v5445_v35 }
 0x969   : > { %v11863_v24 = vpop.eup %10120 }
 0x96a   : > { %v5388_v3 = vpop.xlane.xlu0 %5387  ;;  %v5476_v38 = vsel %vm299_vm0, %v11863_v24, 0.0 }
 0x96b   : > { %v5428_v13 = vsub.f32 %v11782_v8, %v5388_v3  ;;  %5477 = vadd.xlane.f32.xlu1 %v5476_v38 }
 0x96d   : > { %v5447_v57 = vmul.f32 1.442695, %v5428_v13 }
 0x96f   : > { %10124 = vpow2.f32 %v5447_v57 }
 0x971   : > { %v11868_v11 = vpop.eup %10122 }
 0x972   : > { %v5391_v50 = vpop.xlane.xlu0 %5390  ;;  %v5479_v51 = vsel %vm299_vm0, %v11868_v11, 0.0 }
 0x973   : > { %v5429_v5 = vsub.f32 %v11794_v59, %v5391_v50  ;;  %5480 = vadd.xlane.f32.xlu0 %v5479_v51 }
 0x975   : > { %v5449_v20 = vmul.f32 1.442695, %v5429_v5 }
 0x977   : > { %10126 = vpow2.f32 %v5449_v20 }
 0x979   : > { %v11873_v63 = vpop.eup %10124 }
 0x97a   : > { %v5394_v42 = vpop.xlane.xlu1 %5393  ;;  %v5482_v8 = vsel %vm299_vm0, %v11873_v63, 0.0 }
 0x97b   : > { %v5430_v53 = vsub.f32 %v11804_v48, %v5394_v42  ;;  %5483 = vadd.xlane.f32.xlu1 %v5482_v8 }
 0x97d   : > { %v5451_v28 = vmul.f32 1.442695, %v5430_v53 }
 0x97f   : > { %10128 = vpow2.f32 %v5451_v28 }
 0x981   : > { %v11878_v37 = vpop.eup %10126 }
 0x982   : > { %v5397_v23 = vpop.xlane.xlu0 %5396  ;;  %v5485_v59 = vsel %vm299_vm0, %v11878_v37, 0.0 }
 0x983   : > { %v5431_v49 = vsub.f32 %v11814_v36, %v5397_v23  ;;  %5486 = vadd.xlane.f32.xlu0 %v5485_v59 }
 0x985   : > { %v5453_v17 = vmul.f32 1.442695, %v5431_v49 }
 0x987   : > { %10130 = vpow2.f32 %v5453_v17 }
 0x989   : > { %v11883_v16 = vpop.eup %10128 }
 0x98a   : > { %v5400_v58 = vpop.xlane.xlu1 %5399  ;;  %v5488_v48 = vsel %vm299_vm0, %v11883_v16, 0.0 }
 0x98b   : > { %v5432_v2 = vsub.f32 %v11824_v31, %v5400_v58  ;;  %5489 = vadd.xlane.f32.xlu1 %v5488_v48 }
 0x98d   : > { %v5455_v10 = vmul.f32 1.442695, %v5432_v2 }
 0x98f   : > { %10132 = vpow2.f32 %v5455_v10 }
 0x991   : > { %v11888_v29 = vpop.eup %10130 }
 0x992   : > { %v5406_v43 = vpop.xlane.xlu1 %5405  ;;  %v5491_v36 = vsel %vm299_vm0, %v11888_v29, 0.0 }
 0x993   : > { %v5434_v32 = vsub.f32 %v11833_v4, %v5406_v43  ;;  %5492 = vadd.xlane.f32.xlu0 %v5491_v36 }
 0x995   : > { %v5459_v44 = vmul.f32 1.442695, %v5434_v32 }
 0x997   : > { %10134 = vpow2.f32 %v5459_v44 }
 0x999   : > { %v11893_v19 = vpop.eup %10132 }
 0x99a   : > { %v5412_v22 = vpop.xlane.xlu1 %5411  ;;  %v5494_v31 = vsel %vm299_vm0, %v11893_v19, 0.0 }
 0x99b   : > { %v5436_v26 = vsub.f32 %v11838_v33, %v5412_v22  ;;  %5495 = vadd.xlane.f32.xlu1 %v5494_v31 }
 0x99d   : > { %v5463_v47 = vmul.f32 1.442695, %v5436_v26 }
 0x99f   : > { %10136 = vpow2.f32 %v5463_v47 }
 0x9a1   : > { %v11898_v12 = vpop.eup %10134 }
 0x9a2   : > { %v5500_v46 = vsel %vm299_vm0, %v11898_v12, 0.0  ;;  %v5418_v47 = vpop.xlane.xlu1 %5417 }
 0x9a3   : > { %5501 = vadd.xlane.f32.xlu0 %v5500_v46 }
 0x9a9   : > { %v11902_v4 = vpop.eup %10136 }
 0x9aa   : > { %v5506_v35 = vsel %vm299_vm0, %v11902_v4, 0.0 }
 0x9ab   : > { %5507 = vadd.xlane.f32.xlu0 %v5506_v35  ;;  %v5438_v35 = vsub.f32 %v11843_v9, %v5418_v47 }
 0x9ac   : > { %5809 = vrot.lane.b32.xlu1 %v10596_v18, %s10282_s28 }
 0x9b0   : > { %5905 = vrot.lane.b32.xlu1 %v10604_v27, %s10282_s28 }
 0x9b4   : > { %6001 = vrot.lane.b32.xlu1 %v10612_v30, %s10282_s28 }
 0x9b5   : > { %v4989_v33 = vpop.f32.mrb[144].mxu0 }
 0x9b6   : > { %v5353_v3 = vmul.f32 0.70710677, %v4989_v33  ;;  %v9512_v38 = vpop.f32.mrb[145].mxu0  ;;  %v5424_v33 = vpop.xlane.xlu1 %5423 }
 0x9b7   : > { %v4992_v13 = vpop.f32.mrb[146].mxu0 }
 0x9b8   : > { %v11913_v57 = vadd.f32 %v11739_v21, %v5353_v3  ;;  %v9513_v50 = vpop.f32.mrb[147].mxu0  ;;  %6049 = vrot.lane.b32.xlu1 %v10608_v0, %s10282_s28  ;;  %v5467_v3 = vmul.f32 1.442695, %v5438_v35 }
 0x9ba   : > { %v5401_v51 = vsel %vm299_vm0, %v11913_v57, -inf }
 0x9bb   : > { %5402 = vmax.xlane.f32.xlu0 %v5401_v51  ;;  %v5671_v51 = vsel %vm588_vm1, %v11852_v61, 0  ;;  %v5719_v61 = vsel %vm588_vm1, %v11855_v62, 0 }
 0x9bc   : > { %6097 = vrot.lane.b32.xlu1 %v10620_v39, %s10282_s28 }
 0x9bd   : > { %v5089_v5 = vpop.f32.mrb[148].mxu0 }
 0x9be   : > { %v5355_v20 = vmul.f32 0.70710677, %v5089_v5  ;;  %v9524_v42 = vpop.f32.mrb[149].mxu0 }
 0x9bf   : > { %v5092_v8 = vpop.f32.mrb[150].mxu0 }
 0x9c0   : > { %v11922_v53 = vadd.f32 %v11739_v21, %v5355_v20  ;;  %v9525_v28 = vpop.f32.mrb[151].mxu0 }
 0x9c2   : > { %v5407_v23 = vsel %vm299_vm0, %v11922_v53, -inf }
 0x9c3   : > { %5408 = vmax.xlane.f32.xlu0 %v5407_v23 }
 0x9c5   : > { %v5189_v59 = vpop.f32.mrb[152].mxu0 }
 0x9c6   : > { %v5357_v49 = vmul.f32 0.70710677, %v5189_v59  ;;  %v9536_v17 = vpop.f32.mrb[153].mxu0 }
 0x9c7   : > { %v5192_v58 = vpop.f32.mrb[154].mxu0 }
 0x9c8   : > { %v11927_v48 = vadd.f32 %v11739_v21, %v5357_v49  ;;  %v9537_v2 = vpop.f32.mrb[155].mxu0 }
 0x9ca   : > { %v5413_v10 = vsel %vm299_vm0, %v11927_v48, -inf }
 0x9cb   : > { %5414 = vmax.xlane.f32.xlu0 %v5413_v10 }
 0x9cd   : > { %v5289_v43 = vpop.f32.mrb[156].mxu0 }
 0x9ce   : > { %v5359_v36 = vmul.f32 0.70710677, %v5289_v43  ;;  %v9548_v32 = vpop.f32.mrb[157].mxu0 }
 0x9cf   : > { %v5292_v44 = vpop.f32.mrb[158].mxu0 }
 0x9d0   : > { %v11932_v22 = vadd.f32 %v11739_v21, %v5359_v36  ;;  %v9549_v31 = vpop.f32.mrb[159].mxu0 }
 0x9d2   : > { %v5419_v26 = vsel %vm299_vm0, %v11932_v22, -inf }
 0x9d3   : > { %5420 = vmax.xlane.f32.xlu0 %v5419_v26 }
 0x9e9   : > { %5761 = vrot.lane.b32.xlu0 %v10584_v54, %s10282_s28 }
 0x9f0   : > { %v5475_v46 = vpop.xlane.xlu0 %5474 }
 0x9f1   : > { %10138 = vrcp.f32 %v5475_v46 }
 0x9f8   : > { %v5478_v38 = vpop.xlane.xlu1 %5477 }
 0x9f9   : > { %10140 = vrcp.f32 %v5478_v38 }
 0x9fa   : > { %10142 = vpow2.f32 %v5467_v3 }
 0x9fb   : > { %v10139_v21 = vpop.eup %10138 }
 0x9fc   : > { %v5537_v13 = vmul.f32 %v10139_v21, %v11858_v60 }
 0x9fe   : > { %v5553_v50 = vpack.c.bf16 %v5537_v13, %v5537_v13 }
 0xa00   : > { %9559 = vmatmul.mubr.msk.bf16.vlgmr.msra.gmra.mrb[160].mxu0 %vm299_vm0, %v5553_v50  ;;  %v5481_v5 = vpop.xlane.xlu0 %5480 }
 0xa01   : > { %9569 = vmatpush3.bf16.msra.mxu0 %v5671_v51  ;;  %10144 = vrcp.f32 %v5481_v5  ;;  %9570 = vmatprep.mubr.msk.bf16.mxu0 %vm10274_vm2, %v12697_v52 }
 0xa02   : > { %9580 = vmatprep.subr.bf16.mxu0 %v12697_v52 }
 0xa03   : > { %v10141_v9 = vpop.eup %10140 }
 0xa04   : > { %v11946_v20 = vpop.eup %10142  ;;  %v5538_v42 = vmul.f32 %v10141_v9, %v11863_v24 }
 0xa05   : > { %v5512_v8 = vsel %vm299_vm0, %v11946_v20, 0.0 }
 0xa06   : > { %v5554_v60 = vpack.c.bf16 %v5538_v42, %v5538_v42 }
 0xa08   : > { %9565 = vmatmul.mubr.msk.bf16.vlgmr.msra.gmra.mrb[192].mxu1 %vm299_vm0, %v5554_v60  ;;  %v5484_v28 = vpop.xlane.xlu1 %5483  ;;  %5513 = vadd.xlane.f32.xlu0 %v5512_v8 }
 0xa09   : > { %9575 = vmatpush3.bf16.msra.mxu1 %v5719_v61  ;;  %10146 = vrcp.f32 %v5484_v28  ;;  %9576 = vmatprep.mubr.msk.bf16.mxu1 %vm10274_vm2, %v12697_v52 }
 0xa0a   : > { %9586 = vmatprep.subr.bf16.mxu1 %v12697_v52 }
 0xa0b   : > { %v10145_v23 = vpop.eup %10144 }
 0xa0c   : > { %v5539_v24 = vmul.f32 %v10145_v23, %v11868_v11  ;;  %v5440_v11 = vsub.f32 %v11848_v25, %v5424_v33 }
 0xa0e   : > { %v5555_v59 = vpack.c.bf16 %v5539_v24, %v5539_v24  ;;  %v5471_v36 = vmul.f32 1.442695, %v5440_v11 }
 0xa10   : > { %9571 = vmatmul.mubr.msk.bf16.vlgmr.msra.gmra.mrb[164].mxu0 %vm299_vm0, %v5555_v59  ;;  %v5487_v10 = vpop.xlane.xlu0 %5486 }
 0xa11   : > { %9582 = vmatprep.mubr.msk.bf16.mxu0 %vm10274_vm2, %v12697_v52 }
 0xa13   : > { %v10147_v62 = vpop.eup %10146 }
 0xa14   : > { %v5540_v49 = vmul.f32 %v10147_v62, %v11873_v63 }
 0xa16   : > { %v5556_v17 = vpack.c.bf16 %v5540_v49, %v5540_v49 }
 0xa18   : > { %9577 = vmatmul.mubr.msk.bf16.vlgmr.msra.gmra.mrb[196].mxu1 %vm299_vm0, %v5556_v17  ;;  %v5490_v58 = vpop.xlane.xlu1 %5489 }
 0xa19   : > { %9588 = vmatprep.mubr.msk.bf16.mxu1 %vm10274_vm2, %v12697_v52  ;;  %10148 = vrcp.f32 %v5490_v58 }
 0xa1e   : > { %5857 = vrot.lane.b32.xlu0 %v10592_v15, %s10282_s28 }
 0xa20   : > { %v11969_v32 = vpop.xlane.xlu0 %5492 }
 0xa23   : > { %v10149_v2 = vpop.eup %10148 }
 0xa24   : > { %v5542_v63 = vmul.f32 %v10149_v2, %v11883_v16 }
 0xa26   : > { %v5558_v26 = vpack.c.bf16 %v5542_v63, %v5542_v63 }
 0xa28   : > { %v5496_v43 = vpop.xlane.xlu1 %5495 }
 0xa29   : > { %10150 = vrcp.f32 %v5496_v43 }
 0xa2a   : > { %10152 = vpow2.f32 %v5471_v36 }
 0xa2c   : > { %v5810_v44 = vpop.permute.xlu1 %5809 }
 0xa2d   : > { %v5815_v31 = vsel %vm588_vm1, %v5810_v44, 0 }
 0xa2e   : > { %9587 = vmatpush3.bf16.msra.mxu1 %v5815_v31 }
 0xa2f   : > { %9598 = vmatprep.subr.bf16.mxu1 %v12697_v52 }
 0xa30   : > { %v5906_v47 = vpop.permute.xlu1 %5905  ;;  %v5502_v46 = vpop.xlane.xlu0 %5501 }
 0xa31   : > { %v5911_v25 = vsel %vm588_vm1, %v5906_v47, 0  ;;  %10154 = vrcp.f32 %v5502_v46  ;;  %9589 = vmatmul.mubr.msk.bf16.vlgmr.msra.gmra.mrb[200].mxu1 %vm299_vm0, %v5558_v26 }
 0xa32   : > { %9599 = vmatpush3.bf16.msra.mxu1 %v5911_v25  ;;  %9600 = vmatprep.mubr.msk.bf16.mxu1 %vm10274_vm2, %v12697_v52 }
 0xa33   : > { %v10151_v16 = vpop.eup %10150  ;;  %9610 = vmatprep.subr.bf16.mxu1 %v12697_v52 }
 0xa34   : > { %v6002_v35 = vpop.permute.xlu1 %6001  ;;  %v5544_v33 = vmul.f32 %v10151_v16, %v11893_v19  ;;  %v11981_v13 = vpop.eup %10152 }
 0xa35   : > { %v6007_v50 = vsel %vm588_vm1, %v6002_v35, 0  ;;  %v5518_v19 = vsel %vm299_vm0, %v11981_v13, 0.0 }
 0xa36   : > { %v5560_v3 = vpack.c.bf16 %v5544_v33, %v5544_v33 }
 0xa38   : > { %v11979_v38 = vpop.permute.xlu1 %6049  ;;  %v5508_v21 = vpop.xlane.xlu0 %5507 }
 0xa39   : > { %10156 = vrcp.f32 %v5508_v21  ;;  %9601 = vmatmul.mubr.msk.bf16.vlgmr.msra.gmra.mrb[204].mxu1 %vm299_vm0, %v5560_v3 }
 0xa3a   : > { %9611 = vmatpush3.bf16.msra.mxu1 %v6007_v50  ;;  %9612 = vmatprep.mubr.msk.bf16.mxu1 %vm10274_vm2, %v12697_v52 }
 0xa3b   : > { %v10155_v51 = vpop.eup %10154  ;;  %9622 = vmatprep.subr.bf16.mxu1 %v12697_v52 }
 0xa3c   : > { %v5546_v5 = vmul.f32 %v10155_v51, %v11898_v12  ;;  %v6098_v9 = vpop.permute.xlu1 %6097 }
 0xa3d   : > { %5519 = vadd.xlane.f32.xlu0 %v5518_v19  ;;  %v6103_v60 = vsel %vm588_vm1, %v6098_v9, 0 }
 0xa3e   : > { %v5562_v42 = vpack.c.bf16 %v5546_v5, %v5546_v5 }
 0xa41   : > { %9613 = vmatmul.mubr.msk.bf16.vlgmr.msra.gmra.mrb[208].mxu1 %vm299_vm0, %v5562_v42 }
 0xa42   : > { %9623 = vmatpush3.bf16.msra.mxu1 %v6103_v60  ;;  %9624 = vmatprep.mubr.msk.bf16.mxu1 %vm10274_vm2, %v12697_v52 }
 0xa43   : > { %v10157_v8 = vpop.eup %10156  ;;  %9634 = vmatprep.subr.bf16.mxu1 %v12697_v52 }
 0xa44   : > { %v5548_v61 = vmul.f32 %v10157_v8, %v11902_v4 }
 0xa46   : > { %v5564_v28 = vpack.c.bf16 %v5548_v61, %v5548_v61 }
 0xa48   : > { %v5403_v23 = vpop.xlane.xlu0 %5402 }
 0xa49   : > { %v5433_v12 = vsub.f32 %v11913_v57, %v5403_v23  ;;  %9625 = vmatmul.mubr.msk.bf16.vlgmr.msra.gmra.mrb[212].mxu1 %vm299_vm0, %v5564_v28 }
 0xa4a   : > { %9636 = vmatprep.mubr.msk.bf16.mxu1 %vm10274_vm2, %v12697_v52 }
 0xa4b   : > { %v5457_v24 = vmul.f32 1.442695, %v5433_v12 }
 0xa4d   : > { %10158 = vpow2.f32 %v5457_v24 }
 0xa4e   : > { %10160 = vrcp.f32 %v5487_v10 }
 0xa50   : > { %v5409_v4 = vpop.xlane.xlu0 %5408 }
 0xa53   : > { %5953 = vrot.lane.b32.xlu0 %v10600_v55, %s10282_s28 }
 0xa57   : > { %v12003_v59 = vpop.eup %10158  ;;  %6145 = vrot.lane.b32.xlu0 %v10616_v34, %s10282_s28 }
 0xa58   : > { %v5497_v57 = vsel %vm299_vm0, %v12003_v59, 0.0  ;;  %v5415_v62 = vpop.xlane.xlu0 %5414  ;;  %v10161_v49 = vpop.eup %10160 }
 0xa59   : > { %5498 = vadd.xlane.f32.xlu1 %v5497_v57  ;;  %v5541_v58 = vmul.f32 %v10161_v49, %v11878_v37  ;;  %v5435_v37 = vsub.f32 %v11922_v53, %v5409_v4  ;;  %v5437_v36 = vsub.f32 %v11927_v48, %v5415_v62 }
 0xa5b   : > { %6241 = vrot.lane.b32.xlu0 %v10624_v40, %s10282_s28  ;;  %v5557_v10 = vpack.c.bf16 %v5541_v58, %v5541_v58  ;;  %v5461_v43 = vmul.f32 1.442695, %v5435_v37  ;;  %v5465_v63 = vmul.f32 1.442695, %v5437_v36  ;;  %v6055_v36 = vsel %vm588_vm1, %v11979_v38, 0 }
 0xa5d   : > { %10162 = vpow2.f32 %v5461_v43 }
 0xa5e   : > { %10164 = vpow2.f32 %v5465_v63 }
 0xa5f   : > { %6488 = vrot.lane.b32.xlu0 %v10574_v45, %s10283_s11 }
 0xa60   : > { %v5421_v17 = vpop.xlane.xlu0 %5420 }
 0xa61   : > { %v5439_v44 = vsub.f32 %v11932_v22, %v5421_v17 }
 0xa63   : > { %6538 = vrot.lane.b32.xlu0 %v10576_v6, %s10283_s11  ;;  %v5469_v31 = vmul.f32 1.442695, %v5439_v44 }
 0xa64   : > { %v5762_v11 = vpop.permute.xlu0 %5761 }
 0xa65   : > { %v5767_v2 = vsel %vm588_vm1, %v5762_v11, 0  ;;  %10166 = vpow2.f32 %v5469_v31 }
 0xa66   : > { %9581 = vmatpush3.bf16.msra.mxu0 %v5767_v2  ;;  %10168 = vrcp.f32 %v11969_v32 }
 0xa67   : > { %6588 = vrot.lane.b32.xlu0 %v10582_v7, %s10283_s11  ;;  %9592 = vmatprep.subr.bf16.mxu0 %v12697_v52  ;;  %v12044_v53 = vpop.eup %10162 }
 0xa68   : > { %v5503_v48 = vsel %vm299_vm0, %v12044_v53, 0.0  ;;  %v12051_v22 = vpop.eup %10164 }
 0xa69   : > { %9583 = vmatmul.mubr.msk.bf16.vlgmr.msra.gmra.mrb[168].mxu0 %vm299_vm0, %v5557_v10  ;;  %v5509_v26 = vsel %vm299_vm0, %v12051_v22, 0.0 }
 0xa6a   : > { %6193 = vrot.lane.b32.xlu1 %v10628_v1, %s10282_s28  ;;  %9594 = vmatprep.mubr.msk.bf16.mxu0 %vm10274_vm2, %v12697_v52 }
 0xa6b   : > { %6638 = vrot.lane.b32.xlu0 %v10588_v14, %s10283_s11 }
 0xa6f   : > { %6688 = vrot.lane.b32.xlu0 %v10584_v54, %s10283_s11  ;;  %v12057_v47 = vpop.eup %10166 }
 0xa70   : > { %v10169_v32 = vpop.eup %10168  ;;  %v5515_v25 = vsel %vm299_vm0, %v12057_v47, 0.0 }
 0xa71   : > { %v5543_v16 = vmul.f32 %v10169_v32, %v11888_v29 }
 0xa73   : > { %6686 = vrot.lane.b32.xlu0 %v10584_v54, %s10284_s12  ;;  %v5559_v3 = vpack.c.bf16 %v5543_v16, %v5543_v16 }
 0xa77   : > { %6788 = vrot.lane.b32.xlu0 %v10592_v15, %s10283_s11 }
 0xa7b   : > { %6786 = vrot.lane.b32.xlu0 %v10592_v15, %s10284_s12 }
 0xa7f   : > { %6888 = vrot.lane.b32.xlu0 %v10600_v55, %s10283_s11 }
 0xa83   : > { %6886 = vrot.lane.b32.xlu0 %v10600_v55, %s10284_s12 }
 0xa87   : > { %6988 = vrot.lane.b32.xlu0 %v10608_v0, %s10283_s11 }
 0xa8b   : > { %6986 = vrot.lane.b32.xlu0 %v10608_v0, %s10284_s12 }
 0xa8e   : > { %5504 = vadd.xlane.f32.xlu1 %v5503_v48 }
 0xa8f   : > { %7088 = vrot.lane.b32.xlu0 %v10616_v34, %s10283_s11 }
 0xa92   : > { %5510 = vadd.xlane.f32.xlu1 %v5509_v26 }
 0xa93   : > { %7086 = vrot.lane.b32.xlu0 %v10616_v34, %s10284_s12 }
 0xa95   : > { %v5514_v46 = vpop.xlane.xlu0 %5513 }
 0xa96   : > { %5516 = vadd.xlane.f32.xlu1 %v5515_v25  ;;  %10170 = vrcp.f32 %v5514_v46 }
 0xa97   : > { %7188 = vrot.lane.b32.xlu0 %v10624_v40, %s10283_s11 }
 0xa99   : > { %v5858_v35 = vpop.permute.xlu0 %5857 }
 0xa9a   : > { %v5863_v33 = vsel %vm588_vm1, %v5858_v35, 0 }
 0xa9b   : > { %7186 = vrot.lane.b32.xlu0 %v10624_v40, %s10284_s12  ;;  %9593 = vmatpush3.bf16.msra.mxu0 %v5863_v33 }
 0xa9c   : > { %9604 = vmatprep.subr.bf16.mxu0 %v12697_v52 }
 0xa9e   : > { %9595 = vmatmul.mubr.msk.bf16.vlgmr.msra.gmra.mrb[172].mxu0 %vm299_vm0, %v5559_v3 }
 0xa9f   : > { %7510 = vrot.lane.b32.xlu0 %v10574_v45, %s10285_s13  ;;  %9606 = vmatprep.mubr.msk.bf16.mxu0 %vm10274_vm2, %v12697_v52 }
 0xaa0   : > { %v10171_v12 = vpop.eup %10170 }
 0xaa1   : > { %v5550_v57 = vmul.f32 %v10171_v12, %v11946_v20 }
 0xaa3   : > { %7606 = vrot.lane.b32.xlu0 %v10582_v7, %s10285_s13  ;;  %v5566_v10 = vpack.c.bf16 %v5550_v57, %v5550_v57 }
 0xaa7   : > { %6289 = vrot.lane.b32.xlu1 %v10634_v41, %s10282_s28 }
 0xaab   : > { %6486 = vrot.lane.b32.xlu1 %v10574_v45, %s10284_s12 }
 0xaaf   : > { %6536 = vrot.lane.b32.xlu1 %v10576_v6, %s10284_s12 }
 0xab3   : > { %6586 = vrot.lane.b32.xlu1 %v10582_v7, %s10284_s12 }
 0xab7   : > { %6636 = vrot.lane.b32.xlu1 %v10588_v14, %s10284_s12 }
 0xabb   : > { %6738 = vrot.lane.b32.xlu1 %v10596_v18, %s10283_s11 }
 0xabf   : > { %6736 = vrot.lane.b32.xlu1 %v10596_v18, %s10284_s12 }
 0xac3   : > { %6838 = vrot.lane.b32.xlu1 %v10604_v27, %s10283_s11 }
 0xac7   : > { %6836 = vrot.lane.b32.xlu1 %v10604_v27, %s10284_s12 }
 0xaca   : > { %v12095_v45 = vpop.xlane.xlu0 %5519 }
 0xacb   : > { %6938 = vrot.lane.b32.xlu1 %v10612_v30, %s10283_s11 }
 0xace   : > { %v5954_v7 = vpop.permute.xlu0 %5953 }
 0xacf   : > { %v5959_v29 = vsel %vm588_vm1, %v5954_v7, 0  ;;  %6936 = vrot.lane.b32.xlu1 %v10612_v30, %s10284_s12 }
 0xad0   : > { %9605 = vmatpush3.bf16.msra.mxu0 %v5959_v29 }
 0xad1   : > { %9616 = vmatprep.subr.bf16.mxu0 %v12697_v52 }
 0xad2   : > { %v6146_v3 = vpop.permute.xlu0 %6145 }
 0xad3   : > { %v12103_v21 = vpop.f32.mrb[160].mxu0  ;;  %7038 = vrot.lane.b32.xlu1 %v10620_v39, %s10283_s11 }
 0xad4   : > { %v9560_v50 = vpop.f32.mrb[161].mxu0 }
 0xad5   : > { %v5614_v51 = vpop.f32.mrb[162].mxu0 }
 0xad6   : > { %v9561_v19 = vpop.f32.mrb[163].mxu0 }
 0xad7   : > { %7036 = vrot.lane.b32.xlu1 %v10620_v39, %s10284_s12  ;;  %v6242_v19 = vpop.permute.xlu0 %6241 }
 0xadb   : > { %v12109_v5 = vpop.f32.mrb[192].mxu1  ;;  %7138 = vrot.lane.b32.xlu1 %v10628_v1, %s10283_s11  ;;  %v6489_v12 = vpop.permute.xlu0 %6488 }
 0xadc   : > { %v6337_v9 = vpack.c.bf16 %v12109_v5, %v12103_v21  ;;  %v9566_v42 = vpop.f32.mrb[193].mxu1 }
 0xadd   : > { %v5662_v60 = vpop.f32.mrb[194].mxu1 }
 0xade   : > { %v9567_v8 = vpop.f32.mrb[195].mxu1 }
 0xadf   : > { %7136 = vrot.lane.b32.xlu1 %v10628_v1, %s10284_s12 }
 0xae3   : > { %v12117_v61 = vpop.f32.mrb[164].mxu0  ;;  %7238 = vrot.lane.b32.xlu1 %v10634_v41, %s10283_s11 }
 0xae4   : > { %v9572_v28 = vpop.f32.mrb[165].mxu0 }
 0xae5   : > { %v5710_v23 = vpop.f32.mrb[166].mxu0 }
 0xae6   : > { %v9573_v24 = vpop.f32.mrb[167].mxu0  ;;  %v5499_v4 = vpop.xlane.xlu1 %5498 }
 0xae7   : > { %10172 = vrcp.f32 %v5499_v4  ;;  %7236 = vrot.lane.b32.xlu1 %v10634_v41, %s10284_s12 }
 0xae8   : > { %10174 = vrcp.f32 %v12095_v45 }
 0xaea   : > { %v6194_v62 = vpop.permute.xlu1 %6193 }
 0xaeb   : > { %v6199_v49 = vsel %vm588_vm1, %v6194_v62, 0  ;;  %v12125_v17 = vpop.f32.mrb[196].mxu1  ;;  %7558 = vrot.lane.b32.xlu1 %v10576_v6, %s10285_s13  ;;  %v6151_v62 = vsel %vm588_vm1, %v6146_v3, 0 }
 0xaec   : > { %v6338_v58 = vpack.c.bf16 %v12125_v17, %v12117_v61  ;;  %v9578_v11 = vpop.f32.mrb[197].mxu1  ;;  %9635 = vmatpush3.bf16.msra.mxu1 %v6199_v49 }
 0xaed   : > { %v5758_v2 = vpop.f32.mrb[198].mxu1  ;;  %9646 = vmatprep.subr.bf16.mxu1 %v12697_v52 }
 0xaee   : > { %v9579_v37 = vpop.f32.mrb[199].mxu1 }
 0xaef   : > { %7654 = vrot.lane.b32.xlu1 %v10588_v14, %s10285_s13  ;;  %9637 = vmatmul.mubr.msk.bf16.vlgmr.msra.gmra.mrb[216].mxu1 %vm299_vm0, %v5566_v10  ;;  %v6345_v37 = vrot.slane %v11639_v56, 2 }
 0xaf0   : > { %9648 = vmatprep.mubr.msk.bf16.mxu1 %vm10274_vm2, %v12697_v52 }
 0xaf1   : > { %v10173_v20 = vpop.eup %10172 }
 0xaf2   : > { %v5545_v6 = vmul.f32 %v10173_v20, %v12003_v59  ;;  %v10175_v42 = vpop.eup %10174 }
 0xaf3   : > { %v5552_v28 = vmul.f32 %v10175_v42, %v11981_v13 }
 0xaf4   : > { %v5561_v43 = vpack.c.bf16 %v5545_v6, %v5545_v6  ;;  %v6494_v6 = vsel %vm710_vm3, %v6489_v12, 0 }
 0xaf5   : > { %v5568_v49 = vpack.c.bf16 %v5552_v28, %v5552_v28 }
 0xaf6   : > { %9607 = vmatmul.mubr.msk.bf16.vlgmr.msra.gmra.mrb[176].mxu0 %vm299_vm0, %v5561_v43  ;;  %v6247_v43 = vsel %vm588_vm1, %v6242_v19, 0 }
 0xaf7   : > { %9617 = vmatpush3.bf16.msra.mxu0 %v6055_v36  ;;  %9618 = vmatprep.mubr.msk.bf16.mxu0 %vm10274_vm2, %v12697_v52 }
 0xaf8   : > { %9628 = vmatprep.subr.bf16.mxu0 %v12697_v52 }
 0xb04   : > { %v12144_v14 = vpop.f32.mrb[200].mxu1 }
 0xb05   : > { %v9590_v63 = vpop.f32.mrb[201].mxu1 }
 0xb06   : > { %v5854_v44 = vpop.f32.mrb[202].mxu1 }
 0xb07   : > { %v9591_v31 = vpop.f32.mrb[203].mxu1 }
 0xb0c   : > { %v12146_v48 = vpop.f32.mrb[204].mxu1 }
 0xb0d   : > { %v9602_v59 = vpop.f32.mrb[205].mxu1 }
 0xb0e   : > { %v5950_v26 = vpop.f32.mrb[206].mxu1  ;;  %v6371_v59 = vsel %vm4320_vm4, %v6345_v37, 0 }
 0xb0f   : > { %v9603_v32 = vpop.f32.mrb[207].mxu1 }
 0xb14   : > { %v12148_v46 = vpop.f32.mrb[208].mxu1 }
 0xb15   : > { %v9614_v38 = vpop.f32.mrb[209].mxu1 }
 0xb16   : > { %v6046_v25 = vpop.f32.mrb[210].mxu1 }
 0xb17   : > { %v9615_v16 = vpop.f32.mrb[211].mxu1 }
 0xb1b   : > { %v5505_v35 = vpop.xlane.xlu1 %5504 }
 0xb1c   : > { %10176 = vrcp.f32 %v5505_v35  ;;  %v12151_v33 = vpop.f32.mrb[212].mxu1 }
 0xb1d   : > { %v9626_v7 = vpop.f32.mrb[213].mxu1 }
 0xb1e   : > { %v6142_v29 = vpop.f32.mrb[214].mxu1 }
 0xb1f   : > { %v9627_v50 = vpop.f32.mrb[215].mxu1  ;;  %v5511_v51 = vpop.xlane.xlu1 %5510 }
 0xb20   : > { %10178 = vrcp.f32 %v5511_v51 }
 0xb23   : > { %v5517_v60 = vpop.xlane.xlu1 %5516 }
 0xb24   : > { %10180 = vrcp.f32 %v5517_v60 }
 0xb26   : > { %v10177_v8 = vpop.eup %10176 }
 0xb27   : > { %v5547_v23 = vmul.f32 %v10177_v8, %v12044_v53  ;;  %v6290_v45 = vpop.permute.xlu1 %6289  ;;  %v6539_v53 = vpop.permute.xlu0 %6538 }
 0xb28   : > { %v6295_v24 = vsel %vm588_vm1, %v6290_v45, 0  ;;  %v6544_v26 = vsel %vm710_vm3, %v6539_v53, 0 }
 0xb29   : > { %v5563_v4 = vpack.c.bf16 %v5547_v23, %v5547_v23  ;;  %9647 = vmatpush3.bf16.msra.mxu1 %v6295_v24 }
 0xb2a   : > { %v10179_v57 = vpop.eup %10178  ;;  %9670 = vmatprep.subr.bf16.mxu1 %v12697_v52 }
 0xb2b   : > { %9619 = vmatmul.mubr.msk.bf16.vlgmr.msra.gmra.mrb[180].mxu0 %vm299_vm0, %v5563_v4  ;;  %v6487_v11 = vpop.permute.xlu1 %6486  ;;  %v5549_v13 = vmul.f32 %v10179_v57, %v12051_v22  ;;  %v6589_v36 = vpop.permute.xlu0 %6588 }
 0xb2c   : > { %9629 = vmatpush3.bf16.msra.mxu0 %v6151_v62  ;;  %9630 = vmatprep.mubr.msk.bf16.mxu0 %vm10274_vm2, %v12697_v52  ;;  %v6594_v50 = vsel %vm710_vm3, %v6589_v36, 0 }
 0xb2d   : > { %9649 = vmatmul.mubr.msk.bf16.vlgmr.msra.gmra.mrb[220].mxu1 %vm299_vm0, %v5568_v49  ;;  %9640 = vmatprep.subr.bf16.mxu0 %v12697_v52  ;;  %v5565_v10 = vpack.c.bf16 %v5549_v13, %v5549_v13 }
 0xb2e   : > { %9672 = vmatprep.mubr.msk.bf16.mxu1 %vm10274_vm2, %v12697_v52  ;;  %v10181_v20 = vpop.eup %10180 }
 0xb2f   : > { %v6537_v2 = vpop.permute.xlu1 %6536  ;;  %v5551_v63 = vmul.f32 %v10181_v20, %v12057_v47  ;;  %v6639_v32 = vpop.permute.xlu0 %6638 }
 0xb31   : > { %v5567_v31 = vpack.c.bf16 %v5551_v63, %v5551_v63 }
 0xb32   : > { %9671 = vmatpush3.bf16.xpose.msra.mxu1 %v6494_v6 }
 0xb33   : > { %9631 = vmatmul.mubr.msk.bf16.vlgmr.msra.gmra.mrb[184].mxu0 %vm299_vm0, %v5565_v10  ;;  %v6587_v22 = vpop.permute.xlu1 %6586  ;;  %9676 = vmatprep.subr.bf16.mxu1 %v12697_v52  ;;  %v6689_v29 = vpop.permute.xlu0 %6688 }
 0xb34   : > { %9641 = vmatpush3.bf16.msra.mxu0 %v6247_v43  ;;  %9642 = vmatprep.mubr.msk.bf16.mxu0 %vm10274_vm2, %v12697_v52  ;;  %v6694_v21 = vsel %vm710_vm3, %v6689_v29, 0 }
 0xb35   : > { %9934 = vmatprep.subr.msk.bf16.mxu0 %vm4320_vm4, %v6345_v37 }
 0xb37   : > { %v6637_v44 = vpop.permute.xlu1 %6636 }
 0xb39   : > { %9673 = vmatmul.mubr.msk.bf16.vlgmr.msra.gmra.mrb[224].mxu1 %vm710_vm3, %v6487_v11 }
 0xb3a   : > { %9677 = vmatpush3.bf16.xpose.msra.mxu1 %v6544_v26  ;;  %9678 = vmatprep.mubr.msk.bf16.mxu1 %vm10274_vm2, %v12697_v52 }
 0xb3b   : > { %9643 = vmatmul.mubr.msk.bf16.vlgmr.msra.gmra.mrb[188].mxu0 %vm299_vm0, %v5567_v31  ;;  %v6739_v38 = vpop.permute.xlu1 %6738  ;;  %9682 = vmatprep.subr.bf16.mxu1 %v12697_v52 }
 0xb3c   : > { %9653 = vmatpush3.bf16.msra.mxu0 %v6371_v59  ;;  %v5803_v47 = vpop.f32.mrb[168].mxu0  ;;  %9654 = vmatprep.mubr.msk.bf16.mxu0 %vm710_vm3, %v6337_v9  ;;  %v6744_v17 = vsel %vm710_vm3, %v6739_v38, 0 }
 0xb3d   : > { %v6339_v25 = vpack.c.bf16 %v12144_v14, %v5803_v47  ;;  %v9584_v16 = vpop.f32.mrb[169].mxu0  ;;  %9694 = vmatprep.subr.bf16.mxu0 %v12697_v52  ;;  %v6644_v14 = vsel %vm710_vm3, %v6639_v32, 0 }
 0xb3e   : > { %v5806_v35 = vpop.f32.mrb[170].mxu0 }
 0xb3f   : > { %v9585_v3 = vpop.f32.mrb[171].mxu0  ;;  %v6737_v7 = vpop.permute.xlu1 %6736 }
 0xb41   : > { %9679 = vmatmul.mubr.msk.bf16.vlgmr.msra.gmra.mrb[228].mxu1 %vm710_vm3, %v6537_v2 }
 0xb42   : > { %9683 = vmatpush3.bf16.xpose.msra.mxu1 %v6594_v50  ;;  %9684 = vmatprep.mubr.msk.bf16.mxu1 %vm10274_vm2, %v12697_v52 }
 0xb43   : > { %9655 = vmatmul.mubr.msk.bf16.vlgmr.msra.gmra.mrb[128].mxu0 %vm710_vm3, %v6338_v58  ;;  %v6839_v5 = vpop.permute.xlu1 %6838  ;;  %9688 = vmatprep.subr.bf16.mxu1 %v12697_v52 }
 0xb44   : > { %9658 = vmatprep.mubr.msk.bf16.mxu0 %vm710_vm3, %v6339_v25  ;;  %v6844_v51 = vsel %vm710_vm3, %v6839_v5, 0 }
 0xb45   : > { %9695 = vmatpush3.bf16.xpose.msra.mxu0 %v6694_v21 }
 0xb46   : > { %9706 = vmatprep.subr.bf16.mxu0 %v12697_v52 }
 0xb47   : > { %v6837_v9 = vpop.permute.xlu1 %6836 }
 0xb49   : > { %9685 = vmatmul.mubr.msk.bf16.vlgmr.msra.gmra.mrb[232].mxu1 %vm710_vm3, %v6587_v22 }
 0xb4a   : > { %9689 = vmatpush3.bf16.xpose.msra.mxu1 %v6644_v14  ;;  %9690 = vmatprep.mubr.msk.bf16.mxu1 %vm10274_vm2, %v12697_v52 }
 0xb4b   : > { %9700 = vmatprep.subr.bf16.mxu1 %v12697_v52  ;;  %v6939_v61 = vpop.permute.xlu1 %6938 }
 0xb4c   : > { %v6944_v60 = vsel %vm710_vm3, %v6939_v61, 0 }
 0xb4f   : > { %v6937_v58 = vpop.permute.xlu1 %6936 }
 0xb51   : > { %9691 = vmatmul.mubr.msk.bf16.vlgmr.msra.gmra.mrb[236].mxu1 %vm710_vm3, %v6637_v44  ;;  %v6687_v44 = vpop.permute.xlu0 %6686 }
 0xb52   : > { %9701 = vmatpush3.bf16.xpose.msra.mxu1 %v6744_v17  ;;  %9702 = vmatprep.mubr.msk.bf16.mxu1 %vm10274_vm2, %v12697_v52 }
 0xb53   : > { %9712 = vmatprep.subr.bf16.mxu1 %v12697_v52  ;;  %v7039_v19 = vpop.permute.xlu1 %7038 }
 0xb54   : > { %v7044_v28 = vsel %vm710_vm3, %v7039_v19, 0 }
 0xb55   : > { %v6789_v59 = vpop.permute.xlu0 %6788 }
 0xb57   : > { %v7037_v42 = vpop.permute.xlu1 %7036 }
 0xb59   : > { %9703 = vmatmul.mubr.msk.bf16.vlgmr.msra.gmra.mrb[240].mxu1 %vm710_vm3, %v6737_v7  ;;  %v6787_v7 = vpop.permute.xlu0 %6786 }
 0xb5a   : > { %9713 = vmatpush3.bf16.xpose.msra.mxu1 %v6844_v51  ;;  %9714 = vmatprep.mubr.msk.bf16.mxu1 %vm10274_vm2, %v12697_v52 }
 0xb5b   : > { %9724 = vmatprep.subr.bf16.mxu1 %v12697_v52  ;;  %v7139_v8 = vpop.permute.xlu1 %7138 }
 0xb5c   : > { %v7144_v12 = vsel %vm710_vm3, %v7139_v8, 0 }
 0xb5f   : > { %v7137_v23 = vpop.permute.xlu1 %7136 }
 0xb61   : > { %9715 = vmatmul.mubr.msk.bf16.vlgmr.msra.gmra.mrb[244].mxu1 %vm710_vm3, %v6837_v9  ;;  %v6889_v9 = vpop.permute.xlu0 %6888 }
 0xb62   : > { %9725 = vmatpush3.bf16.xpose.msra.mxu1 %v6944_v60  ;;  %9726 = vmatprep.mubr.msk.bf16.mxu1 %vm10274_vm2, %v12697_v52 }
 0xb63   : > { %9736 = vmatprep.subr.bf16.mxu1 %v12697_v52  ;;  %v7239_v57 = vpop.permute.xlu1 %7238 }
 0xb64   : > { %v7244_v13 = vsel %vm710_vm3, %v7239_v57, 0 }
 0xb67   : > { %v7237_v11 = vpop.permute.xlu1 %7236 }
 0xb69   : > { %9727 = vmatmul.mubr.msk.bf16.vlgmr.msra.gmra.mrb[248].mxu1 %vm710_vm3, %v6937_v58 }
 0xb6a   : > { %9737 = vmatpush3.bf16.xpose.msra.mxu1 %v7044_v28  ;;  %9738 = vmatprep.mubr.msk.bf16.mxu1 %vm10274_vm2, %v12697_v52 }
 0xb6b   : > { %9748 = vmatprep.subr.bf16.mxu1 %v12697_v52 }
 0xb71   : > { %v5899_v45 = vpop.f32.mrb[172].mxu0  ;;  %9739 = vmatmul.mubr.msk.bf16.vlgmr.msra.gmra.mrb[252].mxu1 %vm710_vm3, %v7037_v42  ;;  %v12250_v42 = vld [vmem:[%s12689_s6] sm:$0xff] }
 0xb72   : > { %v6340_v24 = vpack.c.bf16 %v12146_v48, %v5899_v45  ;;  %v9596_v4 = vpop.f32.mrb[173].mxu0  ;;  %9749 = vmatpush3.bf16.xpose.msra.mxu1 %v7144_v12  ;;  %9750 = vmatprep.mubr.msk.bf16.mxu1 %vm10274_vm2, %v12697_v52  ;;  %v7559_v48 = vpop.permute.xlu1 %7558 }
 0xb73   : > { %v5902_v62 = vpop.f32.mrb[174].mxu0  ;;  %9760 = vmatprep.subr.bf16.mxu1 %v12697_v52  ;;  %v7564_v53 = vsel %vm588_vm1, %v7559_v48, 0  ;;  %v6887_v12 = vpop.permute.xlu0 %6886 }
 0xb74   : > { %v9597_v49 = vpop.f32.mrb[175].mxu0  ;;  %9659 = vmatmul.mubr.msk.bf16.gmra.mrb[132].mxu0 %vm710_vm3, %v6340_v24 }
 0xb77   : > { %v6989_v48 = vpop.permute.xlu0 %6988 }
 0xb79   : > { %9751 = vmatmul.mubr.msk.bf16.vlgmr.msra.gmra.mrb[0].mxu1 %vm710_vm3, %v7137_v23 }
 0xb7a   : > { %9761 = vmatpush3.bf16.xpose.msra.mxu1 %v7244_v13  ;;  %9762 = vmatprep.mubr.msk.bf16.mxu1 %vm10274_vm2, %v12697_v52  ;;  %v6794_v13 = vsel %vm710_vm3, %v6789_v59, 0 }
 0xb7b   : > { %9772 = vmatprep.subr.bf16.mxu1 %v12697_v52 }
 0xb81   : > { %9763 = vmatmul.mubr.msk.bf16.vlgmr.msra.gmra.mrb[4].mxu1 %vm710_vm3, %v7237_v11 }
 0xb82   : > { %9773 = vmatpush3.bf16.msra.mxu1 %v7564_v53  ;;  %9774 = vmatprep.mubr.msk.bf16.mxu1 %vm10274_vm2, %v12697_v52 }
 0xb83   : > { %9784 = vmatprep.subr.bf16.mxu1 %v12697_v52 }
 0xbc2   : > { %v6235_v2 = vpop.f32.mrb[216].mxu1 }
 0xbc3   : > { %v9638_v10 = vpop.f32.mrb[217].mxu1 }
 0xbc4   : > { %v6238_v37 = vpop.f32.mrb[218].mxu1 }
 0xbc5   : > { %v9639_v20 = vpop.f32.mrb[219].mxu1 }
 0xbc9   : > { %v5995_v6 = vpop.f32.mrb[176].mxu0 }
 0xbca   : > { %v6341_v43 = vpack.c.bf16 %v12148_v46, %v5995_v6  ;;  %v9608_v22 = vpop.f32.mrb[177].mxu0  ;;  %v6987_v6 = vpop.permute.xlu0 %6986 }
 0xbcb   : > { %v5998_v36 = vpop.f32.mrb[178].mxu0 }
 0xbcc   : > { %v9609_v63 = vpop.f32.mrb[179].mxu0  ;;  %9662 = vmatprep.mubr.msk.bf16.mxu0 %vm710_vm3, %v6341_v43  ;;  %v6894_v36 = vsel %vm710_vm3, %v6889_v9, 0 }
 0xbfe   : > { %v6091_v31 = vpop.f32.mrb[180].mxu0 }
 0xbff   : > { %v6342_v26 = vpack.c.bf16 %v12151_v33, %v6091_v31  ;;  %v9620_v32 = vpop.f32.mrb[181].mxu0  ;;  %v7089_v31 = vpop.permute.xlu0 %7088 }
 0xc00   : > { %v6331_v38 = vpop.f32.mrb[220].mxu1  ;;  %v6094_v47 = vpop.f32.mrb[182].mxu0 }
 0xc01   : > { %v9650_v25 = vpop.f32.mrb[221].mxu1  ;;  %v9621_v16 = vpop.f32.mrb[183].mxu0  ;;  %9663 = vmatmul.mubr.msk.bf16.gmra.mrb[136].mxu0 %vm710_vm3, %v6342_v26 }
 0xc02   : > { %v6334_v35 = vpop.f32.mrb[222].mxu1  ;;  %v6994_v25 = vsel %vm710_vm3, %v6989_v48, 0 }
 0xc03   : > { %v9651_v3 = vpop.f32.mrb[223].mxu1  ;;  %v7087_v35 = vpop.permute.xlu0 %7086 }
 0xc06   : > { %v6187_v46 = vpop.f32.mrb[184].mxu0 }
 0xc07   : > { %v6343_v29 = vpack.c.bf16 %v6235_v2, %v6187_v46  ;;  %v9632_v50 = vpop.f32.mrb[185].mxu0  ;;  %v7189_v9 = vpop.permute.xlu0 %7188 }
 0xc08   : > { %v6190_v21 = vpop.f32.mrb[186].mxu0 }
 0xc09   : > { %v9633_v5 = vpop.f32.mrb[187].mxu0  ;;  %9666 = vmatprep.mubr.msk.bf16.mxu0 %vm710_vm3, %v6343_v29 }
 0xc0a   : > { %v7094_v5 = vsel %vm710_vm3, %v7089_v31, 0 }
 0xc0c   : > { %v6530_v14 = vpop.f32.mrb[224].mxu1 }
 0xc0d   : > { %v7286_v33 = vmul.f32 0.70710677, %v6530_v14  ;;  %v9674_v61 = vpop.f32.mrb[225].mxu1 }
 0xc0e   : > { %v6283_v17 = vpop.f32.mrb[188].mxu0  ;;  %v6533_v51 = vpop.f32.mrb[226].mxu1 }
 0xc0f   : > { %v6344_v58 = vpack.c.bf16 %v6331_v38, %v6283_v17  ;;  %v9644_v19 = vpop.f32.mrb[189].mxu0  ;;  %v12253_v60 = vadd.f32 %v12250_v42, %v7286_v33  ;;  %v9675_v8 = vpop.f32.mrb[227].mxu1 }
 0xc10   : > { %v6286_v28 = vpop.f32.mrb[190].mxu0  ;;  %v7187_v51 = vpop.permute.xlu0 %7186 }
 0xc11   : > { %v9645_v23 = vpop.f32.mrb[191].mxu0  ;;  %9667 = vmatmul.mubr.msk.bf16.gmra.mrb[140].mxu0 %vm710_vm3, %v6344_v58  ;;  %v7318_v45 = vsel %vm299_vm0, %v12253_v60, -inf  ;;  %v7194_v28 = vsel %vm710_vm3, %v7189_v9, 0 }
 0xc12   : > { %9696 = vmatprep.mubr.msk.bf16.mxu0 %vm10274_vm2, %v12697_v52  ;;  %7319 = vmax.xlane.f32.xlu0 %v7318_v45 }
 0xc14   : > { %v6580_v24 = vpop.f32.mrb[228].mxu1 }
 0xc15   : > { %v7287_v4 = vmul.f32 0.70710677, %v6580_v24  ;;  %v9680_v57 = vpop.f32.mrb[229].mxu1 }
 0xc16   : > { %v6583_v62 = vpop.f32.mrb[230].mxu1 }
 0xc17   : > { %v12261_v49 = vadd.f32 %v12250_v42, %v7287_v4  ;;  %v9681_v11 = vpop.f32.mrb[231].mxu1 }
 0xc19   : > { %9697 = vmatmul.mubr.msk.bf16.vlgmr.msra.gmra.mrb[192].mxu0 %vm710_vm3, %v6687_v44  ;;  %v7321_v53 = vsel %vm299_vm0, %v12261_v49, -inf }
 0xc1a   : > { %9707 = vmatpush3.bf16.xpose.msra.mxu0 %v6794_v13  ;;  %9708 = vmatprep.mubr.msk.bf16.mxu0 %vm10274_vm2, %v12697_v52 }
 0xc1b   : > { %7322 = vmax.xlane.f32.xlu1 %v7321_v53  ;;  %9718 = vmatprep.subr.bf16.mxu0 %v12697_v52 }
 0xc1c   : > { %v6630_v2 = vpop.f32.mrb[232].mxu1 }
 0xc1d   : > { %v7288_v10 = vmul.f32 0.70710677, %v6630_v2  ;;  %v9686_v37 = vpop.f32.mrb[233].mxu1 }
 0xc1e   : > { %v6633_v20 = vpop.f32.mrb[234].mxu1 }
 0xc1f   : > { %v12271_v43 = vadd.f32 %v12250_v42, %v7288_v10  ;;  %v9687_v22 = vpop.f32.mrb[235].mxu1 }
 0xc21   : > { %9709 = vmatmul.mubr.msk.bf16.vlgmr.msra.gmra.mrb[196].mxu0 %vm710_vm3, %v6787_v7  ;;  %v7324_v63 = vsel %vm299_vm0, %v12271_v43, -inf }
 0xc22   : > { %9719 = vmatpush3.bf16.xpose.msra.mxu0 %v6894_v36  ;;  %9720 = vmatprep.mubr.msk.bf16.mxu0 %vm10274_vm2, %v12697_v52 }
 0xc23   : > { %7325 = vmax.xlane.f32.xlu0 %v7324_v63  ;;  %9730 = vmatprep.subr.bf16.mxu0 %v12697_v52 }
 0xc24   : > { %v6680_v44 = vpop.f32.mrb[236].mxu1 }
 0xc25   : > { %v7289_v59 = vmul.f32 0.70710677, %v6680_v44  ;;  %v9692_v26 = vpop.f32.mrb[237].mxu1 }
 0xc26   : > { %v6683_v32 = vpop.f32.mrb[238].mxu1 }
 0xc27   : > { %v12281_v38 = vadd.f32 %v12250_v42, %v7289_v59  ;;  %v9693_v47 = vpop.f32.mrb[239].mxu1 }
 0xc29   : > { %9721 = vmatmul.mubr.msk.bf16.vlgmr.msra.gmra.mrb[200].mxu0 %vm710_vm3, %v6887_v12  ;;  %v7327_v16 = vsel %vm299_vm0, %v12281_v38, -inf  ;;  %v7511_v12 = vpop.permute.xlu0 %7510 }
 0xc2a   : > { %9731 = vmatpush3.bf16.xpose.msra.mxu0 %v6994_v25  ;;  %9732 = vmatprep.mubr.msk.bf16.mxu0 %vm10274_vm2, %v12697_v52  ;;  %v7516_v13 = vsel %vm588_vm1, %v7511_v12, 0 }
 0xc2b   : > { %7328 = vmax.xlane.f32.xlu0 %v7327_v16  ;;  %9742 = vmatprep.subr.bf16.mxu0 %v12697_v52 }
 0xc2c   : > { %v6780_v3 = vpop.f32.mrb[240].mxu1 }
 0xc2d   : > { %v7291_v46 = vmul.f32 0.70710677, %v6780_v3  ;;  %v9704_v7 = vpop.f32.mrb[241].mxu1 }
 0xc2e   : > { %v6783_v29 = vpop.f32.mrb[242].mxu1 }
 0xc2f   : > { %v12291_v50 = vadd.f32 %v12250_v42, %v7291_v46  ;;  %v9705_v21 = vpop.f32.mrb[243].mxu1  ;;  %v12335_v29 = vpop.permute.xlu0 %7606 }
 0xc31   : > { %9733 = vmatmul.mubr.msk.bf16.vlgmr.msra.gmra.mrb[204].mxu0 %vm710_vm3, %v6987_v6  ;;  %v7333_v14 = vsel %vm299_vm0, %v12291_v50, -inf }
 0xc32   : > { %9743 = vmatpush3.bf16.xpose.msra.mxu0 %v7094_v5  ;;  %9744 = vmatprep.mubr.msk.bf16.mxu0 %vm10274_vm2, %v12697_v52 }
 0xc33   : > { %7334 = vmax.xlane.f32.xlu1 %v7333_v14  ;;  %9754 = vmatprep.subr.bf16.mxu0 %v12697_v52  ;;  %v12338_v14 = vpop.permute.xlu1 %7654 }
 0xc34   : > { %v6880_v33 = vpop.f32.mrb[244].mxu1 }
 0xc35   : > { %v7293_v61 = vmul.f32 0.70710677, %v6880_v33  ;;  %v9716_v17 = vpop.f32.mrb[245].mxu1 }
 0xc36   : > { %v6883_v58 = vpop.f32.mrb[246].mxu1 }
 0xc37   : > { %v12301_v19 = vadd.f32 %v12250_v42, %v7293_v61  ;;  %v9717_v8 = vpop.f32.mrb[247].mxu1 }
 0xc39   : > { %9745 = vmatmul.mubr.msk.bf16.vlgmr.msra.gmra.mrb[208].mxu0 %vm710_vm3, %v7087_v35  ;;  %v7339_v23 = vsel %vm299_vm0, %v12301_v19, -inf }
 0xc3a   : > { %9755 = vmatpush3.bf16.xpose.msra.mxu0 %v7194_v28  ;;  %9756 = vmatprep.mubr.msk.bf16.mxu0 %vm10274_vm2, %v12697_v52 }
 0xc3b   : > { %7340 = vmax.xlane.f32.xlu1 %v7339_v23  ;;  %9766 = vmatprep.subr.bf16.mxu0 %v12697_v52 }
 0xc3c   : > { %v6980_v45 = vpop.f32.mrb[248].mxu1 }
 0xc3d   : > { %v7295_v24 = vmul.f32 0.70710677, %v6980_v45  ;;  %v9728_v4 = vpop.f32.mrb[249].mxu1 }
 0xc3e   : > { %v6983_v57 = vpop.f32.mrb[250].mxu1 }
 0xc3f   : > { %v12311_v62 = vadd.f32 %v12250_v42, %v7295_v24  ;;  %v9729_v11 = vpop.f32.mrb[251].mxu1 }
 0xc41   : > { %9757 = vmatmul.mubr.msk.bf16.vlgmr.msra.gmra.mrb[212].mxu0 %vm710_vm3, %v7187_v51  ;;  %v7345_v48 = vsel %vm299_vm0, %v12311_v62, -inf }
 0xc42   : > { %9767 = vmatpush3.bf16.msra.mxu0 %v7516_v13  ;;  %9768 = vmatprep.mubr.msk.bf16.mxu0 %vm10274_vm2, %v12697_v52 }
 0xc43   : > { %7346 = vmax.xlane.f32.xlu1 %v7345_v48  ;;  %9778 = vmatprep.subr.bf16.mxu0 %v12697_v52 }
 0xc44   : > { %v7080_v53 = vpop.f32.mrb[252].mxu1 }
 0xc45   : > { %v7297_v2 = vmul.f32 0.70710677, %v7080_v53  ;;  %v9740_v10 = vpop.f32.mrb[253].mxu1 }
 0xc46   : > { %v7083_v37 = vpop.f32.mrb[254].mxu1 }
 0xc47   : > { %v12321_v20 = vadd.f32 %v12250_v42, %v7297_v2  ;;  %v9741_v6 = vpop.f32.mrb[255].mxu1 }
 0xc49   : > { %v7351_v22 = vsel %vm299_vm0, %v12321_v20, -inf }
 0xc4a   : > { %7352 = vmax.xlane.f32.xlu1 %v7351_v22 }
 0xc4c   : > { %v7180_v36 = vpop.f32.mrb[0].mxu1 }
 0xc4d   : > { %v7299_v63 = vmul.f32 0.70710677, %v7180_v36  ;;  %v9752_v44 = vpop.f32.mrb[1].mxu1 }
 0xc4e   : > { %v7183_v31 = vpop.f32.mrb[2].mxu1 }
 0xc4f   : > { %v12326_v59 = vadd.f32 %v12250_v42, %v7299_v63  ;;  %v9753_v26 = vpop.f32.mrb[3].mxu1 }
 0xc51   : > { %v7357_v32 = vsel %vm299_vm0, %v12326_v59, -inf }
 0xc52   : > { %7358 = vmax.xlane.f32.xlu1 %v7357_v32 }
 0xc54   : > { %v7280_v47 = vpop.f32.mrb[4].mxu1 }
 0xc55   : > { %v7301_v25 = vmul.f32 0.70710677, %v7280_v47  ;;  %v9764_v16 = vpop.f32.mrb[5].mxu1 }
 0xc56   : > { %v7283_v35 = vpop.f32.mrb[6].mxu1 }
 0xc57   : > { %v12331_v3 = vadd.f32 %v12250_v42, %v7301_v25  ;;  %v9765_v46 = vpop.f32.mrb[7].mxu1 }
 0xc59   : > { %v7363_v7 = vsel %vm299_vm0, %v12331_v3, -inf }
 0xc5a   : > { %7364 = vmax.xlane.f32.xlu1 %v7363_v7 }
 0xc9f   : > { %v7320_v21 = vpop.xlane.xlu0 %7319 }
 0xca0   : > { %v7366_v5 = vsub.f32 %v12253_v60, %v7320_v21 }
 0xca2   : > { %v7382_v9 = vmul.f32 1.442695, %v7366_v5 }
 0xca4   : > { %10182 = vpow2.f32 %v7382_v9 }
 0xca8   : > { %v7323_v33 = vpop.xlane.xlu1 %7322 }
 0xca9   : > { %v7367_v61 = vsub.f32 %v12261_v49, %v7323_v33 }
 0xcab   : > { %v7384_v17 = vmul.f32 1.442695, %v7367_v61 }
 0xcad   : > { %10184 = vpow2.f32 %v7384_v17 }
 0xcae   : > { %v12341_v58 = vpop.eup %10182 }
 0xcaf   : > { %v7414_v8 = vsel %vm299_vm0, %v12341_v58, 0.0 }
 0xcb0   : > { %v7326_v51 = vpop.xlane.xlu0 %7325  ;;  %7415 = vadd.xlane.f32.xlu0 %v7414_v8 }
 0xcb1   : > { %v7368_v28 = vsub.f32 %v12271_v43, %v7326_v51 }
 0xcb3   : > { %v7386_v23 = vmul.f32 1.442695, %v7368_v28 }
 0xcb5   : > { %10186 = vpow2.f32 %v7386_v23 }
 0xcb7   : > { %v12346_v60 = vpop.eup %10184 }
 0xcb8   : > { %v7329_v45 = vpop.xlane.xlu0 %7328  ;;  %v7417_v12 = vsel %vm299_vm0, %v12346_v60, 0.0 }
 0xcb9   : > { %v7369_v49 = vsub.f32 %v12281_v38, %v7329_v45  ;;  %7418 = vadd.xlane.f32.xlu1 %v7417_v12 }
 0xcbb   : > { %v7388_v24 = vmul.f32 1.442695, %v7369_v49 }
 0xcbd   : > { %10188 = vpow2.f32 %v7388_v24 }
 0xcbf   : > { %v12351_v4 = vpop.eup %10186 }
 0xcc0   : > { %v7335_v57 = vpop.xlane.xlu1 %7334  ;;  %v7420_v43 = vsel %vm299_vm0, %v12351_v4, 0.0 }
 0xcc1   : > { %v7371_v11 = vsub.f32 %v12291_v50, %v7335_v57  ;;  %7421 = vadd.xlane.f32.xlu0 %v7420_v43 }
 0xcc3   : > { %v7392_v13 = vmul.f32 1.442695, %v7371_v11 }
 0xcc5   : > { %10190 = vpow2.f32 %v7392_v13 }
 0xcc7   : > { %v12356_v48 = vpop.eup %10188 }
 0xcc8   : > { %v7341_v53 = vpop.xlane.xlu1 %7340  ;;  %v7423_v38 = vsel %vm299_vm0, %v12356_v48, 0.0 }
 0xcc9   : > { %v7373_v2 = vsub.f32 %v12301_v19, %v7341_v53  ;;  %7424 = vadd.xlane.f32.xlu1 %v7423_v38 }
 0xccb   : > { %v7396_v10 = vmul.f32 1.442695, %v7373_v2 }
 0xccd   : > { %10192 = vpow2.f32 %v7396_v10 }
 0xccf   : > { %v12361_v37 = vpop.eup %10190 }
 0xcd0   : > { %v7347_v6 = vpop.xlane.xlu1 %7346  ;;  %v7429_v50 = vsel %vm299_vm0, %v12361_v37, 0.0 }
 0xcd1   : > { %v7375_v22 = vsub.f32 %v12311_v62, %v7347_v6  ;;  %7430 = vadd.xlane.f32.xlu1 %v7429_v50 }
 0xcd3   : > { %v7400_v36 = vmul.f32 1.442695, %v7375_v22 }
 0xcd5   : > { %10194 = vpow2.f32 %v7400_v36 }
 0xcd7   : > { %v12366_v63 = vpop.eup %10192  ;;  %v7353_v44 = vpop.xlane.xlu1 %7352 }
 0xcd8   : > { %v7435_v19 = vsel %vm299_vm0, %v12366_v63, 0.0  ;;  %v7377_v31 = vsub.f32 %v12321_v20, %v7353_v44 }
 0xcd9   : > { %7436 = vadd.xlane.f32.xlu1 %v7435_v19 }
 0xcda   : > { %v7404_v26 = vmul.f32 1.442695, %v7377_v31 }
 0xcdc   : > { %10196 = vpow2.f32 %v7404_v26 }
 0xcdf   : > { %v12371_v32 = vpop.eup %10194  ;;  %v7359_v44 = vpop.xlane.xlu1 %7358 }
 0xce0   : > { %v7441_v47 = vsel %vm299_vm0, %v12371_v32, 0.0  ;;  %v7379_v19 = vsub.f32 %v12326_v59, %v7359_v44 }
 0xce1   : > { %7442 = vadd.xlane.f32.xlu0 %v7441_v47 }
 0xce2   : > { %v7408_v31 = vmul.f32 1.442695, %v7379_v19 }
 0xce4   : > { %10198 = vpow2.f32 %v7408_v31 }
 0xce6   : > { %v12375_v62 = vpop.eup %10196 }
 0xce7   : > { %v7447_v25 = vsel %vm299_vm0, %v12375_v62, 0.0 }
 0xce8   : > { %7448 = vadd.xlane.f32.xlu0 %v7447_v25 }
 0xcea   : > { %7750 = vrot.lane.b32.xlu1 %v10596_v18, %s10285_s13 }
 0xcec   : > { %v6730_v16 = vpop.f32.mrb[192].mxu0 }
 0xced   : > { %v7290_v20 = vmul.f32 0.70710677, %v6730_v16  ;;  %v9698_v35 = vpop.f32.mrb[193].mxu0 }
 0xcee   : > { %7846 = vrot.lane.b32.xlu1 %v10604_v27, %s10285_s13  ;;  %v6733_v46 = vpop.f32.mrb[194].mxu0  ;;  %v12417_v35 = vpop.eup %10198 }
 0xcef   : > { %v12384_v7 = vadd.f32 %v12250_v42, %v7290_v20  ;;  %v9699_v21 = vpop.f32.mrb[195].mxu0  ;;  %v12419_v46 = vpop.xlane.xlu1 %7364  ;;  %v7453_v59 = vsel %vm299_vm0, %v12417_v35, 0.0 }
 0xcf1   : > { %v7330_v5 = vsel %vm299_vm0, %v12384_v7, -inf }
 0xcf2   : > { %7942 = vrot.lane.b32.xlu1 %v10612_v30, %s10285_s13  ;;  %7331 = vmax.xlane.f32.xlu0 %v7330_v5 }
 0xcf4   : > { %v6830_v9 = vpop.f32.mrb[196].mxu0 }
 0xcf5   : > { %v7292_v18 = vmul.f32 0.70710677, %v6830_v9  ;;  %v9710_v33 = vpop.f32.mrb[197].mxu0 }
 0xcf6   : > { %7990 = vrot.lane.b32.xlu1 %v10608_v0, %s10285_s13  ;;  %v6833_v61 = vpop.f32.mrb[198].mxu0 }
 0xcf7   : > { %v12393_v27 = vadd.f32 %v12250_v42, %v7292_v18  ;;  %v9711_v17 = vpop.f32.mrb[199].mxu0  ;;  %v7612_v61 = vsel %vm588_vm1, %v12335_v29, 0 }
 0xcf9   : > { %v7336_v51 = vsel %vm299_vm0, %v12393_v27, -inf }
 0xcfa   : > { %8038 = vrot.lane.b32.xlu1 %v10620_v39, %s10285_s13  ;;  %7337 = vmax.xlane.f32.xlu0 %v7336_v51 }
 0xcfc   : > { %v6930_v30 = vpop.f32.mrb[200].mxu0 }
 0xcfd   : > { %v7294_v8 = vmul.f32 0.70710677, %v6930_v30  ;;  %v9722_v28 = vpop.f32.mrb[201].mxu0 }
 0xcfe   : > { %v6933_v23 = vpop.f32.mrb[202].mxu0 }
 0xcff   : > { %v12400_v45 = vadd.f32 %v12250_v42, %v7294_v8  ;;  %v9723_v0 = vpop.f32.mrb[203].mxu0 }
 0xd01   : > { %v7342_v12 = vsel %vm299_vm0, %v12400_v45, -inf }
 0xd02   : > { %7343 = vmax.xlane.f32.xlu0 %v7342_v12 }
 0xd04   : > { %v7030_v49 = vpop.f32.mrb[204].mxu0 }
 0xd05   : > { %v7296_v24 = vmul.f32 0.70710677, %v7030_v49  ;;  %v9734_v57 = vpop.f32.mrb[205].mxu0 }
 0xd06   : > { %v7033_v43 = vpop.f32.mrb[206].mxu0 }
 0xd07   : > { %v12405_v11 = vadd.f32 %v12250_v42, %v7296_v24  ;;  %v9735_v39 = vpop.f32.mrb[207].mxu0 }
 0xd09   : > { %v7348_v13 = vsel %vm299_vm0, %v12405_v11, -inf }
 0xd0a   : > { %7349 = vmax.xlane.f32.xlu0 %v7348_v13 }
 0xd0c   : > { %v7130_v53 = vpop.f32.mrb[208].mxu0 }
 0xd0d   : > { %v9746_v38 = vpop.f32.mrb[209].mxu0  ;;  %v7298_v26 = vmul.f32 0.70710677, %v7130_v53 }
 0xd0e   : > { %v7133_v2 = vpop.f32.mrb[210].mxu0 }
 0xd0f   : > { %v9747_v10 = vpop.f32.mrb[211].mxu0  ;;  %v12413_v47 = vadd.f32 %v12250_v42, %v7298_v26 }
 0xd11   : > { %v7354_v20 = vsel %vm299_vm0, %v12413_v47, -inf }
 0xd14   : > { %v7230_v6 = vpop.f32.mrb[212].mxu0 }
 0xd15   : > { %v9758_v50 = vpop.f32.mrb[213].mxu0  ;;  %v7300_v25 = vmul.f32 0.70710677, %v7230_v6 }
 0xd16   : > { %v7233_v22 = vpop.f32.mrb[214].mxu0 }
 0xd17   : > { %v9759_v36 = vpop.f32.mrb[215].mxu0 }
 0xd20   : > { %7702 = vrot.lane.b32.xlu0 %v10584_v54, %s10285_s13  ;;  %v12422_v54 = vadd.f32 %v12250_v42, %v7300_v25 }
 0xd22   : > { %v7360_v5 = vsel %vm299_vm0, %v12422_v54, -inf }
 0xd3d   : > { %v7416_v16 = vpop.xlane.xlu0 %7415 }
 0xd3e   : > { %10200 = vrcp.f32 %v7416_v16 }
 0xd3f   : > { %7355 = vmax.xlane.f32.xlu0 %v7354_v20 }
 0xd43   : > { %7454 = vadd.xlane.f32.xlu0 %v7453_v59 }
 0xd46   : > { %v7419_v21 = vpop.xlane.xlu1 %7418 }
 0xd47   : > { %10202 = vrcp.f32 %v7419_v21  ;;  %7361 = vmax.xlane.f32.xlu0 %v7360_v5 }
 0xd48   : > { %v10201_v9 = vpop.eup %10200 }
 0xd49   : > { %v7478_v18 = vmul.f32 %v10201_v9, %v12341_v58  ;;  %v7660_v58 = vsel %vm588_vm1, %v12338_v14, 0 }
 0xd4b   : > { %v7494_v33 = vpack.c.bf16 %v7478_v18, %v7478_v18 }
 0xd4d   : > { %9769 = vmatmul.mubr.msk.bf16.vlgmr.msra.gmra.mrb[216].mxu0 %vm299_vm0, %v7494_v33 }
 0xd4e   : > { %v7422_v42 = vpop.xlane.xlu0 %7421  ;;  %9779 = vmatpush3.bf16.msra.mxu0 %v7612_v61  ;;  %9780 = vmatprep.mubr.msk.bf16.mxu0 %vm10274_vm2, %v12697_v52 }
 0xd4f   : > { %10204 = vrcp.f32 %v7422_v42  ;;  %9790 = vmatprep.subr.bf16.mxu0 %v12697_v52 }
 0xd51   : > { %v10203_v17 = vpop.eup %10202 }
 0xd52   : > { %v7479_v51 = vmul.f32 %v10203_v17, %v12346_v60 }
 0xd54   : > { %v7495_v30 = vpack.c.bf16 %v7479_v51, %v7479_v51 }
 0xd56   : > { %9775 = vmatmul.mubr.msk.bf16.vlgmr.msra.gmra.mrb[8].mxu1 %vm299_vm0, %v7495_v30  ;;  %v7425_v29 = vpop.xlane.xlu1 %7424  ;;  %v7381_v30 = vsub.f32 %v12331_v3, %v12419_v46 }
 0xd57   : > { %9785 = vmatpush3.bf16.msra.mxu1 %v7660_v58  ;;  %10206 = vrcp.f32 %v7425_v29  ;;  %9786 = vmatprep.mubr.msk.bf16.mxu1 %vm10274_vm2, %v12697_v52 }
 0xd58   : > { %9796 = vmatprep.subr.bf16.mxu1 %v12697_v52  ;;  %v7412_v29 = vmul.f32 1.442695, %v7381_v30 }
 0xd59   : > { %v10205_v8 = vpop.eup %10204 }
 0xd5a   : > { %v7480_v28 = vmul.f32 %v10205_v8, %v12351_v4 }
 0xd5c   : > { %v7496_v23 = vpack.c.bf16 %v7480_v28, %v7480_v28 }
 0xd5e   : > { %v7431_v0 = vpop.xlane.xlu1 %7430  ;;  %9781 = vmatmul.mubr.msk.bf16.vlgmr.msra.gmra.mrb[220].mxu0 %vm299_vm0, %v7496_v23 }
 0xd5f   : > { %10208 = vrcp.f32 %v7431_v0  ;;  %9792 = vmatprep.mubr.msk.bf16.mxu0 %vm10274_vm2, %v12697_v52 }
 0xd61   : > { %v10207_v14 = vpop.eup %10206 }
 0xd62   : > { %v7481_v60 = vmul.f32 %v10207_v14, %v12356_v48 }
 0xd64   : > { %v7497_v12 = vpack.c.bf16 %v7481_v60, %v7481_v60 }
 0xd66   : > { %9787 = vmatmul.mubr.msk.bf16.vlgmr.msra.gmra.mrb[12].mxu1 %vm299_vm0, %v7497_v12  ;;  %v7437_v49 = vpop.xlane.xlu1 %7436 }
 0xd67   : > { %10210 = vrcp.f32 %v7437_v49  ;;  %9798 = vmatprep.mubr.msk.bf16.mxu1 %vm10274_vm2, %v12697_v52 }
 0xd69   : > { %v10209_v4 = vpop.eup %10208 }
 0xd6a   : > { %v7483_v24 = vmul.f32 %v10209_v4, %v12361_v37  ;;  %v7751_v57 = vpop.permute.xlu1 %7750 }
 0xd6b   : > { %v7756_v43 = vsel %vm588_vm1, %v7751_v57, 0 }
 0xd6c   : > { %v7499_v39 = vpack.c.bf16 %v7483_v24, %v7483_v24  ;;  %9797 = vmatpush3.bf16.msra.mxu1 %v7756_v43 }
 0xd6d   : > { %9808 = vmatprep.subr.bf16.mxu1 %v12697_v52 }
 0xd6e   : > { %v7847_v13 = vpop.permute.xlu1 %7846  ;;  %v7443_v48 = vpop.xlane.xlu0 %7442 }
 0xd6f   : > { %v7852_v53 = vsel %vm588_vm1, %v7847_v13, 0  ;;  %10212 = vrcp.f32 %v7443_v48  ;;  %9799 = vmatmul.mubr.msk.bf16.vlgmr.msra.gmra.mrb[16].mxu1 %vm299_vm0, %v7499_v39 }
 0xd70   : > { %9809 = vmatpush3.bf16.msra.mxu1 %v7852_v53  ;;  %9810 = vmatprep.mubr.msk.bf16.mxu1 %vm10274_vm2, %v12697_v52 }
 0xd71   : > { %v10211_v38 = vpop.eup %10210  ;;  %9820 = vmatprep.subr.bf16.mxu1 %v12697_v52 }
 0xd72   : > { %v7485_v37 = vmul.f32 %v10211_v38, %v12366_v63  ;;  %v7943_v2 = vpop.permute.xlu1 %7942 }
 0xd73   : > { %v7948_v22 = vsel %vm588_vm1, %v7943_v2, 0 }
 0xd74   : > { %v7501_v10 = vpack.c.bf16 %v7485_v37, %v7485_v37 }
 0xd75   : > { %v7449_v50 = vpop.xlane.xlu0 %7448 }
 0xd76   : > { %v12459_v6 = vpop.permute.xlu1 %7990  ;;  %10214 = vrcp.f32 %v7449_v50 }
 0xd77   : > { %9811 = vmatmul.mubr.msk.bf16.vlgmr.msra.gmra.mrb[20].mxu1 %vm299_vm0, %v7501_v10 }
 0xd78   : > { %9821 = vmatpush3.bf16.msra.mxu1 %v7948_v22  ;;  %9822 = vmatprep.mubr.msk.bf16.mxu1 %vm10274_vm2, %v12697_v52 }
 0xd79   : > { %v10213_v36 = vpop.eup %10212  ;;  %9832 = vmatprep.subr.bf16.mxu1 %v12697_v52 }
 0xd7a   : > { %v7487_v44 = vmul.f32 %v10213_v36, %v12371_v32  ;;  %v8039_v19 = vpop.permute.xlu1 %8038 }
 0xd7b   : > { %v8044_v31 = vsel %vm588_vm1, %v8039_v19, 0 }
 0xd7c   : > { %v7503_v63 = vpack.c.bf16 %v7487_v44, %v7487_v44 }
 0xd7f   : > { %9823 = vmatmul.mubr.msk.bf16.vlgmr.msra.gmra.mrb[24].mxu1 %vm299_vm0, %v7503_v63  ;;  %v7332_v26 = vpop.xlane.xlu0 %7331 }
 0xd80   : > { %9833 = vmatpush3.bf16.msra.mxu1 %v8044_v31  ;;  %v7370_v25 = vsub.f32 %v12384_v7, %v7332_v26  ;;  %9834 = vmatprep.mubr.msk.bf16.mxu1 %vm10274_vm2, %v12697_v52  ;;  %v10215_v16 = vpop.eup %10214 }
 0xd81   : > { %9844 = vmatprep.subr.bf16.mxu1 %v12697_v52  ;;  %v7489_v20 = vmul.f32 %v10215_v16, %v12375_v62 }
 0xd82   : > { %v7390_v59 = vmul.f32 1.442695, %v7370_v25 }
 0xd83   : > { %v7505_v32 = vpack.c.bf16 %v7489_v20, %v7489_v20 }
 0xd84   : > { %10216 = vpow2.f32 %v7390_v59 }
 0xd87   : > { %9835 = vmatmul.mubr.msk.bf16.vlgmr.msra.gmra.mrb[28].mxu1 %vm299_vm0, %v7505_v32  ;;  %v7338_v21 = vpop.xlane.xlu0 %7337 }
 0xd88   : > { %9846 = vmatprep.mubr.msk.bf16.mxu1 %vm10274_vm2, %v12697_v52 }
 0xd8e   : > { %v10217_v5 = vpop.eup %10216 }
 0xd8f   : > { %v7344_v9 = vpop.xlane.xlu0 %7343  ;;  %v7426_v7 = vsel %vm299_vm0, %v10217_v5, 0.0 }
 0xd90   : > { %v7374_v18 = vsub.f32 %v12400_v45, %v7344_v9  ;;  %7427 = vadd.xlane.f32.xlu0 %v7426_v7  ;;  %v7372_v45 = vsub.f32 %v12393_v27, %v7338_v21 }
 0xd92   : > { %v7398_v33 = vmul.f32 1.442695, %v7374_v18  ;;  %v7394_v58 = vmul.f32 1.442695, %v7372_v45 }
 0xd94   : > { %10218 = vpow2.f32 %v7398_v33 }
 0xd95   : > { %10220 = vpow2.f32 %v7394_v58 }
 0xd96   : > { %10222 = vpow2.f32 %v7412_v29 }
 0xd97   : > { %v7350_v61 = vpop.xlane.xlu0 %7349 }
 0xd98   : > { %v7376_v8 = vsub.f32 %v12405_v11, %v7350_v61 }
 0xd9a   : > { %v7402_v23 = vmul.f32 1.442695, %v7376_v8 }
 0xd9b   : > { %v7703_v62 = vpop.permute.xlu0 %7702 }
 0xd9c   : > { %v7708_v42 = vsel %vm588_vm1, %v7703_v62, 0  ;;  %10224 = vpow2.f32 %v7402_v23 }
 0xd9d   : > { %9791 = vmatpush3.bf16.msra.mxu0 %v7708_v42 }
 0xd9e   : > { %v12480_v17 = vpop.eup %10218  ;;  %9802 = vmatprep.subr.bf16.mxu0 %v12697_v52 }
 0xd9f   : > { %v7438_v51 = vsel %vm299_vm0, %v12480_v17, 0.0  ;;  %v12493_v28 = vpop.eup %10220 }
 0xda0   : > { %7439 = vadd.xlane.f32.xlu1 %v7438_v51  ;;  %v12497_v0 = vpop.eup %10222 }
 0xda6   : > { %7798 = vrot.lane.b32.xlu0 %v10592_v15, %s10285_s13  ;;  %v7432_v15 = vsel %vm299_vm0, %v12493_v28, 0.0  ;;  %v12502_v11 = vpop.eup %10224 }
 0xda7   : > { %v7444_v12 = vsel %vm299_vm0, %v12502_v11, 0.0 }
 0xdb1   : > { %8134 = vrot.lane.b32.xlu1 %v10628_v1, %s10285_s13  ;;  %v7459_v1 = vsel %vm299_vm0, %v12497_v0, 0.0 }
 0xdc5   : > { %7433 = vadd.xlane.f32.xlu0 %v7432_v15 }
 0xdc9   : > { %7460 = vadd.xlane.f32.xlu0 %v7459_v1 }
 0xdcc   : > { %v7356_v3 = vpop.xlane.xlu0 %7355 }
 0xdcd   : > { %v7378_v27 = vsub.f32 %v12413_v47, %v7356_v3 }
 0xdcf   : > { %v7406_v46 = vmul.f32 1.442695, %v7378_v27 }
 0xdd0   : > { %v7455_v14 = vpop.xlane.xlu0 %7454 }
 0xdd1   : > { %10226 = vpow2.f32 %v7406_v46 }
 0xdd4   : > { %v7362_v60 = vpop.xlane.xlu0 %7361 }
 0xdd5   : > { %v7380_v49 = vsub.f32 %v12422_v54, %v7362_v60  ;;  %7445 = vadd.xlane.f32.xlu1 %v7444_v12 }
 0xdd7   : > { %v7410_v4 = vmul.f32 1.442695, %v7380_v49 }
 0xdd9   : > { %10228 = vpow2.f32 %v7410_v4 }
 0xddb   : > { %v12507_v24 = vpop.eup %10226 }
 0xddc   : > { %v7450_v57 = vsel %vm299_vm0, %v12507_v24, 0.0 }
 0xddd   : > { %7451 = vadd.xlane.f32.xlu1 %v7450_v57 }
 0xddf   : > { %7894 = vrot.lane.b32.xlu0 %v10600_v55, %s10285_s13 }
 0xde3   : > { %v12513_v47 = vpop.eup %10228  ;;  %8086 = vrot.lane.b32.xlu0 %v10616_v34, %s10285_s13 }
 0xde4   : > { %v7456_v54 = vsel %vm299_vm0, %v12513_v47, 0.0 }
 0xde5   : > { %7457 = vadd.xlane.f32.xlu1 %v7456_v54 }
 0xde7   : > { %8182 = vrot.lane.b32.xlu0 %v10624_v40, %s10285_s13 }
 0xdf6   : > { %8230 = vrot.lane.b32.xlu1 %v10634_v41, %s10285_s13 }
 0xe1d   : > { %v7428_v43 = vpop.xlane.xlu0 %7427 }
 0xe1e   : > { %10230 = vrcp.f32 %v7428_v43 }
 0xe1f   : > { %10232 = vrcp.f32 %v7455_v14 }
 0xe20   : > { %v12523_v39 = vpop.f32.mrb[216].mxu0 }
 0xe21   : > { %v9770_v55 = vpop.f32.mrb[217].mxu0  ;;  %v7799_v37 = vpop.permute.xlu0 %7798 }
 0xe22   : > { %v7555_v13 = vpop.f32.mrb[218].mxu0  ;;  %v7804_v36 = vsel %vm588_vm1, %v7799_v37, 0 }
 0xe23   : > { %v9771_v48 = vpop.f32.mrb[219].mxu0 }
 0xe28   : > { %v10231_v53 = vpop.eup %10230 }
 0xe29   : > { %v7482_v34 = vmul.f32 %v10231_v53, %v10217_v5  ;;  %v12525_v38 = vpop.f32.mrb[8].mxu1  ;;  %v10233_v22 = vpop.eup %10232 }
 0xe2a   : > { %v8278_v2 = vpack.c.bf16 %v12525_v38, %v12523_v39  ;;  %v9776_v40 = vpop.f32.mrb[9].mxu1  ;;  %v7491_v63 = vmul.f32 %v10233_v22, %v12417_v35 }
 0xe2b   : > { %v7603_v10 = vpop.f32.mrb[10].mxu1  ;;  %v7498_v50 = vpack.c.bf16 %v7482_v34, %v7482_v34 }
 0xe2c   : > { %v9777_v41 = vpop.f32.mrb[11].mxu1  ;;  %v7507_v20 = vpack.c.bf16 %v7491_v63, %v7491_v63  ;;  %v8286_v63 = vrot.slane %v11639_v56, 3 }
 0xe2d   : > { %v7440_v44 = vpop.xlane.xlu1 %7439  ;;  %9793 = vmatmul.mubr.msk.bf16.vlgmr.msra.gmra.mrb[224].mxu0 %vm299_vm0, %v7498_v50 }
 0xe2e   : > { %9803 = vmatpush3.bf16.msra.mxu0 %v7804_v36  ;;  %9804 = vmatprep.mubr.msk.bf16.mxu0 %vm10274_vm2, %v12697_v52 }
 0xe2f   : > { %9814 = vmatprep.subr.bf16.mxu0 %v12697_v52 }
 0xe31   : > { %v12535_v19 = vpop.f32.mrb[220].mxu0  ;;  %v8135_v31 = vpop.permute.xlu1 %8134 }
 0xe32   : > { %v9782_v26 = vpop.f32.mrb[221].mxu0  ;;  %v8140_v25 = vsel %vm588_vm1, %v8135_v31, 0 }
 0xe33   : > { %v7651_v16 = vpop.f32.mrb[222].mxu0  ;;  %9845 = vmatpush3.bf16.msra.mxu1 %v8140_v25 }
 0xe34   : > { %v9783_v59 = vpop.f32.mrb[223].mxu0  ;;  %9856 = vmatprep.subr.bf16.mxu1 %v12697_v52  ;;  %v8312_v16 = vsel %vm4320_vm4, %v8286_v63, 0 }
 0xe36   : > { %9847 = vmatmul.mubr.msk.bf16.vlgmr.msra.gmra.mrb[32].mxu1 %vm299_vm0, %v7507_v20 }
 0xe37   : > { %9858 = vmatprep.mubr.msk.bf16.mxu1 %vm10274_vm2, %v12697_v52 }
 0xe39   : > { %v12542_v32 = vpop.f32.mrb[12].mxu1 }
 0xe3a   : > { %v8279_v35 = vpack.c.bf16 %v12542_v32, %v12535_v19  ;;  %v9788_v21 = vpop.f32.mrb[13].mxu1 }
 0xe3b   : > { %v7699_v5 = vpop.f32.mrb[14].mxu1 }
 0xe3c   : > { %v9789_v9 = vpop.f32.mrb[15].mxu1 }
 0xe42   : > { %v12546_v7 = vpop.f32.mrb[16].mxu1 }
 0xe43   : > { %v9800_v18 = vpop.f32.mrb[17].mxu1 }
 0xe44   : > { %v7795_v33 = vpop.f32.mrb[18].mxu1 }
 0xe45   : > { %v9801_v61 = vpop.f32.mrb[19].mxu1 }
 0xe4a   : > { %v12548_v62 = vpop.f32.mrb[20].mxu1 }
 0xe4b   : > { %v9812_v42 = vpop.f32.mrb[21].mxu1 }
 0xe4c   : > { %v7891_v51 = vpop.f32.mrb[22].mxu1 }
 0xe4d   : > { %v9813_v45 = vpop.f32.mrb[23].mxu1 }
 0xe52   : > { %v12550_v30 = vpop.f32.mrb[24].mxu1  ;;  %v7434_v58 = vpop.xlane.xlu0 %7433 }
 0xe53   : > { %v9824_v29 = vpop.f32.mrb[25].mxu1  ;;  %10234 = vrcp.f32 %v7434_v58 }
 0xe54   : > { %v7987_v8 = vpop.f32.mrb[26].mxu1  ;;  %10236 = vrcp.f32 %v7440_v44 }
 0xe55   : > { %v9825_v23 = vpop.f32.mrb[27].mxu1 }
 0xe56   : > { %v7461_v15 = vpop.xlane.xlu0 %7460 }
 0xe5a   : > { %v12552_v1 = vpop.f32.mrb[28].mxu1  ;;  %v7895_v12 = vpop.permute.xlu0 %7894 }
 0xe5b   : > { %v9836_v3 = vpop.f32.mrb[29].mxu1  ;;  %v7900_v57 = vsel %vm588_vm1, %v7895_v12, 0 }
 0xe5c   : > { %v8083_v27 = vpop.f32.mrb[30].mxu1 }
 0xe5d   : > { %v10235_v46 = vpop.eup %10234  ;;  %v9837_v14 = vpop.f32.mrb[31].mxu1 }
 0xe5e   : > { %v7484_v60 = vmul.f32 %v10235_v46, %v12493_v28  ;;  %v10237_v4 = vpop.eup %10236  ;;  %v7996_v28 = vsel %vm588_vm1, %v12459_v6, 0  ;;  %v8087_v53 = vpop.permute.xlu0 %8086 }
 0xe5f   : > { %v7486_v43 = vmul.f32 %v10237_v4, %v12480_v17  ;;  %v8092_v40 = vsel %vm588_vm1, %v8087_v53, 0 }
 0xe60   : > { %v7500_v49 = vpack.c.bf16 %v7484_v60, %v7484_v60 }
 0xe61   : > { %v7502_v55 = vpack.c.bf16 %v7486_v43, %v7486_v43 }
 0xe62   : > { %v7446_v54 = vpop.xlane.xlu1 %7445  ;;  %9805 = vmatmul.mubr.msk.bf16.vlgmr.msra.gmra.mrb[228].mxu0 %vm299_vm0, %v7500_v49  ;;  %v8183_v22 = vpop.permute.xlu0 %8182 }
 0xe63   : > { %10238 = vrcp.f32 %v7446_v54  ;;  %9815 = vmatpush3.bf16.msra.mxu0 %v7900_v57  ;;  %9816 = vmatprep.mubr.msk.bf16.mxu0 %vm10274_vm2, %v12697_v52  ;;  %v8188_v26 = vsel %vm588_vm1, %v8183_v22, 0  ;;  %v12607_v54 = vld [vmem:[%s12688_s5] ss:$0 sm:$0xff] }
 0xe64   : > { %9826 = vmatprep.subr.bf16.mxu0 %v12697_v52  ;;  %10240 = vrcp.f32 %v7461_v15 }
 0xe6a   : > { %v7452_v13 = vpop.xlane.xlu1 %7451  ;;  %9817 = vmatmul.mubr.msk.bf16.vlgmr.msra.gmra.mrb[232].mxu0 %vm299_vm0, %v7502_v55 }
 0xe6b   : > { %10242 = vrcp.f32 %v7452_v13  ;;  %9827 = vmatpush3.bf16.msra.mxu0 %v7996_v28  ;;  %9828 = vmatprep.mubr.msk.bf16.mxu0 %vm10274_vm2, %v12697_v52 }
 0xe6c   : > { %9838 = vmatprep.subr.bf16.mxu0 %v12697_v52 }
 0xe6d   : > { %v10239_v48 = vpop.eup %10238 }
 0xe6e   : > { %v7488_v17 = vmul.f32 %v10239_v48, %v12502_v11  ;;  %v10241_v37 = vpop.eup %10240 }
 0xe6f   : > { %v7493_v50 = vmul.f32 %v10241_v37, %v12497_v0 }
 0xe70   : > { %v7504_v34 = vpack.c.bf16 %v7488_v17, %v7488_v17  ;;  %v10249_v17 = vld [vmem:[%s10342_s30 + $0x10] sm:$0xff] }
 0xe71   : > { %v7509_v31 = vpack.c.bf16 %v7493_v50, %v7493_v50  ;;  %v10251_v50 = vld [vmem:[%s10342_s30 + $0x18] sm:$0xff] }
 0xe72   : > { %v7458_v10 = vpop.xlane.xlu1 %7457  ;;  %9829 = vmatmul.mubr.msk.bf16.vlgmr.msra.gmra.mrb[236].mxu0 %vm299_vm0, %v7504_v34 }
 0xe73   : > { %10244 = vrcp.f32 %v7458_v10  ;;  %9839 = vmatpush3.bf16.msra.mxu0 %v8092_v40  ;;  %9840 = vmatprep.mubr.msk.bf16.mxu0 %vm10274_vm2, %v12697_v52  ;;  %v10250_v40 = vld [vmem:[%s10342_s30] sm:$0xff] }
 0xe74   : > { %9850 = vmatprep.subr.bf16.mxu0 %v12697_v52 }
 0xe75   : > { %v10243_v6 = vpop.eup %10242 }
 0xe76   : > { %v7490_v11 = vmul.f32 %v10243_v6, %v12507_v24  ;;  %v8231_v41 = vpop.permute.xlu1 %8230 }
 0xe77   : > { %v8236_v36 = vsel %vm588_vm1, %v8231_v41, 0  ;;  %v10252_v41 = vld [vmem:[%s10342_s30 + $0x8] sm:$0xff] }
 0xe78   : > { %9857 = vmatpush3.bf16.msra.mxu1 %v8236_v36  ;;  %v7506_v44 = vpack.c.bf16 %v7490_v11, %v7490_v11 }
 0xe7a   : > { %9841 = vmatmul.mubr.msk.bf16.vlgmr.msra.gmra.mrb[240].mxu0 %vm299_vm0, %v7506_v44 }
 0xe7b   : > { %9851 = vmatpush3.bf16.msra.mxu0 %v8188_v26  ;;  %9859 = vmatmul.mubr.msk.bf16.vlgmr.msra.gmra.mrb[36].mxu1 %vm299_vm0, %v7509_v31 }
 0xe7c   : > { %9852 = vmatprep.mubr.msk.bf16.mxu0 %vm10274_vm2, %v12697_v52  ;;  %9935 = vmatprep.subr.msk.bf16.mxu0 %vm4320_vm4, %v8286_v63 }
 0xe7d   : > { %v10245_v0 = vpop.eup %10244 }
 0xe7e   : > { %v7492_v24 = vmul.f32 %v10245_v0, %v12513_v47  ;;  %v10253_v0 = vld [vmem:[%s10342_s30 + $0x30] sm:$0xff] }
 0xe80   : > { %v7508_v25 = vpack.c.bf16 %v7492_v24, %v7492_v24 }
 0xe82   : > { %9853 = vmatmul.mubr.msk.bf16.vlgmr.msra.gmra.mrb[244].mxu0 %vm299_vm0, %v7508_v25 }
 0xe83   : > { %9864 = vmatprep.mubr.msk.bf16.mxu0 %vm710_vm3, %v8278_v2  ;;  %9863 = vmatpush3.bf16.msra.mxu0 %v8312_v16 }
 0xe8a   : > { %9865 = vmatmul.mubr.msk.bf16.vlgmr.msra.gmra.mrb[128].mxu0 %vm710_vm3, %v8279_v35 }
 0xf00   : > { %v7744_v52 = vpop.f32.mrb[224].mxu0 }
 0xf01   : > { %v8280_v56 = vpack.c.bf16 %v12546_v7, %v7744_v52  ;;  %v9794_v47 = vpop.f32.mrb[225].mxu0  ;;  %v10254_v52 = vld [vmem:[%s10342_s30 + $0x20] sm:$0xff] }
 0xf02   : > { %v7747_v20 = vpop.f32.mrb[226].mxu0 }
 0xf03   : > { %v9795_v59 = vpop.f32.mrb[227].mxu0  ;;  %9868 = vmatprep.mubr.msk.bf16.mxu0 %vm710_vm3, %v8280_v56  ;;  %v10255_v20 = vld [vmem:[%s10342_s30 + $0x38] sm:$0xff] }
 0xf09   : > { %v8176_v21 = vpop.f32.mrb[32].mxu1 }
 0xf0a   : > { %v9848_v5 = vpop.f32.mrb[33].mxu1 }
 0xf0b   : > { %v8179_v9 = vpop.f32.mrb[34].mxu1 }
 0xf0c   : > { %v9849_v39 = vpop.f32.mrb[35].mxu1 }
 0xf35   : > { %v7840_v38 = vpop.f32.mrb[228].mxu0 }
 0xf36   : > { %v8281_v2 = vpack.c.bf16 %v12548_v62, %v7840_v38  ;;  %v9806_v18 = vpop.f32.mrb[229].mxu0 }
 0xf37   : > { %v7843_v33 = vpop.f32.mrb[230].mxu0 }
 0xf38   : > { %v9807_v19 = vpop.f32.mrb[231].mxu0  ;;  %9869 = vmatmul.mubr.msk.bf16.gmra.mrb[132].mxu0 %vm710_vm3, %v8281_v2  ;;  %v10257_v33 = vld [vmem:[%s10342_s30 + $0x50] sm:$0xff] }
 0xf3d   : > { %v7936_v32 = vpop.f32.mrb[232].mxu0 }
 0xf3e   : > { %v8282_v35 = vpack.c.bf16 %v12550_v30, %v7936_v32  ;;  %v9818_v7 = vpop.f32.mrb[233].mxu0 }
 0xf3f   : > { %v7939_v61 = vpop.f32.mrb[234].mxu0  ;;  %v10258_v7 = vld [vmem:[%s10342_s30 + $0x40] sm:$0xff] }
 0xf40   : > { %v9819_v42 = vpop.f32.mrb[235].mxu0  ;;  %9872 = vmatprep.mubr.msk.bf16.mxu0 %vm710_vm3, %v8282_v35 }
 0xf45   : > { %v8032_v51 = vpop.f32.mrb[236].mxu0 }
 0xf46   : > { %v8283_v45 = vpack.c.bf16 %v12552_v1, %v8032_v51  ;;  %v9830_v58 = vpop.f32.mrb[237].mxu0  ;;  %v10259_v51 = vld [vmem:[%s10342_s30 + $0x58] sm:$0xff] }
 0xf47   : > { %v8035_v29 = vpop.f32.mrb[238].mxu0  ;;  %v10260_v58 = vld [vmem:[%s10342_s30 + $0x48] sm:$0xff] }
 0xf48   : > { %v9831_v8 = vpop.f32.mrb[239].mxu0  ;;  %9873 = vmatmul.mubr.msk.bf16.gmra.mrb[136].mxu0 %vm710_vm3, %v8283_v45 }
 0xf4d   : > { %v8128_v62 = vpop.f32.mrb[240].mxu0 }
 0xf4e   : > { %v8284_v23 = vpack.c.bf16 %v8176_v21, %v8128_v62  ;;  %v9842_v15 = vpop.f32.mrb[241].mxu0  ;;  %v8272_v3 = vpop.f32.mrb[36].mxu1  ;;  %v10256_v21 = vld [vmem:[%s10342_s30 + $0x28] sm:$0xff] }
 0xf4f   : > { %v8131_v27 = vpop.f32.mrb[242].mxu0  ;;  %v9860_v30 = vpop.f32.mrb[37].mxu1 }
 0xf50   : > { %v9843_v46 = vpop.f32.mrb[243].mxu0  ;;  %v8275_v14 = vpop.f32.mrb[38].mxu1  ;;  %9876 = vmatprep.mubr.msk.bf16.mxu0 %vm710_vm3, %v8284_v23  ;;  %v10261_v27 = vld [vmem:[%s10342_s30 + $0x70] sm:$0xff] }
 0xf51   : > { %v9861_v60 = vpop.f32.mrb[39].mxu1 }
 0xf52   : > { %v10262_v60 = vld [vmem:[%s10342_s30 + $0x60] sm:$0xff] }
 0xf55   : > { %v8224_v12 = vpop.f32.mrb[244].mxu0 }
 0xf56   : > { %v8285_v1 = vpack.c.bf16 %v8272_v3, %v8224_v12  ;;  %v9854_v49 = vpop.f32.mrb[245].mxu0 }
 0xf57   : > { %v8227_v4 = vpop.f32.mrb[246].mxu0  ;;  %v10263_v49 = vld [vmem:[%s10342_s30 + $0x78] sm:$0xff] }
 0xf58   : > { %v9855_v57 = vpop.f32.mrb[247].mxu0  ;;  %9877 = vmatmul.mubr.msk.bf16.gmra.mrb[140].mxu0 %vm710_vm3, %v8285_v1 }
 0xf59   : > { %v10264_v57 = vld [vmem:[%s10342_s30 + $0x68] sm:$0xff] }
 0xf5d   : > { %v9866_v43 = vpop.f32.mrb[128].mxu0 }
 0xf5e   : > { %v8436_v55 = vadd.f32 %v9866_v43, %v12607_v54  ;;  %v8348_v28 = vpop.f32.mrb[129].mxu0 }
 0xf5f   : > { %v8434_v13 = vadd.f32 %v12607_v54, %v8348_v28  ;;  %v9867_v48 = vpop.f32.mrb[130].mxu0 }
 0xf60   : > { %v8452_v53 = vadd.f32 %v10249_v17, %v8436_v55  ;;  %v8437_v34 = vadd.f32 %v9867_v48, %v12607_v54  ;;  %v8351_v37 = vpop.f32.mrb[131].mxu0 }
 0xf61   : > { %v8450_v10 = vadd.f32 %v10250_v40, %v8434_v13  ;;  %v8435_v6 = vadd.f32 %v12607_v54, %v8351_v37 }
 0xf62   : > { %8468 = vst.msk [vmem:[%s12615_s20 + $0x10] sm:$0xff] %vm299_vm0, %v8452_v53  ;;  %v8453_v11 = vadd.f32 %v10251_v50, %v8437_v34 }
 0xf63   : > { %8466 = vst.msk [vmem:[%s12615_s20] sm:$0xff] %vm299_vm0, %v8450_v10  ;;  %v8451_v22 = vadd.f32 %v10252_v41, %v8435_v6 }
 0xf64   : > { %8469 = vst.msk [vmem:[%s12615_s20 + $0x18] sm:$0xff] %vm299_vm0, %v8453_v11 }
 0xf65   : > { %8467 = vst.msk [vmem:[%s12615_s20 + $0x8] sm:$0xff] %vm299_vm0, %v8451_v22 }
0x100b   : > { %v9870_v36 = vpop.f32.mrb[132].mxu0 }
0x100c   : > { %v8440_v44 = vadd.f32 %v9870_v36, %v12607_v54  ;;  %v8364_v63 = vpop.f32.mrb[133].mxu0 }
0x100d   : > { %v8438_v31 = vadd.f32 %v12607_v54, %v8364_v63  ;;  %v9871_v26 = vpop.f32.mrb[134].mxu0 }
0x100e   : > { %v8456_v24 = vadd.f32 %v10253_v0, %v8440_v44  ;;  %v8441_v25 = vadd.f32 %v9871_v26, %v12607_v54  ;;  %v8367_v16 = vpop.f32.mrb[135].mxu0 }
0x100f   : > { %v8454_v56 = vadd.f32 %v10254_v52, %v8438_v31  ;;  %v8439_v47 = vadd.f32 %v12607_v54, %v8367_v16 }
0x1010   : > { %8472 = vst.msk [vmem:[%s12615_s20 + $0x30] sm:$0xff] %vm299_vm0, %v8456_v24  ;;  %v8457_v59 = vadd.f32 %v10255_v20, %v8441_v25 }
0x1011   : > { %8470 = vst.msk [vmem:[%s12615_s20 + $0x20] sm:$0xff] %vm299_vm0, %v8454_v56  ;;  %v8455_v5 = vadd.f32 %v10256_v21, %v8439_v47 }
0x1012   : > { %8473 = vst.msk [vmem:[%s12615_s20 + $0x38] sm:$0xff] %vm299_vm0, %v8457_v59 }
0x1013   : > { %8471 = vst.msk [vmem:[%s12615_s20 + $0x28] sm:$0xff] %vm299_vm0, %v8455_v5 }
0x101b   : > { %v9874_v9 = vpop.f32.mrb[136].mxu0 }
0x101c   : > { %v8444_v39 = vadd.f32 %v9874_v9, %v12607_v54  ;;  %v8380_v38 = vpop.f32.mrb[137].mxu0 }
0x101d   : > { %v8442_v2 = vadd.f32 %v12607_v54, %v8380_v38  ;;  %v9875_v18 = vpop.f32.mrb[138].mxu0 }
0x101e   : > { %v8460_v19 = vadd.f32 %v10257_v33, %v8444_v39  ;;  %v8445_v32 = vadd.f32 %v9875_v18, %v12607_v54  ;;  %v8383_v35 = vpop.f32.mrb[139].mxu0 }
0x101f   : > { %v8458_v61 = vadd.f32 %v10258_v7, %v8442_v2  ;;  %v8443_v42 = vadd.f32 %v12607_v54, %v8383_v35 }
0x1020   : > { %8476 = vst.msk [vmem:[%s12615_s20 + $0x50] sm:$0xff] %vm299_vm0, %v8460_v19  ;;  %v8461_v45 = vadd.f32 %v10259_v51, %v8445_v32 }
0x1021   : > { %8474 = vst.msk [vmem:[%s12615_s20 + $0x40] sm:$0xff] %vm299_vm0, %v8458_v61  ;;  %v8459_v29 = vadd.f32 %v10260_v58, %v8443_v42 }
0x1022   : > { %8477 = vst.msk [vmem:[%s12615_s20 + $0x58] sm:$0xff] %vm299_vm0, %v8461_v45 }
0x1023   : > { %8475 = vst.msk [vmem:[%s12615_s20 + $0x48] sm:$0xff] %vm299_vm0, %v8459_v29 }
0x102b   : > { %v9878_v8 = vpop.f32.mrb[140].mxu0 }
0x102c   : > { %v8448_v62 = vadd.f32 %v9878_v8, %v12607_v54  ;;  %v8396_v23 = vpop.f32.mrb[141].mxu0 }
0x102d   : > { %v8446_v15 = vadd.f32 %v12607_v54, %v8396_v23  ;;  %v9879_v3 = vpop.f32.mrb[142].mxu0 }
0x102e   : > { %v8464_v30 = vadd.f32 %v10261_v27, %v8448_v62  ;;  %v8449_v46 = vadd.f32 %v9879_v3, %v12607_v54  ;;  %v8399_v14 = vpop.f32.mrb[143].mxu0 }
0x102f   : > { %v8462_v12 = vadd.f32 %v10262_v60, %v8446_v15  ;;  %v8447_v1 = vadd.f32 %v12607_v54, %v8399_v14 }
0x1030   : > { %8480 = vst.msk [vmem:[%s12615_s20 + $0x70] sm:$0xff] %vm299_vm0, %v8464_v30  ;;  %v8465_v4 = vadd.f32 %v10263_v49, %v8449_v46 }
0x1031   : > { %8478 = vst.msk [vmem:[%s12615_s20 + $0x60] sm:$0xff] %vm299_vm0, %v8462_v12  ;;  %v8463_v43 = vadd.f32 %v10264_v57, %v8447_v1 }
0x1032   : > { %8481 = vst.msk [vmem:[%s12615_s20 + $0x78] sm:$0xff] %vm299_vm0, %v8465_v4 }
0x1033   : > { %8479 = vst.msk [vmem:[%s12615_s20 + $0x68] sm:$0xff] %vm299_vm0, %v8463_v43 }
0x1034 PF: > { %s17_s24 = sadd.s32 1, %s10271_s24  }
0x1035   : > { %p14_p4 = scmp.ge.s32.totalorder %s17_s24, 4  }
0x1037   :  { %16 = sbr.rel (!%p14_p4) target bundleno = 1 (0x1), region = 78 }

</bundles_post_ra>
